<compile_context>
chip_gen: v7x
topology: tpu7x:2x2x1
jax: 0.10.0
libtpu: 0.0.40
codegen_flags: <defaults>
</compile_context>

<pallas_src>
import functools

import jax
import jax.numpy as jnp
from jax.experimental import pallas as pl
from jax.experimental.pallas import tpu as pltpu

_LANE = 128
_DEFAULT_VMEM_LIMIT = 48 * 1024 * 1024   # safe for v7x; raise to 64-96 MiB on v6e/v5e
_SINGLE_BUFFER_WEIGHTS_OK = True          # flipped if pl.Buffered(1) is rejected


def _basic_block_kernel(x_ref, w1_ref, s1_ref, b1_ref, w2_ref, s2_ref, b2_ref,
                        o_ref, pad_sc):
    """One (batch, row-strip) step: conv3x3+BN+ReLU -> conv3x3+BN -> +id -> ReLU."""
    _, TH, W, Cp = o_ref.shape          # output strip
    H = x_ref.shape[1]                  # full image height
    S = pl.num_programs(1)              # number of row strips (static)
    s = pl.program_id(1)
    r0 = s * TH                         # first output row of this strip

    bf16 = jnp.bfloat16

    def conv3x3(src_ref, w_ref, hout):
        """3x3 'SAME' conv as 9 accumulated MXU matmuls (bf16 in, f32 acc).

        src_ref rows [0, hout+2) x cols [0, W+2) hold the zero-padded input of
        the hout output rows.  Returns (hout*W, Cp) f32.
        """
        acc = None
        for dy in range(3):
            for dx in range(3):
                t = dy * 3 + dx
                lhs = src_ref[dy:dy + hout, dx:dx + W, :].reshape(hout * W, Cp)
                p = jnp.dot(lhs, w_ref[t * Cp:(t + 1) * Cp, :],
                            preferred_element_type=jnp.float32)
                acc = p if acc is None else acc + p
        return acc

    # ---- stage the zero-padded input strip in VMEM scratch -----------------
    # pad_sc row d / col c  <->  input row (r0 - 2 + d) / col (c - 1); rows or
    # cols outside the image are zero.  Only the halo border is (re)zeroed
    # every step (cheap), which also keeps the kernel correct when the grid is
    # sharded across TensorCores.
    pad_sc[:, 0:1, :] = jnp.zeros((TH + 4, 1, Cp), bf16)
    pad_sc[:, W + 1:W + 2, :] = jnp.zeros((TH + 4, 1, Cp), bf16)
    pad_sc[0:2, :, :] = jnp.zeros((2, W + 2, Cp), bf16)
    pad_sc[TH + 2:TH + 4, :, :] = jnp.zeros((2, W + 2, Cp), bf16)

    if S == 1:                          # whole image in one strip (TH == H)
        pad_sc[2:TH + 2, 1:W + 1, :] = x_ref[0]
    else:
        @pl.when(jnp.logical_and(s > 0, s < S - 1))
        def _():                        # interior strip: full 2-row halo
            pad_sc[0:TH + 4, 1:W + 1, :] = x_ref[0, pl.ds(r0 - 2, TH + 4), :, :]

        @pl.when(s == 0)
        def _():                        # top of image: 2 zero rows above
            pad_sc[2:TH + 4, 1:W + 1, :] = x_ref[0, 0:TH + 2, :, :]

        @pl.when(s == S - 1)
        def _():                        # bottom of image: 2 zero rows below
            pad_sc[0:TH + 2, 1:W + 1, :] = x_ref[0, H - TH - 2:H, :, :]

    # ---- conv1 (TH+2 mid rows: 1-row halo for conv2) + bn1 + relu -----------
    acc1 = conv3x3(pad_sc, w1_ref, TH + 2)
    mid = jnp.maximum(acc1 * s1_ref[...] + b1_ref[...], 0.0)

    # ---- stage the zero-padded mid activation, reusing the same scratch ----
    # pad_sc row d now holds mid row (r0 - 1 + d); conv2 reads rows [0, TH+2).
    pad_sc[0:TH + 2, 1:W + 1, :] = mid.astype(bf16).reshape(TH + 2, W, Cp)

    def _zero_mid_top():                # mid row -1 is conv2 zero padding
        pad_sc[0:1, :, :] = jnp.zeros((1, W + 2, Cp), bf16)

    def _zero_mid_bottom():             # mid row H is conv2 zero padding
        pad_sc[TH + 1:TH + 2, :, :] = jnp.zeros((1, W + 2, Cp), bf16)

    if S == 1:
        _zero_mid_top()
        _zero_mid_bottom()
    else:
        pl.when(s == 0)(_zero_mid_top)
        pl.when(s == S - 1)(_zero_mid_bottom)

    # ---- conv2 + bn2 + residual add (f32) + relu -----------------------------
    acc2 = conv3x3(pad_sc, w2_ref, TH)
    ident = x_ref[0, pl.ds(r0, TH), :, :].astype(jnp.float32).reshape(TH * W, Cp)
    out = jnp.maximum(acc2 * s2_ref[...] + b2_ref[...] + ident, 0.0)
    o_ref[0] = out.astype(o_ref.dtype).reshape(TH, W, Cp)


def _invariant_spec(shape, single_buffer):
    """BlockSpec for a grid-invariant operand (weights / folded BN params)."""
    index_map = lambda n, s: (0,) * len(shape)
    if single_buffer:
        # Constant block index across the whole grid -> one VMEM buffer is
        # enough (saves up to ~9 MB vs default double buffering at C=512).
        return pl.BlockSpec(shape, index_map, pipeline_mode=pl.Buffered(1))
    return pl.BlockSpec(shape, index_map)


@functools.partial(jax.jit, static_argnames=("strip_h", "single_buffer_weights",
                                              "vmem_limit_bytes"))
def _pallas_forward(x, w1, s1, b1, w2, s2, b2, *, strip_h,
                    single_buffer_weights, vmem_limit_bytes):
    """x: (N, H, W, Cp) bf16 channel-padded NHWC.  Returns the same shape/dtype."""
    N, H, W, Cp = x.shape
    TH = strip_h
    S = H // TH

    grid_spec = pltpu.PrefetchScalarGridSpec(
        num_scalar_prefetch=0,
        grid=(N, S),
        in_specs=[
            # Whole image per batch element; the block index is constant along
            # the strip axis, so the image is DMA'd from HBM once per n.
            pl.BlockSpec((1, H, W, Cp), lambda n, s: (n, 0, 0, 0)),
            _invariant_spec((9 * Cp, Cp), single_buffer_weights),   # w1 (bf16)
            _invariant_spec((1, Cp), single_buffer_weights),        # bn1 scale
            _invariant_spec((1, Cp), single_buffer_weights),        # bn1 bias
            _invariant_spec((9 * Cp, Cp), single_buffer_weights),   # w2 (bf16)
            _invariant_spec((1, Cp), single_buffer_weights),        # bn2 scale
            _invariant_spec((1, Cp), single_buffer_weights),        # bn2 bias
        ],
        out_specs=pl.BlockSpec((1, TH, W, Cp), lambda n, s: (n, s, 0, 0)),
        scratch_shapes=[
            # Single reused zero-padded buffer: padded input strip, then the
            # padded mid activation strip (review item: scratch reuse).
            pltpu.VMEM((TH + 4, W + 2, Cp), jnp.bfloat16),
        ],
    )

    return pl.pallas_call(
        _basic_block_kernel,
        out_shape=jax.ShapeDtypeStruct((N, H, W, Cp), jnp.bfloat16),
        grid_spec=grid_spec,
        compiler_params=pltpu.CompilerParams(
            # Both axes are independent -> megacore may shard either.
            dimension_semantics=("parallel", "parallel"),
            vmem_limit_bytes=vmem_limit_bytes),
    )(x, w1, s1, b1, w2, s2, b2)


def _pick_strip_height(H, W, Cp, strip_h=None, max_strip_bytes=6 * 1024 * 1024):
    """Largest divisor of H whose per-strip VMEM footprint fits the budget.

    The budget targets v7x (64 MiB physical VMEM / TC); on v6e/v5e (128 MiB)
    a larger budget (=> larger strips) amortizes the ~0.35us/step overhead.
    """
    if strip_h is not None and H % strip_h == 0 and (strip_h >= 2 or strip_h == H):
        return strip_h
    divisors = [d for d in range(2, H + 1) if H % d == 0]
    for th in sorted(divisors, reverse=True):
        # bf16 padded scratch + ~3 strip-sized f32 temporaries (acc/mid/out).
        est = (th + 4) * (W + 2) * Cp * 2 + 3 * (th + 2) * W * Cp * 4
        if est <= max_strip_bytes:
            return th
    return min(divisors) if divisors else H


def basic_block_forward_nhwc(x_nhwc, params, strip_h=None,
                             vmem_limit_bytes=_DEFAULT_VMEM_LIMIT):
    """Inter-block API: (N, H, W, Cp) bf16 channel-padded NHWC in and out."""
    global _SINGLE_BUFFER_WEIGHTS_OK
    N, H, W, Cp = x_nhwc.shape
    th = _pick_strip_height(H, W, Cp, strip_h)
    args = (x_nhwc, params["w1"], params["s1"], params["b1"],
            params["w2"], params["s2"], params["b2"])
    if _SINGLE_BUFFER_WEIGHTS_OK:
        try:
            return _pallas_forward(*args, strip_h=th, single_buffer_weights=True,
                                   vmem_limit_bytes=vmem_limit_bytes)
        except Exception:
            # This jax build rejects pipeline_mode=pl.Buffered(1); fall back to
            # default double buffering for the invariant operands.
            _SINGLE_BUFFER_WEIGHTS_OK = False
    return _pallas_forward(*args, strip_h=th, single_buffer_weights=False,
                           vmem_limit_bytes=vmem_limit_bytes)


def basic_block_forward_nchw(x_nchw, params, strip_h=None):
    """PyTorch-facing wrapper: NCHW float32 in, NCHW float32 out.

    NCHW<->NHWC transpose, lane-width channel pad/slice and f32<->bf16 casts
    happen only here; chained BasicBlocks should call basic_block_forward_nhwc
    directly to keep the padded bf16 layout persistent in HBM.
    """
    C = params["channels"]
    Cp = params["w1"].shape[1]
    x = jnp.transpose(x_nchw, (0, 2, 3, 1)).astype(jnp.bfloat16)
    if C != Cp:
        x = jnp.pad(x, ((0, 0), (0, 0), (0, 0), (0, Cp - C)))
    y = basic_block_forward_nhwc(x, params, strip_h)
    return jnp.transpose(y[..., :C].astype(jnp.float32), (0, 3, 1, 2))


def prepare_params(w1, gamma1, beta1, mean1, var1,
                   w2, gamma2, beta2, mean2, var2, eps=1e-5):
    """Fold BN to affine, pad channels to the lane width, reorder weights.

    w1/w2: (3, 3, Cin, Cout) HWIO float32 with Cin == Cout (identity shortcut).
    Each weight becomes a (9*Cp, Cp) bf16 matrix whose row-block t = 3*dy + dx
    is the (Cin, Cout) matrix of tap (dy, dx), matching the kernel's 9-matmul
    accumulation order.
    """
    C = w1.shape[-1]
    assert w1.shape == (3, 3, C, C) and w2.shape == (3, 3, C, C), (
        "identity-shortcut BasicBlock requires Cin == Cout")
    Cp = max(_LANE, ((C + _LANE - 1) // _LANE) * _LANE)

    def fold_w(w):
        wp = jnp.zeros((3, 3, Cp, Cp), jnp.float32).at[:, :, :C, :C].set(w)
        return wp.reshape(9 * Cp, Cp).astype(jnp.bfloat16)

    def _pad(a):
        return jnp.pad(a, (0, Cp - C)) if C != Cp else a

    def fold_bn(gamma, beta, mean, var):
        scale = gamma / jnp.sqrt(var + eps)
        bias = beta - mean * scale
        return (_pad(scale).reshape(1, Cp).astype(jnp.float32),
                _pad(bias).reshape(1, Cp).astype(jnp.float32))

    s1, b1 = fold_bn(gamma1, beta1, mean1, var1)
    s2, b2 = fold_bn(gamma2, beta2, mean2, var2)
    return {"w1": fold_w(w1), "s1": s1, "b1": b1,
            "w2": fold_w(w2), "s2": s2, "b2": b2, "channels": C}


def _reference_nhwc(x, w1, s1, b1, w2, s2, b2):
    """Pure-JAX f32 reference of the module semantics (for the self-test)."""
    dn = ("NHWC", "HWIO", "NHWC")
    o = jax.lax.conv_general_dilated(x, w1, (1, 1), "SAME", dimension_numbers=dn,
                                     precision=jax.lax.Precision.HIGHEST)
    o = jnp.maximum(o * s1 + b1, 0.0)
    o = jax.lax.conv_general_dilated(o, w2, (1, 1), "SAME", dimension_numbers=dn,
                                     precision=jax.lax.Precision.HIGHEST)
    return jnp.maximum(o * s2 + b2 + x, 0.0)


if __name__ == "__main__":
    # Small shapes: batch=2, channels=4, spatial=16x16, stride=1, no downsample.
    N, C, H, W = 2, 4, 16, 16
    EPS = 1e-5

    key = jax.random.PRNGKey(0)
    keys = jax.random.split(key, 11)

    x_nchw = jax.random.normal(keys[0], (N, C, H, W), jnp.float32)

    # Conv weights in HWIO (3, 3, Cin, Cout).
    w1 = jax.random.normal(keys[1], (3, 3, C, C), jnp.float32) * 0.1
    w2 = jax.random.normal(keys[2], (3, 3, C, C), jnp.float32) * 0.1

    # BatchNorm parameters (deterministic synthetic init).
    gamma1 = 1.0 + 0.1 * jax.random.normal(keys[3], (C,), jnp.float32)
    beta1 = 0.1 * jax.random.normal(keys[4], (C,), jnp.float32)
    mean1 = 0.1 * jax.random.normal(keys[5], (C,), jnp.float32)
    var1 = jax.random.uniform(keys[6], (C,), jnp.float32, 0.5, 1.5)
    gamma2 = 1.0 + 0.1 * jax.random.normal(keys[7], (C,), jnp.float32)
    beta2 = 0.1 * jax.random.normal(keys[8], (C,), jnp.float32)
    mean2 = 0.1 * jax.random.normal(keys[9], (C,), jnp.float32)
    var2 = jax.random.uniform(keys[10], (C,), jnp.float32, 0.5, 1.5)

    params = prepare_params(w1, gamma1, beta1, mean1, var1,
                            w2, gamma2, beta2, mean2, var2, eps=EPS)

    # Exercise both code paths: 4-row strips (grid (N, 4): first / interior /
    # last halo branches) and the heuristic single-strip whole-image path.
    y_strips = basic_block_forward_nchw(x_nchw, params, strip_h=4)
    y_whole = basic_block_forward_nchw(x_nchw, params)          # -> one strip
    y_strips = jax.block_until_ready(y_strips)
    y_whole = jax.block_until_ready(y_whole)

    # Pure-JAX f32 reference.  Kernel I/O is bf16, so feed the reference the
    # same bf16-quantized input; the remaining error is the bf16 rounding of
    # the matmul inputs and of the output (accumulation is f32 in-kernel).
    s1v = gamma1 / jnp.sqrt(var1 + EPS)
    b1v = beta1 - mean1 * s1v
    s2v = gamma2 / jnp.sqrt(var2 + EPS)
    b2v = beta2 - mean2 * s2v
    xq = x_nchw.astype(jnp.bfloat16).astype(jnp.float32)
    x_nhwc = jnp.transpose(xq, (0, 2, 3, 1))
    y_ref = jnp.transpose(_reference_nhwc(x_nhwc, w1, s1v, b1v, w2, s2v, b2v),
                          (0, 3, 1, 2))

    assert y_strips.shape == (N, C, H, W)
    assert y_whole.shape == (N, C, H, W)
    err_s = float(jnp.max(jnp.abs(y_strips - y_ref)))
    err_w = float(jnp.max(jnp.abs(y_whole - y_ref)))
    # bf16 matmul inputs + bf16 output (f32 accumulation / residual math).
    assert err_s < 5e-2, f"strip-path max abs err {err_s}"
    assert err_w < 5e-2, f"whole-image-path max abs err {err_w}"
    print("KERNEL_OK")
</pallas_src>

<mosaic_0001>
module attributes {stable_mosaic.version = 11 : i64} {
  func.func @_basic_block_kernel(%arg0: i32, %arg1: i32, %arg2: memref<1x16x16x128xbf16, #tpu.memory_space<vmem>>, %arg3: memref<1152x128xbf16, #tpu.memory_space<vmem>>, %arg4: memref<1x128xf32, #tpu.memory_space<vmem>>, %arg5: memref<1x128xf32, #tpu.memory_space<vmem>>, %arg6: memref<1152x128xbf16, #tpu.memory_space<vmem>>, %arg7: memref<1x128xf32, #tpu.memory_space<vmem>>, %arg8: memref<1x128xf32, #tpu.memory_space<vmem>>, %arg9: memref<1x4x16x128xbf16, #tpu.memory_space<vmem>>, %arg10: memref<8x18x128xbf16, #tpu.memory_space<vmem>>) attributes {dimension_semantics = [#tpu.dimension_semantics<parallel>, #tpu.dimension_semantics<parallel>], iteration_bounds = array<i64: 2, 4>, scalar_prefetch = 0 : i64, scratch_operands = 1 : i64, tpu.core_type = #tpu.core_type<tc>, window_params = [{transform_indices = @transform_0, window_bounds = array<i64: 1, 16, 16, 128>}, {pipeline_mode = #tpu.pipeline_mode<synchronous>, transform_indices = @transform_1, window_bounds = array<i64: 1152, 128>}, {pipeline_mode = #tpu.pipeline_mode<synchronous>, transform_indices = @transform_2, window_bounds = array<i64: 1, 128>}, {pipeline_mode = #tpu.pipeline_mode<synchronous>, transform_indices = @transform_3, window_bounds = array<i64: 1, 128>}, {pipeline_mode = #tpu.pipeline_mode<synchronous>, transform_indices = @transform_4, window_bounds = array<i64: 1152, 128>}, {pipeline_mode = #tpu.pipeline_mode<synchronous>, transform_indices = @transform_5, window_bounds = array<i64: 1, 128>}, {pipeline_mode = #tpu.pipeline_mode<synchronous>, transform_indices = @transform_6, window_bounds = array<i64: 1, 128>}, {transform_indices = @transform_7, window_bounds = array<i64: 1, 4, 16, 128>}]} {
    %c4_i32 = arith.constant 4 : i32
    %0 = arith.muli %arg1, %c4_i32 : i32
    %cst = arith.constant 0.000000e+00 : bf16
    %1 = vector.broadcast %cst : bf16 to vector<8x1x128xbf16>
    %c0 = arith.constant 0 : index
    %c0_0 = arith.constant 0 : index
    %c0_1 = arith.constant 0 : index
    %2 = vector.load %arg10[%c0, %c0_0, %c0_1] : memref<8x18x128xbf16, #tpu.memory_space<vmem>>, vector<8x1x128xbf16>
    tpu.vector_store %arg10[%c0, %c0_0, %c0_1], %1 {strides = array<i32>} : memref<8x18x128xbf16, #tpu.memory_space<vmem>>, vector<8x1x128xbf16>,
    %cst_2 = arith.constant 0.000000e+00 : bf16
    %3 = vector.broadcast %cst_2 : bf16 to vector<8x1x128xbf16>
    %c0_3 = arith.constant 0 : index
    %c17 = arith.constant 17 : index
    %c0_4 = arith.constant 0 : index
    %4 = vector.load %arg10[%c0_3, %c17, %c0_4] : memref<8x18x128xbf16, #tpu.memory_space<vmem>>, vector<8x1x128xbf16>
    tpu.vector_store %arg10[%c0_3, %c17, %c0_4], %3 {strides = array<i32>} : memref<8x18x128xbf16, #tpu.memory_space<vmem>>, vector<8x1x128xbf16>,
    %cst_5 = arith.constant 0.000000e+00 : bf16
    %5 = vector.broadcast %cst_5 : bf16 to vector<2x18x128xbf16>
    %c0_6 = arith.constant 0 : index
    %c0_7 = arith.constant 0 : index
    %c0_8 = arith.constant 0 : index
    %6 = vector.load %arg10[%c0_6, %c0_7, %c0_8] : memref<8x18x128xbf16, #tpu.memory_space<vmem>>, vector<2x18x128xbf16>
    tpu.vector_store %arg10[%c0_6, %c0_7, %c0_8], %5 {strides = array<i32>} : memref<8x18x128xbf16, #tpu.memory_space<vmem>>, vector<2x18x128xbf16>,
    %cst_9 = arith.constant 0.000000e+00 : bf16
    %7 = vector.broadcast %cst_9 : bf16 to vector<2x18x128xbf16>
    %c6 = arith.constant 6 : index
    %c0_10 = arith.constant 0 : index
    %c0_11 = arith.constant 0 : index
    %8 = vector.load %arg10[%c6, %c0_10, %c0_11] : memref<8x18x128xbf16, #tpu.memory_space<vmem>>, vector<2x18x128xbf16>
    tpu.vector_store %arg10[%c6, %c0_10, %c0_11], %7 {strides = array<i32>} : memref<8x18x128xbf16, #tpu.memory_space<vmem>>, vector<2x18x128xbf16>,
    %c0_i32 = arith.constant 0 : i32
    %9 = arith.cmpi sgt, %arg1, %c0_i32 : i32
    %c3_i32 = arith.constant 3 : i32
    %10 = arith.cmpi slt, %arg1, %c3_i32 : i32
    %11 = arith.andi %9, %10 : i1
    %12 = arith.extui %11 : i1 to i32
    %c0_i32_12 = arith.constant 0 : i32
    %13 = arith.cmpi ne, %12, %c0_i32_12 : i32
    scf.if %13 {
      %c2_i32 = arith.constant 2 : i32
      %144 = arith.subi %0, %c2_i32 : i32
      %c0_139 = arith.constant 0 : index
      %145 = arith.index_cast %144 : i32 to index
      %c0_140 = arith.constant 0 : index
      %c0_141 = arith.constant 0 : index
      %146 = vector.load %arg2[%c0_139, %145, %c0_140, %c0_141] : memref<1x16x16x128xbf16, #tpu.memory_space<vmem>>, vector<1x8x16x128xbf16>
      %147 = vector.shape_cast %146 : vector<1x8x16x128xbf16> to vector<8x16x128xbf16>
      %c0_142 = arith.constant 0 : index
      %c1_143 = arith.constant 1 : index
      %c0_144 = arith.constant 0 : index
      %148 = vector.load %arg10[%c0_142, %c1_143, %c0_144] : memref<8x18x128xbf16, #tpu.memory_space<vmem>>, vector<8x16x128xbf16>
      tpu.vector_store %arg10[%c0_142, %c1_143, %c0_144], %147 {strides = array<i32>} : memref<8x18x128xbf16, #tpu.memory_space<vmem>>, vector<8x16x128xbf16>,
    } else {
    }
    %c0_i32_13 = arith.constant 0 : i32
    %14 = arith.cmpi eq, %arg1, %c0_i32_13 : i32
    %15 = arith.extui %14 : i1 to i32
    %c0_i32_14 = arith.constant 0 : i32
    %16 = arith.cmpi ne, %15, %c0_i32_14 : i32
    scf.if %16 {
      %c0_139 = arith.constant 0 : index
      %c0_140 = arith.constant 0 : index
      %c0_141 = arith.constant 0 : index
      %c0_142 = arith.constant 0 : index
      %144 = vector.load %arg2[%c0_139, %c0_140, %c0_141, %c0_142] : memref<1x16x16x128xbf16, #tpu.memory_space<vmem>>, vector<1x6x16x128xbf16>
      %145 = vector.shape_cast %144 : vector<1x6x16x128xbf16> to vector<6x16x128xbf16>
      %c2_143 = arith.constant 2 : index
      %c1_144 = arith.constant 1 : index
      %c0_145 = arith.constant 0 : index
      %146 = vector.load %arg10[%c2_143, %c1_144, %c0_145] : memref<8x18x128xbf16, #tpu.memory_space<vmem>>, vector<6x16x128xbf16>
      tpu.vector_store %arg10[%c2_143, %c1_144, %c0_145], %145 {strides = array<i32>} : memref<8x18x128xbf16, #tpu.memory_space<vmem>>, vector<6x16x128xbf16>,
    } else {
    }
    %c3_i32_15 = arith.constant 3 : i32
    %17 = arith.cmpi eq, %arg1, %c3_i32_15 : i32
    %18 = arith.extui %17 : i1 to i32
    %c0_i32_16 = arith.constant 0 : i32
    %19 = arith.cmpi ne, %18, %c0_i32_16 : i32
    scf.if %19 {
      %c0_139 = arith.constant 0 : index
      %c10 = arith.constant 10 : index
      %c0_140 = arith.constant 0 : index
      %c0_141 = arith.constant 0 : index
      %144 = vector.load %arg2[%c0_139, %c10, %c0_140, %c0_141] : memref<1x16x16x128xbf16, #tpu.memory_space<vmem>>, vector<1x6x16x128xbf16>
      %145 = vector.shape_cast %144 : vector<1x6x16x128xbf16> to vector<6x16x128xbf16>
      %c0_142 = arith.constant 0 : index
      %c1_143 = arith.constant 1 : index
      %c0_144 = arith.constant 0 : index
      %146 = vector.load %arg10[%c0_142, %c1_143, %c0_144] : memref<8x18x128xbf16, #tpu.memory_space<vmem>>, vector<6x16x128xbf16>
      tpu.vector_store %arg10[%c0_142, %c1_143, %c0_144], %145 {strides = array<i32>} : memref<8x18x128xbf16, #tpu.memory_space<vmem>>, vector<6x16x128xbf16>,
    } else {
    }
    %c0_17 = arith.constant 0 : index
    %c0_18 = arith.constant 0 : index
    %c0_19 = arith.constant 0 : index
    %20 = vector.load %arg10[%c0_17, %c0_18, %c0_19] : memref<8x18x128xbf16, #tpu.memory_space<vmem>>, vector<6x16x128xbf16>
    %21 = vector.shape_cast %20 : vector<6x16x128xbf16> to vector<96x128xbf16>
    %c0_20 = arith.constant 0 : index
    %c0_21 = arith.constant 0 : index
    %22 = vector.load %arg3[%c0_20, %c0_21] : memref<1152x128xbf16, #tpu.memory_space<vmem>>, vector<128x128xbf16>
    %cst_22 = arith.constant dense<0.000000e+00> : vector<96x128xf32>
    %23 = tpu.matmul %21, %22, %cst_22 {dimension_numbers = #tpu.dot_dimension_numbers<[1], [0], [0], [1], [0, 0, 1, 1], [], []>} : vector<96x128xbf16>, vector<128x128xbf16>, vector<96x128xf32> -> vector<96x128xf32>
    %c0_23 = arith.constant 0 : index
    %c1 = arith.constant 1 : index
    %c0_24 = arith.constant 0 : index
    %24 = vector.load %arg10[%c0_23, %c1, %c0_24] : memref<8x18x128xbf16, #tpu.memory_space<vmem>>, vector<6x16x128xbf16>
    %25 = vector.shape_cast %24 : vector<6x16x128xbf16> to vector<96x128xbf16>
    %c128 = arith.constant 128 : index
    %c0_25 = arith.constant 0 : index
    %26 = vector.load %arg3[%c128, %c0_25] : memref<1152x128xbf16, #tpu.memory_space<vmem>>, vector<128x128xbf16>
    %cst_26 = arith.constant dense<0.000000e+00> : vector<96x128xf32>
    %27 = tpu.matmul %25, %26, %cst_26 {dimension_numbers = #tpu.dot_dimension_numbers<[1], [0], [0], [1], [0, 0, 1, 1], [], []>} : vector<96x128xbf16>, vector<128x128xbf16>, vector<96x128xf32> -> vector<96x128xf32>
    %28 = arith.addf %23, %27 : vector<96x128xf32>
    %c0_27 = arith.constant 0 : index
    %c2 = arith.constant 2 : index
    %c0_28 = arith.constant 0 : index
    %29 = vector.load %arg10[%c0_27, %c2, %c0_28] : memref<8x18x128xbf16, #tpu.memory_space<vmem>>, vector<6x16x128xbf16>
    %30 = vector.shape_cast %29 : vector<6x16x128xbf16> to vector<96x128xbf16>
    %c256 = arith.constant 256 : index
    %c0_29 = arith.constant 0 : index
    %31 = vector.load %arg3[%c256, %c0_29] : memref<1152x128xbf16, #tpu.memory_space<vmem>>, vector<128x128xbf16>
    %cst_30 = arith.constant dense<0.000000e+00> : vector<96x128xf32>
    %32 = tpu.matmul %30, %31, %cst_30 {dimension_numbers = #tpu.dot_dimension_numbers<[1], [0], [0], [1], [0, 0, 1, 1], [], []>} : vector<96x128xbf16>, vector<128x128xbf16>, vector<96x128xf32> -> vector<96x128xf32>
    %33 = arith.addf %28, %32 : vector<96x128xf32>
    %c1_31 = arith.constant 1 : index
    %c0_32 = arith.constant 0 : index
    %c0_33 = arith.constant 0 : index
    %34 = vector.load %arg10[%c1_31, %c0_32, %c0_33] : memref<8x18x128xbf16, #tpu.memory_space<vmem>>, vector<6x16x128xbf16>
    %35 = vector.shape_cast %34 : vector<6x16x128xbf16> to vector<96x128xbf16>
    %c384 = arith.constant 384 : index
    %c0_34 = arith.constant 0 : index
    %36 = vector.load %arg3[%c384, %c0_34] : memref<1152x128xbf16, #tpu.memory_space<vmem>>, vector<128x128xbf16>
    %cst_35 = arith.constant dense<0.000000e+00> : vector<96x128xf32>
    %37 = tpu.matmul %35, %36, %cst_35 {dimension_numbers = #tpu.dot_dimension_numbers<[1], [0], [0], [1], [0, 0, 1, 1], [], []>} : vector<96x128xbf16>, vector<128x128xbf16>, vector<96x128xf32> -> vector<96x128xf32>
    %38 = arith.addf %33, %37 : vector<96x128xf32>
    %c1_36 = arith.constant 1 : index
    %c1_37 = arith.constant 1 : index
    %c0_38 = arith.constant 0 : index
    %39 = vector.load %arg10[%c1_36, %c1_37, %c0_38] : memref<8x18x128xbf16, #tpu.memory_space<vmem>>, vector<6x16x128xbf16>
    %40 = vector.shape_cast %39 : vector<6x16x128xbf16> to vector<96x128xbf16>
    %c512 = arith.constant 512 : index
    %c0_39 = arith.constant 0 : index
    %41 = vector.load %arg3[%c512, %c0_39] : memref<1152x128xbf16, #tpu.memory_space<vmem>>, vector<128x128xbf16>
    %cst_40 = arith.constant dense<0.000000e+00> : vector<96x128xf32>
    %42 = tpu.matmul %40, %41, %cst_40 {dimension_numbers = #tpu.dot_dimension_numbers<[1], [0], [0], [1], [0, 0, 1, 1], [], []>} : vector<96x128xbf16>, vector<128x128xbf16>, vector<96x128xf32> -> vector<96x128xf32>
    %43 = arith.addf %38, %42 : vector<96x128xf32>
    %c1_41 = arith.constant 1 : index
    %c2_42 = arith.constant 2 : index
    %c0_43 = arith.constant 0 : index
    %44 = vector.load %arg10[%c1_41, %c2_42, %c0_43] : memref<8x18x128xbf16, #tpu.memory_space<vmem>>, vector<6x16x128xbf16>
    %45 = vector.shape_cast %44 : vector<6x16x128xbf16> to vector<96x128xbf16>
    %c640 = arith.constant 640 : index
    %c0_44 = arith.constant 0 : index
    %46 = vector.load %arg3[%c640, %c0_44] : memref<1152x128xbf16, #tpu.memory_space<vmem>>, vector<128x128xbf16>
    %cst_45 = arith.constant dense<0.000000e+00> : vector<96x128xf32>
    %47 = tpu.matmul %45, %46, %cst_45 {dimension_numbers = #tpu.dot_dimension_numbers<[1], [0], [0], [1], [0, 0, 1, 1], [], []>} : vector<96x128xbf16>, vector<128x128xbf16>, vector<96x128xf32> -> vector<96x128xf32>
    %48 = arith.addf %43, %47 : vector<96x128xf32>
    %c2_46 = arith.constant 2 : index
    %c0_47 = arith.constant 0 : index
    %c0_48 = arith.constant 0 : index
    %49 = vector.load %arg10[%c2_46, %c0_47, %c0_48] : memref<8x18x128xbf16, #tpu.memory_space<vmem>>, vector<6x16x128xbf16>
    %50 = vector.shape_cast %49 : vector<6x16x128xbf16> to vector<96x128xbf16>
    %c768 = arith.constant 768 : index
    %c0_49 = arith.constant 0 : index
    %51 = vector.load %arg3[%c768, %c0_49] : memref<1152x128xbf16, #tpu.memory_space<vmem>>, vector<128x128xbf16>
    %cst_50 = arith.constant dense<0.000000e+00> : vector<96x128xf32>
    %52 = tpu.matmul %50, %51, %cst_50 {dimension_numbers = #tpu.dot_dimension_numbers<[1], [0], [0], [1], [0, 0, 1, 1], [], []>} : vector<96x128xbf16>, vector<128x128xbf16>, vector<96x128xf32> -> vector<96x128xf32>
    %53 = arith.addf %48, %52 : vector<96x128xf32>
    %c2_51 = arith.constant 2 : index
    %c1_52 = arith.constant 1 : index
    %c0_53 = arith.constant 0 : index
    %54 = vector.load %arg10[%c2_51, %c1_52, %c0_53] : memref<8x18x128xbf16, #tpu.memory_space<vmem>>, vector<6x16x128xbf16>
    %55 = vector.shape_cast %54 : vector<6x16x128xbf16> to vector<96x128xbf16>
    %c896 = arith.constant 896 : index
    %c0_54 = arith.constant 0 : index
    %56 = vector.load %arg3[%c896, %c0_54] : memref<1152x128xbf16, #tpu.memory_space<vmem>>, vector<128x128xbf16>
    %cst_55 = arith.constant dense<0.000000e+00> : vector<96x128xf32>
    %57 = tpu.matmul %55, %56, %cst_55 {dimension_numbers = #tpu.dot_dimension_numbers<[1], [0], [0], [1], [0, 0, 1, 1], [], []>} : vector<96x128xbf16>, vector<128x128xbf16>, vector<96x128xf32> -> vector<96x128xf32>
    %58 = arith.addf %53, %57 : vector<96x128xf32>
    %c2_56 = arith.constant 2 : index
    %c2_57 = arith.constant 2 : index
    %c0_58 = arith.constant 0 : index
    %59 = vector.load %arg10[%c2_56, %c2_57, %c0_58] : memref<8x18x128xbf16, #tpu.memory_space<vmem>>, vector<6x16x128xbf16>
    %60 = vector.shape_cast %59 : vector<6x16x128xbf16> to vector<96x128xbf16>
    %c1024 = arith.constant 1024 : index
    %c0_59 = arith.constant 0 : index
    %61 = vector.load %arg3[%c1024, %c0_59] : memref<1152x128xbf16, #tpu.memory_space<vmem>>, vector<128x128xbf16>
    %cst_60 = arith.constant dense<0.000000e+00> : vector<96x128xf32>
    %62 = tpu.matmul %60, %61, %cst_60 {dimension_numbers = #tpu.dot_dimension_numbers<[1], [0], [0], [1], [0, 0, 1, 1], [], []>} : vector<96x128xbf16>, vector<128x128xbf16>, vector<96x128xf32> -> vector<96x128xf32>
    %63 = arith.addf %58, %62 : vector<96x128xf32>
    %c0_61 = arith.constant 0 : index
    %c0_62 = arith.constant 0 : index
    %64 = vector.load %arg4[%c0_61, %c0_62] : memref<1x128xf32, #tpu.memory_space<vmem>>, vector<1x128xf32>
    %65 = vector.broadcast %64 : vector<1x128xf32> to vector<96x128xf32>
    %66 = arith.mulf %63, %65 : vector<96x128xf32>
    %c0_63 = arith.constant 0 : index
    %c0_64 = arith.constant 0 : index
    %67 = vector.load %arg5[%c0_63, %c0_64] : memref<1x128xf32, #tpu.memory_space<vmem>>, vector<1x128xf32>
    %68 = vector.broadcast %67 : vector<1x128xf32> to vector<96x128xf32>
    %69 = arith.addf %66, %68 : vector<96x128xf32>
    %cst_65 = arith.constant 0.000000e+00 : f32
    %70 = vector.broadcast %cst_65 : f32 to vector<96x128xf32>
    %71 = arith.maximumf %69, %70 : vector<96x128xf32>
    %72 = arith.truncf %71 : vector<96x128xf32> to vector<96x128xbf16>
    %73 = vector.shape_cast %72 : vector<96x128xbf16> to vector<6x16x128xbf16>
    %c0_66 = arith.constant 0 : index
    %c1_67 = arith.constant 1 : index
    %c0_68 = arith.constant 0 : index
    %74 = vector.load %arg10[%c0_66, %c1_67, %c0_68] : memref<8x18x128xbf16, #tpu.memory_space<vmem>>, vector<6x16x128xbf16>
    tpu.vector_store %arg10[%c0_66, %c1_67, %c0_68], %73 {strides = array<i32>} : memref<8x18x128xbf16, #tpu.memory_space<vmem>>, vector<6x16x128xbf16>,
    %c0_i32_69 = arith.constant 0 : i32
    %75 = arith.cmpi eq, %arg1, %c0_i32_69 : i32
    %76 = arith.extui %75 : i1 to i32
    %c0_i32_70 = arith.constant 0 : i32
    %77 = arith.cmpi ne, %76, %c0_i32_70 : i32
    scf.if %77 {
      %cst_139 = arith.constant 0.000000e+00 : bf16
      %144 = vector.broadcast %cst_139 : bf16 to vector<1x18x128xbf16>
      %c0_140 = arith.constant 0 : index
      %c0_141 = arith.constant 0 : index
      %c0_142 = arith.constant 0 : index
      %145 = vector.load %arg10[%c0_140, %c0_141, %c0_142] : memref<8x18x128xbf16, #tpu.memory_space<vmem>>, vector<1x18x128xbf16>
      tpu.vector_store %arg10[%c0_140, %c0_141, %c0_142], %144 {strides = array<i32>} : memref<8x18x128xbf16, #tpu.memory_space<vmem>>, vector<1x18x128xbf16>,
    } else {
    }
    %c3_i32_71 = arith.constant 3 : i32
    %78 = arith.cmpi eq, %arg1, %c3_i32_71 : i32
    %79 = arith.extui %78 : i1 to i32
    %c0_i32_72 = arith.constant 0 : i32
    %80 = arith.cmpi ne, %79, %c0_i32_72 : i32
    scf.if %80 {
      %cst_139 = arith.constant 0.000000e+00 : bf16
      %144 = vector.broadcast %cst_139 : bf16 to vector<1x18x128xbf16>
      %c5 = arith.constant 5 : index
      %c0_140 = arith.constant 0 : index
      %c0_141 = arith.constant 0 : index
      %145 = vector.load %arg10[%c5, %c0_140, %c0_141] : memref<8x18x128xbf16, #tpu.memory_space<vmem>>, vector<1x18x128xbf16>
      tpu.vector_store %arg10[%c5, %c0_140, %c0_141], %144 {strides = array<i32>} : memref<8x18x128xbf16, #tpu.memory_space<vmem>>, vector<1x18x128xbf16>,
    } else {
    }
    %c0_73 = arith.constant 0 : index
    %c0_74 = arith.constant 0 : index
    %c0_75 = arith.constant 0 : index
    %81 = vector.load %arg10[%c0_73, %c0_74, %c0_75] : memref<8x18x128xbf16, #tpu.memory_space<vmem>>, vector<4x16x128xbf16>
    %82 = vector.shape_cast %81 : vector<4x16x128xbf16> to vector<64x128xbf16>
    %c0_76 = arith.constant 0 : index
    %c0_77 = arith.constant 0 : index
    %83 = vector.load %arg6[%c0_76, %c0_77] : memref<1152x128xbf16, #tpu.memory_space<vmem>>, vector<128x128xbf16>
    %cst_78 = arith.constant dense<0.000000e+00> : vector<64x128xf32>
    %84 = tpu.matmul %82, %83, %cst_78 {dimension_numbers = #tpu.dot_dimension_numbers<[1], [0], [0], [1], [0, 0, 1, 1], [], []>} : vector<64x128xbf16>, vector<128x128xbf16>, vector<64x128xf32> -> vector<64x128xf32>
    %c0_79 = arith.constant 0 : index
    %c1_80 = arith.constant 1 : index
    %c0_81 = arith.constant 0 : index
    %85 = vector.load %arg10[%c0_79, %c1_80, %c0_81] : memref<8x18x128xbf16, #tpu.memory_space<vmem>>, vector<4x16x128xbf16>
    %86 = vector.shape_cast %85 : vector<4x16x128xbf16> to vector<64x128xbf16>
    %c128_82 = arith.constant 128 : index
    %c0_83 = arith.constant 0 : index
    %87 = vector.load %arg6[%c128_82, %c0_83] : memref<1152x128xbf16, #tpu.memory_space<vmem>>, vector<128x128xbf16>
    %cst_84 = arith.constant dense<0.000000e+00> : vector<64x128xf32>
    %88 = tpu.matmul %86, %87, %cst_84 {dimension_numbers = #tpu.dot_dimension_numbers<[1], [0], [0], [1], [0, 0, 1, 1], [], []>} : vector<64x128xbf16>, vector<128x128xbf16>, vector<64x128xf32> -> vector<64x128xf32>
    %89 = arith.addf %84, %88 : vector<64x128xf32>
    %c0_85 = arith.constant 0 : index
    %c2_86 = arith.constant 2 : index
    %c0_87 = arith.constant 0 : index
    %90 = vector.load %arg10[%c0_85, %c2_86, %c0_87] : memref<8x18x128xbf16, #tpu.memory_space<vmem>>, vector<4x16x128xbf16>
    %91 = vector.shape_cast %90 : vector<4x16x128xbf16> to vector<64x128xbf16>
    %c256_88 = arith.constant 256 : index
    %c0_89 = arith.constant 0 : index
    %92 = vector.load %arg6[%c256_88, %c0_89] : memref<1152x128xbf16, #tpu.memory_space<vmem>>, vector<128x128xbf16>
    %cst_90 = arith.constant dense<0.000000e+00> : vector<64x128xf32>
    %93 = tpu.matmul %91, %92, %cst_90 {dimension_numbers = #tpu.dot_dimension_numbers<[1], [0], [0], [1], [0, 0, 1, 1], [], []>} : vector<64x128xbf16>, vector<128x128xbf16>, vector<64x128xf32> -> vector<64x128xf32>
    %94 = arith.addf %89, %93 : vector<64x128xf32>
    %c1_91 = arith.constant 1 : index
    %c0_92 = arith.constant 0 : index
    %c0_93 = arith.constant 0 : index
    %95 = vector.load %arg10[%c1_91, %c0_92, %c0_93] : memref<8x18x128xbf16, #tpu.memory_space<vmem>>, vector<4x16x128xbf16>
    %96 = vector.shape_cast %95 : vector<4x16x128xbf16> to vector<64x128xbf16>
    %c384_94 = arith.constant 384 : index
    %c0_95 = arith.constant 0 : index
    %97 = vector.load %arg6[%c384_94, %c0_95] : memref<1152x128xbf16, #tpu.memory_space<vmem>>, vector<128x128xbf16>
    %cst_96 = arith.constant dense<0.000000e+00> : vector<64x128xf32>
    %98 = tpu.matmul %96, %97, %cst_96 {dimension_numbers = #tpu.dot_dimension_numbers<[1], [0], [0], [1], [0, 0, 1, 1], [], []>} : vector<64x128xbf16>, vector<128x128xbf16>, vector<64x128xf32> -> vector<64x128xf32>
    %99 = arith.addf %94, %98 : vector<64x128xf32>
    %c1_97 = arith.constant 1 : index
    %c1_98 = arith.constant 1 : index
    %c0_99 = arith.constant 0 : index
    %100 = vector.load %arg10[%c1_97, %c1_98, %c0_99] : memref<8x18x128xbf16, #tpu.memory_space<vmem>>, vector<4x16x128xbf16>
    %101 = vector.shape_cast %100 : vector<4x16x128xbf16> to vector<64x128xbf16>
    %c512_100 = arith.constant 512 : index
    %c0_101 = arith.constant 0 : index
    %102 = vector.load %arg6[%c512_100, %c0_101] : memref<1152x128xbf16, #tpu.memory_space<vmem>>, vector<128x128xbf16>
    %cst_102 = arith.constant dense<0.000000e+00> : vector<64x128xf32>
    %103 = tpu.matmul %101, %102, %cst_102 {dimension_numbers = #tpu.dot_dimension_numbers<[1], [0], [0], [1], [0, 0, 1, 1], [], []>} : vector<64x128xbf16>, vector<128x128xbf16>, vector<64x128xf32> -> vector<64x128xf32>
    %104 = arith.addf %99, %103 : vector<64x128xf32>
    %c1_103 = arith.constant 1 : index
    %c2_104 = arith.constant 2 : index
    %c0_105 = arith.constant 0 : index
    %105 = vector.load %arg10[%c1_103, %c2_104, %c0_105] : memref<8x18x128xbf16, #tpu.memory_space<vmem>>, vector<4x16x128xbf16>
    %106 = vector.shape_cast %105 : vector<4x16x128xbf16> to vector<64x128xbf16>
    %c640_106 = arith.constant 640 : index
    %c0_107 = arith.constant 0 : index
    %107 = vector.load %arg6[%c640_106, %c0_107] : memref<1152x128xbf16, #tpu.memory_space<vmem>>, vector<128x128xbf16>
    %cst_108 = arith.constant dense<0.000000e+00> : vector<64x128xf32>
    %108 = tpu.matmul %106, %107, %cst_108 {dimension_numbers = #tpu.dot_dimension_numbers<[1], [0], [0], [1], [0, 0, 1, 1], [], []>} : vector<64x128xbf16>, vector<128x128xbf16>, vector<64x128xf32> -> vector<64x128xf32>
    %109 = arith.addf %104, %108 : vector<64x128xf32>
    %c2_109 = arith.constant 2 : index
    %c0_110 = arith.constant 0 : index
    %c0_111 = arith.constant 0 : index
    %110 = vector.load %arg10[%c2_109, %c0_110, %c0_111] : memref<8x18x128xbf16, #tpu.memory_space<vmem>>, vector<4x16x128xbf16>
    %111 = vector.shape_cast %110 : vector<4x16x128xbf16> to vector<64x128xbf16>
    %c768_112 = arith.constant 768 : index
    %c0_113 = arith.constant 0 : index
    %112 = vector.load %arg6[%c768_112, %c0_113] : memref<1152x128xbf16, #tpu.memory_space<vmem>>, vector<128x128xbf16>
    %cst_114 = arith.constant dense<0.000000e+00> : vector<64x128xf32>
    %113 = tpu.matmul %111, %112, %cst_114 {dimension_numbers = #tpu.dot_dimension_numbers<[1], [0], [0], [1], [0, 0, 1, 1], [], []>} : vector<64x128xbf16>, vector<128x128xbf16>, vector<64x128xf32> -> vector<64x128xf32>
    %114 = arith.addf %109, %113 : vector<64x128xf32>
    %c2_115 = arith.constant 2 : index
    %c1_116 = arith.constant 1 : index
    %c0_117 = arith.constant 0 : index
    %115 = vector.load %arg10[%c2_115, %c1_116, %c0_117] : memref<8x18x128xbf16, #tpu.memory_space<vmem>>, vector<4x16x128xbf16>
    %116 = vector.shape_cast %115 : vector<4x16x128xbf16> to vector<64x128xbf16>
    %c896_118 = arith.constant 896 : index
    %c0_119 = arith.constant 0 : index
    %117 = vector.load %arg6[%c896_118, %c0_119] : memref<1152x128xbf16, #tpu.memory_space<vmem>>, vector<128x128xbf16>
    %cst_120 = arith.constant dense<0.000000e+00> : vector<64x128xf32>
    %118 = tpu.matmul %116, %117, %cst_120 {dimension_numbers = #tpu.dot_dimension_numbers<[1], [0], [0], [1], [0, 0, 1, 1], [], []>} : vector<64x128xbf16>, vector<128x128xbf16>, vector<64x128xf32> -> vector<64x128xf32>
    %119 = arith.addf %114, %118 : vector<64x128xf32>
    %c2_121 = arith.constant 2 : index
    %c2_122 = arith.constant 2 : index
    %c0_123 = arith.constant 0 : index
    %120 = vector.load %arg10[%c2_121, %c2_122, %c0_123] : memref<8x18x128xbf16, #tpu.memory_space<vmem>>, vector<4x16x128xbf16>
    %121 = vector.shape_cast %120 : vector<4x16x128xbf16> to vector<64x128xbf16>
    %c1024_124 = arith.constant 1024 : index
    %c0_125 = arith.constant 0 : index
    %122 = vector.load %arg6[%c1024_124, %c0_125] : memref<1152x128xbf16, #tpu.memory_space<vmem>>, vector<128x128xbf16>
    %cst_126 = arith.constant dense<0.000000e+00> : vector<64x128xf32>
    %123 = tpu.matmul %121, %122, %cst_126 {dimension_numbers = #tpu.dot_dimension_numbers<[1], [0], [0], [1], [0, 0, 1, 1], [], []>} : vector<64x128xbf16>, vector<128x128xbf16>, vector<64x128xf32> -> vector<64x128xf32>
    %124 = arith.addf %119, %123 : vector<64x128xf32>
    %c0_127 = arith.constant 0 : index
    %125 = arith.index_cast %0 : i32 to index
    %c0_128 = arith.constant 0 : index
    %c0_129 = arith.constant 0 : index
    %126 = vector.load %arg2[%c0_127, %125, %c0_128, %c0_129] : memref<1x16x16x128xbf16, #tpu.memory_space<vmem>>, vector<1x4x16x128xbf16>
    %127 = vector.shape_cast %126 : vector<1x4x16x128xbf16> to vector<4x16x128xbf16>
    %128 = arith.extf %127 : vector<4x16x128xbf16> to vector<4x16x128xf32>
    %129 = vector.shape_cast %128 : vector<4x16x128xf32> to vector<64x128xf32>
    %c0_130 = arith.constant 0 : index
    %c0_131 = arith.constant 0 : index
    %130 = vector.load %arg7[%c0_130, %c0_131] : memref<1x128xf32, #tpu.memory_space<vmem>>, vector<1x128xf32>
    %131 = vector.broadcast %130 : vector<1x128xf32> to vector<64x128xf32>
    %132 = arith.mulf %124, %131 : vector<64x128xf32>
    %c0_132 = arith.constant 0 : index
    %c0_133 = arith.constant 0 : index
    %133 = vector.load %arg8[%c0_132, %c0_133] : memref<1x128xf32, #tpu.memory_space<vmem>>, vector<1x128xf32>
    %134 = vector.broadcast %133 : vector<1x128xf32> to vector<64x128xf32>
    %135 = arith.addf %132, %134 : vector<64x128xf32>
    %136 = arith.addf %135, %129 : vector<64x128xf32>
    %cst_134 = arith.constant 0.000000e+00 : f32
    %137 = vector.broadcast %cst_134 : f32 to vector<64x128xf32>
    %138 = arith.maximumf %136, %137 : vector<64x128xf32>
    %139 = arith.truncf %138 : vector<64x128xf32> to vector<64x128xbf16>
    %140 = vector.shape_cast %139 : vector<64x128xbf16> to vector<4x16x128xbf16>
    %c0_135 = arith.constant 0 : index
    %c0_136 = arith.constant 0 : index
    %c0_137 = arith.constant 0 : index
    %c0_138 = arith.constant 0 : index
    %141 = vector.load %arg9[%c0_135, %c0_136, %c0_137, %c0_138] : memref<1x4x16x128xbf16, #tpu.memory_space<vmem>>, vector<1x4x16x128xbf16>
    %142 = vector.shape_cast %141 : vector<1x4x16x128xbf16> to vector<4x16x128xbf16>
    %143 = vector.shape_cast %140 : vector<4x16x128xbf16> to vector<1x4x16x128xbf16>
    tpu.vector_store %arg9[%c0_135, %c0_136, %c0_137, %c0_138], %143 {strides = array<i32>} : memref<1x4x16x128xbf16, #tpu.memory_space<vmem>>, vector<1x4x16x128xbf16>,
    return
  }
  func.func @transform_0(%arg0: i32, %arg1: i32) -> (i32, i32, i32, i32) {
    %c0_i32 = arith.constant 0 : i32
    %c0_i32_0 = arith.constant 0 : i32
    %c0_i32_1 = arith.constant 0 : i32
    %c0_i32_2 = arith.constant 0 : i32
    return %arg0, %c0_i32, %c0_i32_0, %c0_i32_1 : i32, i32, i32, i32
  }
  func.func @transform_1(%arg0: i32, %arg1: i32) -> (i32, i32) {
    %c0_i32 = arith.constant 0 : i32
    %c0_i32_0 = arith.constant 0 : i32
    %c0_i32_1 = arith.constant 0 : i32
    return %c0_i32, %c0_i32_0 : i32, i32
  }
  func.func @transform_2(%arg0: i32, %arg1: i32) -> (i32, i32) {
    %c0_i32 = arith.constant 0 : i32
    %c0_i32_0 = arith.constant 0 : i32
    %c0_i32_1 = arith.constant 0 : i32
    return %c0_i32, %c0_i32_0 : i32, i32
  }
  func.func @transform_3(%arg0: i32, %arg1: i32) -> (i32, i32) {
    %c0_i32 = arith.constant 0 : i32
    %c0_i32_0 = arith.constant 0 : i32
    %c0_i32_1 = arith.constant 0 : i32
    return %c0_i32, %c0_i32_0 : i32, i32
  }
  func.func @transform_4(%arg0: i32, %arg1: i32) -> (i32, i32) {
    %c0_i32 = arith.constant 0 : i32
    %c0_i32_0 = arith.constant 0 : i32
    %c0_i32_1 = arith.constant 0 : i32
    return %c0_i32, %c0_i32_0 : i32, i32
  }
  func.func @transform_5(%arg0: i32, %arg1: i32) -> (i32, i32) {
    %c0_i32 = arith.constant 0 : i32
    %c0_i32_0 = arith.constant 0 : i32
    %c0_i32_1 = arith.constant 0 : i32
    return %c0_i32, %c0_i32_0 : i32, i32
  }
  func.func @transform_6(%arg0: i32, %arg1: i32) -> (i32, i32) {
    %c0_i32 = arith.constant 0 : i32
    %c0_i32_0 = arith.constant 0 : i32
    %c0_i32_1 = arith.constant 0 : i32
    return %c0_i32, %c0_i32_0 : i32, i32
  }
  func.func @transform_7(%arg0: i32, %arg1: i32) -> (i32, i32, i32, i32) {
    %c0_i32 = arith.constant 0 : i32
    %c0_i32_0 = arith.constant 0 : i32
    %c0_i32_1 = arith.constant 0 : i32
    return %arg0, %arg1, %c0_i32, %c0_i32_0 : i32, i32, i32, i32
  }
}

module attributes {stable_mosaic.version = 11 : i64} {
  func.func @_basic_block_kernel(%arg0: i32, %arg1: i32, %arg2: memref<1x16x16x128xbf16, #tpu.memory_space<vmem>>, %arg3: memref<1152x128xbf16, #tpu.memory_space<vmem>>, %arg4: memref<1x128xf32, #tpu.memory_space<vmem>>, %arg5: memref<1x128xf32, #tpu.memory_space<vmem>>, %arg6: memref<1152x128xbf16, #tpu.memory_space<vmem>>, %arg7: memref<1x128xf32, #tpu.memory_space<vmem>>, %arg8: memref<1x128xf32, #tpu.memory_space<vmem>>, %arg9: memref<1x4x16x128xbf16, #tpu.memory_space<vmem>>, %arg10: memref<8x18x128xbf16, #tpu.memory_space<vmem>>) attributes {dimension_semantics = [#tpu.dimension_semantics<parallel>, #tpu.dimension_semantics<parallel>], iteration_bounds = array<i64: 2, 4>, scalar_prefetch = 0 : i64, scratch_operands = 1 : i64, tpu.core_type = #tpu.core_type<tc>, window_params = [{transform_indices = @transform_0, window_bounds = array<i64: 1, 16, 16, 128>}, {pipeline_mode = #tpu.pipeline_mode<synchronous>, transform_indices = @transform_1, window_bounds = array<i64: 1152, 128>}, {pipeline_mode = #tpu.pipeline_mode<synchronous>, transform_indices = @transform_2, window_bounds = array<i64: 1, 128>}, {pipeline_mode = #tpu.pipeline_mode<synchronous>, transform_indices = @transform_3, window_bounds = array<i64: 1, 128>}, {pipeline_mode = #tpu.pipeline_mode<synchronous>, transform_indices = @transform_4, window_bounds = array<i64: 1152, 128>}, {pipeline_mode = #tpu.pipeline_mode<synchronous>, transform_indices = @transform_5, window_bounds = array<i64: 1, 128>}, {pipeline_mode = #tpu.pipeline_mode<synchronous>, transform_indices = @transform_6, window_bounds = array<i64: 1, 128>}, {transform_indices = @transform_7, window_bounds = array<i64: 1, 4, 16, 128>}]} {
    %c4_i32 = arith.constant 4 : i32
    %0 = arith.muli %arg1, %c4_i32 : i32
    %cst = arith.constant 0.000000e+00 : bf16
    %1 = vector.broadcast %cst : bf16 to vector<8x1x128xbf16>
    %c0 = arith.constant 0 : index
    %c0_0 = arith.constant 0 : index
    %c0_1 = arith.constant 0 : index
    %2 = vector.load %arg10[%c0, %c0_0, %c0_1] : memref<8x18x128xbf16, #tpu.memory_space<vmem>>, vector<8x1x128xbf16>
    tpu.vector_store %arg10[%c0, %c0_0, %c0_1], %1 {strides = array<i32>} : memref<8x18x128xbf16, #tpu.memory_space<vmem>>, vector<8x1x128xbf16>,
    %cst_2 = arith.constant 0.000000e+00 : bf16
    %3 = vector.broadcast %cst_2 : bf16 to vector<8x1x128xbf16>
    %c0_3 = arith.constant 0 : index
    %c17 = arith.constant 17 : index
    %c0_4 = arith.constant 0 : index
    %4 = vector.load %arg10[%c0_3, %c17, %c0_4] : memref<8x18x128xbf16, #tpu.memory_space<vmem>>, vector<8x1x128xbf16>
    tpu.vector_store %arg10[%c0_3, %c17, %c0_4], %3 {strides = array<i32>} : memref<8x18x128xbf16, #tpu.memory_space<vmem>>, vector<8x1x128xbf16>,
    %cst_5 = arith.constant 0.000000e+00 : bf16
    %5 = vector.broadcast %cst_5 : bf16 to vector<2x18x128xbf16>
    %c0_6 = arith.constant 0 : index
    %c0_7 = arith.constant 0 : index
    %c0_8 = arith.constant 0 : index
    %6 = vector.load %arg10[%c0_6, %c0_7, %c0_8] : memref<8x18x128xbf16, #tpu.memory_space<vmem>>, vector<2x18x128xbf16>
    tpu.vector_store %arg10[%c0_6, %c0_7, %c0_8], %5 {strides = array<i32>} : memref<8x18x128xbf16, #tpu.memory_space<vmem>>, vector<2x18x128xbf16>,
    %cst_9 = arith.constant 0.000000e+00 : bf16
    %7 = vector.broadcast %cst_9 : bf16 to vector<2x18x128xbf16>
    %c6 = arith.constant 6 : index
    %c0_10 = arith.constant 0 : index
    %c0_11 = arith.constant 0 : index
    %8 = vector.load %arg10[%c6, %c0_10, %c0_11] : memref<8x18x128xbf16, #tpu.memory_space<vmem>>, vector<2x18x128xbf16>
    tpu.vector_store %arg10[%c6, %c0_10, %c0_11], %7 {strides = array<i32>} : memref<8x18x128xbf16, #tpu.memory_space<vmem>>, vector<2x18x128xbf16>,
    %c0_i32 = arith.constant 0 : i32
    %9 = arith.cmpi sgt, %arg1, %c0_i32 : i32
    %c3_i32 = arith.constant 3 : i32
    %10 = arith.cmpi slt, %arg1, %c3_i32 : i32
    %11 = arith.andi %9, %10 : i1
    %12 = arith.extui %11 : i1 to i32
    %c0_i32_12 = arith.constant 0 : i32
    %13 = arith.cmpi ne, %12, %c0_i32_12 : i32
    scf.if %13 {
      %c2_i32 = arith.constant 2 : i32
      %144 = arith.subi %0, %c2_i32 : i32
      %c0_139 = arith.constant 0 : index
      %145 = arith.index_cast %144 : i32 to index
      %c0_140 = arith.constant 0 : index
      %c0_141 = arith.constant 0 : index
      %146 = vector.load %arg2[%c0_139, %145, %c0_140, %c0_141] : memref<1x16x16x128xbf16, #tpu.memory_space<vmem>>, vector<1x8x16x128xbf16>
      %147 = vector.shape_cast %146 : vector<1x8x16x128xbf16> to vector<8x16x128xbf16>
      %c0_142 = arith.constant 0 : index
      %c1_143 = arith.constant 1 : index
      %c0_144 = arith.constant 0 : index
      %148 = vector.load %arg10[%c0_142, %c1_143, %c0_144] : memref<8x18x128xbf16, #tpu.memory_space<vmem>>, vector<8x16x128xbf16>
      tpu.vector_store %arg10[%c0_142, %c1_143, %c0_144], %147 {strides = array<i32>} : memref<8x18x128xbf16, #tpu.memory_space<vmem>>, vector<8x16x128xbf16>,
    } else {
    }
    %c0_i32_13 = arith.constant 0 : i32
    %14 = arith.cmpi eq, %arg1, %c0_i32_13 : i32
    %15 = arith.extui %14 : i1 to i32
    %c0_i32_14 = arith.constant 0 : i32
    %16 = arith.cmpi ne, %15, %c0_i32_14 : i32
    scf.if %16 {
      %c0_139 = arith.constant 0 : index
      %c0_140 = arith.constant 0 : index
      %c0_141 = arith.constant 0 : index
      %c0_142 = arith.constant 0 : index
      %144 = vector.load %arg2[%c0_139, %c0_140, %c0_141, %c0_142] : memref<1x16x16x128xbf16, #tpu.memory_space<vmem>>, vector<1x6x16x128xbf16>
      %145 = vector.shape_cast %144 : vector<1x6x16x128xbf16> to vector<6x16x128xbf16>
      %c2_143 = arith.constant 2 : index
      %c1_144 = arith.constant 1 : index
      %c0_145 = arith.constant 0 : index
      %146 = vector.load %arg10[%c2_143, %c1_144, %c0_145] : memref<8x18x128xbf16, #tpu.memory_space<vmem>>, vector<6x16x128xbf16>
      tpu.vector_store %arg10[%c2_143, %c1_144, %c0_145], %145 {strides = array<i32>} : memref<8x18x128xbf16, #tpu.memory_space<vmem>>, vector<6x16x128xbf16>,
    } else {
    }
    %c3_i32_15 = arith.constant 3 : i32
    %17 = arith.cmpi eq, %arg1, %c3_i32_15 : i32
    %18 = arith.extui %17 : i1 to i32
    %c0_i32_16 = arith.constant 0 : i32
    %19 = arith.cmpi ne, %18, %c0_i32_16 : i32
    scf.if %19 {
      %c0_139 = arith.constant 0 : index
      %c10 = arith.constant 10 : index
      %c0_140 = arith.constant 0 : index
      %c0_141 = arith.constant 0 : index
      %144 = vector.load %arg2[%c0_139, %c10, %c0_140, %c0_141] : memref<1x16x16x128xbf16, #tpu.memory_space<vmem>>, vector<1x6x16x128xbf16>
      %145 = vector.shape_cast %144 : vector<1x6x16x128xbf16> to vector<6x16x128xbf16>
      %c0_142 = arith.constant 0 : index
      %c1_143 = arith.constant 1 : index
      %c0_144 = arith.constant 0 : index
      %146 = vector.load %arg10[%c0_142, %c1_143, %c0_144] : memref<8x18x128xbf16, #tpu.memory_space<vmem>>, vector<6x16x128xbf16>
      tpu.vector_store %arg10[%c0_142, %c1_143, %c0_144], %145 {strides = array<i32>} : memref<8x18x128xbf16, #tpu.memory_space<vmem>>, vector<6x16x128xbf16>,
    } else {
    }
    %c0_17 = arith.constant 0 : index
    %c0_18 = arith.constant 0 : index
    %c0_19 = arith.constant 0 : index
    %20 = vector.load %arg10[%c0_17, %c0_18, %c0_19] : memref<8x18x128xbf16, #tpu.memory_space<vmem>>, vector<6x16x128xbf16>
    %21 = vector.shape_cast %20 : vector<6x16x128xbf16> to vector<96x128xbf16>
    %c0_20 = arith.constant 0 : index
    %c0_21 = arith.constant 0 : index
    %22 = vector.load %arg3[%c0_20, %c0_21] : memref<1152x128xbf16, #tpu.memory_space<vmem>>, vector<128x128xbf16>
    %cst_22 = arith.constant dense<0.000000e+00> : vector<96x128xf32>
    %23 = tpu.matmul %21, %22, %cst_22 {dimension_numbers = #tpu.dot_dimension_numbers<[1], [0], [0], [1], [0, 0, 1, 1], [], []>} : vector<96x128xbf16>, vector<128x128xbf16>, vector<96x128xf32> -> vector<96x128xf32>
    %c0_23 = arith.constant 0 : index
    %c1 = arith.constant 1 : index
    %c0_24 = arith.constant 0 : index
    %24 = vector.load %arg10[%c0_23, %c1, %c0_24] : memref<8x18x128xbf16, #tpu.memory_space<vmem>>, vector<6x16x128xbf16>
    %25 = vector.shape_cast %24 : vector<6x16x128xbf16> to vector<96x128xbf16>
    %c128 = arith.constant 128 : index
    %c0_25 = arith.constant 0 : index
    %26 = vector.load %arg3[%c128, %c0_25] : memref<1152x128xbf16, #tpu.memory_space<vmem>>, vector<128x128xbf16>
    %cst_26 = arith.constant dense<0.000000e+00> : vector<96x128xf32>
    %27 = tpu.matmul %25, %26, %cst_26 {dimension_numbers = #tpu.dot_dimension_numbers<[1], [0], [0], [1], [0, 0, 1, 1], [], []>} : vector<96x128xbf16>, vector<128x128xbf16>, vector<96x128xf32> -> vector<96x128xf32>
    %28 = arith.addf %23, %27 : vector<96x128xf32>
    %c0_27 = arith.constant 0 : index
    %c2 = arith.constant 2 : index
    %c0_28 = arith.constant 0 : index
    %29 = vector.load %arg10[%c0_27, %c2, %c0_28] : memref<8x18x128xbf16, #tpu.memory_space<vmem>>, vector<6x16x128xbf16>
    %30 = vector.shape_cast %29 : vector<6x16x128xbf16> to vector<96x128xbf16>
    %c256 = arith.constant 256 : index
    %c0_29 = arith.constant 0 : index
    %31 = vector.load %arg3[%c256, %c0_29] : memref<1152x128xbf16, #tpu.memory_space<vmem>>, vector<128x128xbf16>
    %cst_30 = arith.constant dense<0.000000e+00> : vector<96x128xf32>
    %32 = tpu.matmul %30, %31, %cst_30 {dimension_numbers = #tpu.dot_dimension_numbers<[1], [0], [0], [1], [0, 0, 1, 1], [], []>} : vector<96x128xbf16>, vector<128x128xbf16>, vector<96x128xf32> -> vector<96x128xf32>
    %33 = arith.addf %28, %32 : vector<96x128xf32>
    %c1_31 = arith.constant 1 : index
    %c0_32 = arith.constant 0 : index
    %c0_33 = arith.constant 0 : index
    %34 = vector.load %arg10[%c1_31, %c0_32, %c0_33] : memref<8x18x128xbf16, #tpu.memory_space<vmem>>, vector<6x16x128xbf16>
    %35 = vector.shape_cast %34 : vector<6x16x128xbf16> to vector<96x128xbf16>
    %c384 = arith.constant 384 : index
    %c0_34 = arith.constant 0 : index
    %36 = vector.load %arg3[%c384, %c0_34] : memref<1152x128xbf16, #tpu.memory_space<vmem>>, vector<128x128xbf16>
    %cst_35 = arith.constant dense<0.000000e+00> : vector<96x128xf32>
    %37 = tpu.matmul %35, %36, %cst_35 {dimension_numbers = #tpu.dot_dimension_numbers<[1], [0], [0], [1], [0, 0, 1, 1], [], []>} : vector<96x128xbf16>, vector<128x128xbf16>, vector<96x128xf32> -> vector<96x128xf32>
    %38 = arith.addf %33, %37 : vector<96x128xf32>
    %c1_36 = arith.constant 1 : index
    %c1_37 = arith.constant 1 : index
    %c0_38 = arith.constant 0 : index
    %39 = vector.load %arg10[%c1_36, %c1_37, %c0_38] : memref<8x18x128xbf16, #tpu.memory_space<vmem>>, vector<6x16x128xbf16>
    %40 = vector.shape_cast %39 : vector<6x16x128xbf16> to vector<96x128xbf16>
    %c512 = arith.constant 512 : index
    %c0_39 = arith.constant 0 : index
    %41 = vector.load %arg3[%c512, %c0_39] : memref<1152x128xbf16, #tpu.memory_space<vmem>>, vector<128x128xbf16>
    %cst_40 = arith.constant dense<0.000000e+00> : vector<96x128xf32>
    %42 = tpu.matmul %40, %41, %cst_40 {dimension_numbers = #tpu.dot_dimension_numbers<[1], [0], [0], [1], [0, 0, 1, 1], [], []>} : vector<96x128xbf16>, vector<128x128xbf16>, vector<96x128xf32> -> vector<96x128xf32>
    %43 = arith.addf %38, %42 : vector<96x128xf32>
    %c1_41 = arith.constant 1 : index
    %c2_42 = arith.constant 2 : index
    %c0_43 = arith.constant 0 : index
    %44 = vector.load %arg10[%c1_41, %c2_42, %c0_43] : memref<8x18x128xbf16, #tpu.memory_space<vmem>>, vector<6x16x128xbf16>
    %45 = vector.shape_cast %44 : vector<6x16x128xbf16> to vector<96x128xbf16>
    %c640 = arith.constant 640 : index
    %c0_44 = arith.constant 0 : index
    %46 = vector.load %arg3[%c640, %c0_44] : memref<1152x128xbf16, #tpu.memory_space<vmem>>, vector<128x128xbf16>
    %cst_45 = arith.constant dense<0.000000e+00> : vector<96x128xf32>
    %47 = tpu.matmul %45, %46, %cst_45 {dimension_numbers = #tpu.dot_dimension_numbers<[1], [0], [0], [1], [0, 0, 1, 1], [], []>} : vector<96x128xbf16>, vector<128x128xbf16>, vector<96x128xf32> -> vector<96x128xf32>
    %48 = arith.addf %43, %47 : vector<96x128xf32>
    %c2_46 = arith.constant 2 : index
    %c0_47 = arith.constant 0 : index
    %c0_48 = arith.constant 0 : index
    %49 = vector.load %arg10[%c2_46, %c0_47, %c0_48] : memref<8x18x128xbf16, #tpu.memory_space<vmem>>, vector<6x16x128xbf16>
    %50 = vector.shape_cast %49 : vector<6x16x128xbf16> to vector<96x128xbf16>
    %c768 = arith.constant 768 : index
    %c0_49 = arith.constant 0 : index
    %51 = vector.load %arg3[%c768, %c0_49] : memref<1152x128xbf16, #tpu.memory_space<vmem>>, vector<128x128xbf16>
    %cst_50 = arith.constant dense<0.000000e+00> : vector<96x128xf32>
    %52 = tpu.matmul %50, %51, %cst_50 {dimension_numbers = #tpu.dot_dimension_numbers<[1], [0], [0], [1], [0, 0, 1, 1], [], []>} : vector<96x128xbf16>, vector<128x128xbf16>, vector<96x128xf32> -> vector<96x128xf32>
    %53 = arith.addf %48, %52 : vector<96x128xf32>
    %c2_51 = arith.constant 2 : index
    %c1_52 = arith.constant 1 : index
    %c0_53 = arith.constant 0 : index
    %54 = vector.load %arg10[%c2_51, %c1_52, %c0_53] : memref<8x18x128xbf16, #tpu.memory_space<vmem>>, vector<6x16x128xbf16>
    %55 = vector.shape_cast %54 : vector<6x16x128xbf16> to vector<96x128xbf16>
    %c896 = arith.constant 896 : index
    %c0_54 = arith.constant 0 : index
    %56 = vector.load %arg3[%c896, %c0_54] : memref<1152x128xbf16, #tpu.memory_space<vmem>>, vector<128x128xbf16>
    %cst_55 = arith.constant dense<0.000000e+00> : vector<96x128xf32>
    %57 = tpu.matmul %55, %56, %cst_55 {dimension_numbers = #tpu.dot_dimension_numbers<[1], [0], [0], [1], [0, 0, 1, 1], [], []>} : vector<96x128xbf16>, vector<128x128xbf16>, vector<96x128xf32> -> vector<96x128xf32>
    %58 = arith.addf %53, %57 : vector<96x128xf32>
    %c2_56 = arith.constant 2 : index
    %c2_57 = arith.constant 2 : index
    %c0_58 = arith.constant 0 : index
    %59 = vector.load %arg10[%c2_56, %c2_57, %c0_58] : memref<8x18x128xbf16, #tpu.memory_space<vmem>>, vector<6x16x128xbf16>
    %60 = vector.shape_cast %59 : vector<6x16x128xbf16> to vector<96x128xbf16>
    %c1024 = arith.constant 1024 : index
    %c0_59 = arith.constant 0 : index
    %61 = vector.load %arg3[%c1024, %c0_59] : memref<1152x128xbf16, #tpu.memory_space<vmem>>, vector<128x128xbf16>
    %cst_60 = arith.constant dense<0.000000e+00> : vector<96x128xf32>
    %62 = tpu.matmul %60, %61, %cst_60 {dimension_numbers = #tpu.dot_dimension_numbers<[1], [0], [0], [1], [0, 0, 1, 1], [], []>} : vector<96x128xbf16>, vector<128x128xbf16>, vector<96x128xf32> -> vector<96x128xf32>
    %63 = arith.addf %58, %62 : vector<96x128xf32>
    %c0_61 = arith.constant 0 : index
    %c0_62 = arith.constant 0 : index
    %64 = vector.load %arg4[%c0_61, %c0_62] : memref<1x128xf32, #tpu.memory_space<vmem>>, vector<1x128xf32>
    %65 = vector.broadcast %64 : vector<1x128xf32> to vector<96x128xf32>
    %66 = arith.mulf %63, %65 : vector<96x128xf32>
    %c0_63 = arith.constant 0 : index
    %c0_64 = arith.constant 0 : index
    %67 = vector.load %arg5[%c0_63, %c0_64] : memref<1x128xf32, #tpu.memory_space<vmem>>, vector<1x128xf32>
    %68 = vector.broadcast %67 : vector<1x128xf32> to vector<96x128xf32>
    %69 = arith.addf %66, %68 : vector<96x128xf32>
    %cst_65 = arith.constant 0.000000e+00 : f32
    %70 = vector.broadcast %cst_65 : f32 to vector<96x128xf32>
    %71 = arith.maximumf %69, %70 : vector<96x128xf32>
    %72 = arith.truncf %71 : vector<96x128xf32> to vector<96x128xbf16>
    %73 = vector.shape_cast %72 : vector<96x128xbf16> to vector<6x16x128xbf16>
    %c0_66 = arith.constant 0 : index
    %c1_67 = arith.constant 1 : index
    %c0_68 = arith.constant 0 : index
    %74 = vector.load %arg10[%c0_66, %c1_67, %c0_68] : memref<8x18x128xbf16, #tpu.memory_space<vmem>>, vector<6x16x128xbf16>
    tpu.vector_store %arg10[%c0_66, %c1_67, %c0_68], %73 {strides = array<i32>} : memref<8x18x128xbf16, #tpu.memory_space<vmem>>, vector<6x16x128xbf16>,
    %c0_i32_69 = arith.constant 0 : i32
    %75 = arith.cmpi eq, %arg1, %c0_i32_69 : i32
    %76 = arith.extui %75 : i1 to i32
    %c0_i32_70 = arith.constant 0 : i32
    %77 = arith.cmpi ne, %76, %c0_i32_70 : i32
    scf.if %77 {
      %cst_139 = arith.constant 0.000000e+00 : bf16
      %144 = vector.broadcast %cst_139 : bf16 to vector<1x18x128xbf16>
      %c0_140 = arith.constant 0 : index
      %c0_141 = arith.constant 0 : index
      %c0_142 = arith.constant 0 : index
      %145 = vector.load %arg10[%c0_140, %c0_141, %c0_142] : memref<8x18x128xbf16, #tpu.memory_space<vmem>>, vector<1x18x128xbf16>
      tpu.vector_store %arg10[%c0_140, %c0_141, %c0_142], %144 {strides = array<i32>} : memref<8x18x128xbf16, #tpu.memory_space<vmem>>, vector<1x18x128xbf16>,
    } else {
    }
    %c3_i32_71 = arith.constant 3 : i32
    %78 = arith.cmpi eq, %arg1, %c3_i32_71 : i32
    %79 = arith.extui %78 : i1 to i32
    %c0_i32_72 = arith.constant 0 : i32
    %80 = arith.cmpi ne, %79, %c0_i32_72 : i32
    scf.if %80 {
      %cst_139 = arith.constant 0.000000e+00 : bf16
      %144 = vector.broadcast %cst_139 : bf16 to vector<1x18x128xbf16>
      %c5 = arith.constant 5 : index
      %c0_140 = arith.constant 0 : index
      %c0_141 = arith.constant 0 : index
      %145 = vector.load %arg10[%c5, %c0_140, %c0_141] : memref<8x18x128xbf16, #tpu.memory_space<vmem>>, vector<1x18x128xbf16>
      tpu.vector_store %arg10[%c5, %c0_140, %c0_141], %144 {strides = array<i32>} : memref<8x18x128xbf16, #tpu.memory_space<vmem>>, vector<1x18x128xbf16>,
    } else {
    }
    %c0_73 = arith.constant 0 : index
    %c0_74 = arith.constant 0 : index
    %c0_75 = arith.constant 0 : index
    %81 = vector.load %arg10[%c0_73, %c0_74, %c0_75] : memref<8x18x128xbf16, #tpu.memory_space<vmem>>, vector<4x16x128xbf16>
    %82 = vector.shape_cast %81 : vector<4x16x128xbf16> to vector<64x128xbf16>
    %c0_76 = arith.constant 0 : index
    %c0_77 = arith.constant 0 : index
    %83 = vector.load %arg6[%c0_76, %c0_77] : memref<1152x128xbf16, #tpu.memory_space<vmem>>, vector<128x128xbf16>
    %cst_78 = arith.constant dense<0.000000e+00> : vector<64x128xf32>
    %84 = tpu.matmul %82, %83, %cst_78 {dimension_numbers = #tpu.dot_dimension_numbers<[1], [0], [0], [1], [0, 0, 1, 1], [], []>} : vector<64x128xbf16>, vector<128x128xbf16>, vector<64x128xf32> -> vector<64x128xf32>
    %c0_79 = arith.constant 0 : index
    %c1_80 = arith.constant 1 : index
    %c0_81 = arith.constant 0 : index
    %85 = vector.load %arg10[%c0_79, %c1_80, %c0_81] : memref<8x18x128xbf16, #tpu.memory_space<vmem>>, vector<4x16x128xbf16>
    %86 = vector.shape_cast %85 : vector<4x16x128xbf16> to vector<64x128xbf16>
    %c128_82 = arith.constant 128 : index
    %c0_83 = arith.constant 0 : index
    %87 = vector.load %arg6[%c128_82, %c0_83] : memref<1152x128xbf16, #tpu.memory_space<vmem>>, vector<128x128xbf16>
    %cst_84 = arith.constant dense<0.000000e+00> : vector<64x128xf32>
    %88 = tpu.matmul %86, %87, %cst_84 {dimension_numbers = #tpu.dot_dimension_numbers<[1], [0], [0], [1], [0, 0, 1, 1], [], []>} : vector<64x128xbf16>, vector<128x128xbf16>, vector<64x128xf32> -> vector<64x128xf32>
    %89 = arith.addf %84, %88 : vector<64x128xf32>
    %c0_85 = arith.constant 0 : index
    %c2_86 = arith.constant 2 : index
    %c0_87 = arith.constant 0 : index
    %90 = vector.load %arg10[%c0_85, %c2_86, %c0_87] : memref<8x18x128xbf16, #tpu.memory_space<vmem>>, vector<4x16x128xbf16>
    %91 = vector.shape_cast %90 : vector<4x16x128xbf16> to vector<64x128xbf16>
    %c256_88 = arith.constant 256 : index
    %c0_89 = arith.constant 0 : index
    %92 = vector.load %arg6[%c256_88, %c0_89] : memref<1152x128xbf16, #tpu.memory_space<vmem>>, vector<128x128xbf16>
    %cst_90 = arith.constant dense<0.000000e+00> : vector<64x128xf32>
    %93 = tpu.matmul %91, %92, %cst_90 {dimension_numbers = #tpu.dot_dimension_numbers<[1], [0], [0], [1], [0, 0, 1, 1], [], []>} : vector<64x128xbf16>, vector<128x128xbf16>, vector<64x128xf32> -> vector<64x128xf32>
    %94 = arith.addf %89, %93 : vector<64x128xf32>
    %c1_91 = arith.constant 1 : index
    %c0_92 = arith.constant 0 : index
    %c0_93 = arith.constant 0 : index
    %95 = vector.load %arg10[%c1_91, %c0_92, %c0_93] : memref<8x18x128xbf16, #tpu.memory_space<vmem>>, vector<4x16x128xbf16>
    %96 = vector.shape_cast %95 : vector<4x16x128xbf16> to vector<64x128xbf16>
    %c384_94 = arith.constant 384 : index
    %c0_95 = arith.constant 0 : index
    %97 = vector.load %arg6[%c384_94, %c0_95] : memref<1152x128xbf16, #tpu.memory_space<vmem>>, vector<128x128xbf16>
    %cst_96 = arith.constant dense<0.000000e+00> : vector<64x128xf32>
    %98 = tpu.matmul %96, %97, %cst_96 {dimension_numbers = #tpu.dot_dimension_numbers<[1], [0], [0], [1], [0, 0, 1, 1], [], []>} : vector<64x128xbf16>, vector<128x128xbf16>, vector<64x128xf32> -> vector<64x128xf32>
    %99 = arith.addf %94, %98 : vector<64x128xf32>
    %c1_97 = arith.constant 1 : index
    %c1_98 = arith.constant 1 : index
    %c0_99 = arith.constant 0 : index
    %100 = vector.load %arg10[%c1_97, %c1_98, %c0_99] : memref<8x18x128xbf16, #tpu.memory_space<vmem>>, vector<4x16x128xbf16>
    %101 = vector.shape_cast %100 : vector<4x16x128xbf16> to vector<64x128xbf16>
    %c512_100 = arith.constant 512 : index
    %c0_101 = arith.constant 0 : index
    %102 = vector.load %arg6[%c512_100, %c0_101] : memref<1152x128xbf16, #tpu.memory_space<vmem>>, vector<128x128xbf16>
    %cst_102 = arith.constant dense<0.000000e+00> : vector<64x128xf32>
    %103 = tpu.matmul %101, %102, %cst_102 {dimension_numbers = #tpu.dot_dimension_numbers<[1], [0], [0], [1], [0, 0, 1, 1], [], []>} : vector<64x128xbf16>, vector<128x128xbf16>, vector<64x128xf32> -> vector<64x128xf32>
    %104 = arith.addf %99, %103 : vector<64x128xf32>
    %c1_103 = arith.constant 1 : index
    %c2_104 = arith.constant 2 : index
    %c0_105 = arith.constant 0 : index
    %105 = vector.load %arg10[%c1_103, %c2_104, %c0_105] : memref<8x18x128xbf16, #tpu.memory_space<vmem>>, vector<4x16x128xbf16>
    %106 = vector.shape_cast %105 : vector<4x16x128xbf16> to vector<64x128xbf16>
    %c640_106 = arith.constant 640 : index
    %c0_107 = arith.constant 0 : index
    %107 = vector.load %arg6[%c640_106, %c0_107] : memref<1152x128xbf16, #tpu.memory_space<vmem>>, vector<128x128xbf16>
    %cst_108 = arith.constant dense<0.000000e+00> : vector<64x128xf32>
    %108 = tpu.matmul %106, %107, %cst_108 {dimension_numbers = #tpu.dot_dimension_numbers<[1], [0], [0], [1], [0, 0, 1, 1], [], []>} : vector<64x128xbf16>, vector<128x128xbf16>, vector<64x128xf32> -> vector<64x128xf32>
    %109 = arith.addf %104, %108 : vector<64x128xf32>
    %c2_109 = arith.constant 2 : index
    %c0_110 = arith.constant 0 : index
    %c0_111 = arith.constant 0 : index
    %110 = vector.load %arg10[%c2_109, %c0_110, %c0_111] : memref<8x18x128xbf16, #tpu.memory_space<vmem>>, vector<4x16x128xbf16>
    %111 = vector.shape_cast %110 : vector<4x16x128xbf16> to vector<64x128xbf16>
    %c768_112 = arith.constant 768 : index
    %c0_113 = arith.constant 0 : index
    %112 = vector.load %arg6[%c768_112, %c0_113] : memref<1152x128xbf16, #tpu.memory_space<vmem>>, vector<128x128xbf16>
    %cst_114 = arith.constant dense<0.000000e+00> : vector<64x128xf32>
    %113 = tpu.matmul %111, %112, %cst_114 {dimension_numbers = #tpu.dot_dimension_numbers<[1], [0], [0], [1], [0, 0, 1, 1], [], []>} : vector<64x128xbf16>, vector<128x128xbf16>, vector<64x128xf32> -> vector<64x128xf32>
    %114 = arith.addf %109, %113 : vector<64x128xf32>
    %c2_115 = arith.constant 2 : index
    %c1_116 = arith.constant 1 : index
    %c0_117 = arith.constant 0 : index
    %115 = vector.load %arg10[%c2_115, %c1_116, %c0_117] : memref<8x18x128xbf16, #tpu.memory_space<vmem>>, vector<4x16x128xbf16>
    %116 = vector.shape_cast %115 : vector<4x16x128xbf16> to vector<64x128xbf16>
    %c896_118 = arith.constant 896 : index
    %c0_119 = arith.constant 0 : index
    %117 = vector.load %arg6[%c896_118, %c0_119] : memref<1152x128xbf16, #tpu.memory_space<vmem>>, vector<128x128xbf16>
    %cst_120 = arith.constant dense<0.000000e+00> : vector<64x128xf32>
    %118 = tpu.matmul %116, %117, %cst_120 {dimension_numbers = #tpu.dot_dimension_numbers<[1], [0], [0], [1], [0, 0, 1, 1], [], []>} : vector<64x128xbf16>, vector<128x128xbf16>, vector<64x128xf32> -> vector<64x128xf32>
    %119 = arith.addf %114, %118 : vector<64x128xf32>
    %c2_121 = arith.constant 2 : index
    %c2_122 = arith.constant 2 : index
    %c0_123 = arith.constant 0 : index
    %120 = vector.load %arg10[%c2_121, %c2_122, %c0_123] : memref<8x18x128xbf16, #tpu.memory_space<vmem>>, vector<4x16x128xbf16>
    %121 = vector.shape_cast %120 : vector<4x16x128xbf16> to vector<64x128xbf16>
    %c1024_124 = arith.constant 1024 : index
    %c0_125 = arith.constant 0 : index
    %122 = vector.load %arg6[%c1024_124, %c0_125] : memref<1152x128xbf16, #tpu.memory_space<vmem>>, vector<128x128xbf16>
    %cst_126 = arith.constant dense<0.000000e+00> : vector<64x128xf32>
    %123 = tpu.matmul %121, %122, %cst_126 {dimension_numbers = #tpu.dot_dimension_numbers<[1], [0], [0], [1], [0, 0, 1, 1], [], []>} : vector<64x128xbf16>, vector<128x128xbf16>, vector<64x128xf32> -> vector<64x128xf32>
    %124 = arith.addf %119, %123 : vector<64x128xf32>
    %c0_127 = arith.constant 0 : index
    %125 = arith.index_cast %0 : i32 to index
    %c0_128 = arith.constant 0 : index
    %c0_129 = arith.constant 0 : index
    %126 = vector.load %arg2[%c0_127, %125, %c0_128, %c0_129] : memref<1x16x16x128xbf16, #tpu.memory_space<vmem>>, vector<1x4x16x128xbf16>
    %127 = vector.shape_cast %126 : vector<1x4x16x128xbf16> to vector<4x16x128xbf16>
    %128 = arith.extf %127 : vector<4x16x128xbf16> to vector<4x16x128xf32>
    %129 = vector.shape_cast %128 : vector<4x16x128xf32> to vector<64x128xf32>
    %c0_130 = arith.constant 0 : index
    %c0_131 = arith.constant 0 : index
    %130 = vector.load %arg7[%c0_130, %c0_131] : memref<1x128xf32, #tpu.memory_space<vmem>>, vector<1x128xf32>
    %131 = vector.broadcast %130 : vector<1x128xf32> to vector<64x128xf32>
    %132 = arith.mulf %124, %131 : vector<64x128xf32>
    %c0_132 = arith.constant 0 : index
    %c0_133 = arith.constant 0 : index
    %133 = vector.load %arg8[%c0_132, %c0_133] : memref<1x128xf32, #tpu.memory_space<vmem>>, vector<1x128xf32>
    %134 = vector.broadcast %133 : vector<1x128xf32> to vector<64x128xf32>
    %135 = arith.addf %132, %134 : vector<64x128xf32>
    %136 = arith.addf %135, %129 : vector<64x128xf32>
    %cst_134 = arith.constant 0.000000e+00 : f32
    %137 = vector.broadcast %cst_134 : f32 to vector<64x128xf32>
    %138 = arith.maximumf %136, %137 : vector<64x128xf32>
    %139 = arith.truncf %138 : vector<64x128xf32> to vector<64x128xbf16>
    %140 = vector.shape_cast %139 : vector<64x128xbf16> to vector<4x16x128xbf16>
    %c0_135 = arith.constant 0 : index
    %c0_136 = arith.constant 0 : index
    %c0_137 = arith.constant 0 : index
    %c0_138 = arith.constant 0 : index
    %141 = vector.load %arg9[%c0_135, %c0_136, %c0_137, %c0_138] : memref<1x4x16x128xbf16, #tpu.memory_space<vmem>>, vector<1x4x16x128xbf16>
    %142 = vector.shape_cast %141 : vector<1x4x16x128xbf16> to vector<4x16x128xbf16>
    %143 = vector.shape_cast %140 : vector<4x16x128xbf16> to vector<1x4x16x128xbf16>
    tpu.vector_store %arg9[%c0_135, %c0_136, %c0_137, %c0_138], %143 {strides = array<i32>} : memref<1x4x16x128xbf16, #tpu.memory_space<vmem>>, vector<1x4x16x128xbf16>,
    return
  }
  func.func @transform_0(%arg0: i32, %arg1: i32) -> (i32, i32, i32, i32) {
    %c0_i32 = arith.constant 0 : i32
    %c0_i32_0 = arith.constant 0 : i32
    %c0_i32_1 = arith.constant 0 : i32
    %c0_i32_2 = arith.constant 0 : i32
    return %arg0, %c0_i32, %c0_i32_0, %c0_i32_1 : i32, i32, i32, i32
  }
  func.func @transform_1(%arg0: i32, %arg1: i32) -> (i32, i32) {
    %c0_i32 = arith.constant 0 : i32
    %c0_i32_0 = arith.constant 0 : i32
    %c0_i32_1 = arith.constant 0 : i32
    return %c0_i32, %c0_i32_0 : i32, i32
  }
  func.func @transform_2(%arg0: i32, %arg1: i32) -> (i32, i32) {
    %c0_i32 = arith.constant 0 : i32
    %c0_i32_0 = arith.constant 0 : i32
    %c0_i32_1 = arith.constant 0 : i32
    return %c0_i32, %c0_i32_0 : i32, i32
  }
  func.func @transform_3(%arg0: i32, %arg1: i32) -> (i32, i32) {
    %c0_i32 = arith.constant 0 : i32
    %c0_i32_0 = arith.constant 0 : i32
    %c0_i32_1 = arith.constant 0 : i32
    return %c0_i32, %c0_i32_0 : i32, i32
  }
  func.func @transform_4(%arg0: i32, %arg1: i32) -> (i32, i32) {
    %c0_i32 = arith.constant 0 : i32
    %c0_i32_0 = arith.constant 0 : i32
    %c0_i32_1 = arith.constant 0 : i32
    return %c0_i32, %c0_i32_0 : i32, i32
  }
  func.func @transform_5(%arg0: i32, %arg1: i32) -> (i32, i32) {
    %c0_i32 = arith.constant 0 : i32
    %c0_i32_0 = arith.constant 0 : i32
    %c0_i32_1 = arith.constant 0 : i32
    return %c0_i32, %c0_i32_0 : i32, i32
  }
  func.func @transform_6(%arg0: i32, %arg1: i32) -> (i32, i32) {
    %c0_i32 = arith.constant 0 : i32
    %c0_i32_0 = arith.constant 0 : i32
    %c0_i32_1 = arith.constant 0 : i32
    return %c0_i32, %c0_i32_0 : i32, i32
  }
  func.func @transform_7(%arg0: i32, %arg1: i32) -> (i32, i32, i32, i32) {
    %c0_i32 = arith.constant 0 : i32
    %c0_i32_0 = arith.constant 0 : i32
    %c0_i32_1 = arith.constant 0 : i32
    return %arg0, %arg1, %c0_i32, %c0_i32_0 : i32, i32, i32, i32
  }
}

</mosaic_0001>

<bundles_post_ra>
// kernel: _pallas_forward.1
= control target key start
LH: loop header
LB: loop body
LE: loop exit
PB: predicated region body
PF: predicated region fallthrough
CT: control target
= control target key end

     0   :  { %s8835_s0 = inlined_call_operand.hbm [shape: bf16[2,16,16,128], index: 0, kind: input, shape index: {}]   ;;  %s8836_s1 = inlined_call_operand.hbm [shape: bf16[1152,128], index: 1, kind: input, shape index: {}]   ;;  %s8837_s2 = inlined_call_operand.vmem [shape: f32[1,128], index: 2, kind: input, shape index: {}]   ;;  %s8838_s3 = inlined_call_operand.vmem [shape: f32[1,128], index: 3, kind: input, shape index: {}]   ;;  %s8839_s4 = inlined_call_operand.hbm [shape: bf16[1152,128], index: 4, kind: input, shape index: {}]   ;;  %s8840_s5 = inlined_call_operand.vmem [shape: f32[1,128], index: 5, kind: input, shape index: {}]   ;;  %s8841_s6 = inlined_call_operand.vmem [shape: f32[1,128], index: 6, kind: input, shape index: {}]   ;;  %s8842_s7 = inlined_call_operand.hbm [shape: bf16[2,16,16,128], index: 7, kind: output, shape index: {}]  }
   0x1   :  { %8857 = sst [smem:[#allocation19_spill]] %s8836_s1 }
   0x2   :  { %8858 = sst [smem:[#allocation20_spill]] %s8839_s4 }
   0x3   :  { %8859 = sst [smem:[#allocation21_spill]] %s8841_s6 }
   0x4   :  { %8860 = sst [smem:[#allocation22_spill]] %s8842_s7 }
   0x5   :  { %12 = vsyncpa [#allocation4], 0 }
   0x6   :  { %14 = vsyncpa [#allocation4 + $0x1], 0 }
   0x7   :  { %15 = vsyncpa [#allocation7], 0 }
   0x8   :  { %16 = vsyncpa [#allocation5], 0 }
   0x9   :  { %18 = vsyncpa [#allocation5 + $0x1], 0  ;;  %s7551_s24 = smov 0   ;;  %s7553_s25 = smov 0  }
   0xa   :  { %s7555_s26 = smov 0   ;;  %s7557_s27 = smov 0  }
   0xb   :  { %s7559_s28 = smov 0   ;;  %s7561_s29 = smov 0  }
   0xc   :  { %s7563_s30 = smov 0   ;;  %s7565_s8 = smov 0  }
   0xd   :  { %s7567_s9 = smov 0   ;;  %s7569_s10 = smov 0  }
   0xe   :  { %s7571_s11 = smov 0  }
   0xf LB: > { %8861 = sst [smem:[#allocation13_spill]] %s7458_s24  ;;  %s5721_s12 = sadd.s32 4294967295, %s7498_s11   ;;  %s7498_s11 = sphi %s7571_s11, %s24_s11   ;;  %s7494_s10 = sphi %s7569_s10, %s8925_s10   ;;  %s7490_s9 = sphi %s7567_s9, %s8917_s9   ;;  %s7486_s8 = sphi %s7565_s8, %s8924_s8   ;;  %s7482_s30 = sphi %s7563_s30, %s8916_s30   ;;  %s7478_s29 = sphi %s7561_s29, %s8923_s29   ;;  %s7474_s28 = sphi %s7559_s28, %s8922_s28   ;;  %s7470_s27 = sphi %s7557_s27, %s8921_s27   ;;  %s7466_s26 = sphi %s7555_s26, %s8920_s26   ;;  %s7462_s25 = sphi %s7553_s25, %s8919_s25   ;;  %s7458_s24 = sphi %s7551_s24, %s8918_s24  }
  0x10   : > { %8862 = sst [smem:[#allocation14_spill]] %s7486_s8  ;;  %s5722_s13 = sadd.s32 4294967294, %s7498_s11  }
  0x11   : > { %8863 = sst [smem:[#allocation15_spill]] %s7490_s9  ;;  %p56_p0 = scmp.ne.s32.totalorder %s7474_s28, %s7470_s27 }
  0x12   : > { %p7607_p1 = scmp.eq.s32.totalorder %s5721_s12, 0  ;;  %p207_p2 = scmp.ne.s32.totalorder %s7466_s26, %s7462_s25 }
  0x13   : > { %p208_p4 = scmp.eq.s32.totalorder %s5721_s12, 7  ;;  %p213_p5 = scmp.ne.s32.totalorder %s7462_s25, %s7458_s24 }
  0x14   : > { %s8864_s14 = scalar_select %p7607_p1, 1, 0 }
  0x15   : > { %p7616_p3 = por %p7607_p1, %p56_p0  ;;  %p214_p6 = scmp.eq.s32.totalorder %s5722_s13, 7 }
  0x16   : > { %p7622_p7 = por %p208_p4, %p207_p2  ;;  %p5723_p8 = scmp.ge.s32.totalorder %s7498_s11, 1 }
  0x17   : > { %s8865_s16 = scalar_select %p7616_p3, 1, 0 }
  0x18   : > { %s8866_s17 = scalar_select %p7622_p7, 1, 0 }
  0x19   : > { %p7627_p9 = por %p214_p6, %p213_p5  ;;  %p221_p10 = scmp.lt.s32.totalorder %s7498_s11, 9 }
  0x1a   : > { %8867 = sst [smem:[#allocation16_spill]] %s8866_s17  ;;  %s7500_s20 = smov [#allocation6]  }
  0x1b   : > { %s8868_s18 = scalar_select %p7627_p9, 1, 0 }
  0x1c   : > { %p7632_p11 = pnand %p5723_p8, %p221_p10  ;;  %s233_s21 = sshll.u32 %s7500_s20, 4  ;;  %s234_s21 = int_to_ptr.vmem [resolvable:$true] %s233_s21 }
  0x1d   : > { %8869 = sst [smem:[#allocation17_spill]] %s8868_s18  ;;  %s7501_s23 = smov [#allocation8]  }
  0x1e   : > { %s8870_s19 = scalar_select %p7632_p11, 1, 0 }
  0x1f   : > { %p6993_p12 = pneg %p7632_p11  ;;  %s252_s27 = sshll.u32 %s7501_s23, 4  ;;  %s7644_s27 = int_to_ptr.vmem [resolvable:$true] %s252_s27 }
  0x20   : > { %s8872_s1 = sld [smem:[#allocation19_spill]] }
  0x21   : > { %p7640_p13 = pnand %p6993_p12, %p7607_p1 }
  0x23   : > { %p7288_p2 = pneg %p7640_p13 }
  0x26   : > { %s7286_s15 = scalar_lea.hbm %s8872_s1, 9216 }
  0x27   : > { %p7287_p0 = scmp.ne.s32.totalorder %s8872_s1, %s7286_s15  ;;  %p7293_p6 = scmp.lt.u32.totalorder %s7286_s15, %s8872_s1 }
  0x29   : > { %p7289_p4 = pnand %p7288_p2, %p7287_p0 }
  0x2b   : > { %p7290_p5 = pneg %p7289_p4 }
  0x2d   : > { %p7295_p8 = pnand %p7293_p6, %p7290_p5 }
  0x2f   : > { %7298 = shalt.err (!%p7295_p8)
}
  0x30   : > { %s7299_s23 = scalar_lea.vmem %s234_s21, 9216  ;;  %p7307_p7 = scmp.lt.s32.totalorder %s234_s21, %s234_s21 }
  0x31   : > { %p7300_p10 = scmp.ne.s32.totalorder %s234_s21, %s7299_s23  ;;  %p7308_p1 = scmp.lt.s32.totalorder %s7299_s23, %s7299_s23 }
  0x33   : > { %p7302_p12 = pnand %p7300_p10, %p7288_p2  ;;  %p7309_p3 = por %p7308_p1, %p7307_p7 }
  0x35   : > { %p7303_p9 = pneg %p7302_p12 }
  0x37   : > { %p7310_p11 = pnand %p7309_p3, %p7303_p9 }
  0x39   : > { %7313 = shalt.err (!%p7310_p11)
}
  0x3a   : > { %s8853_s18 = smov 64   ;;  %s8854_s12 = smov 4  }
  0x3b   : > { %6996 = dma.hbm_to_vmem [thread:$0]  (!%p7640_p13), %s8872_s1, 9216, %s234_s21, [#allocation7], %s8853_s18, %s8853_s18, %s8854_s12  }
  0x3c   : > { %s8873_s4 = sld [smem:[#allocation20_spill]] }
  0x42   : > { %s7314_s20 = scalar_lea.hbm %s8873_s4, 9216 }
  0x43   : > { %p7315_p1 = scmp.ne.s32.totalorder %s8873_s4, %s7314_s20  ;;  %p7321_p9 = scmp.lt.u32.totalorder %s7314_s20, %s8873_s4 }
  0x45   : > { %p7317_p3 = pnand %p7315_p1, %p7288_p2 }
  0x47   : > { %p7318_p7 = pneg %p7317_p3 }
  0x49   : > { %p7323_p11 = pnand %p7321_p9, %p7318_p7 }
  0x4b   : > { %7326 = shalt.err (!%p7323_p11)
}
  0x4c   : > { %s7327_s21 = scalar_lea.vmem %s7644_s27, 9216  ;;  %p7335_p6 = scmp.lt.s32.totalorder %s7644_s27, %s7644_s27 }
  0x4d   : > { %p7328_p0 = scmp.ne.s32.totalorder %s7644_s27, %s7327_s21  ;;  %p7336_p8 = scmp.lt.s32.totalorder %s7327_s21, %s7327_s21 }
  0x4f   : > { %p7330_p4 = pnand %p7328_p0, %p7288_p2  ;;  %p7337_p10 = por %p7336_p8, %p7335_p6 }
  0x51   : > { %p7331_p5 = pneg %p7330_p4 }
  0x53   : > { %p7338_p12 = pnand %p7337_p10, %p7331_p5 }
  0x55   : > { %7341 = shalt.err (!%p7338_p12)
}
  0x56   : > { %6999 = dma.hbm_to_vmem [thread:$0]  (!%p7640_p13), %s8873_s4, 9216, %s7644_s27, [#allocation7], %s8853_s18, %s8853_s18, %s8854_s12  }
  0x57   : > { %s33_s17 = sadd.s32 1, %s7490_s9  ;;  %s36_s22 = sadd.s32 1, %s7494_s10 }
  0x58   : > { %p34_p2 = scmp.ge.s32.totalorder %s33_s17, 4  ;;  %s43_s7 = sadd.s32 1, %s7478_s29 }
  0x59   : > { %p50_p1 = scmp.ne.s32.totalorder %s7478_s29, %s7474_s28  ;;  %p51_p3 = scmp.eq.s32.totalorder %s7498_s11, 0 }
  0x5a   : > { %s8927_s17 = smov (%p34_p2, %s33_s17), 0  ;;  %s8929_s22 = smov (!%p34_p2, %s36_s22), %s7494_s10 }
  0x5b   : > { %8874 = sst [smem:[#allocation18_spill]] %s8927_s17  ;;  %p7708_p7 = por %p51_p3, %p50_p1 }
  0x5c   : > { %s193_s15 = ssub.s32 %s7490_s9, %s8927_s17  ;;  %p38_p13 = scmp.ge.s32.totalorder %s8929_s22, 2 }
  0x5d   : > { %p7010_p9 = scmp.lt.s32.totalorder %s7498_s11, 8  ;;  %s272_s27 = sand.u32 1, %s7478_s29  }
  0x5e   : > { %s6052_s13 = sshll.u32 %s7494_s10, 11  ;;  %s8931_s22 = smov (%p38_p13, %s8929_s22), 0 }
  0x5f   : > { %s5727_s20 = sshll.u32 %s272_s27, 7  ;;  %s40_s23 = ssub.s32 %s7494_s10, %s8931_s22 }
  0x60   : > { %p41_p11 = scmp.eq.s32.totalorder %s40_s23, 0  ;;  %s194_s21 = sor.u32 %s193_s15, %s40_s23 }
  0x61   : > { %p195_p0 = scmp.eq.s32.totalorder %s194_s21, 0  ;;  %s7724_s18 = scalar_lea.hbm %s8835_s0, %s6052_s13 }
  0x62   : > { %s7727_s12 = scalar_select %p41_p11, %s7478_s29, %s43_s7  }
  0x63   : > { %s8876_s1 = sadd.s32 1, %s7466_s26  ;;  %s276_s17 = scalar_lea.vmem [#allocation3], %s5727_s20 }
  0x64   : > { %s7732_s4 = scalar_select %p195_p0, %s7466_s26, %s8876_s1  }
  0x65   : > { %s283_s9 = sshll.u32 %s276_s17, 4  ;;  %p7738_p4 = pnand %p7010_p9, %p7708_p7  ;;  %s7742_s9 = int_to_ptr.vmem [resolvable:$true] %s283_s9 }
  0x66   : > { %s7744_s13 = scalar_lea.sflag [#allocation4], %s272_s27  ;;  %s7342_s7 = scalar_lea.hbm %s7724_s18, 2048 }
  0x67   : > { %p7343_p5 = scmp.ne.s32.totalorder %s7724_s18, %s7342_s7  ;;  %p7344_p6 = pneg %p7738_p4 }
  0x68   : > { %s7347_s24 = scalar_lea.hbm %s8835_s0, 4096  ;;  %p7348_p12 = scmp.lt.u32.totalorder %s7724_s18, %s8835_s0 }
  0x69   : > { %p7345_p8 = pnand %p7344_p6, %p7343_p5  ;;  %p7349_p2 = scmp.lt.u32.totalorder %s7347_s24, %s7342_s7 }
  0x6a   : > { %p7351_p3 = scmp.lt.u32.totalorder %s7342_s7, %s7724_s18 }
  0x6b   : > { %p7346_p10 = pneg %p7345_p8  ;;  %p7350_p1 = por %p7349_p2, %p7348_p12 }
  0x6d   : > { %p7352_p7 = por %p7351_p3, %p7350_p1 }
  0x6f   : > { %p7353_p13 = pnand %p7352_p7, %p7346_p10 }
  0x71   : > { %7356 = shalt.err (!%p7353_p13)
}
  0x72   : > { %s7357_s27 = scalar_lea.vmem %s7742_s9, 2048  ;;  %s7504_s21 = smov [#allocation3]  }
  0x73   : > { %p7358_p9 = scmp.ne.s32.totalorder %s7742_s9, %s7357_s27  ;;  %s7362_s6 = sshll.u32 %s7504_s21, 4  ;;  %s7363_s6 = int_to_ptr.vmem [resolvable:$false] %s7362_s6 }
  0x74   : > { %s7364_s8 = scalar_lea.vmem %s7363_s6, 4096  ;;  %p7365_p5 = scmp.lt.s32.totalorder %s7742_s9, %s7363_s6 }
  0x75   : > { %p7360_p11 = pnand %p7358_p9, %p7344_p6  ;;  %p7366_p8 = scmp.lt.s32.totalorder %s7364_s8, %s7357_s27 }
  0x77   : > { %p7361_p0 = pneg %p7360_p11  ;;  %p7367_p12 = por %p7366_p8, %p7365_p5 }
  0x79   : > { %p7368_p2 = pnand %p7367_p12, %p7361_p0 }
  0x7b   : > { %7371 = shalt.err (!%p7368_p2)
}
  0x7c   : > { %s8878_s7 = smov 4   ;;  %s8879_s1 = smov 64  }
  0x7d   : > { %7003 = dma.hbm_to_vmem [thread:$0]  (!%p7738_p4), %s7724_s18, 2048, %s7742_s9, %s7744_s13, %s8879_s1, %s8879_s1, %s8878_s7  }
  0x7e   : > { %p8880_p6 = scmp.ne.s32.totalorder %s8870_s19, 0 }
  0x7f   : > { %s297_s17 = sand.u32 (!%p8880_p6), 1, %s7474_s28   ;;  %p8881_p10 = scmp.ne.s32.totalorder (!%p8880_p6), %s8865_s16, 0 }
  0x80   : > { %295 = sbr.rel (%p8880_p6) target bundleno = 1338 (0x53a), region = 48  ;;  %s5731_s24 = sshll.u32 (!%p8880_p6), %s297_s17, 7 }
  0x81   : > { %s298_s20 = scalar_lea.sflag (!%p8880_p6), [#allocation4], %s297_s17  ;;  %s7778_s23 = scalar_lea.vmem (!%p8880_p6), [#allocation3], %s5731_s24 }
  0x87   : > { %7445 = dma.done.wait (%p8881_p10), %s298_s20, 2048  }
  0x88   : > { %7447 = vsyncadd (%p8881_p10), %s298_s20, 4294965248  ;;  %p8882_p1 = scmp.ne.s32.totalorder %s8864_s14, 0 }
  0x8a   : > { %7449 = dma.done.wait (%p8882_p1), [#allocation7], 18432  }
  0x8b   : > { %7451 = vsyncadd (%p8882_p1), [#allocation7], 4294948864  ;;  %s337_s9 = sand.u32 1, %s7462_s25   ;;  %s5735_s19 = sshll.u32 %s7482_s30, 2  ;;  %v7505_v0 = vmov 0   ;;  %vm343_vm0 = vcmask 1040384  }
  0x8c   : > { %s7792_s18 = sshll.u32 %s337_s9, 5  ;;  %397 = vst [vmem:[#allocation2 + $0x4] sm:$0xf] %v7505_v0  ;;  %400 = vst [vmem:[#allocation2 + $0x10] sm:$0xf] %v7505_v0  ;;  %p409_p4 = scmp.gt.s32.totalorder %s7482_s30, 0 }
  0x8d   : > { %404 = vst [vmem:[#allocation2 + $0x4c] sm:$0xf] %v7505_v0  ;;  %407 = vst [vmem:[#allocation2 + $0x58] sm:$0xf] %v7505_v0  ;;  %vm344_vm1 = vsmask.f32 256 }
  0x8e   : > { %p410_p3 = scmp.lt.s32.totalorder %s7482_s30, 3  ;;  %vm370_vm2 = vsmask.f32 7938  ;;  %vm7801_vm3 = vmand %vm343_vm0, %vm344_vm1  ;;  %v346_v3 = vld [vmem:[#allocation2] sm:$0x1]  ;;  %s7843_s16 = scalar_lea.vmem [#allocation9], %s7792_s18 }
  0x8f   : > { %vm7806_vm4 = vmand %vm343_vm0, %vm370_vm2  ;;  %v349_v4 = vld [vmem:[#allocation2 + $0xc] sm:$0x1]  ;;  %v364_v5 = vld [vmem:[#allocation2 + $0x48] sm:$0x1]  ;;  %v347_v6 = vsel %vm7801_vm3, 0, %v346_v3 }
  0x90   : > { %p7796_p7 = pnand %p410_p3, %p409_p4  ;;  %v350_v7 = vsel %vm7801_vm3, 0, %v349_v4  ;;  %v365_v8 = vsel %vm7801_vm3, 0, %v364_v5  ;;  %v367_v9 = vld [vmem:[#allocation2 + $0x54] sm:$0x1]  ;;  %348 = vst [vmem:[#allocation2] sm:$0x1] %v347_v6 }
  0x91   : > { %351 = vst [vmem:[#allocation2 + $0xc] sm:$0x1] %v350_v7  ;;  %366 = vst [vmem:[#allocation2 + $0x48] sm:$0x1] %v365_v8  ;;  %v368_v10 = vsel %vm7801_vm3, 0, %v367_v9  ;;  %s5736_s15 = sadd.s32 (!%p7796_p7), 4294967294, %s5735_s19 }
  0x92   : > { %v372_v11 = vld [vmem:[#allocation2 + $0x8] sm:$0x1]  ;;  %v375_v12 = vld [vmem:[#allocation2 + $0x14] sm:$0x1]  ;;  %369 = vst [vmem:[#allocation2 + $0x54] sm:$0x1] %v368_v10 }
  0x93   : > { %v373_v13 = vsel %vm7806_vm4, 0, %v372_v11  ;;  %v376_v14 = vsel %vm7806_vm4, 0, %v375_v12  ;;  %v390_v15 = vld [vmem:[#allocation2 + $0x50] sm:$0x1]  ;;  %v393_v16 = vld [vmem:[#allocation2 + $0x5c] sm:$0x1] }
  0x94   : > { %396 = vst [vmem:[#allocation2] sm:$0xf] %v7505_v0  ;;  %399 = vst [vmem:[#allocation2 + $0xc] sm:$0xf] %v7505_v0  ;;  %v391_v17 = vsel %vm7806_vm4, 0, %v390_v15  ;;  %v394_v18 = vsel %vm7806_vm4, 0, %v393_v16 }
  0x95   : > { %403 = vst [vmem:[#allocation2 + $0x48] sm:$0xf] %v7505_v0  ;;  %374 = vst [vmem:[#allocation2 + $0x8] sm:$0x1] %v373_v13  ;;  %v352_v19 = vld [vmem:[#allocation2 + $0x18] sm:$0x1] }
  0x96   : > { %377 = vst [vmem:[#allocation2 + $0x14] sm:$0x1] %v376_v14  ;;  %v355_v20 = vld [vmem:[#allocation2 + $0x24] sm:$0x1]  ;;  %406 = vst [vmem:[#allocation2 + $0x54] sm:$0xf] %v7505_v0 }
  0x97   : > { %392 = vst [vmem:[#allocation2 + $0x50] sm:$0x1] %v391_v17  ;;  %395 = vst [vmem:[#allocation2 + $0x5c] sm:$0x1] %v394_v18  ;;  %v353_v21 = vsel %vm7801_vm3, 0, %v352_v19  ;;  %v356_v22 = vsel %vm7801_vm3, 0, %v355_v20 }
  0x98   : > { %v358_v23 = vld [vmem:[#allocation2 + $0x30] sm:$0x1]  ;;  %v361_v24 = vld [vmem:[#allocation2 + $0x3c] sm:$0x1]  ;;  %398 = vst [vmem:[#allocation2 + $0x8] sm:$0x1] %v7505_v0 }
  0x99   : > { %401 = vst [vmem:[#allocation2 + $0x14] sm:$0x1] %v7505_v0  ;;  %354 = vst [vmem:[#allocation2 + $0x18] sm:$0x1] %v353_v21  ;;  %v359_v25 = vsel %vm7801_vm3, 0, %v358_v23  ;;  %v362_v26 = vsel %vm7801_vm3, 0, %v361_v24 }
  0x9a   : > { %357 = vst [vmem:[#allocation2 + $0x24] sm:$0x1] %v356_v22  ;;  %v378_v27 = vld [vmem:[#allocation2 + $0x20] sm:$0x1]  ;;  %v381_v28 = vld [vmem:[#allocation2 + $0x2c] sm:$0x1] }
  0x9b   : > { %405 = vst [vmem:[#allocation2 + $0x50] sm:$0x1] %v7505_v0  ;;  %408 = vst [vmem:[#allocation2 + $0x5c] sm:$0x1] %v7505_v0  ;;  %v379_v29 = vsel %vm7806_vm4, 0, %v378_v27  ;;  %v382_v30 = vsel %vm7806_vm4, 0, %v381_v28 }
  0x9c   : > { %360 = vst [vmem:[#allocation2 + $0x30] sm:$0x1] %v359_v25  ;;  %363 = vst [vmem:[#allocation2 + $0x3c] sm:$0x1] %v362_v26  ;;  %v384_v31 = vld [vmem:[#allocation2 + $0x38] sm:$0x1] }
  0x9d   : > { %v387_v32 = vld [vmem:[#allocation2 + $0x44] sm:$0x1]  ;;  %380 = vst [vmem:[#allocation2 + $0x20] sm:$0x1] %v379_v29  ;;  %383 = vst [vmem:[#allocation2 + $0x2c] sm:$0x1] %v382_v30 }
  0x9e   : > { %v385_v33 = vsel %vm7806_vm4, 0, %v384_v31  ;;  %v388_v34 = vsel %vm7806_vm4, 0, %v387_v32  ;;  %414 = sbr.rel (%p7796_p7) target bundleno = 194 (0xc2), region = 64  ;;  %s6053_s13 = sshll.u32 (!%p7796_p7), %s5736_s15, 3  ;;  %vm597_vm5 = vcmask (!%p7796_p7), 1043456  }
  0x9f   : > { %386 = vst [vmem:[#allocation2 + $0x38] sm:$0x1] %v385_v33  ;;  %389 = vst [vmem:[#allocation2 + $0x44] sm:$0x1] %v388_v34  ;;  %s7850_s27 = scalar_lea.vmem (!%p7796_p7), %s7778_s23, %s6053_s13 [#allocation3]  ;;  %vm435_vm6 = vsmask.f32 (!%p7796_p7), 4368 }
  0xa0   : > { %v419_v35 = vld [vmem:[%s7850_s27] sm:$0xf] (!%p7796_p7)  ;;  %v420_v36 = vld [vmem:[%s7850_s27 + $0x4] sm:$0xf] (!%p7796_p7)  ;;  %v421_v37 = vld [vmem:[%s7850_s27 + $0x8] sm:$0xf] (!%p7796_p7) }
  0xa1   : > { %v438_v38 = vshrl.u32 (!%p7796_p7), %v419_v35, 16  ;;  %v441_v39 = vshll.u32 (!%p7796_p7), %v419_v35, 16  ;;  %v446_v40 = vshrl.u32 (!%p7796_p7), %v420_v36, 16  ;;  %v449_v41 = vshll.u32 (!%p7796_p7), %v420_v36, 16  ;;  %v422_v42 = vld [vmem:[%s7850_s27 + $0xc] sm:$0xf] (!%p7796_p7)  ;;  %vm7859_vm7 = vmand (!%p7796_p7), %vm597_vm5, %vm370_vm2 }
  0xa2   : > { %v599_v43 = vld [vmem:[#allocation2] sm:$0xf] (!%p7796_p7)  ;;  %v455_v44 = vshrl.u32 (!%p7796_p7), %v421_v37, 16  ;;  %v458_v45 = vshll.u32 (!%p7796_p7), %v421_v37, 16  ;;  %v463_v46 = vshrl.u32 (!%p7796_p7), %v422_v42, 16  ;;  %v466_v47 = vshll.u32 (!%p7796_p7), %v422_v42, 16  ;;  %vm7866_vm8 = vmor (!%p7796_p7), %vm344_vm1, %vm435_vm6 }
  0xa3   : > { %v423_v48 = vld [vmem:[%s7850_s27 + $0x10] sm:$0xf] (!%p7796_p7)  ;;  %v440_v49 = vrot.slane (!%p7796_p7), %v438_v38, 7  ;;  %v448_v51 = vrot.slane (!%p7796_p7), %v446_v40, 7  ;;  %v424_v54 = vld [vmem:[%s7850_s27 + $0x14] sm:$0xf] (!%p7796_p7) }
  0xa4   : > { %v472_v52 = vshrl.u32 (!%p7796_p7), %v423_v48, 16  ;;  %v475_v53 = vshll.u32 (!%p7796_p7), %v423_v48, 16  ;;  %v603_v56 = vld [vmem:[#allocation2 + $0x8] sm:$0x1] (!%p7796_p7)  ;;  %v457_v57 = vrot.slane (!%p7796_p7), %v455_v44, 7  ;;  %v465_v58 = vrot.slane (!%p7796_p7), %v463_v46, 7 }
  0xa5   : > { %v480_v59 = vshrl.u32 %v424_v54, 16  ;;  %v483_v60 = vshll.u32 %v424_v54, 16  ;;  %v443_v61 = vor.u32 %v441_v39, %v440_v49  ;;  %v444_v62 = vrot.slane %v440_v49, 4  ;;  %v606_v2 = vld [vmem:[#allocation2 + $0xc] sm:$0xf] }
  0xa6   : > { %v451_v63 = vor.u32 %v449_v41, %v448_v51  ;;  %v453_v0 = vrot.slane %v448_v51, 4  ;;  %v610_v3 = vld [vmem:[#allocation2 + $0x14] sm:$0x1]  ;;  %v460_v4 = vor.u32 %v458_v45, %v457_v57  ;;  %v461_v5 = vrot.slane %v457_v57, 4  ;;  %v425_v8 = vld [vmem:[%s7850_s27 + $0x18] sm:$0xf] }
  0xa7   : > { %v468_v6 = vor.u32 %v466_v47, %v465_v58  ;;  %v470_v7 = vrot.slane %v465_v58, 4  ;;  %v600_v9 = vsel %vm7859_vm7, %v443_v61, %v599_v43  ;;  %v474_v12 = vrot.slane %v472_v52, 7  ;;  %v613_v13 = vld [vmem:[#allocation2 + $0x18] sm:$0xf]  ;;  %v426_v14 = vld [vmem:[%s7850_s27 + $0x1c] sm:$0xf] }
  0xa8   : > { %v452_v10 = vsel %vm7866_vm8, %v444_v62, %v451_v63  ;;  %v604_v11 = vsel %vm7801_vm3, %v453_v0, %v603_v56  ;;  %601 = vst [vmem:[#allocation2] sm:$0xf] %v600_v9  ;;  %v607_v15 = vsel %vm7859_vm7, %v460_v4, %v606_v2  ;;  %v482_v18 = vrot.slane %v480_v59, 7  ;;  %v617_v19 = vld [vmem:[#allocation2 + $0x20] sm:$0x1] }
  0xa9   : > { %602 = vst [vmem:[#allocation2 + $0x4] sm:$0xf] %v452_v10  ;;  %605 = vst [vmem:[#allocation2 + $0x8] sm:$0x1] %v604_v11  ;;  %v469_v16 = vsel %vm7866_vm8, %v461_v5, %v468_v6  ;;  %v611_v17 = vsel %vm7801_vm3, %v470_v7, %v610_v3  ;;  %v427_v20 = vld [vmem:[%s7850_s27 + $0x20] sm:$0xf]  ;;  %v477_v21 = vor.u32 %v475_v53, %v474_v12 }
  0xaa   : > { %608 = vst [vmem:[#allocation2 + $0xc] sm:$0xf] %v607_v15  ;;  %609 = vst [vmem:[#allocation2 + $0x10] sm:$0xf] %v469_v16  ;;  %v478_v22 = vrot.slane %v474_v12, 4  ;;  %v489_v23 = vshrl.u32 %v425_v8, 16  ;;  %v485_v26 = vor.u32 %v483_v60, %v482_v18 }
  0xab   : > { %612 = vst [vmem:[#allocation2 + $0x14] sm:$0x1] %v611_v17  ;;  %v492_v24 = vshll.u32 %v425_v8, 16  ;;  %v428_v25 = vld [vmem:[%s7850_s27 + $0x24] sm:$0xf]  ;;  %v487_v27 = vrot.slane %v482_v18, 4  ;;  %v614_v30 = vsel %vm7859_vm7, %v477_v21, %v613_v13 }
  0xac   : > { %v497_v28 = vshrl.u32 %v426_v14, 16  ;;  %v500_v29 = vshll.u32 %v426_v14, 16  ;;  %v491_v31 = vrot.slane %v489_v23, 7  ;;  %v506_v32 = vshrl.u32 %v427_v20, 16  ;;  %v429_v34 = vld [vmem:[%s7850_s27 + $0x28] sm:$0xf] }
  0xad   : > { %v509_v33 = vshll.u32 %v427_v20, 16  ;;  %615 = vst [vmem:[#allocation2 + $0x18] sm:$0xf] %v614_v30  ;;  %v486_v35 = vsel %vm7866_vm8, %v478_v22, %v485_v26  ;;  %v618_v36 = vsel %vm7801_vm3, %v487_v27, %v617_v19  ;;  %v620_v37 = vld [vmem:[#allocation2 + $0x24] sm:$0xf]  ;;  %v514_v40 = vshrl.u32 %v428_v25, 16 }
  0xae   : > { %v499_v38 = vrot.slane %v497_v28, 7  ;;  %v624_v39 = vld [vmem:[#allocation2 + $0x2c] sm:$0x1]  ;;  %616 = vst [vmem:[#allocation2 + $0x1c] sm:$0xf] %v486_v35  ;;  %v494_v41 = vor.u32 %v492_v24, %v491_v31  ;;  %v495_v42 = vrot.slane %v491_v31, 4 }
  0xaf   : > { %619 = vst [vmem:[#allocation2 + $0x20] sm:$0x1] %v618_v36  ;;  %v508_v43 = vrot.slane %v506_v32, 7  ;;  %v627_v44 = vld [vmem:[#allocation2 + $0x30] sm:$0xf]  ;;  %v517_v45 = vshll.u32 %v428_v25, 16 }
  0xb0   : > { %v502_v46 = vor.u32 %v500_v29, %v499_v38  ;;  %v504_v47 = vrot.slane %v499_v38, 4  ;;  %v516_v48 = vrot.slane %v514_v40, 7  ;;  %v523_v49 = vshrl.u32 %v429_v34, 16  ;;  %v430_v51 = vld [vmem:[%s7850_s27 + $0x2c] sm:$0xf] }
  0xb1   : > { %v621_v52 = vsel %vm7859_vm7, %v494_v41, %v620_v37  ;;  %v511_v53 = vor.u32 %v509_v33, %v508_v43  ;;  %v512_v54 = vrot.slane %v508_v43, 4  ;;  %v631_v56 = vld [vmem:[#allocation2 + $0x38] sm:$0x1]  ;;  %v526_v57 = vshll.u32 %v429_v34, 16  ;;  %v431_v58 = vld [vmem:[%s7850_s27 + $0x30] sm:$0xf] }
  0xb2   : > { %622 = vst [vmem:[#allocation2 + $0x24] sm:$0xf] %v621_v52  ;;  %v503_v59 = vsel %vm7866_vm8, %v495_v42, %v502_v46  ;;  %v625_v60 = vsel %vm7801_vm3, %v504_v47, %v624_v39  ;;  %v519_v61 = vor.u32 %v517_v45, %v516_v48  ;;  %v521_v62 = vrot.slane %v516_v48, 4  ;;  %v432_v63 = vld [vmem:[%s7850_s27 + $0x34] sm:$0xf] }
  0xb3   : > { %623 = vst [vmem:[#allocation2 + $0x28] sm:$0xf] %v503_v59  ;;  %626 = vst [vmem:[#allocation2 + $0x2c] sm:$0x1] %v625_v60  ;;  %v628_v0 = vsel %vm7859_vm7, %v511_v53, %v627_v44  ;;  %v525_v2 = vrot.slane %v523_v49, 7  ;;  %v531_v3 = vshrl.u32 %v430_v51, 16 }
  0xb4   : > { %v534_v4 = vshll.u32 %v430_v51, 16  ;;  %v433_v5 = vld [vmem:[%s7850_s27 + $0x38] sm:$0xf]  ;;  %629 = vst [vmem:[#allocation2 + $0x30] sm:$0xf] %v628_v0  ;;  %v520_v6 = vsel %vm7866_vm8, %v512_v54, %v519_v61  ;;  %v632_v7 = vsel %vm7801_vm3, %v521_v62, %v631_v56  ;;  %v540_v9 = vshrl.u32 %v431_v58, 16 }
  0xb5   : > { %v634_v8 = vld [vmem:[#allocation2 + $0x3c] sm:$0xf]  ;;  %v543_v10 = vshll.u32 %v431_v58, 16  ;;  %630 = vst [vmem:[#allocation2 + $0x34] sm:$0xf] %v520_v6  ;;  %v528_v11 = vor.u32 %v526_v57, %v525_v2  ;;  %v529_v12 = vrot.slane %v525_v2, 4 }
  0xb6   : > { %633 = vst [vmem:[#allocation2 + $0x38] sm:$0x1] %v632_v7  ;;  %v533_v13 = vrot.slane %v531_v3, 7  ;;  %v548_v14 = vshrl.u32 %v432_v63, 16  ;;  %v434_v15 = vld [vmem:[%s7850_s27 + $0x3c] sm:$0xf] }
  0xb7   : > { %v638_v16 = vld [vmem:[#allocation2 + $0x44] sm:$0x1]  ;;  %v542_v17 = vrot.slane %v540_v9, 7  ;;  %v551_v18 = vshll.u32 %v432_v63, 16  ;;  %v557_v19 = vshrl.u32 %v433_v5, 16  ;;  %v560_v20 = vshll.u32 %v433_v5, 16 }
  0xb8   : > { %v635_v21 = vsel %vm7859_vm7, %v528_v11, %v634_v8  ;;  %v536_v22 = vor.u32 %v534_v4, %v533_v13  ;;  %v538_v23 = vrot.slane %v533_v13, 4  ;;  %v641_v24 = vld [vmem:[#allocation2 + $0x48] sm:$0xf]  ;;  %v550_v25 = vrot.slane %v548_v14, 7  ;;  %v645_v28 = vld [vmem:[#allocation2 + $0x50] sm:$0x1] }
  0xb9   : > { %636 = vst [vmem:[#allocation2 + $0x3c] sm:$0xf] %v635_v21  ;;  %v545_v26 = vor.u32 %v543_v10, %v542_v17  ;;  %v546_v27 = vrot.slane %v542_v17, 4  ;;  %v559_v29 = vrot.slane %v557_v19, 7  ;;  %v565_v30 = vshrl.u32 %v434_v15, 16 }
  0xba   : > { %v537_v31 = vsel %vm7866_vm8, %v529_v12, %v536_v22  ;;  %v639_v32 = vsel %vm7801_vm3, %v538_v23, %v638_v16  ;;  %v553_v33 = vor.u32 %v551_v18, %v550_v25  ;;  %v555_v34 = vrot.slane %v550_v25, 4  ;;  %v648_v35 = vld [vmem:[#allocation2 + $0x54] sm:$0xf]  ;;  %v652_v43 = vld [vmem:[#allocation2 + $0x5c] sm:$0x1] }
  0xbb   : > { %637 = vst [vmem:[#allocation2 + $0x40] sm:$0xf] %v537_v31  ;;  %640 = vst [vmem:[#allocation2 + $0x44] sm:$0x1] %v639_v32  ;;  %v642_v36 = vsel %vm7859_vm7, %v545_v26, %v641_v24  ;;  %v562_v37 = vor.u32 %v560_v20, %v559_v29  ;;  %v567_v38 = vrot.slane %v565_v30, 7  ;;  %v563_v41 = vrot.slane %v559_v29, 4 }
  0xbc   : > { %643 = vst [vmem:[#allocation2 + $0x48] sm:$0xf] %v642_v36  ;;  %v554_v39 = vsel %vm7866_vm8, %v546_v27, %v553_v33  ;;  %v646_v40 = vsel %vm7801_vm3, %v555_v34, %v645_v28  ;;  %v568_v42 = vshll.u32 %v434_v15, 16 }
  0xbd   : > { %644 = vst [vmem:[#allocation2 + $0x4c] sm:$0xf] %v554_v39  ;;  %647 = vst [vmem:[#allocation2 + $0x50] sm:$0x1] %v646_v40  ;;  %v649_v44 = vsel %vm7859_vm7, %v562_v37, %v648_v35  ;;  %v572_v45 = vrot.slane %v567_v38, 4 }
  0xbe   : > { %650 = vst [vmem:[#allocation2 + $0x54] sm:$0xf] %v649_v44  ;;  %v570_v46 = vor.u32 %v568_v42, %v567_v38 }
  0xbf   : > { %v653_v47 = vsel %vm7801_vm3, %v572_v45, %v652_v43 }
  0xc0   : > { %v571_v48 = vsel %vm7866_vm8, %v563_v41, %v570_v46  ;;  %654 = vst [vmem:[#allocation2 + $0x5c] sm:$0x1] %v653_v47 }
  0xc1   : > { %651 = vst [vmem:[#allocation2 + $0x58] sm:$0xf] %v571_v48 }
  0xc2 PF: > { %p5739_p13 = scmp.ne.s32.totalorder %s7482_s30, 0 }
  0xc3   : > { %v659_v50 = vld [vmem:[%s7778_s23] sm:$0xf] (!%p5739_p13)  ;;  %vm794_vm9 = vcmask (!%p5739_p13), 1043456   ;;  %v660_v52 = vld [vmem:[%s7778_s23 + $0x4] sm:$0xf] (!%p5739_p13) }
  0xc4   : > { %658 = sbr.rel (%p5739_p13) target bundleno = 224 (0xe0), region = 68  ;;  %v674_v49 = vshrl.u32 (!%p5739_p13), %v659_v50, 16  ;;  %v677_v51 = vshll.u32 (!%p5739_p13), %v659_v50, 16  ;;  %vm671_vm10 = vsmask.f32 (!%p5739_p13), 4368  ;;  %v682_v55 = vshrl.u32 (!%p5739_p13), %v660_v52, 16  ;;  %vm7935_vm11 = vmand (!%p5739_p13), %vm794_vm9, %vm370_vm2 }
  0xc5   : > { %v685_v53 = vshll.u32 (!%p5739_p13), %v660_v52, 16  ;;  %v661_v54 = vld [vmem:[%s7778_s23 + $0x8] sm:$0xf] (!%p5739_p13)  ;;  %v796_v57 = vld [vmem:[#allocation2 + $0x18] sm:$0xf] (!%p5739_p13)  ;;  %vm7941_vm12 = vmor (!%p5739_p13), %vm344_vm1, %vm671_vm10 }
  0xc6   : > { %v676_v56 = vrot.slane (!%p5739_p13), %v674_v49, 7  ;;  %v691_v58 = vshrl.u32 (!%p5739_p13), %v661_v54, 16  ;;  %v694_v59 = vshll.u32 (!%p5739_p13), %v661_v54, 16  ;;  %v684_v61 = vrot.slane (!%p5739_p13), %v682_v55, 7  ;;  %v800_v62 = vld [vmem:[#allocation2 + $0x20] sm:$0x1] (!%p5739_p13) }
  0xc7   : > { %v662_v63 = vld [vmem:[%s7778_s23 + $0xc] sm:$0xf] (!%p5739_p13)  ;;  %v663_v6 = vld [vmem:[%s7778_s23 + $0x10] sm:$0xf] (!%p5739_p13)  ;;  %v803_v9 = vld [vmem:[#allocation2 + $0x24] sm:$0xf] (!%p5739_p13) }
  0xc8   : > { %v679_v0 = vor.u32 (!%p5739_p13), %v677_v51, %v676_v56  ;;  %v680_v3 = vrot.slane (!%p5739_p13), %v676_v56, 4  ;;  %v693_v4 = vrot.slane (!%p5739_p13), %v691_v58, 7  ;;  %v699_v5 = vshrl.u32 (!%p5739_p13), %v662_v63, 16  ;;  %v664_v16 = vld [vmem:[%s7778_s23 + $0x14] sm:$0xf] (!%p5739_p13) }
  0xc9   : > { %v687_v7 = vor.u32 (!%p5739_p13), %v685_v53, %v684_v61  ;;  %v689_v8 = vrot.slane (!%p5739_p13), %v684_v61, 4  ;;  %v702_v10 = vshll.u32 (!%p5739_p13), %v662_v63, 16  ;;  %v708_v11 = vshrl.u32 (!%p5739_p13), %v663_v6, 16  ;;  %v807_v19 = vld [vmem:[#allocation2 + $0x2c] sm:$0x1] (!%p5739_p13) }
  0xca   : > { %v797_v12 = vsel (!%p5739_p13), %vm7935_vm11, %v679_v0, %v796_v57  ;;  %v696_v13 = vor.u32 (!%p5739_p13), %v694_v59, %v693_v4  ;;  %v697_v14 = vrot.slane (!%p5739_p13), %v693_v4, 4  ;;  %v701_v15 = vrot.slane (!%p5739_p13), %v699_v5, 7  ;;  %v665_v22 = vld [vmem:[%s7778_s23 + $0x18] sm:$0xf] (!%p5739_p13)  ;;  %v810_v26 = vld [vmem:[#allocation2 + $0x30] sm:$0xf] (!%p5739_p13) }
  0xcb   : > { %798 = vst [vmem:[#allocation2 + $0x18] sm:$0xf] %v797_v12  ;;  %v688_v17 = vsel %vm7941_vm12, %v680_v3, %v687_v7  ;;  %v801_v18 = vsel %vm7801_vm3, %v689_v8, %v800_v62  ;;  %v710_v20 = vrot.slane %v708_v11, 7  ;;  %v711_v21 = vshll.u32 %v663_v6, 16  ;;  %v666_v28 = vld [vmem:[%s7778_s23 + $0x1c] sm:$0xf] }
  0xcc   : > { %799 = vst [vmem:[#allocation2 + $0x1c] sm:$0xf] %v688_v17  ;;  %802 = vst [vmem:[#allocation2 + $0x20] sm:$0x1] %v801_v18  ;;  %v804_v23 = vsel %vm7935_vm11, %v696_v13, %v803_v9  ;;  %v704_v24 = vor.u32 %v702_v10, %v701_v15  ;;  %v706_v25 = vrot.slane %v701_v15, 4  ;;  %v716_v27 = vshrl.u32 %v664_v16, 16 }
  0xcd   : > { %805 = vst [vmem:[#allocation2 + $0x24] sm:$0xf] %v804_v23  ;;  %v713_v29 = vor.u32 %v711_v21, %v710_v20  ;;  %v714_v30 = vrot.slane %v710_v20, 4  ;;  %v719_v31 = vshll.u32 %v664_v16, 16  ;;  %v725_v32 = vshrl.u32 %v665_v22, 16 }
  0xce   : > { %v667_v33 = vld [vmem:[%s7778_s23 + $0x20] sm:$0xf]  ;;  %v705_v34 = vsel %vm7941_vm12, %v697_v14, %v704_v24  ;;  %v808_v35 = vsel %vm7801_vm3, %v706_v25, %v807_v19  ;;  %v718_v36 = vrot.slane %v716_v27, 7  ;;  %v728_v37 = vshll.u32 %v665_v22, 16  ;;  %v668_v38 = vld [vmem:[%s7778_s23 + $0x24] sm:$0xf] }
  0xcf   : > { %806 = vst [vmem:[#allocation2 + $0x28] sm:$0xf] %v705_v34  ;;  %809 = vst [vmem:[#allocation2 + $0x2c] sm:$0x1] %v808_v35  ;;  %v811_v39 = vsel %vm7935_vm11, %v713_v29, %v810_v26  ;;  %v814_v40 = vld [vmem:[#allocation2 + $0x38] sm:$0x1] }
  0xd0   : > { %v727_v41 = vrot.slane %v725_v32, 7  ;;  %v733_v42 = vshrl.u32 %v666_v28, 16  ;;  %v736_v43 = vshll.u32 %v666_v28, 16  ;;  %812 = vst [vmem:[#allocation2 + $0x30] sm:$0xf] %v811_v39  ;;  %v721_v44 = vor.u32 %v719_v31, %v718_v36 }
  0xd1   : > { %v723_v45 = vrot.slane %v718_v36, 4  ;;  %v817_v46 = vld [vmem:[#allocation2 + $0x3c] sm:$0xf]  ;;  %v742_v47 = vshrl.u32 %v667_v33, 16  ;;  %v745_v48 = vshll.u32 %v667_v33, 16  ;;  %v750_v52 = vshrl.u32 %v668_v38, 16 }
  0xd2   : > { %v730_v50 = vor.u32 %v728_v37, %v727_v41  ;;  %v731_v49 = vrot.slane %v727_v41, 4  ;;  %v735_v51 = vrot.slane %v733_v42, 7  ;;  %v669_v55 = vld [vmem:[%s7778_s23 + $0x28] sm:$0xf]  ;;  %v722_v53 = vsel %vm7941_vm12, %v714_v30, %v721_v44  ;;  %v821_v56 = vld [vmem:[#allocation2 + $0x44] sm:$0x1] }
  0xd3   : > { %v815_v54 = vsel %vm7801_vm3, %v723_v45, %v814_v40  ;;  %v744_v57 = vrot.slane %v742_v47, 7  ;;  %v753_v58 = vshll.u32 %v668_v38, 16  ;;  %813 = vst [vmem:[#allocation2 + $0x34] sm:$0xf] %v722_v53  ;;  %v824_v63 = vld [vmem:[#allocation2 + $0x48] sm:$0xf] }
  0xd4   : > { %816 = vst [vmem:[#allocation2 + $0x38] sm:$0x1] %v815_v54  ;;  %v818_v59 = vsel %vm7935_vm11, %v730_v50, %v817_v46  ;;  %v738_v61 = vor.u32 %v736_v43, %v735_v51  ;;  %v740_v62 = vrot.slane %v735_v51, 4  ;;  %v752_v0 = vrot.slane %v750_v52, 7  ;;  %v670_v3 = vld [vmem:[%s7778_s23 + $0x2c] sm:$0xf] }
  0xd5   : > { %819 = vst [vmem:[#allocation2 + $0x3c] sm:$0xf] %v818_v59  ;;  %v747_v4 = vor.u32 %v745_v48, %v744_v57  ;;  %v748_v5 = vrot.slane %v744_v57, 4  ;;  %v828_v6 = vld [vmem:[#allocation2 + $0x50] sm:$0x1]  ;;  %v759_v7 = vshrl.u32 %v669_v55, 16 }
  0xd6   : > { %v762_v8 = vshll.u32 %v669_v55, 16  ;;  %v739_v9 = vsel %vm7941_vm12, %v731_v49, %v738_v61  ;;  %v822_v10 = vsel %vm7801_vm3, %v740_v62, %v821_v56  ;;  %v755_v11 = vor.u32 %v753_v58, %v752_v0  ;;  %v831_v19 = vld [vmem:[#allocation2 + $0x54] sm:$0xf]  ;;  %v835_v23 = vld [vmem:[#allocation2 + $0x5c] sm:$0x1] }
  0xd7   : > { %v757_v12 = vrot.slane %v752_v0, 4  ;;  %820 = vst [vmem:[#allocation2 + $0x40] sm:$0xf] %v739_v9  ;;  %823 = vst [vmem:[#allocation2 + $0x44] sm:$0x1] %v822_v10  ;;  %v825_v13 = vsel %vm7935_vm11, %v747_v4, %v824_v63  ;;  %v761_v14 = vrot.slane %v759_v7, 7 }
  0xd8   : > { %v767_v15 = vshrl.u32 %v670_v3, 16  ;;  %v770_v16 = vshll.u32 %v670_v3, 16  ;;  %826 = vst [vmem:[#allocation2 + $0x48] sm:$0xf] %v825_v13  ;;  %v756_v17 = vsel %vm7941_vm12, %v748_v5, %v755_v11 }
  0xd9   : > { %v829_v18 = vsel %vm7801_vm3, %v757_v12, %v828_v6  ;;  %827 = vst [vmem:[#allocation2 + $0x4c] sm:$0xf] %v756_v17  ;;  %v764_v20 = vor.u32 %v762_v8, %v761_v14  ;;  %v765_v21 = vrot.slane %v761_v14, 4 }
  0xda   : > { %830 = vst [vmem:[#allocation2 + $0x50] sm:$0x1] %v829_v18  ;;  %v769_v22 = vrot.slane %v767_v15, 7 }
  0xdb   : > { %v832_v24 = vsel %vm7935_vm11, %v764_v20, %v831_v19 }
  0xdc   : > { %v772_v25 = vor.u32 %v770_v16, %v769_v22  ;;  %v774_v26 = vrot.slane %v769_v22, 4  ;;  %833 = vst [vmem:[#allocation2 + $0x54] sm:$0xf] %v832_v24 }
  0xde   : > { %v773_v27 = vsel %vm7941_vm12, %v765_v21, %v772_v25  ;;  %v836_v28 = vsel %vm7801_vm3, %v774_v26, %v835_v23 }
  0xdf   : > { %834 = vst [vmem:[#allocation2 + $0x58] sm:$0xf] %v773_v27  ;;  %837 = vst [vmem:[#allocation2 + $0x5c] sm:$0x1] %v836_v28 }
  0xe0 PF: > { %p5740_p9 = scmp.ne.s32.totalorder %s7482_s30, 3 }
  0xe1   : > { %v5741_v60 = vld [vmem:[%s7778_s23 + $0x50] sm:$0xf] (!%p5740_p9)  ;;  %vm977_vm13 = vcmask (!%p5740_p9), 1043456   ;;  %v5742_v2 = vld [vmem:[%s7778_s23 + $0x54] sm:$0xf] (!%p5740_p9) }
  0xe2   : > { %841 = sbr.rel (%p5740_p9) target bundleno = 254 (0xfe), region = 72  ;;  %v858_v29 = vshrl.u32 (!%p5740_p9), %v5741_v60, 16  ;;  %v861_v30 = vshll.u32 (!%p5740_p9), %v5741_v60, 16  ;;  %vm855_vm14 = vsmask.f32 (!%p5740_p9), 4368  ;;  %v866_v31 = vshrl.u32 (!%p5740_p9), %v5742_v2, 16  ;;  %vm7996_vm15 = vmand (!%p5740_p9), %vm977_vm13, %vm370_vm2 }
  0xe3   : > { %v869_v32 = vshll.u32 (!%p5740_p9), %v5742_v2, 16  ;;  %v5743_v33 = vld [vmem:[%s7778_s23 + $0x58] sm:$0xf] (!%p5740_p9)  ;;  %v979_v35 = vld [vmem:[#allocation2] sm:$0xf] (!%p5740_p9)  ;;  %vm8002_vm0 = vmor (!%p5740_p9), %vm344_vm1, %vm855_vm14 }
  0xe4   : > { %v860_v34 = vrot.slane (!%p5740_p9), %v858_v29, 7  ;;  %v875_v36 = vshrl.u32 (!%p5740_p9), %v5743_v33, 16  ;;  %v878_v37 = vshll.u32 (!%p5740_p9), %v5743_v33, 16  ;;  %v868_v39 = vrot.slane (!%p5740_p9), %v866_v31, 7  ;;  %v983_v40 = vld [vmem:[#allocation2 + $0x8] sm:$0x1] (!%p5740_p9) }
  0xe5   : > { %v5744_v41 = vld [vmem:[%s7778_s23 + $0x5c] sm:$0xf] (!%p5740_p9)  ;;  %v5745_v47 = vld [vmem:[%s7778_s23 + $0x60] sm:$0xf] (!%p5740_p9)  ;;  %v986_v49 = vld [vmem:[#allocation2 + $0xc] sm:$0xf] (!%p5740_p9) }
  0xe6   : > { %v863_v42 = vor.u32 (!%p5740_p9), %v861_v30, %v860_v34  ;;  %v864_v44 = vrot.slane (!%p5740_p9), %v860_v34, 4  ;;  %v877_v45 = vrot.slane (!%p5740_p9), %v875_v36, 7  ;;  %v883_v46 = vshrl.u32 (!%p5740_p9), %v5744_v41, 16  ;;  %v5746_v57 = vld [vmem:[%s7778_s23 + $0x64] sm:$0xf] (!%p5740_p9) }
  0xe7   : > { %v871_v48 = vor.u32 (!%p5740_p9), %v869_v32, %v868_v39  ;;  %v873_v50 = vrot.slane (!%p5740_p9), %v868_v39, 4  ;;  %v886_v51 = vshll.u32 (!%p5740_p9), %v5744_v41, 16  ;;  %v892_v52 = vshrl.u32 (!%p5740_p9), %v5745_v47, 16  ;;  %v990_v61 = vld [vmem:[#allocation2 + $0x14] sm:$0x1] (!%p5740_p9) }
  0xe8   : > { %v980_v55 = vsel (!%p5740_p9), %vm7996_vm15, %v863_v42, %v979_v35  ;;  %v880_v53 = vor.u32 (!%p5740_p9), %v878_v37, %v877_v45  ;;  %v881_v54 = vrot.slane (!%p5740_p9), %v877_v45, 4  ;;  %v885_v56 = vrot.slane (!%p5740_p9), %v883_v46, 7  ;;  %v5747_v0 = vld [vmem:[%s7778_s23 + $0x68] sm:$0xf] (!%p5740_p9)  ;;  %v993_v6 = vld [vmem:[#allocation2 + $0x18] sm:$0xf] (!%p5740_p9) }
  0xe9   : > { %981 = vst [vmem:[#allocation2] sm:$0xf] %v980_v55  ;;  %v872_v58 = vsel %vm8002_vm0, %v864_v44, %v871_v48  ;;  %v984_v59 = vsel %vm7801_vm3, %v873_v50, %v983_v40  ;;  %v894_v62 = vrot.slane %v892_v52, 7  ;;  %v895_v63 = vshll.u32 %v5745_v47, 16  ;;  %v5748_v8 = vld [vmem:[%s7778_s23 + $0x6c] sm:$0xf] }
  0xea   : > { %982 = vst [vmem:[#allocation2 + $0x4] sm:$0xf] %v872_v58  ;;  %985 = vst [vmem:[#allocation2 + $0x8] sm:$0x1] %v984_v59  ;;  %v987_v3 = vsel %vm7996_vm15, %v880_v53, %v986_v49  ;;  %v888_v4 = vor.u32 %v886_v51, %v885_v56  ;;  %v890_v5 = vrot.slane %v885_v56, 4  ;;  %v900_v7 = vshrl.u32 %v5746_v57, 16 }
  0xeb   : > { %988 = vst [vmem:[#allocation2 + $0xc] sm:$0xf] %v987_v3  ;;  %v897_v9 = vor.u32 %v895_v63, %v894_v62  ;;  %v898_v10 = vrot.slane %v894_v62, 4  ;;  %v903_v11 = vshll.u32 %v5746_v57, 16  ;;  %v909_v12 = vshrl.u32 %v5747_v0, 16 }
  0xec   : > { %v5749_v13 = vld [vmem:[%s7778_s23 + $0x70] sm:$0xf]  ;;  %v889_v14 = vsel %vm8002_vm0, %v881_v54, %v888_v4  ;;  %v991_v15 = vsel %vm7801_vm3, %v890_v5, %v990_v61  ;;  %v902_v16 = vrot.slane %v900_v7, 7  ;;  %v912_v17 = vshll.u32 %v5747_v0, 16  ;;  %v5750_v18 = vld [vmem:[%s7778_s23 + $0x74] sm:$0xf] }
  0xed   : > { %989 = vst [vmem:[#allocation2 + $0x10] sm:$0xf] %v889_v14  ;;  %992 = vst [vmem:[#allocation2 + $0x14] sm:$0x1] %v991_v15  ;;  %v994_v19 = vsel %vm7996_vm15, %v897_v9, %v993_v6  ;;  %v997_v20 = vld [vmem:[#allocation2 + $0x20] sm:$0x1] }
  0xee   : > { %v911_v21 = vrot.slane %v909_v12, 7  ;;  %v917_v22 = vshrl.u32 %v5748_v8, 16  ;;  %v920_v23 = vshll.u32 %v5748_v8, 16  ;;  %995 = vst [vmem:[#allocation2 + $0x18] sm:$0xf] %v994_v19  ;;  %v905_v24 = vor.u32 %v903_v11, %v902_v16 }
  0xef   : > { %v907_v25 = vrot.slane %v902_v16, 4  ;;  %v1000_v26 = vld [vmem:[#allocation2 + $0x24] sm:$0xf]  ;;  %v926_v27 = vshrl.u32 %v5749_v13, 16  ;;  %v929_v28 = vshll.u32 %v5749_v13, 16  ;;  %v934_v2 = vshrl.u32 %v5750_v18, 16 }
  0xf0   : > { %v914_v60 = vor.u32 %v912_v17, %v911_v21  ;;  %v915_v29 = vrot.slane %v911_v21, 4  ;;  %v919_v30 = vrot.slane %v917_v22, 7  ;;  %v5751_v31 = vld [vmem:[%s7778_s23 + $0x78] sm:$0xf]  ;;  %v906_v32 = vsel %vm8002_vm0, %v898_v10, %v905_v24  ;;  %v1004_v34 = vld [vmem:[#allocation2 + $0x2c] sm:$0x1] }
  0xf1   : > { %v998_v33 = vsel %vm7801_vm3, %v907_v25, %v997_v20  ;;  %v928_v35 = vrot.slane %v926_v27, 7  ;;  %v937_v36 = vshll.u32 %v5750_v18, 16  ;;  %996 = vst [vmem:[#allocation2 + $0x1c] sm:$0xf] %v906_v32  ;;  %v1007_v41 = vld [vmem:[#allocation2 + $0x30] sm:$0xf] }
  0xf2   : > { %999 = vst [vmem:[#allocation2 + $0x20] sm:$0x1] %v998_v33  ;;  %v1001_v37 = vsel %vm7996_vm15, %v914_v60, %v1000_v26  ;;  %v922_v39 = vor.u32 %v920_v23, %v919_v30  ;;  %v924_v40 = vrot.slane %v919_v30, 4  ;;  %v936_v42 = vrot.slane %v934_v2, 7  ;;  %v5752_v44 = vld [vmem:[%s7778_s23 + $0x7c] sm:$0xf] }
  0xf3   : > { %1002 = vst [vmem:[#allocation2 + $0x24] sm:$0xf] %v1001_v37  ;;  %v931_v45 = vor.u32 %v929_v28, %v928_v35  ;;  %v932_v46 = vrot.slane %v928_v35, 4  ;;  %v1011_v47 = vld [vmem:[#allocation2 + $0x38] sm:$0x1]  ;;  %v943_v48 = vshrl.u32 %v5751_v31, 16 }
  0xf4   : > { %v946_v50 = vshll.u32 %v5751_v31, 16  ;;  %v923_v49 = vsel %vm8002_vm0, %v915_v29, %v922_v39  ;;  %v1005_v51 = vsel %vm7801_vm3, %v924_v40, %v1004_v34  ;;  %v939_v52 = vor.u32 %v937_v36, %v936_v42  ;;  %v1014_v61 = vld [vmem:[#allocation2 + $0x3c] sm:$0xf]  ;;  %v1018_v3 = vld [vmem:[#allocation2 + $0x44] sm:$0x1] }
  0xf5   : > { %v941_v55 = vrot.slane %v936_v42, 4  ;;  %1003 = vst [vmem:[#allocation2 + $0x28] sm:$0xf] %v923_v49  ;;  %1006 = vst [vmem:[#allocation2 + $0x2c] sm:$0x1] %v1005_v51  ;;  %v1008_v53 = vsel %vm7996_vm15, %v931_v45, %v1007_v41  ;;  %v945_v54 = vrot.slane %v943_v48, 7 }
  0xf6   : > { %v951_v56 = vshrl.u32 %v5752_v44, 16  ;;  %v954_v57 = vshll.u32 %v5752_v44, 16  ;;  %1009 = vst [vmem:[#allocation2 + $0x30] sm:$0xf] %v1008_v53  ;;  %v940_v58 = vsel %vm8002_vm0, %v932_v46, %v939_v52 }
  0xf7   : > { %v1012_v59 = vsel %vm7801_vm3, %v941_v55, %v1011_v47  ;;  %1010 = vst [vmem:[#allocation2 + $0x34] sm:$0xf] %v940_v58  ;;  %v948_v62 = vor.u32 %v946_v50, %v945_v54  ;;  %v949_v63 = vrot.slane %v945_v54, 4 }
  0xf8   : > { %1013 = vst [vmem:[#allocation2 + $0x38] sm:$0x1] %v1012_v59  ;;  %v953_v0 = vrot.slane %v951_v56, 7 }
  0xf9   : > { %v1015_v4 = vsel %vm7996_vm15, %v948_v62, %v1014_v61 }
  0xfa   : > { %v956_v5 = vor.u32 %v954_v57, %v953_v0  ;;  %v958_v6 = vrot.slane %v953_v0, 4  ;;  %1016 = vst [vmem:[#allocation2 + $0x3c] sm:$0xf] %v1015_v4 }
  0xfc   : > { %v957_v7 = vsel %vm8002_vm0, %v949_v63, %v956_v5  ;;  %v1019_v8 = vsel %vm7801_vm3, %v958_v6, %v1018_v3 }
  0xfd   : > { %1017 = vst [vmem:[#allocation2 + $0x40] sm:$0xf] %v957_v7  ;;  %1020 = vst [vmem:[#allocation2 + $0x44] sm:$0x1] %v1019_v8 }
  0xfe PF: > { %v7111_v9 = vld [vmem:[#allocation6 + $0x40] sm:$0xff]   ;;  %v7112_v10 = vld [vmem:[#allocation6 + $0x48] sm:$0xff]   ;;  %v7113_v11 = vld [vmem:[#allocation6 + $0x50] sm:$0xff]   ;;  %vm1055_vm4 = vsmask.f32 3328  ;;  %vm1554_vm7 = vcmask 1042432  }
  0xff   : > { %6353 = vmatprep.subr.bf16.mxu0 %v7111_v9  ;;  %v7114_v38 = vld [vmem:[#allocation6 + $0x58] sm:$0xff]   ;;  %v8052_v13 = vld [vmem:[#allocation2 + $0x4] sm:$0xf]  ;;  %v8054_v43 = vld [vmem:[#allocation2 + $0x8] sm:$0x1]  ;;  %vm1555_vm8 = vcmask 1046532  }
 0x100   : > { %6354 = vmatpush3.bf16.msra.mxu0 %v7111_v9  ;;  %vm1056_vm5 = vsmask.f32 7440  ;;  %v1068_v16 = vshll.u32 %v8052_v13, 16  ;;  %v1072_v17 = vshrl.u32 %v8052_v13, 16  ;;  %v1078_v18 = vshll.u32 %v8054_v43, 16  ;;  %v7115_v22 = vld [vmem:[#allocation6 + $0x60] sm:$0xff]   ;;  %vm8158_vm9 = vmor %vm1554_vm7, %vm1555_vm8 }
 0x101   : > { %6355 = vmatprep.subr.bf16.mxu0 %v7112_v10  ;;  %v8061_v21 = vld [vmem:[#allocation2 + $0xc] sm:$0xf]  ;;  %v8063_v25 = vld [vmem:[#allocation2 + $0x10] sm:$0xf]  ;;  %v8066_v28 = vld [vmem:[#allocation2 + $0x14] sm:$0x1] }
 0x102   : > { %v1070_v23 = vrot.slane %v1068_v16, 5  ;;  %v1074_v24 = vrot.slane %v1072_v17, 4  ;;  %v1083_v26 = vshrl.u32 %v8061_v21, 16  ;;  %v1086_v60 = vshll.u32 %v8061_v21, 16  ;;  %vm8073_vm6 = vmor %vm1055_vm4, %vm1056_vm5  ;;  %v7116_v40 = vld [vmem:[#allocation6 + $0x68] sm:$0xff]   ;;  %v7117_v51 = vld [vmem:[#allocation6 + $0x70] sm:$0xff]  }
 0x103   : > { %v1092_v29 = vshll.u32 %v8063_v25, 16  ;;  %v1096_v30 = vshrl.u32 %v8063_v25, 16  ;;  %v1080_v32 = vrot.slane %v1078_v18, 5  ;;  %v1102_v34 = vshll.u32 %v8066_v28, 16  ;;  %v8082_v48 = vld [vmem:[#allocation2 + $0x18] sm:$0xf] }
 0x104   : > { %6356 = vmatpush3.bf16.msra.mxu0 %v7112_v10  ;;  %v1075_v31 = vor.u32 %v1074_v24, %v1070_v23  ;;  %v1085_v33 = vrot.slane %v1083_v26, 4  ;;  %v1088_v36 = vrot.slane %v1086_v60, 5  ;;  %v8084_v50 = vld [vmem:[#allocation2 + $0x1c] sm:$0xf]  ;;  %v8086_v49 = vld [vmem:[#allocation2 + $0x20] sm:$0x1] }
 0x105   : > { %6357 = vmatprep.subr.bf16.mxu0 %v7113_v11  ;;  %v8050_v12 = vld [vmem:[#allocation2] sm:$0xf]  ;;  %v1094_v37 = vrot.slane %v1092_v29, 5  ;;  %v1098_v39 = vrot.slane %v1096_v30, 4  ;;  %v1104_v46 = vrot.slane %v1102_v34, 5  ;;  %v1107_v54 = vshrl.u32 %v8082_v48, 16 }
 0x106   : > { %v1059_v14 = vshrl.u32 %v8050_v12, 16  ;;  %v1062_v15 = vshll.u32 %v8050_v12, 16  ;;  %v1076_v41 = vrot.slane %v1075_v31, 4  ;;  %v1089_v44 = vor.u32 %v1088_v36, %v1085_v33  ;;  %v8095_v63 = vld [vmem:[#allocation2 + $0x24] sm:$0xf]  ;;  %v7118_v3 = vld [vmem:[#allocation6 + $0x78] sm:$0xff]  }
 0x107   : > { %v1099_v45 = vor.u32 %v1098_v39, %v1094_v37  ;;  %v1110_v56 = vshll.u32 %v8082_v48, 16  ;;  %v1116_v57 = vshll.u32 %v8084_v50, 16  ;;  %v1120_v58 = vshrl.u32 %v8084_v50, 16  ;;  %v8097_v0 = vld [vmem:[#allocation2 + $0x28] sm:$0xf] }
 0x108   : > { %6358 = vmatpush3.bf16.msra.mxu0 %v7113_v11  ;;  %v1061_v19 = vrot.slane %v1059_v14, 4  ;;  %v1064_v20 = vrot.slane %v1062_v15, 5  ;;  %v1081_v47 = vsel %vm8073_vm6, %v1076_v41, %v1080_v32  ;;  %v1090_v55 = vrot.slane %v1089_v44, 4  ;;  %v8101_v8 = vld [vmem:[#allocation2 + $0x2c] sm:$0x1] }
 0x109   : > { %6359 = vmatprep.subr.bf16.mxu0 %v7114_v38  ;;  %v1100_v53 = vrot.slane %v1099_v45, 4  ;;  %v1126_v59 = vshll.u32 %v8086_v49, 16  ;;  %v1109_v62 = vrot.slane %v1107_v54, 4  ;;  %v1112_v5 = vrot.slane %v1110_v56, 5  ;;  %v8108_v18 = vld [vmem:[#allocation2 + $0x30] sm:$0xf] }
 0x10a   : > { %v1065_v27 = vor.u32 %v1064_v20, %v1061_v19  ;;  %v1095_v61 = vsel %vm8073_vm6, %v1090_v55, %v1094_v37  ;;  %v1118_v6 = vrot.slane %v1116_v57, 5  ;;  %v1122_v7 = vrot.slane %v1120_v58, 4  ;;  %v8113_v30 = vld [vmem:[#allocation2 + $0x38] sm:$0x1]  ;;  %v8122_v41 = vld [vmem:[#allocation2 + $0x3c] sm:$0xf] }
 0x10b   : > { %v1105_v4 = vsel %vm8073_vm6, %v1100_v53, %v1104_v46  ;;  %v1128_v9 = vrot.slane %v1126_v59, 5  ;;  %v1131_v10 = vshrl.u32 %v8095_v63, 16  ;;  %v1134_v11 = vshll.u32 %v8095_v63, 16  ;;  %v8127_v54 = vld [vmem:[#allocation2 + $0x44] sm:$0x1] }
 0x10c   : > { %6360 = vmatpush3.bf16.msra.mxu0 %v7114_v38  ;;  %v1066_v35 = vrot.slane %v1065_v27, 4  ;;  %v1140_v38 = vshll.u32 %v8097_v0, 16  ;;  %v1113_v14 = vor.u32 %v1112_v5, %v1109_v62  ;;  %v1123_v15 = vor.u32 %v1122_v7, %v1118_v6 }
 0x10d   : > { %6361 = vmatprep.subr.bf16.mxu0 %v7115_v22  ;;  %v1144_v16 = vshrl.u32 %v8097_v0, 16  ;;  %v1150_v17 = vshll.u32 %v8101_v8, 16  ;;  %v1133_v19 = vrot.slane %v1131_v10, 4  ;;  %v1136_v20 = vrot.slane %v1134_v11, 5 }
 0x10e   : > { %v1071_v42 = vsel %vm8073_vm6, %v1066_v35, %v1070_v23  ;;  %v8110_v23 = vld [vmem:[#allocation2 + $0x34] sm:$0xf]  ;;  %v1155_v24 = vshrl.u32 %v8108_v18, 16  ;;  %v5754_v26 = vcombine.low %v1095_v61, %v1105_v4  ;;  %v1114_v27 = vrot.slane %v1113_v14, 4  ;;  %v7119_v35 = vld [vmem:[#allocation6] sm:$0xff]  }
 0x10f   : > { %v5753_v52 = vcombine.low %v1071_v42, %v1081_v47  ;;  %v1124_v60 = vrot.slane %v1123_v15, 4  ;;  %v1146_v29 = vrot.slane %v1144_v16, 4  ;;  %v1137_v31 = vor.u32 %v1136_v20, %v1133_v19  ;;  %v8124_v47 = vld [vmem:[#allocation2 + $0x40] sm:$0xf]  ;;  %v7121_v16 = vld [vmem:[#allocation6 + $0x10] sm:$0xff]  }
 0x110   : > { %6362 = vmatpush3.bf16.msra.mxu0 %v7115_v22  ;;  %v1142_v22 = vrot.slane %v1140_v38, 5  ;;  %v1157_v32 = vrot.slane %v1155_v24, 4  ;;  %v1158_v33 = vshll.u32 %v8108_v18, 16  ;;  %v1164_v34 = vshll.u32 %v8110_v23, 16 }
 0x111   : > { %6363 = vmatprep.subr.bf16.mxu0 %v7116_v40  ;;  %6369 = vmatprep.mubr.bf16.mxu0 %v5753_v52  ;;  %v1119_v36 = vsel %vm8073_vm6, %v1114_v27, %v1118_v6  ;;  %v1129_v37 = vsel %vm8073_vm6, %v1124_v60, %v1128_v9  ;;  %v1138_v42 = vrot.slane %v1137_v31, 4  ;;  %v1152_v44 = vrot.slane %v1150_v17, 5 }
 0x112   : > { %v1147_v39 = vor.u32 %v1146_v29, %v1142_v22  ;;  %v1160_v45 = vrot.slane %v1158_v33, 5  ;;  %v1166_v46 = vrot.slane %v1164_v34, 5  ;;  %v1174_v53 = vshll.u32 %v8113_v30, 16  ;;  %v7123_v34 = vld [vmem:[#allocation6 + $0x20] sm:$0xff]  }
 0x113   : > { %v1179_v56 = vshrl.u32 %v8122_v41, 16  ;;  %v5755_v57 = vcombine.low %v1119_v36, %v1129_v37  ;;  %v1182_v59 = vshll.u32 %v8122_v41, 16  ;;  %v1188_v61 = vshll.u32 %v8124_v47, 16  ;;  %v7124_v37 = vld [vmem:[#allocation6 + $0x28] sm:$0xff]  }
 0x114   : > { %6364 = vmatpush3.bf16.msra.mxu0 %v7116_v40  ;;  %v1168_v40 = vshrl.u32 %v8110_v23, 16  ;;  %v1148_v52 = vrot.slane %v1147_v39, 4  ;;  %v1161_v58 = vor.u32 %v1160_v45, %v1157_v32  ;;  %v1176_v4 = vrot.slane %v1174_v53, 5  ;;  %v7125_v39 = vld [vmem:[#allocation6 + $0x30] sm:$0xff]   ;;  %v7130_v45 = vld [vmem:[#allocation6 + $0x88] sm:$0xff]  }
 0x115   : > { %6365 = vmatprep.subr.bf16.mxu0 %v7117_v51  ;;  %v1181_v5 = vrot.slane %v1179_v56, 4  ;;  %v1184_v7 = vrot.slane %v1182_v59, 5  ;;  %v1190_v10 = vrot.slane %v1188_v61, 5  ;;  %v1192_v11 = vshrl.u32 %v8124_v47, 16  ;;  %v7136_v61 = vld [vmem:[#allocation6 + $0xa8] sm:$0xff]  }
 0x116   : > { %v1170_v55 = vrot.slane %v1168_v40, 4  ;;  %v1162_v6 = vrot.slane %v1161_v58, 4  ;;  %v1198_v38 = vshll.u32 %v8127_v54, 16  ;;  %v1153_v14 = vsel %vm8073_vm6, %v1148_v52, %v1152_v44  ;;  %v7126_v40 = vld [vmem:[#allocation6 + $0x38] sm:$0xff]   ;;  %v1536_v52 = vld [vmem:[#allocation2] sm:$0xe] }
 0x117   : > { %v1185_v15 = vor.u32 %v1184_v7, %v1181_v5  ;;  %v1194_v20 = vrot.slane %v1192_v11, 4  ;;  %v5767_v36 = vcombine.low %v8050_v12, %v8052_v13  ;;  %v5768_v44 = vcombine.low %v8061_v21, %v8063_v25  ;;  %v7138_v5 = vld [vmem:[#allocation6 + $0xb0] sm:$0xff]   ;;  %v1538_v7 = vld [vmem:[#allocation2 + $0x18] sm:$0xe] }
 0x118   : > { %6366 = vmatpush3.bf16.msra.mxu0 %v7117_v51  ;;  %v7120_v51 = vld [vmem:[#allocation6 + $0x8] sm:$0xff]   ;;  %v1171_v62 = vor.u32 %v1170_v55, %v1166_v46  ;;  %v1167_v17 = vsel %vm8073_vm6, %v1162_v6, %v1166_v46  ;;  %v1200_v29 = vrot.slane %v1198_v38, 5  ;;  %v5769_v12 = vcombine.low %v8082_v48, %v8084_v50  ;;  %v7131_v46 = vld [vmem:[#allocation6 + $0x90] sm:$0xff]   ;;  %v7132_v48 = vld [vmem:[#allocation6 + $0x98] sm:$0xff]  }
 0x119   : > { %6367 = vmatprep.subr.bf16.mxu0 %v7118_v3  ;;  %v1186_v60 = vrot.slane %v1185_v15, 4  ;;  %v5770_v55 = vcombine.low %v8095_v63, %v8097_v0  ;;  %v5771_v21 = vcombine.low %v8108_v18, %v8110_v23  ;;  %v5781_v53 = vrot.slane %v1536_v52, 9  ;;  %v7146_v52 = vld [vmem:[#allocation6 + $0xe8] sm:$0xff]  }
 0x11a   : > { %v1172_v9 = vrot.slane %v1171_v62, 4  ;;  %v5772_v59 = vcombine.low %v8122_v41, %v8124_v47  ;;  %v1537_v62 = vld [vmem:[#allocation2 + $0xc] sm:$0xe]  ;;  %v1573_v6 = vrot.slane %v8084_v50, 5  ;;  %v1576_v38 = vrot.slane %v8086_v49, 5 }
 0x11b   : > { %v1191_v32 = vsel %vm8073_vm6, %v1186_v60, %v1190_v10  ;;  %v5782_v41 = vrot.slane %v1537_v62, 9  ;;  %v1539_v50 = vld [vmem:[#allocation2 + $0x24] sm:$0xe]  ;;  %vm3580_vm10 = vcmask 1043456   ;;  %vm3458_vm11 = vsmask.f32 4368 }
 0x11c   : > { %6368 = vmatpush3.bf16.msra.mxu0 %v7118_v3  ;;  %v1143_v3 = vsel %vm8073_vm6, %v1138_v42, %v1142_v22  ;;  %v1177_v19 = vsel %vm8073_vm6, %v1172_v9, %v1176_v4  ;;  %v7122_v22 = vld [vmem:[#allocation6 + $0x18] sm:$0xff]   ;;  %v7128_v42 = vld [vmem:[#allocation6 + $0x80] sm:$0xff]   ;;  %v1566_v4 = vrot.slane %v8063_v25, 5  ;;  %v1569_v9 = vrot.slane %v8066_v28, 5  ;;  %vm8445_vm12 = vmand %vm3580_vm10, %vm370_vm2 }
 0x11d   : > { %6381 = vmatprep.subr.bf16.mxu0 %v7119_v35  ;;  %v5756_v24 = vcombine.low %v1143_v3, %v1153_v14  ;;  %v5757_v27 = vcombine.low %v1167_v17, %v1177_v19  ;;  %v5783_v3 = vrot.slane %v1538_v7, 9  ;;  %v1575_v14 = vrot.slane %v1573_v6, 4  ;;  %v7141_v28 = vld [vmem:[#allocation6 + $0xc0] sm:$0xff]   ;;  %v8202_v7 = vld [vmem:[#allocation2 + $0x14] sm:$0x1]  ;;  %vm8452_vm13 = vmor %vm344_vm1, %vm3458_vm11 }
 0x11e   : > { %v1568_v11 = vrot.slane %v1566_v4, 4  ;;  %v1567_v25 = vsel %vm8158_vm9, %v5782_v41, %v1566_v4  ;;  %v1587_v19 = vrot.slane %v8110_v23, 5  ;;  %v5784_v60 = vrot.slane %v1539_v50, 9 }
 0x11f   : > { %6370 = vmatmul.mubr.bf16.vlgmr.msra.gmra.mrb[0].mxu0 %v5754_v26  ;;  %v1195_v26 = vor.u32 %v1194_v20, %v1190_v10  ;;  %v7140_v10 = vld [vmem:[#allocation6 + $0xb8] sm:$0xff]   ;;  %v1574_v17 = vsel %vm8158_vm9, %v5783_v3, %v1573_v6  ;;  %v1577_v49 = vsel %vm8158_vm9, %v1575_v14, %v1576_v38  ;;  %v1540_v20 = vld [vmem:[#allocation2 + $0x30] sm:$0xe] }
 0x120   : > { %6382 = vmatpush3.bf16.msra.mxu0 %v7119_v35  ;;  %6373 = vmatprep.mubr.bf16.mxu0 %v5755_v57  ;;  %v1562_v57 = vrot.slane %v8054_v43, 5  ;;  %v1570_v15 = vsel %vm8158_vm9, %v1568_v11, %v1569_v9  ;;  %v7153_v9 = vld [vmem:[#allocation6 + $0x110] sm:$0xff]   ;;  %v2024_v11 = vshll.u32 %v8202_v7, 16  ;;  %v1989_v38 = vld [vmem:[#allocation2 + $0x18] sm:$0xf] }
 0x121   : > { %6383 = vmatprep.subr.bf16.mxu0 %v7120_v51  ;;  %v1196_v31 = vrot.slane %v1195_v26, 4  ;;  %v1583_v26 = vrot.slane %v8101_v8, 5  ;;  %v7157_v3 = vld [vmem:[#allocation2 + $0x30] sm:$0xff]   ;;  %v8205_v14 = vld [vmem:[#allocation2 + $0x1c] sm:$0xf]  ;;  %v2029_v50 = vshrl.u32 %v1989_v38, 16 }
 0x123   : > { %v1201_v33 = vsel %vm8073_vm6, %v1196_v31, %v1200_v29  ;;  %v1589_v31 = vrot.slane %v1587_v19, 4 }
 0x124   : > { %6384 = vmatpush3.bf16.msra.mxu0 %v7120_v51  ;;  %v5758_v35 = vcombine.low %v1191_v32, %v1201_v33  ;;  %v1559_v51 = vrot.slane %v8052_v13, 5  ;;  %v7134_v13 = vld [vmem:[#allocation6 + $0xa0] sm:$0xff]   ;;  %v1590_v32 = vrot.slane %v8113_v30, 5  ;;  %v7143_v33 = vld [vmem:[#allocation6 + $0xd0] sm:$0xff]   ;;  %v1541_v30 = vld [vmem:[#allocation2 + $0x3c] sm:$0xe] }
 0x125   : > { %6385 = vmatprep.subr.bf16.mxu0 %v7121_v16 }
 0x126   : > { %v1561_v56 = vrot.slane %v1559_v51, 4  ;;  %v1560_v63 = vsel %vm8158_vm9, %v5781_v53, %v1559_v51  ;;  %v8198_v53 = vld [vmem:[#allocation2 + $0x10] sm:$0xf] }
 0x127   : > { %6374 = vmatmul.mubr.bf16.gmra.mrb[4].mxu0 %v5756_v24  ;;  %v5788_v24 = vcombine.low %v1567_v25, %v1570_v15  ;;  %v1992_v25 = vld [vmem:[#allocation2 + $0x24] sm:$0xf]  ;;  %v7159_v15 = vld [vmem:[#allocation2 + $0x3c] sm:$0xff]  }
 0x128   : > { %6386 = vmatpush3.bf16.msra.mxu0 %v7121_v16  ;;  %6377 = vmatprep.mubr.bf16.mxu0 %v5757_v27  ;;  %v1563_v18 = vsel %vm8158_vm9, %v1561_v56, %v1562_v57  ;;  %v1580_v16 = vrot.slane %v8097_v0, 5  ;;  %v5789_v27 = vcombine.low %v1574_v17, %v1577_v49  ;;  %v7142_v0 = vld [vmem:[#allocation6 + $0xc8] sm:$0xff]   ;;  %v7150_v56 = vld [vmem:[#allocation6 + $0x100] sm:$0xff]   ;;  %v7154_v17 = vld [vmem:[#allocation6 + $0x118] sm:$0xff]  }
 0x129   : > { %6387 = vmatprep.subr.bf16.mxu0 %v7122_v22  ;;  %v5787_v43 = vcombine.low %v1560_v63, %v1563_v18  ;;  %v2014_v63 = vshll.u32 %v8198_v53, 16  ;;  %v2018_v18 = vshrl.u32 %v8198_v53, 16 }
 0x12a   : > { %v1582_v29 = vrot.slane %v1580_v16, 4  ;;  %v1581_v23 = vsel %vm8158_vm9, %v5784_v60, %v1580_v16  ;;  %v2032_v16 = vshll.u32 %v1989_v38, 16  ;;  %v2056_v60 = vshll.u32 %v1992_v25, 16 }
 0x12b   : > { %v2020_v6 = vrot.slane %v2018_v18, 4 }
 0x12c   : > { %6388 = vmatpush3.bf16.msra.mxu0 %v7122_v22  ;;  %v5785_v22 = vrot.slane %v1540_v20, 9  ;;  %v1584_v8 = vsel %vm8158_vm9, %v1582_v29, %v1583_v26  ;;  %v2026_v20 = vrot.slane %v2024_v11, 5  ;;  %v2042_v26 = vshrl.u32 %v8205_v14, 16 }
 0x12d   : > { %6389 = vmatprep.subr.bf16.mxu0 %v7123_v34 }
 0x12f   : > { %6378 = vmatmul.mubr.bf16.gmra.mrb[8].mxu0 %v5758_v35  ;;  %v1588_v35 = vsel %vm8158_vm9, %v5785_v22, %v1587_v19  ;;  %v2031_v22 = vrot.slane %v2029_v50, 4 }
 0x130   : > { %6390 = vmatpush3.bf16.msra.mxu0 %v7123_v34  ;;  %6397 = vmatprep.mubr.bf16.mxu0 %v5767_v36  ;;  %v1594_v34 = vrot.slane %v8124_v47, 5  ;;  %v1591_v36 = vsel %vm8158_vm9, %v1589_v31, %v1590_v32  ;;  %v2034_v31 = vrot.slane %v2032_v16, 5  ;;  %v7156_v32 = vld [vmem:[#allocation6 + $0x120] sm:$0xff]   ;;  %v7162_v16 = vld [vmem:[#allocation6 + $0x138] sm:$0xff]  }
 0x131   : > { %6391 = vmatprep.subr.bf16.mxu0 %v7124_v37 }
 0x134   : > { %6392 = vmatpush3.bf16.msra.mxu0 %v7124_v37  ;;  %v5790_v37 = vcombine.low %v1581_v23, %v1584_v8  ;;  %v8217_v8 = vld [vmem:[#allocation2 + $0x20] sm:$0x1] }
 0x135   : > { %6393 = vmatprep.subr.bf16.mxu0 %v7125_v39 }
 0x138   : > { %6394 = vmatpush3.bf16.msra.mxu0 %v7125_v39  ;;  %v1597_v39 = vrot.slane %v8127_v54, 5  ;;  %v7149_v54 = vld [vmem:[#allocation2 + $0xc] sm:$0xff]  }
 0x139   : > { %6395 = vmatprep.subr.bf16.mxu0 %v7126_v40 }
 0x13c   : > { %6396 = vmatpush3.bf16.msra.mxu0 %v7126_v40  ;;  %v5791_v40 = vcombine.low %v1588_v35, %v1591_v36  ;;  %v2044_v36 = vrot.slane %v2042_v26, 4  ;;  %v8239_v26 = vld [vmem:[#allocation2 + $0x4c] sm:$0xf] }
 0x13d   : > { %6409 = vmatprep.subr.bf16.mxu0 %v7128_v42 }
 0x13f   : > { %6398 = vmatmul.mubr.bf16.vlgmr.msra.gmra.mrb[0].mxu0 %v5768_v44  ;;  %v1596_v44 = vrot.slane %v1594_v34, 4 }
 0x140   : > { %6410 = vmatpush3.bf16.msra.mxu0 %v7128_v42  ;;  %6401 = vmatprep.mubr.bf16.mxu0 %v5769_v12  ;;  %v5786_v42 = vrot.slane %v1541_v30, 9  ;;  %v7144_v12 = vld [vmem:[#allocation6 + $0xd8] sm:$0xff]  }
 0x141   : > { %6411 = vmatprep.subr.bf16.mxu0 %v7130_v45 }
 0x142   : > { %v1595_v47 = vsel %vm8158_vm9, %v5786_v42, %v1594_v34  ;;  %v7161_v34 = vld [vmem:[#allocation2 + $0x48] sm:$0xff]  }
 0x144   : > { %6412 = vmatpush3.bf16.msra.mxu0 %v7130_v45  ;;  %v1598_v45 = vsel %vm8158_vm9, %v1596_v44, %v1597_v39  ;;  %v8221_v39 = vld [vmem:[#allocation2 + $0x2c] sm:$0x1]  ;;  %v1995_v44 = vld [vmem:[#allocation2 + $0x30] sm:$0xf] }
 0x145   : > { %6413 = vmatprep.subr.bf16.mxu0 %v7131_v46  ;;  %v5792_v51 = vcombine.low %v1595_v47, %v1598_v45  ;;  %v2035_v47 = vor.u32 %v2034_v31, %v2031_v22  ;;  %v2048_v45 = vshll.u32 %v8217_v8, 16 }
 0x147   : > { %6402 = vmatmul.mubr.bf16.gmra.mrb[4].mxu0 %v5770_v55  ;;  %v7147_v55 = vld [vmem:[#allocation6 + $0xf0] sm:$0xff]  }
 0x148   : > { %6414 = vmatpush3.bf16.msra.mxu0 %v7131_v46  ;;  %6405 = vmatprep.mubr.bf16.mxu0 %v5771_v21  ;;  %v7145_v46 = vld [vmem:[#allocation6 + $0xe0] sm:$0xff]   ;;  %v7148_v21 = vld [vmem:[#allocation6 + $0xf8] sm:$0xff]  }
 0x149   : > { %6415 = vmatprep.subr.bf16.mxu0 %v7132_v48 }
 0x14c   : > { %6416 = vmatpush3.bf16.msra.mxu0 %v7132_v48  ;;  %v1986_v48 = vld [vmem:[#allocation2 + $0xc] sm:$0xf] }
 0x14d   : > { %6417 = vmatprep.subr.bf16.mxu0 %v7134_v13  ;;  %v2005_v57 = vshrl.u32 %v1986_v48, 16 }
 0x14f   : > { %6406 = vmatmul.mubr.bf16.gmra.mrb[8].mxu0 %v5772_v59  ;;  %v7151_v59 = vld [vmem:[#allocation2 + $0x18] sm:$0xff]   ;;  %v2007_v62 = vrot.slane %v2005_v57, 4 }
 0x150   : > { %6418 = vmatpush3.bf16.msra.mxu0 %v7134_v13  ;;  %6425 = vmatprep.mubr.bf16.mxu0 %v5787_v43  ;;  %v2008_v13 = vshll.u32 %v1986_v48, 16  ;;  %v7155_v43 = vld [vmem:[#allocation2 + $0x24] sm:$0xff]   ;;  %v1998_v48 = vld [vmem:[#allocation2 + $0x3c] sm:$0xf] }
 0x151   : > { %6419 = vmatprep.subr.bf16.mxu0 %v7136_v61 }
 0x152   : > { %v2010_v4 = vrot.slane %v2008_v13, 5  ;;  %v2080_v13 = vshll.u32 %v1995_v44, 16 }
 0x154   : > { %6420 = vmatpush3.bf16.msra.mxu0 %v7136_v61  ;;  %v7152_v61 = vld [vmem:[#allocation6 + $0x108] sm:$0xff]  }
 0x155   : > { %6421 = vmatprep.subr.bf16.mxu0 %v7138_v5 }
 0x158   : > { %6422 = vmatpush3.bf16.msra.mxu0 %v7138_v5  ;;  %v2016_v5 = vrot.slane %v2014_v63, 5 }
 0x159   : > { %6423 = vmatprep.subr.bf16.mxu0 %v7140_v10 }
 0x15a   : > { %v2021_v41 = vor.u32 %v2020_v6, %v2016_v5 }
 0x15c   : > { %6424 = vmatpush3.bf16.msra.mxu0 %v7140_v10  ;;  %v2011_v10 = vor.u32 %v2010_v4, %v2007_v62  ;;  %v2022_v19 = vrot.slane %v2021_v41, 4  ;;  %v2101_v62 = vshrl.u32 %v1998_v48, 16  ;;  %v2104_v4 = vshll.u32 %v1998_v48, 16  ;;  %v7164_v48 = vld [vmem:[#allocation6 + $0x148] sm:$0xff]  }
 0x15d   : > { %6437 = vmatprep.subr.bf16.mxu0 %v7141_v28 }
 0x15e   : > { %v2012_v49 = vrot.slane %v2011_v10, 4  ;;  %v2027_v23 = vsel %vm8073_vm6, %v2022_v19, %v2026_v20  ;;  %v2106_v19 = vrot.slane %v2104_v4, 5 }
 0x15f   : > { %6426 = vmatmul.mubr.bf16.vlgmr.msra.gmra.mrb[0].mxu0 %v5788_v24  ;;  %v2038_v24 = vshll.u32 %v8205_v14, 16 }
 0x160   : > { %6438 = vmatpush3.bf16.msra.mxu0 %v7141_v28  ;;  %6429 = vmatprep.mubr.bf16.mxu0 %v5789_v27  ;;  %v8207_v28 = vld [vmem:[#allocation2 + $0x28] sm:$0xf]  ;;  %v2053_v27 = vshrl.u32 %v1992_v25, 16  ;;  %v2082_v25 = vrot.slane %v2080_v13, 5 }
 0x161   : > { %6439 = vmatprep.subr.bf16.mxu0 %v7142_v0  ;;  %v2062_v29 = vshll.u32 %v8207_v28, 16  ;;  %v8219_v35 = vrot.slane %v2038_v24, 5 }
 0x162   : > { %v2055_v30 = vrot.slane %v2053_v27, 4 }
 0x164   : > { %6440 = vmatpush3.bf16.msra.mxu0 %v7142_v0  ;;  %v2066_v0 = vshrl.u32 %v8207_v28, 16 }
 0x165   : > { %6441 = vmatprep.subr.bf16.mxu0 %v7143_v33 }
 0x166   : > { %v2068_v42 = vrot.slane %v2066_v0, 4  ;;  %v8247_v0 = vld [vmem:[#allocation2 + $0x44] sm:$0x1] }
 0x167   : > { %6430 = vmatmul.mubr.bf16.gmra.mrb[4].mxu0 %v5790_v37  ;;  %v2058_v37 = vrot.slane %v2056_v60, 5 }
 0x168   : > { %6442 = vmatpush3.bf16.msra.mxu0 %v7143_v33  ;;  %6433 = vmatprep.mubr.bf16.mxu0 %v5791_v40  ;;  %v2017_v33 = vsel %vm8073_vm6, %v2012_v49, %v2016_v5  ;;  %v8223_v40 = vrot.slane %v2062_v29, 5  ;;  %v2103_v49 = vrot.slane %v2101_v62, 4 }
 0x169   : > { %6443 = vmatprep.subr.bf16.mxu0 %v7144_v12 }
 0x16a   : > { %v2069_v57 = vor.u32 %v2068_v42, %v8223_v40 }
 0x16c   : > { %6444 = vmatpush3.bf16.msra.mxu0 %v7144_v12  ;;  %v5815_v12 = vcombine.low %v2017_v33, %v2027_v23  ;;  %v2070_v38 = vrot.slane %v2069_v57, 4 }
 0x16d   : > { %6445 = vmatprep.subr.bf16.mxu0 %v7145_v46 }
 0x16f   : > { %6434 = vmatmul.mubr.bf16.gmra.mrb[8].mxu0 %v5792_v51  ;;  %v7158_v51 = vld [vmem:[#allocation6 + $0x128] sm:$0xff]  }
 0x170   : > { %6446 = vmatpush3.bf16.msra.mxu0 %v7145_v46  ;;  %6453 = vmatprep.mubr.bf16.mxu0 %v7149_v54  ;;  %v8226_v46 = vld [vmem:[#allocation2 + $0x34] sm:$0xf]  ;;  %v2045_v54 = vor.u32 %v2044_v36, %v8219_v35  ;;  %v2138_v36 = vshrl.u32 %v8239_v26, 16 }
 0x171   : > { %6447 = vmatprep.subr.bf16.mxu0 %v7146_v52  ;;  %v2086_v63 = vshll.u32 %v8226_v46, 16  ;;  %v2090_v18 = vshrl.u32 %v8226_v46, 16 }
 0x173   : > { %v2092_v50 = vrot.slane %v2090_v18, 4  ;;  %v8257_v18 = vld [vmem:[#allocation2 + $0x50] sm:$0x1] }
 0x174   : > { %6448 = vmatpush3.bf16.msra.mxu0 %v7146_v52  ;;  %v2059_v52 = vor.u32 %v2058_v37, %v2055_v30  ;;  %v7163_v30 = vld [vmem:[#allocation6 + $0x140] sm:$0xff]   ;;  %v2107_v37 = vor.u32 %v2106_v19, %v2103_v49  ;;  %v2144_v4 = vshll.u32 %v8257_v18, 16  ;;  %v2358_v19 = vrot.slane %v8202_v7, 5 }
 0x175   : > { %6449 = vmatprep.subr.bf16.mxu0 %v7147_v55 }
 0x176   : > { %v2060_v10 = vrot.slane %v2059_v52, 4  ;;  %v2108_v57 = vrot.slane %v2107_v37, 4  ;;  %v7170_v37 = vld [vmem:[#allocation6 + $0x178] sm:$0xff]  }
 0x178   : > { %6450 = vmatpush3.bf16.msra.mxu0 %v7147_v55  ;;  %v2072_v55 = vshll.u32 %v8221_v39, 16  ;;  %v2065_v22 = vsel %vm8073_vm6, %v2060_v10, %v8223_v40  ;;  %v2355_v10 = vrot.slane %v8198_v53, 5 }
 0x179   : > { %6451 = vmatprep.subr.bf16.mxu0 %v7148_v21 }
 0x17a   : > { %v2074_v41 = vrot.slane %v2072_v55, 5  ;;  %v2357_v49 = vrot.slane %v2355_v10, 4 }
 0x17c   : > { %6452 = vmatpush3.bf16.msra.mxu0 %v7148_v21  ;;  %v2077_v21 = vshrl.u32 %v1995_v44, 16  ;;  %v2075_v31 = vsel %vm8073_vm6, %v2070_v38, %v2074_v41  ;;  %v2120_v44 = vshll.u32 %v8247_v0, 16  ;;  %v2329_v41 = vld [vmem:[#allocation2 + $0xc] sm:$0xe] }
 0x17d   : > { %6465 = vmatprep.subr.bf16.mxu0 %v7150_v56  ;;  %v5817_v40 = vcombine.low %v2065_v22, %v2075_v31  ;;  %v7168_v22 = vld [vmem:[#allocation6 + $0x168] sm:$0xff]   ;;  %v2362_v31 = vrot.slane %v8205_v14, 5 }
 0x17e   : > { %v2079_v11 = vrot.slane %v2077_v21, 4  ;;  %v2140_v21 = vrot.slane %v2138_v36, 4 }
 0x17f   : > { %6454 = vmatmul.mubr.bf16.vlgmr.msra.gmra.mrb[0].mxu0 %v7151_v59  ;;  %v2036_v59 = vrot.slane %v2035_v47, 4  ;;  %v2364_v36 = vrot.slane %v2362_v31, 4 }
 0x180   : > { %6466 = vmatpush3.bf16.msra.mxu0 %v7150_v56  ;;  %6457 = vmatprep.mubr.bf16.mxu0 %v7155_v43  ;;  %v8230_v56 = vld [vmem:[#allocation2 + $0x40] sm:$0xf]  ;;  %v2050_v43 = vrot.slane %v2048_v45, 5 }
 0x181   : > { %6467 = vmatprep.subr.bf16.mxu0 %v7152_v61  ;;  %v2110_v5 = vshll.u32 %v8230_v56, 16  ;;  %v2114_v6 = vshrl.u32 %v8230_v56, 16  ;;  %v2041_v27 = vsel %vm8073_vm6, %v2036_v59, %v8219_v35  ;;  %v2134_v35 = vshll.u32 %v8239_v26, 16 }
 0x183   : > { %v2112_v20 = vrot.slane %v2110_v5, 5  ;;  %v2116_v24 = vrot.slane %v2114_v6, 4  ;;  %v2136_v55 = vrot.slane %v2134_v35, 5  ;;  %v7165_v5 = vld [vmem:[#allocation6 + $0x150] sm:$0xff]  }
 0x184   : > { %6468 = vmatpush3.bf16.msra.mxu0 %v7152_v61  ;;  %v7160_v61 = vld [vmem:[#allocation6 + $0x130] sm:$0xff]  }
 0x185   : > { %6469 = vmatprep.subr.bf16.mxu0 %v7153_v9  ;;  %v2117_v42 = vor.u32 %v2116_v24, %v2112_v20  ;;  %v2141_v62 = vor.u32 %v2140_v21, %v2136_v55  ;;  %v2113_v6 = vsel %vm8073_vm6, %v2108_v57, %v2112_v20  ;;  %v7167_v24 = vld [vmem:[#allocation6 + $0x160] sm:$0xff]  }
 0x187   : > { %6458 = vmatmul.mubr.bf16.gmra.mrb[4].mxu0 %v7157_v3  ;;  %v8237_v3 = vld [vmem:[#allocation2 + $0x38] sm:$0x1]  ;;  %v2118_v13 = vrot.slane %v2117_v42, 4 }
 0x188   : > { %6470 = vmatpush3.bf16.msra.mxu0 %v7153_v9  ;;  %6461 = vmatprep.mubr.bf16.mxu0 %v7159_v15  ;;  %v2046_v9 = vrot.slane %v2045_v54, 4  ;;  %v2088_v15 = vrot.slane %v2086_v63, 5  ;;  %v2096_v29 = vshll.u32 %v8237_v3, 16  ;;  %v2122_v63 = vrot.slane %v2120_v44, 5 }
 0x189   : > { %6471 = vmatprep.subr.bf16.mxu0 %v7154_v17  ;;  %v2379_v57 = vrot.slane %v8237_v3, 5 }
 0x18a   : > { %v2051_v60 = vsel %vm8073_vm6, %v2046_v9, %v2050_v43  ;;  %v2093_v33 = vor.u32 %v2092_v50, %v2088_v15  ;;  %v2123_v9 = vsel %vm8073_vm6, %v2118_v13, %v2122_v63  ;;  %v2146_v50 = vrot.slane %v2144_v4, 5 }
 0x18b   : > { %v5819_v38 = vcombine.low %v2113_v6, %v2123_v9 }
 0x18c   : > { %6472 = vmatpush3.bf16.msra.mxu0 %v7154_v17  ;;  %v2001_v17 = vld [vmem:[#allocation2 + $0x48] sm:$0xf]  ;;  %v2094_v45 = vrot.slane %v2093_v33, 4  ;;  %v2330_v33 = vld [vmem:[#allocation2 + $0x18] sm:$0xe] }
 0x18d   : > { %6473 = vmatprep.subr.bf16.mxu0 %v7156_v32  ;;  %v2125_v23 = vshrl.u32 %v2001_v17, 16  ;;  %v5830_v35 = vrot.slane %v2330_v33, 9 }
 0x18f   : > { %6462 = vmatmul.mubr.bf16.gmra.mrb[8].mxu0 %v7161_v34  ;;  %v2128_v34 = vshll.u32 %v2001_v17, 16  ;;  %v2127_v54 = vrot.slane %v2125_v23, 4  ;;  %v5829_v17 = vrot.slane %v2329_v41, 9  ;;  %v2369_v23 = vrot.slane %v8207_v28, 5 }
 0x190   : > { %6474 = vmatpush3.bf16.msra.mxu0 %v7156_v32  ;;  %6481 = vmatprep.mubr.bf16.mxu0 %v5815_v12  ;;  %v2083_v32 = vor.u32 %v2082_v25, %v2079_v11  ;;  %v5816_v12 = vcombine.low %v2041_v27, %v2051_v60  ;;  %v2359_v60 = vsel %vm8158_vm9, %v2357_v49, %v2358_v19  ;;  %v2376_v28 = vrot.slane %v8226_v46, 5  ;;  %v7172_v46 = vld [vmem:[#allocation6 + $0x188] sm:$0xff]   ;;  %v2782_v49 = vld [vmem:[#allocation2 + $0x18] sm:$0xf]  ;;  %v8308_v19 = vld [vmem:[#allocation2 + $0x1c] sm:$0xf] }
 0x191   : > { %6475 = vmatprep.subr.bf16.mxu0 %v7158_v51  ;;  %v2130_v52 = vrot.slane %v2128_v34, 5  ;;  %v2356_v27 = vsel %vm8158_vm9, %v5829_v17, %v2355_v10  ;;  %v2331_v34 = vld [vmem:[#allocation2 + $0x24] sm:$0xe]  ;;  %v2371_v44 = vrot.slane %v2369_v23, 4  ;;  %v2363_v14 = vsel %vm8158_vm9, %v5830_v35, %v2362_v31  ;;  %v7178_v17 = vld [vmem:[#allocation6 + $0x1b8] sm:$0xff]   ;;  %v7183_v35 = vld [vmem:[#allocation6 + $0x1d0] sm:$0xff]  }
 0x192   : > { %v2084_v47 = vrot.slane %v2083_v32, 4  ;;  %v5835_v7 = vcombine.low %v2356_v27, %v2359_v60  ;;  %v7169_v32 = vld [vmem:[#allocation6 + $0x170] sm:$0xff]   ;;  %v5831_v42 = vrot.slane %v2331_v34, 9  ;;  %v2393_v41 = vrot.slane %v8257_v18, 5  ;;  %v8312_v34 = vld [vmem:[#allocation2 + $0x20] sm:$0x1] }
 0x193   : > { %v7177_v18 = vld [vmem:[#allocation6 + $0x1b0] sm:$0xff]   ;;  %v2810_v27 = vshll.u32 %v8308_v19, 16  ;;  %v2814_v60 = vshrl.u32 %v8308_v19, 16 }
 0x194   : > { %6476 = vmatpush3.bf16.msra.mxu0 %v7158_v51  ;;  %v2098_v51 = vrot.slane %v2096_v29, 5  ;;  %v2089_v59 = vsel %vm8073_vm6, %v2084_v47, %v2088_v15  ;;  %v2142_v15 = vrot.slane %v2141_v62, 4  ;;  %v7171_v47 = vld [vmem:[#allocation6 + $0x180] sm:$0xff]   ;;  %v7173_v62 = vld [vmem:[#allocation6 + $0x190] sm:$0xff]  }
 0x195   : > { %6477 = vmatprep.subr.bf16.mxu0 %v7160_v61  ;;  %v2812_v33 = vrot.slane %v2810_v27, 5 }
 0x196   : > { %v2099_v43 = vsel %vm8073_vm6, %v2094_v45, %v2098_v51  ;;  %v2147_v53 = vsel %vm8073_vm6, %v2142_v15, %v2146_v50  ;;  %v2332_v51 = vld [vmem:[#allocation2 + $0x30] sm:$0xe]  ;;  %v7179_v50 = vld [vmem:[#allocation2 + $0x18] sm:$0xff]  }
 0x197   : > { %v5818_v11 = vcombine.low %v2089_v59, %v2099_v43  ;;  %v5832_v21 = vrot.slane %v2332_v51, 9  ;;  %v2386_v59 = vrot.slane %v8247_v0, 5  ;;  %v2334_v0 = vld [vmem:[#allocation2 + $0x48] sm:$0xe] }
 0x198   : > { %6478 = vmatpush3.bf16.msra.mxu0 %v7160_v61  ;;  %v2131_v61 = vor.u32 %v2130_v52, %v2127_v54  ;;  %v2333_v54 = vld [vmem:[#allocation2 + $0x3c] sm:$0xe]  ;;  %v5834_v9 = vrot.slane %v2334_v0, 9 }
 0x199   : > { %6479 = vmatprep.subr.bf16.mxu0 %v7162_v16  ;;  %v5833_v13 = vrot.slane %v2333_v54, 9  ;;  %v2791_v0 = vld [vmem:[#allocation2 + $0x3c] sm:$0xf] }
 0x19a   : > { %v2132_v25 = vrot.slane %v2131_v61, 4  ;;  %v2390_v61 = vrot.slane %v8239_v26, 5 }
 0x19c   : > { %6480 = vmatpush3.bf16.msra.mxu0 %v7162_v16  ;;  %v7166_v16 = vld [vmem:[#allocation6 + $0x158] sm:$0xff]   ;;  %v2137_v20 = vsel %vm8073_vm6, %v2132_v25, %v2136_v55  ;;  %v2392_v10 = vrot.slane %v2390_v61, 4  ;;  %v2391_v26 = vsel %vm8158_vm9, %v5834_v9, %v2390_v61  ;;  %v7175_v25 = vld [vmem:[#allocation6 + $0x1a0] sm:$0xff]   ;;  %v8327_v61 = vld [vmem:[#allocation2 + $0x2c] sm:$0x1] }
 0x19d   : > { %6493 = vmatprep.subr.bf16.mxu0 %v7163_v30  ;;  %v5820_v29 = vcombine.low %v2137_v20, %v2147_v53  ;;  %v7180_v20 = vld [vmem:[#allocation6 + $0x1c0] sm:$0xff]   ;;  %v2801_v53 = vshrl.u32 %v2782_v49, 16 }
 0x19f   : > { %6482 = vmatmul.mubr.bf16.vlgmr.msra.gmra.mrb[0].mxu0 %v5816_v12  ;;  %v2372_v12 = vrot.slane %v8221_v39, 5  ;;  %v2383_v39 = vrot.slane %v8230_v56, 5  ;;  %v2377_v56 = vsel %vm8158_vm9, %v5832_v21, %v2376_v28  ;;  %v2803_v31 = vrot.slane %v2801_v53, 4 }
 0x1a0   : > { %6494 = vmatpush3.bf16.msra.mxu0 %v7163_v30  ;;  %6485 = vmatprep.mubr.bf16.mxu0 %v5817_v40  ;;  %v2365_v30 = vrot.slane %v8217_v8, 5  ;;  %v2370_v8 = vsel %vm8158_vm9, %v5831_v42, %v2369_v23  ;;  %v2816_v23 = vrot.slane %v2814_v60, 4  ;;  %v2785_v42 = vld [vmem:[#allocation2 + $0x24] sm:$0xf] }
 0x1a1   : > { %6495 = vmatprep.subr.bf16.mxu0 %v7164_v48  ;;  %v2373_v45 = vsel %vm8158_vm9, %v2371_v44, %v2372_v12  ;;  %v2385_v63 = vrot.slane %v2383_v39, 4  ;;  %v2384_v3 = vsel %vm8158_vm9, %v5833_v13, %v2383_v39  ;;  %v7187_v44 = vld [vmem:[#allocation2 + $0x3c] sm:$0xff]   ;;  %v7189_v12 = vld [vmem:[#allocation2 + $0x48] sm:$0xff]  }
 0x1a2   : > { %v2366_v40 = vsel %vm8158_vm9, %v2364_v36, %v2365_v30  ;;  %v5837_v55 = vcombine.low %v2370_v8, %v2373_v45  ;;  %v2817_v30 = vor.u32 %v2816_v23, %v2812_v33  ;;  %v8317_v8 = vld [vmem:[#allocation2 + $0x34] sm:$0xf]  ;;  %v7184_v45 = vld [vmem:[#allocation6 + $0x1d8] sm:$0xff]  }
 0x1a3   : > { %v5836_v52 = vcombine.low %v2363_v14, %v2366_v40  ;;  %v2387_v4 = vsel %vm8158_vm9, %v2385_v63, %v2386_v59  ;;  %v8315_v14 = vld [vmem:[#allocation2 + $0x28] sm:$0xf]  ;;  %v2825_v40 = vshrl.u32 %v2785_v42, 16  ;;  %v7186_v59 = vld [vmem:[#allocation6 + $0x1e0] sm:$0xff]  }
 0x1a4   : > { %6496 = vmatpush3.bf16.msra.mxu0 %v7164_v48  ;;  %v2378_v48 = vrot.slane %v2376_v28, 4  ;;  %v5839_v6 = vcombine.low %v2384_v3, %v2387_v4  ;;  %v2828_v28 = vshll.u32 %v2785_v42, 16  ;;  %v2818_v39 = vrot.slane %v2817_v30, 4 }
 0x1a5   : > { %6497 = vmatprep.subr.bf16.mxu0 %v7165_v5  ;;  %v2827_v13 = vrot.slane %v2825_v40, 4 }
 0x1a6   : > { %v2380_v43 = vsel %vm8158_vm9, %v2378_v48, %v2379_v57  ;;  %v2858_v57 = vshll.u32 %v8317_v8, 16  ;;  %v2830_v63 = vrot.slane %v2828_v28, 5  ;;  %v7192_v28 = vld [vmem:[#allocation6 + $0x1f8] sm:$0xff]  }
 0x1a7   : > { %6486 = vmatmul.mubr.bf16.gmra.mrb[4].mxu0 %v5818_v11  ;;  %v7174_v11 = vld [vmem:[#allocation6 + $0x198] sm:$0xff]  }
 0x1a8   : > { %6498 = vmatpush3.bf16.msra.mxu0 %v7165_v5  ;;  %6489 = vmatprep.mubr.bf16.mxu0 %v5819_v38  ;;  %v5838_v5 = vcombine.low %v2377_v56, %v2380_v43  ;;  %v2394_v38 = vsel %vm8158_vm9, %v2392_v10, %v2393_v41  ;;  %v8331_v9 = vrot.slane %v2858_v57, 5  ;;  %v8333_v41 = vld [vmem:[#allocation2 + $0x40] sm:$0xf] }
 0x1a9   : > { %6499 = vmatprep.subr.bf16.mxu0 %v7166_v16  ;;  %v5840_v15 = vcombine.low %v2391_v26, %v2394_v38  ;;  %v2831_v26 = vor.u32 %v2830_v63, %v2827_v13  ;;  %v2844_v38 = vshll.u32 %v8327_v61, 16  ;;  %v2886_v60 = vshrl.u32 %v8333_v41, 16 }
 0x1ab   : > { %v2888_v40 = vrot.slane %v2886_v60, 4  ;;  %v8370_v60 = vld [vmem:[#allocation2 + $0x5c] sm:$0x1] }
 0x1ac   : > { %6500 = vmatpush3.bf16.msra.mxu0 %v7166_v16  ;;  %v7176_v16 = vld [vmem:[#allocation6 + $0x1a8] sm:$0xff]  }
 0x1ad   : > { %6501 = vmatprep.subr.bf16.mxu0 %v7167_v24 }
 0x1af   : > { %6490 = vmatmul.mubr.bf16.gmra.mrb[8].mxu0 %v5820_v29  ;;  %v7181_v29 = vld [vmem:[#allocation2 + $0x24] sm:$0xff]  }
 0x1b0   : > { %6502 = vmatpush3.bf16.msra.mxu0 %v7167_v24  ;;  %6509 = vmatprep.mubr.bf16.mxu0 %v5835_v7  ;;  %v2804_v24 = vshll.u32 %v2782_v49, 16  ;;  %v7185_v7 = vld [vmem:[#allocation2 + $0x30] sm:$0xff]   ;;  %v2794_v49 = vld [vmem:[#allocation2 + $0x48] sm:$0xf] }
 0x1b1   : > { %6503 = vmatprep.subr.bf16.mxu0 %v7168_v22 }
 0x1b4   : > { %6504 = vmatpush3.bf16.msra.mxu0 %v7168_v22  ;;  %v7182_v22 = vld [vmem:[#allocation6 + $0x1c8] sm:$0xff]  }
 0x1b5   : > { %6505 = vmatprep.subr.bf16.mxu0 %v7169_v32 }
 0x1b8   : > { %6506 = vmatpush3.bf16.msra.mxu0 %v7169_v32  ;;  %v2806_v32 = vrot.slane %v2804_v24, 5 }
 0x1b9   : > { %6507 = vmatprep.subr.bf16.mxu0 %v7170_v37 }
 0x1ba   : > { %v2807_v36 = vor.u32 %v2806_v32, %v2803_v31  ;;  %v2897_v31 = vshrl.u32 %v2794_v49, 16  ;;  %v2900_v32 = vshll.u32 %v2794_v49, 16  ;;  %v7194_v49 = vld [vmem:[#allocation6 + $0x208] sm:$0xff]  }
 0x1bc   : > { %6508 = vmatpush3.bf16.msra.mxu0 %v7170_v37  ;;  %v2820_v37 = vshll.u32 %v8312_v34, 16  ;;  %v2808_v51 = vrot.slane %v2807_v36, 4 }
 0x1bd   : > { %6521 = vmatprep.subr.bf16.mxu0 %v7171_v47 }
 0x1be   : > { %v2822_v54 = vrot.slane %v2820_v37, 5  ;;  %v2813_v56 = vsel %vm8073_vm6, %v2808_v51, %v2812_v33  ;;  %v2899_v51 = vrot.slane %v2897_v31, 4 }
 0x1bf   : > { %6510 = vmatmul.mubr.bf16.vlgmr.msra.gmra.mrb[0].mxu0 %v5836_v52  ;;  %v2834_v52 = vshll.u32 %v8315_v14, 16 }
 0x1c0   : > { %6522 = vmatpush3.bf16.msra.mxu0 %v7171_v47  ;;  %6513 = vmatprep.mubr.bf16.mxu0 %v5837_v55  ;;  %v2788_v47 = vld [vmem:[#allocation2 + $0x30] sm:$0xf]  ;;  %v2838_v55 = vshrl.u32 %v8315_v14, 16  ;;  %v2823_v43 = vsel %vm8073_vm6, %v2818_v39, %v2822_v54  ;;  %v2902_v39 = vrot.slane %v2900_v32, 5  ;;  %v2940_v32 = vshll.u32 %v8370_v60, 16 }
 0x1c1   : > { %6523 = vmatprep.subr.bf16.mxu0 %v7172_v46  ;;  %v2849_v21 = vshrl.u32 %v2788_v47, 16  ;;  %v2852_v48 = vshll.u32 %v2788_v47, 16  ;;  %v8329_v3 = vrot.slane %v2834_v52, 5  ;;  %v8349_v47 = vld [vmem:[#allocation2 + $0x44] sm:$0x1] }
 0x1c2   : > { %v2840_v4 = vrot.slane %v2838_v55, 4  ;;  %v8351_v55 = vld [vmem:[#allocation2 + $0x58] sm:$0xf] }
 0x1c4   : > { %6524 = vmatpush3.bf16.msra.mxu0 %v7172_v46  ;;  %v2862_v46 = vshrl.u32 %v8317_v8, 16 }
 0x1c5   : > { %6525 = vmatprep.subr.bf16.mxu0 %v7173_v62 }
 0x1c6   : > { %v2864_v10 = vrot.slane %v2862_v46, 4  ;;  %v8358_v46 = vld [vmem:[#allocation2 + $0x50] sm:$0x1] }
 0x1c7   : > { %6514 = vmatmul.mubr.bf16.gmra.mrb[4].mxu0 %v5838_v5  ;;  %v2851_v5 = vrot.slane %v2849_v21, 4 }
 0x1c8   : > { %6526 = vmatpush3.bf16.msra.mxu0 %v7173_v62  ;;  %6517 = vmatprep.mubr.bf16.mxu0 %v5839_v6  ;;  %v7191_v62 = vld [vmem:[#allocation2 + $0x54] sm:$0xff]   ;;  %v2854_v6 = vrot.slane %v2852_v48, 5  ;;  %v2865_v24 = vor.u32 %v2864_v10, %v8331_v9 }
 0x1c9   : > { %6527 = vmatprep.subr.bf16.mxu0 %v7174_v11 }
 0x1ca   : > { %v2855_v53 = vor.u32 %v2854_v6, %v2851_v5  ;;  %v2903_v5 = vor.u32 %v2902_v39, %v2899_v51  ;;  %v3154_v39 = vrot.slane %v8312_v34, 5 }
 0x1cc   : > { %6528 = vmatpush3.bf16.msra.mxu0 %v7174_v11  ;;  %v5863_v11 = vcombine.low %v2813_v56, %v2823_v43  ;;  %v2856_v42 = vrot.slane %v2855_v53, 4  ;;  %v2892_v56 = vshll.u32 %v8349_v47, 16  ;;  %v2904_v53 = vrot.slane %v2903_v5, 4  ;;  %v7200_v5 = vld [vmem:[#allocation6 + $0x238] sm:$0xff]  }
 0x1cd   : > { %6529 = vmatprep.subr.bf16.mxu0 %v7175_v25 }
 0x1ce   : > { %v2861_v13 = vsel %vm8073_vm6, %v2856_v42, %v8331_v9  ;;  %v2916_v9 = vshll.u32 %v8358_v46, 16 }
 0x1cf   : > { %6518 = vmatmul.mubr.bf16.gmra.mrb[8].mxu0 %v5840_v15  ;;  %v7188_v15 = vld [vmem:[#allocation6 + $0x1e8] sm:$0xff]  }
 0x1d0   : > { %6530 = vmatpush3.bf16.msra.mxu0 %v7175_v25  ;;  %6537 = vmatprep.mubr.bf16.mxu0 %v7179_v50  ;;  %v8336_v25 = vld [vmem:[#allocation2 + $0x38] sm:$0x1]  ;;  %v2873_v50 = vshrl.u32 %v2791_v0, 16 }
 0x1d1   : > { %6531 = vmatprep.subr.bf16.mxu0 %v7176_v16  ;;  %v2868_v27 = vshll.u32 %v8336_v25, 16 }
 0x1d2   : > { %v2875_v36 = vrot.slane %v2873_v50, 4 }
 0x1d4   : > { %6532 = vmatpush3.bf16.msra.mxu0 %v7176_v16  ;;  %v2841_v16 = vor.u32 %v2840_v4, %v8329_v3  ;;  %v2934_v4 = vshrl.u32 %v8351_v55, 16 }
 0x1d5   : > { %6533 = vmatprep.subr.bf16.mxu0 %v7177_v18 }
 0x1d8   : > { %6534 = vmatpush3.bf16.msra.mxu0 %v7177_v18  ;;  %v2876_v18 = vshll.u32 %v2791_v0, 16  ;;  %v7193_v0 = vld [vmem:[#allocation6 + $0x200] sm:$0xff]  }
 0x1d9   : > { %6535 = vmatprep.subr.bf16.mxu0 %v7178_v17 }
 0x1da   : > { %v2878_v30 = vrot.slane %v2876_v18, 5 }
 0x1dc   : > { %6536 = vmatpush3.bf16.msra.mxu0 %v7178_v17  ;;  %v2882_v17 = vshll.u32 %v8333_v41, 16  ;;  %v2879_v57 = vor.u32 %v2878_v30, %v2875_v36  ;;  %v3151_v36 = vrot.slane %v8308_v19, 5  ;;  %v3125_v30 = vld [vmem:[#allocation2 + $0x18] sm:$0xe] }
 0x1dd   : > { %6549 = vmatprep.subr.bf16.mxu0 %v7180_v20 }
 0x1de   : > { %v8347_v37 = vrot.slane %v2882_v17, 5  ;;  %v2936_v17 = vrot.slane %v2934_v4, 4  ;;  %v3153_v51 = vrot.slane %v3151_v36, 4 }
 0x1df   : > { %6538 = vmatmul.mubr.bf16.vlgmr.msra.gmra.mrb[0].mxu0 %v7181_v29  ;;  %v2832_v29 = vrot.slane %v2831_v26, 4  ;;  %v2880_v26 = vrot.slane %v2879_v57, 4 }
 0x1e0   : > { %6550 = vmatpush3.bf16.msra.mxu0 %v7180_v20  ;;  %6541 = vmatprep.mubr.bf16.mxu0 %v7185_v7  ;;  %v8340_v20 = vld [vmem:[#allocation2 + $0x4c] sm:$0xf]  ;;  %v2846_v7 = vrot.slane %v2844_v38, 5 }
 0x1e1   : > { %6551 = vmatprep.subr.bf16.mxu0 %v7182_v22  ;;  %v2906_v33 = vshll.u32 %v8340_v20, 16  ;;  %v2910_v23 = vshrl.u32 %v8340_v20, 16  ;;  %v2837_v21 = vsel %vm8073_vm6, %v2832_v29, %v8329_v3  ;;  %v2930_v3 = vshll.u32 %v8351_v55, 16 }
 0x1e2   : > { %v2885_v29 = vsel %vm8073_vm6, %v2880_v26, %v8347_v37 }
 0x1e3   : > { %v2908_v54 = vrot.slane %v2906_v33, 5  ;;  %v2912_v52 = vrot.slane %v2910_v23, 4  ;;  %v2932_v18 = vrot.slane %v2930_v3, 5  ;;  %v7195_v33 = vld [vmem:[#allocation6 + $0x210] sm:$0xff]  }
 0x1e4   : > { %6552 = vmatpush3.bf16.msra.mxu0 %v7182_v22  ;;  %v7190_v22 = vld [vmem:[#allocation6 + $0x1f0] sm:$0xff]  }
 0x1e5   : > { %6553 = vmatprep.subr.bf16.mxu0 %v7183_v35  ;;  %v2913_v6 = vor.u32 %v2912_v52, %v2908_v54  ;;  %v2937_v31 = vor.u32 %v2936_v17, %v2932_v18  ;;  %v2909_v23 = vsel %vm8073_vm6, %v2904_v53, %v2908_v54  ;;  %v7197_v52 = vld [vmem:[#allocation6 + $0x220] sm:$0xff]  }
 0x1e7   : > { %6542 = vmatmul.mubr.bf16.gmra.mrb[4].mxu0 %v7187_v44  ;;  %v2866_v44 = vrot.slane %v2865_v24, 4  ;;  %v2914_v24 = vrot.slane %v2913_v6, 4 }
 0x1e8   : > { %6554 = vmatpush3.bf16.msra.mxu0 %v7183_v35  ;;  %6545 = vmatprep.mubr.bf16.mxu0 %v7189_v12  ;;  %v2842_v35 = vrot.slane %v2841_v16, 4  ;;  %v2870_v12 = vrot.slane %v2868_v27, 5  ;;  %v2918_v27 = vrot.slane %v2916_v9, 5 }
 0x1e9   : > { %6555 = vmatprep.subr.bf16.mxu0 %v7184_v45 }
 0x1ea   : > { %v2847_v48 = vsel %vm8073_vm6, %v2842_v35, %v2846_v7  ;;  %v2871_v63 = vsel %vm8073_vm6, %v2866_v44, %v2870_v12  ;;  %v2919_v35 = vsel %vm8073_vm6, %v2914_v24, %v2918_v27  ;;  %v2938_v12 = vrot.slane %v2937_v31, 4 }
 0x1eb   : > { %v5864_v10 = vcombine.low %v2837_v21, %v2847_v48  ;;  %v5867_v42 = vcombine.low %v2909_v23, %v2919_v35  ;;  %v3155_v48 = vsel %vm8158_vm9, %v3153_v51, %v3154_v39  ;;  %v3182_v24 = vrot.slane %v8358_v46, 5 }
 0x1ec   : > { %6556 = vmatpush3.bf16.msra.mxu0 %v7184_v45  ;;  %v2797_v45 = vld [vmem:[#allocation2 + $0x54] sm:$0xf]  ;;  %v3189_v23 = vrot.slane %v8370_v60, 5  ;;  %v8430_v60 = vld [vmem:[%s8838_s3] ss:$0 sm:$0xff] }
 0x1ed   : > { %6557 = vmatprep.subr.bf16.mxu0 %v7186_v59  ;;  %v2921_v43 = vshrl.u32 %v2797_v45, 16 }
 0x1ef   : > { %6546 = vmatmul.mubr.bf16.gmra.mrb[8].mxu0 %v7191_v62  ;;  %v2924_v62 = vshll.u32 %v2797_v45, 16  ;;  %v2923_v50 = vrot.slane %v2921_v43, 4  ;;  %v5877_v45 = vrot.slane %v3125_v30, 9  ;;  %v3165_v43 = vrot.slane %v8317_v8, 5  ;;  %v8425_v30 = vld [vmem:[%s8837_s2] ss:$0 sm:$0xff] }
 0x1f0   : > { %6558 = vmatpush3.bf16.msra.mxu0 %v7186_v59  ;;  %6565 = vmatprep.mubr.bf16.mxu0 %v5863_v11  ;;  %v2889_v59 = vor.u32 %v2888_v40, %v8347_v37  ;;  %v5865_v11 = vcombine.low %v2861_v13, %v2871_v63  ;;  %v2942_v40 = vrot.slane %v2940_v32, 5  ;;  %v7198_v13 = vld [vmem:[#allocation6 + $0x228] sm:$0xff]   ;;  %v3158_v63 = vrot.slane %v8315_v14, 5 }
 0x1f1   : > { %6559 = vmatprep.subr.bf16.mxu0 %v7188_v15  ;;  %v2926_v16 = vrot.slane %v2924_v62, 5  ;;  %v3152_v21 = vsel %vm8158_vm9, %v5877_v45, %v3151_v36  ;;  %v3127_v62 = vld [vmem:[#allocation2 + $0x30] sm:$0xe]  ;;  %v3167_v9 = vrot.slane %v3165_v43, 4  ;;  %v3172_v8 = vrot.slane %v8333_v41, 5 }
 0x1f2   : > { %v2890_v38 = vrot.slane %v2889_v59, 4  ;;  %v2943_v19 = vsel %vm8073_vm6, %v2938_v12, %v2942_v40  ;;  %v5883_v34 = vcombine.low %v3152_v21, %v3155_v48  ;;  %v7199_v59 = vld [vmem:[#allocation6 + $0x230] sm:$0xff]   ;;  %v3160_v4 = vrot.slane %v3158_v63, 4 }
 0x1f3   : > { %v5879_v6 = vrot.slane %v3127_v62, 9  ;;  %v3174_v17 = vrot.slane %v3172_v8, 4 }
 0x1f4   : > { %6560 = vmatpush3.bf16.msra.mxu0 %v7188_v15  ;;  %v2894_v15 = vrot.slane %v2892_v56, 5  ;;  %v3126_v56 = vld [vmem:[#allocation2 + $0x24] sm:$0xe] }
 0x1f5   : > { %6561 = vmatprep.subr.bf16.mxu0 %v7190_v22  ;;  %v5878_v3 = vrot.slane %v3126_v56, 9  ;;  %v3166_v26 = vsel %vm8158_vm9, %v5879_v6, %v3165_v43 }
 0x1f6   : > { %v2895_v7 = vsel %vm8073_vm6, %v2890_v38, %v2894_v15  ;;  %v3128_v38 = vld [vmem:[#allocation2 + $0x3c] sm:$0xe]  ;;  %v3179_v15 = vrot.slane %v8340_v20, 5 }
 0x1f7   : > { %v5866_v37 = vcombine.low %v2885_v29, %v2895_v7  ;;  %v3159_v14 = vsel %vm8158_vm9, %v5878_v3, %v3158_v63  ;;  %v3186_v29 = vrot.slane %v8351_v55, 5 }
 0x1f8   : > { %6562 = vmatpush3.bf16.msra.mxu0 %v7190_v22  ;;  %v2927_v22 = vor.u32 %v2926_v16, %v2923_v50  ;;  %v3181_v41 = vrot.slane %v3179_v15, 4 }
 0x1f9   : > { %6563 = vmatprep.subr.bf16.mxu0 %v7192_v28 }
 0x1fa   : > { %v2928_v44 = vrot.slane %v2927_v22, 4  ;;  %v3130_v22 = vld [vmem:[#allocation2 + $0x54] sm:$0xe] }
 0x1fb   : > { %v5882_v46 = vrot.slane %v3130_v22, 9 }
 0x1fc   : > { %6564 = vmatpush3.bf16.msra.mxu0 %v7192_v28  ;;  %v7196_v28 = vld [vmem:[#allocation6 + $0x218] sm:$0xff]   ;;  %v2933_v54 = vsel %vm8073_vm6, %v2928_v44, %v2932_v18  ;;  %v5880_v18 = vrot.slane %v3128_v38, 9 }
 0x1fd   : > { %6577 = vmatprep.subr.bf16.mxu0 %v7193_v0  ;;  %v5868_v57 = vcombine.low %v2933_v54, %v2943_v19  ;;  %v3187_v35 = vsel %vm8158_vm9, %v5882_v46, %v3186_v29  ;;  %v3585_v46 = vld [vmem:[#allocation2 + $0x8] sm:$0x1] }
 0x1fe   : > { %v3173_v27 = vsel %vm8158_vm9, %v5880_v18, %v3172_v8 }
 0x1ff   : > { %6566 = vmatmul.mubr.bf16.vlgmr.msra.gmra.mrb[0].mxu0 %v5864_v10  ;;  %v3168_v10 = vrot.slane %v8336_v25, 5  ;;  %v3129_v25 = vld [vmem:[#allocation2 + $0x48] sm:$0xe] }
 0x200   : > { %6578 = vmatpush3.bf16.msra.mxu0 %v7193_v0  ;;  %6569 = vmatprep.mubr.bf16.mxu0 %v5865_v11  ;;  %v3161_v0 = vrot.slane %v8327_v61, 5  ;;  %v5881_v53 = vrot.slane %v3129_v25, 9 }
 0x201   : > { %6579 = vmatprep.subr.bf16.mxu0 %v7194_v49  ;;  %v3169_v61 = vsel %vm8158_vm9, %v3167_v9, %v3168_v10 }
 0x202   : > { %v3162_v11 = vsel %vm8158_vm9, %v3160_v4, %v3161_v0  ;;  %v5885_v16 = vcombine.low %v3166_v26, %v3169_v61  ;;  %v3180_v7 = vsel %vm8158_vm9, %v5881_v53, %v3179_v15  ;;  %v3588_v15 = vld [vmem:[#allocation2 + $0xc] sm:$0xf] }
 0x203   : > { %v5884_v50 = vcombine.low %v3159_v14, %v3162_v11 }
 0x204   : > { %6580 = vmatpush3.bf16.msra.mxu0 %v7194_v49  ;;  %v3175_v49 = vrot.slane %v8349_v47, 5  ;;  %v3183_v47 = vsel %vm8158_vm9, %v3181_v41, %v3182_v24 }
 0x205   : > { %6581 = vmatprep.subr.bf16.mxu0 %v7195_v33  ;;  %v5887_v32 = vcombine.low %v3180_v7, %v3183_v47 }
 0x206   : > { %v3176_v20 = vsel %vm8158_vm9, %v3174_v17, %v3175_v49 }
 0x207   : > { %6570 = vmatmul.mubr.bf16.gmra.mrb[4].mxu0 %v5866_v37  ;;  %v5886_v31 = vcombine.low %v3173_v27, %v3176_v20 }
 0x208   : > { %6582 = vmatpush3.bf16.msra.mxu0 %v7195_v33  ;;  %6573 = vmatprep.mubr.bf16.mxu0 %v5867_v42  ;;  %v3188_v33 = vrot.slane %v3186_v29, 4  ;;  %v3592_v29 = vld [vmem:[#allocation2 + $0x14] sm:$0x1] }
 0x209   : > { %6583 = vmatprep.subr.bf16.mxu0 %v7196_v28 }
 0x20a   : > { %v3190_v55 = vsel %vm8158_vm9, %v3188_v33, %v3189_v23  ;;  %v7201_v23 = vld [vmem:[#allocation2] sm:$0xf] }
 0x20b   : > { %v5888_v36 = vcombine.low %v3187_v35, %v3190_v55 }
 0x20c   : > { %6584 = vmatpush3.bf16.msra.mxu0 %v7196_v28 }
 0x20d   : > { %6585 = vmatprep.subr.bf16.mxu0 %v7197_v52 }
 0x20f   : > { %6574 = vmatmul.mubr.bf16.gmra.mrb[8].mxu0 %v5868_v57 }
 0x210   : > { %6586 = vmatpush3.bf16.msra.mxu0 %v7197_v52  ;;  %6593 = vmatprep.mubr.bf16.mxu0 %v5883_v34 }
 0x211   : > { %6587 = vmatprep.subr.bf16.mxu0 %v7198_v13 }
 0x214   : > { %6588 = vmatpush3.bf16.msra.mxu0 %v7198_v13 }
 0x215   : > { %6589 = vmatprep.subr.bf16.mxu0 %v7199_v59 }
 0x218   : > { %6590 = vmatpush3.bf16.msra.mxu0 %v7199_v59 }
 0x219   : > { %6591 = vmatprep.subr.bf16.mxu0 %v7200_v5 }
 0x21c   : > { %6592 = vmatpush3.bf16.msra.mxu0 %v7200_v5 }
 0x21f   : > { %6594 = vmatmul.mubr.bf16.vlgmr.msra.gmra.mrb[0].mxu0 %v5884_v50 }
 0x220   : > { %6597 = vmatprep.mubr.bf16.mxu0 %v5885_v16 }
 0x227   : > { %6598 = vmatmul.mubr.bf16.gmra.mrb[4].mxu0 %v5886_v31 }
 0x228   : > { %6601 = vmatprep.mubr.bf16.mxu0 %v5887_v32 }
 0x22f   : > { %6602 = vmatmul.mubr.bf16.gmra.mrb[8].mxu0 %v5888_v36 }
 0x2f2   : > { %v6595_v37 = vpop.f32.mrb[0].mxu0 }
 0x2f3   : > { %v3381_v42 = vmul.f32 %v6595_v37, %v8425_v30  ;;  %v3313_v44 = vpop.f32.mrb[1].mxu0 }
 0x2f4   : > { %v3379_v12 = vmul.f32 %v8425_v30, %v3313_v44  ;;  %v6596_v40 = vpop.f32.mrb[2].mxu0 }
 0x2f5   : > { %v3400_v28 = vadd.f32 %v8430_v60, %v3381_v42  ;;  %v3382_v45 = vmul.f32 %v6596_v40, %v8425_v30  ;;  %v3316_v51 = vpop.f32.mrb[3].mxu0 }
 0x2f6   : > { %v3398_v39 = vadd.f32 %v8430_v60, %v3379_v12  ;;  %v3380_v54 = vmul.f32 %v8425_v30, %v3316_v51 }
 0x2f7   : > { %v3412_v19 = vmax.f32 %v3400_v28, 0.0  ;;  %v3401_v52 = vadd.f32 %v8430_v60, %v3382_v45 }
 0x2f8   : > { %v3410_v21 = vmax.f32 %v3398_v39, 0.0  ;;  %v3399_v48 = vadd.f32 %v8430_v60, %v3380_v54 }
 0x2f9   : > { %v6056_v57 = vpack.c.bf16 %v3412_v19, %v3412_v19  ;;  %v3413_v34 = vmax.f32 %v3401_v52, 0.0 }
 0x2fa   : > { %v6054_v13 = vpack.c.bf16 %v3410_v21, %v3410_v21  ;;  %v3411_v63 = vmax.f32 %v3399_v48, 0.0  ;;  %v6599_v59 = vpop.f32.mrb[4].mxu0 }
 0x2fb   : > { %v3478_v56 = vshrl.u32 %v6056_v57, 16  ;;  %v3481_v43 = vshll.u32 %v6056_v57, 16  ;;  %v6057_v62 = vpack.c.bf16 %v3413_v34, %v3413_v34  ;;  %v3385_v3 = vmul.f32 %v6599_v59, %v8425_v30  ;;  %v3329_v4 = vpop.f32.mrb[5].mxu0 }
 0x2fc   : > { %v3461_v0 = vshrl.u32 %v6054_v13, 16  ;;  %v3464_v5 = vshll.u32 %v6054_v13, 16  ;;  %v6055_v6 = vpack.c.bf16 %v3411_v63, %v3411_v63  ;;  %v3383_v9 = vmul.f32 %v8425_v30, %v3329_v4  ;;  %v6600_v10 = vpop.f32.mrb[6].mxu0  ;;  %v3602_v63 = vld [vmem:[#allocation2 + $0x24] sm:$0xf] }
 0x2fd   : > { %v3480_v14 = vrot.slane %v3478_v56, 7  ;;  %v3486_v11 = vshrl.u32 %v6057_v62, 16  ;;  %v3489_v8 = vshll.u32 %v6057_v62, 16  ;;  %v3404_v26 = vadd.f32 %v8430_v60, %v3385_v3  ;;  %v3332_v61 = vpop.f32.mrb[7].mxu0  ;;  %v3595_v4 = vld [vmem:[#allocation2 + $0x18] sm:$0xf] }
 0x2fe   : > { %v3463_v25 = vrot.slane %v3461_v0, 7  ;;  %v3469_v50 = vshrl.u32 %v6055_v6, 16  ;;  %v3472_v16 = vshll.u32 %v6055_v6, 16  ;;  %v3402_v18 = vadd.f32 %v8430_v60, %v3383_v9 }
 0x2ff   : > { %v3483_v17 = vor.u32 %v3481_v43, %v3480_v14  ;;  %v3484_v49 = vrot.slane %v3480_v14, 4  ;;  %v3488_v53 = vrot.slane %v3486_v11, 7  ;;  %v3416_v41 = vmax.f32 %v3404_v26, 0.0 }
 0x300   : > { %v3466_v24 = vor.u32 %v3464_v5, %v3463_v25  ;;  %v3467_v27 = vrot.slane %v3463_v25, 4  ;;  %v3471_v7 = vrot.slane %v3469_v50, 7  ;;  %v3414_v47 = vmax.f32 %v3402_v18, 0.0 }
 0x301   : > { %v3589_v22 = vsel %vm8445_vm12, %v3483_v17, %v3588_v15  ;;  %v3491_v31 = vor.u32 %v3489_v8, %v3488_v53  ;;  %v3493_v32 = vrot.slane %v3488_v53, 4  ;;  %v6060_v33 = vpack.c.bf16 %v3416_v41, %v3416_v41 }
 0x302   : > { %3590 = vst [vmem:[#allocation2 + $0xc] sm:$0xf] %v3589_v22  ;;  %v3582_v35 = vsel %vm8445_vm12, %v3466_v24, %v7201_v23  ;;  %v3474_v55 = vor.u32 %v3472_v16, %v3471_v7  ;;  %v3476_v36 = vrot.slane %v3471_v7, 4  ;;  %v6058_v37 = vpack.c.bf16 %v3414_v47, %v3414_v47  ;;  %v6603_v42 = vpop.f32.mrb[8].mxu0 }
 0x303   : > { %3583 = vst [vmem:[#allocation2] sm:$0xf] %v3582_v35  ;;  %v3492_v44 = vsel %vm8452_vm13, %v3484_v49, %v3491_v31  ;;  %v3593_v12 = vsel %vm7801_vm3, %v3493_v32, %v3592_v29  ;;  %v3512_v40 = vshrl.u32 %v6060_v33, 16  ;;  %v3515_v28 = vshll.u32 %v6060_v33, 16  ;;  %v3345_v45 = vpop.f32.mrb[9].mxu0 }
 0x304   : > { %3591 = vst [vmem:[#allocation2 + $0x10] sm:$0xf] %v3492_v44  ;;  %3594 = vst [vmem:[#allocation2 + $0x14] sm:$0x1] %v3593_v12  ;;  %v3475_v51 = vsel %vm8452_vm13, %v3467_v27, %v3474_v55  ;;  %v3586_v39 = vsel %vm7801_vm3, %v3476_v36, %v3585_v46  ;;  %v3495_v54 = vshrl.u32 %v6058_v37, 16  ;;  %v3498_v19 = vshll.u32 %v6058_v37, 16 }
 0x305   : > { %v6604_v52 = vpop.f32.mrb[10].mxu0  ;;  %3584 = vst [vmem:[#allocation2 + $0x4] sm:$0xf] %v3475_v51  ;;  %3587 = vst [vmem:[#allocation2 + $0x8] sm:$0x1] %v3586_v39  ;;  %v3514_v21 = vrot.slane %v3512_v40, 7  ;;  %v3386_v48 = vmul.f32 %v6600_v10, %v8425_v30  ;;  %v3384_v57 = vmul.f32 %v8425_v30, %v3332_v61  ;;  %v3389_v34 = vmul.f32 %v6603_v42, %v8425_v30 }
 0x306   : > { %v3348_v13 = vpop.f32.mrb[11].mxu0  ;;  %v3497_v59 = vrot.slane %v3495_v54, 7  ;;  %v3387_v56 = vmul.f32 %v8425_v30, %v3345_v45  ;;  %v3390_v43 = vmul.f32 %v6604_v52, %v8425_v30  ;;  %v3599_v35 = vld [vmem:[#allocation2 + $0x20] sm:$0x1]  ;;  %v3616_v45 = vld [vmem:[#allocation2 + $0x3c] sm:$0xf] }
 0x307   : > { %v3388_v62 = vmul.f32 %v8425_v30, %v3348_v13  ;;  %v3517_v3 = vor.u32 %v3515_v28, %v3514_v21  ;;  %v3405_v0 = vadd.f32 %v8430_v60, %v3386_v48  ;;  %v3403_v5 = vadd.f32 %v8430_v60, %v3384_v57  ;;  %v3609_v51 = vld [vmem:[#allocation2 + $0x30] sm:$0xf] }
 0x308   : > { %v3500_v6 = vor.u32 %v3498_v19, %v3497_v59  ;;  %v3408_v9 = vadd.f32 %v8430_v60, %v3389_v34  ;;  %v3406_v10 = vadd.f32 %v8430_v60, %v3387_v56  ;;  %v3409_v26 = vadd.f32 %v8430_v60, %v3390_v43  ;;  %v3620_v43 = vld [vmem:[#allocation2 + $0x44] sm:$0x1] }
 0x309   : > { %v3603_v14 = vsel %vm8445_vm12, %v3517_v3, %v3602_v63  ;;  %v3417_v11 = vmax.f32 %v3405_v0, 0.0  ;;  %v3415_v8 = vmax.f32 %v3403_v5, 0.0  ;;  %v3407_v25 = vadd.f32 %v8430_v60, %v3388_v62  ;;  %v3606_v60 = vld [vmem:[#allocation2 + $0x2c] sm:$0x1] }
 0x30a   : > { %3604 = vst [vmem:[#allocation2 + $0x24] sm:$0xf] %v3603_v14  ;;  %v3596_v30 = vsel %vm8445_vm12, %v3500_v6, %v3595_v4  ;;  %v3420_v61 = vmax.f32 %v3408_v9, 0.0  ;;  %v3418_v15 = vmax.f32 %v3406_v10, 0.0  ;;  %v3421_v49 = vmax.f32 %v3409_v26, 0.0 }
 0x30b   : > { %3597 = vst [vmem:[#allocation2 + $0x18] sm:$0xf] %v3596_v30  ;;  %v6061_v50 = vpack.c.bf16 %v3417_v11, %v3417_v11  ;;  %v6059_v16 = vpack.c.bf16 %v3415_v8, %v3415_v8  ;;  %v3419_v53 = vmax.f32 %v3407_v25, 0.0  ;;  %v3518_v41 = vrot.slane %v3514_v21, 4  ;;  %v3613_v6 = vld [vmem:[#allocation2 + $0x38] sm:$0x1] }
 0x30c   : > { %v6064_v18 = vpack.c.bf16 %v3420_v61, %v3420_v61  ;;  %v6062_v17 = vpack.c.bf16 %v3418_v15, %v3418_v15  ;;  %v3501_v24 = vrot.slane %v3497_v59, 4  ;;  %v6065_v37 = vpack.c.bf16 %v3421_v49, %v3421_v49 }
 0x30d   : > { %v3520_v27 = vshrl.u32 %v6061_v50, 16  ;;  %v3503_v29 = vshrl.u32 %v6059_v16, 16  ;;  %v3523_v7 = vshll.u32 %v6061_v50, 16  ;;  %v3506_v47 = vshll.u32 %v6059_v16, 16 }
 0x30e   : > { %v3546_v22 = vshrl.u32 %v6064_v18, 16  ;;  %v3529_v31 = vshrl.u32 %v6062_v17, 16  ;;  %v3549_v33 = vshll.u32 %v6064_v18, 16  ;;  %v3532_v23 = vshll.u32 %v6062_v17, 16 }
 0x30f   : > { %v3522_v32 = vrot.slane %v3520_v27, 7  ;;  %v3505_v46 = vrot.slane %v3503_v29, 7  ;;  %v6063_v42 = vpack.c.bf16 %v3419_v53, %v3419_v53  ;;  %v3554_v13 = vshrl.u32 %v6065_v37, 16 }
 0x310   : > { %v3548_v55 = vrot.slane %v3546_v22, 7  ;;  %v3531_v36 = vrot.slane %v3529_v31, 7  ;;  %v3557_v56 = vshll.u32 %v6065_v37, 16  ;;  %v7506_v30 = vmov (!%p5739_p13), 0  }
 0x311   : > { %v3525_v44 = vor.u32 %v3523_v7, %v3522_v32  ;;  %v3527_v12 = vrot.slane %v3522_v32, 4  ;;  %v3508_v40 = vor.u32 %v3506_v47, %v3505_v46  ;;  %v3510_v28 = vrot.slane %v3505_v46, 4  ;;  %3626 = vst [vmem:[#allocation2] sm:$0xf] (!%p5739_p13), %v7506_v30  ;;  %3627 = vst [vmem:[#allocation2 + $0x4] sm:$0xf] (!%p5739_p13), %v7506_v30 }
 0x312   : > { %v3551_v39 = vor.u32 %v3549_v33, %v3548_v55  ;;  %v3534_v54 = vor.u32 %v3532_v23, %v3531_v36  ;;  %v3537_v63 = vshrl.u32 %v6063_v42, 16  ;;  %v3556_v59 = vrot.slane %v3554_v13, 7  ;;  %3628 = vst [vmem:[#allocation2 + $0x8] sm:$0x1] (!%p5739_p13), %v7506_v30 }
 0x313   : > { %v3526_v19 = vsel %vm8452_vm13, %v3518_v41, %v3525_v44  ;;  %v3607_v52 = vsel %vm7801_vm3, %v3527_v12, %v3606_v60  ;;  %v3509_v21 = vsel %vm8452_vm13, %v3501_v24, %v3508_v40  ;;  %v3600_v48 = vsel %vm7801_vm3, %v3510_v28, %v3599_v35  ;;  %3625 = sbr.rel (%p5739_p13) target bundleno = 794 (0x31a), region = 76 }
 0x314   : > { %3605 = vst [vmem:[#allocation2 + $0x28] sm:$0xf] %v3526_v19  ;;  %3608 = vst [vmem:[#allocation2 + $0x2c] sm:$0x1] %v3607_v52  ;;  %v3617_v57 = vsel %vm8445_vm12, %v3551_v39, %v3616_v45  ;;  %v3610_v34 = vsel %vm8445_vm12, %v3534_v54, %v3609_v51  ;;  %v3539_v62 = vrot.slane %v3537_v63, 7  ;;  %v3540_v3 = vshll.u32 %v6063_v42, 16 }
 0x315   : > { %3598 = vst [vmem:[#allocation2 + $0x1c] sm:$0xf] %v3509_v21  ;;  %3601 = vst [vmem:[#allocation2 + $0x20] sm:$0x1] %v3600_v48  ;;  %v3552_v4 = vrot.slane %v3548_v55, 4  ;;  %v3559_v0 = vor.u32 %v3557_v56, %v3556_v59  ;;  %v3561_v5 = vrot.slane %v3556_v59, 4 }
 0x316   : > { %3618 = vst [vmem:[#allocation2 + $0x3c] sm:$0xf] %v3617_v57  ;;  %3611 = vst [vmem:[#allocation2 + $0x30] sm:$0xf] %v3610_v34  ;;  %v3535_v9 = vrot.slane %v3531_v36, 4  ;;  %v3542_v10 = vor.u32 %v3540_v3, %v3539_v62  ;;  %v3544_v14 = vrot.slane %v3539_v62, 4 }
 0x317   : > { %v3560_v38 = vsel %vm8452_vm13, %v3552_v4, %v3559_v0  ;;  %v3621_v11 = vsel %vm7801_vm3, %v3561_v5, %v3620_v43 }
 0x318   : > { %3619 = vst [vmem:[#allocation2 + $0x40] sm:$0xf] %v3560_v38  ;;  %3622 = vst [vmem:[#allocation2 + $0x44] sm:$0x1] %v3621_v11  ;;  %v3543_v8 = vsel %vm8452_vm13, %v3535_v9, %v3542_v10  ;;  %v3614_v26 = vsel %vm7801_vm3, %v3544_v14, %v3613_v6 }
 0x319   : > { %3612 = vst [vmem:[#allocation2 + $0x34] sm:$0xf] %v3543_v8  ;;  %3615 = vst [vmem:[#allocation2 + $0x38] sm:$0x1] %v3614_v26 }
 0x31a PF: > { %3631 = sbr.rel (%p5740_p9) target bundleno = 801 (0x321), region = 80  ;;  %v7507_v61 = vmov (!%p5740_p9), 0  }
 0x31b   : > { %3633 = vst [vmem:[#allocation2 + $0x3c] sm:$0xf] (!%p5740_p9), %v7507_v61  ;;  %3634 = vst [vmem:[#allocation2 + $0x40] sm:$0xf] (!%p5740_p9), %v7507_v61 }
 0x31c   : > { %3635 = vst [vmem:[#allocation2 + $0x44] sm:$0x1] (!%p5740_p9), %v7507_v61 }
 0x321 PF: > { %v7202_v1 = vld [vmem:[#allocation8 + $0x40] sm:$0xff]   ;;  %v7203_v20 = vld [vmem:[#allocation8 + $0x48] sm:$0xff]   ;;  %v7204_v15 = vld [vmem:[#allocation8 + $0x50] sm:$0xff]   ;;  %s6067_s1 = sshll.u32 %s7482_s30, 5  ;;  %s8908_s14 = sld [smem:[#allocation21_spill]] }
 0x322   : > { %6605 = vmatprep.subr.bf16.mxu1 %v7202_v1  ;;  %v7205_v25 = vld [vmem:[#allocation8 + $0x58] sm:$0xff]   ;;  %v8508_v50 = vld [vmem:[#allocation2] sm:$0xf]  ;;  %v8510_v16 = vld [vmem:[#allocation2 + $0x4] sm:$0xf]  ;;  %s5491_s17 = scalar_lea.vmem %s7778_s23, %s6067_s1 [#allocation3]  ;;  %s8909_s23 = sld [smem:[#allocation14_spill]] }
 0x323   : > { %6606 = vmatpush3.bf16.msra.mxu1 %v7202_v1  ;;  %v8512_v18 = vld [vmem:[#allocation2 + $0x8] sm:$0x1]  ;;  %v3665_v17 = vshrl.u32 %v8508_v50, 16  ;;  %v3668_v49 = vshll.u32 %v8508_v50, 16  ;;  %v3674_v53 = vshll.u32 %v8510_v16, 16  ;;  %v3678_v41 = vshrl.u32 %v8510_v16, 16 }
 0x324   : > { %6607 = vmatprep.subr.bf16.mxu1 %v7203_v20  ;;  %v7206_v24 = vld [vmem:[#allocation8 + $0x60] sm:$0xff]   ;;  %v3684_v27 = vshll.u32 %v8512_v18, 16  ;;  %v8519_v31 = vld [vmem:[#allocation2 + $0xc] sm:$0xf]  ;;  %v8521_v46 = vld [vmem:[#allocation2 + $0x10] sm:$0xf] }
 0x325   : > { %v3667_v29 = vrot.slane %v3665_v17, 4  ;;  %v3670_v7 = vrot.slane %v3668_v49, 5  ;;  %v3676_v47 = vrot.slane %v3674_v53, 5  ;;  %v3680_v22 = vrot.slane %v3678_v41, 4  ;;  %v3661_v33 = vld [vmem:[#allocation2 + $0x14] sm:$0x1] }
 0x326   : > { %v3686_v32 = vrot.slane %v3684_v27, 5  ;;  %v3689_v23 = vshrl.u32 %v8519_v31, 16  ;;  %v3692_v55 = vshll.u32 %v8519_v31, 16  ;;  %v3698_v36 = vshll.u32 %v8521_v46, 16  ;;  %v7207_v51 = vld [vmem:[#allocation8 + $0x68] sm:$0xff]   ;;  %v7208_v63 = vld [vmem:[#allocation8 + $0x70] sm:$0xff]  }
 0x327   : > { %6608 = vmatpush3.bf16.msra.mxu1 %v7203_v20  ;;  %v3671_v60 = vor.u32 %v3670_v7, %v3667_v29  ;;  %v3681_v35 = vor.u32 %v3680_v22, %v3676_v47  ;;  %v3702_v42 = vshrl.u32 %v8521_v46, 16  ;;  %v4063_v44 = vrot.slane %v8521_v46, 5  ;;  %v8541_v56 = vld [vmem:[#allocation2 + $0x18] sm:$0xf]  ;;  %v8543_v62 = vld [vmem:[#allocation2 + $0x1c] sm:$0xf] }
 0x328   : > { %6609 = vmatprep.subr.bf16.mxu1 %v7204_v15  ;;  %v3691_v37 = vrot.slane %v3689_v23, 4  ;;  %v3694_v28 = vrot.slane %v3692_v55, 5  ;;  %v8528_v45 = vrot.slane %v3698_v36, 5  ;;  %v3708_v54 = vshll.u32 %v3661_v33, 16  ;;  %v3662_v3 = vld [vmem:[#allocation2 + $0x20] sm:$0x1] }
 0x329   : > { %v3672_v12 = vrot.slane %v3671_v60, 4  ;;  %v3682_v40 = vrot.slane %v3681_v35, 4  ;;  %v3704_v39 = vrot.slane %v3702_v42, 4  ;;  %v4065_v19 = vrot.slane %v4063_v44, 4  ;;  %v8549_v38 = vld [vmem:[#allocation2 + $0x24] sm:$0xf] }
 0x32a   : > { %v4066_v52 = vrot.slane %v3661_v33, 5  ;;  %v3695_v57 = vor.u32 %v3694_v28, %v3691_v37  ;;  %v3713_v4 = vshrl.u32 %v8541_v56, 16  ;;  %v3710_v0 = vrot.slane %v3708_v54, 5  ;;  %v8551_v61 = vld [vmem:[#allocation2 + $0x28] sm:$0xf]  ;;  %v7209_v1 = vld [vmem:[#allocation8 + $0x78] sm:$0xff]  }
 0x32b   : > { %6610 = vmatpush3.bf16.msra.mxu1 %v7204_v15  ;;  %v3677_v21 = vsel %vm8073_vm6, %v3672_v12, %v3676_v47  ;;  %v3687_v48 = vsel %vm8073_vm6, %v3682_v40, %v3686_v32  ;;  %v3705_v59 = vor.u32 %v3704_v39, %v8528_v45  ;;  %v3716_v5 = vshll.u32 %v8541_v56, 16  ;;  %v3663_v15 = vld [vmem:[#allocation2 + $0x2c] sm:$0x1]  ;;  %v7210_v35 = vld [vmem:[#allocation8] sm:$0xff]   ;;  %s6076_s15 = sshll.u32 %s7482_s30, 3  ;;  %s6048_s13 = sshll.u32 %s8909_s23, 5 }
 0x32c   : > { %6611 = vmatprep.subr.bf16.mxu1 %v7205_v25  ;;  %v5913_v34 = vcombine.low %v3677_v21, %v3687_v48  ;;  %v8538_v13 = vsel %vm8158_vm9, %v4065_v19, %v4066_v52  ;;  %v3696_v43 = vrot.slane %v3695_v57, 4  ;;  %v3722_v6 = vshll.u32 %v8543_v62, 16  ;;  %v7211_v54 = vld [vmem:[#allocation8 + $0x8] sm:$0xff]   ;;  %s5608_s27 = sadd.s32 %s6076_s15, %s6048_s13  ;;  %s8910_s30 = sld [smem:[#allocation16_spill]] }
 0x32d   : > { %v3726_v9 = vshrl.u32 %v8543_v62, 16  ;;  %v3715_v10 = vrot.slane %v3713_v4, 4  ;;  %v3732_v14 = vshll.u32 %v3662_v3, 16  ;;  %v3706_v11 = vrot.slane %v3705_v59, 4  ;;  %v4043_v59 = vld [vmem:[#allocation2 + $0xc] sm:$0xe] }
 0x32e   : > { %6621 = vmatprep.mubr.bf16.mxu1 %v5913_v34  ;;  %v3718_v8 = vrot.slane %v3716_v5, 5  ;;  %v3724_v26 = vrot.slane %v3722_v6, 5  ;;  %v3701_v20 = vsel %vm8073_vm6, %v3696_v43, %v8528_v45  ;;  %v3740_v17 = vshll.u32 %v8549_v38, 16  ;;  %v7283_v2 = vld [vmem:[#allocation8 + $0x228] sm:$0xff]   ;;  %s6049_s21 = sshll.u32 %s5608_s27, 6  ;;  %s5611_s6 = sshll.u32 %s7843_s16, 4  ;;  %s8768_s6 = int_to_ptr.vmem [resolvable:$true] %s5611_s6 }
 0x32f   : > { %6612 = vmatpush3.bf16.msra.mxu1 %v7205_v25  ;;  %v3728_v30 = vrot.slane %v3726_v9, 4  ;;  %v3737_v25 = vshrl.u32 %v8549_v38, 16  ;;  %v3746_v49 = vshll.u32 %v8551_v61, 16  ;;  %v3750_v27 = vshrl.u32 %v8551_v61, 16  ;;  %v7213_v9 = vld [vmem:[#allocation8 + $0x18] sm:$0xff]   ;;  %s8911_s1 = sld [smem:[#allocation22_spill]] }
 0x330   : > { %6613 = vmatprep.subr.bf16.mxu1 %v7206_v24  ;;  %v3719_v53 = vor.u32 %v3718_v8, %v3715_v10  ;;  %v3742_v7 = vrot.slane %v3740_v17, 5  ;;  %v3756_v22 = vshll.u32 %v3663_v15, 16  ;;  %v3711_v32 = vsel %vm8073_vm6, %v3706_v11, %v3710_v0  ;;  %v7216_v17 = vld [vmem:[#allocation8 + $0x30] sm:$0xff]   ;;  %s8774_s24 = scalar_lea.sflag [#allocation5], %s337_s9  ;;  %s7372_s20 = scalar_lea.vmem %s8768_s6, 512 }
 0x331   : > { %v3729_v41 = vor.u32 %v3728_v30, %v3724_v26  ;;  %v3739_v29 = vrot.slane %v3737_v25, 4  ;;  %v3748_v47 = vrot.slane %v3746_v49, 5  ;;  %v3752_v60 = vrot.slane %v3750_v27, 4  ;;  %v7215_v25 = vld [vmem:[#allocation8 + $0x28] sm:$0xff]   ;;  %v7217_v49 = vld [vmem:[#allocation8 + $0x38] sm:$0xff]   ;;  %p7373_p11 = scmp.ne.s32.totalorder %s8768_s6, %s7372_s20  ;;  %s7508_s19 = smov [#allocation9]  }
 0x332   : > { %v3720_v33 = vrot.slane %v3719_v53, 4  ;;  %v4070_v12 = vrot.slane %v8543_v62, 5  ;;  %v5914_v40 = vcombine.low %v3701_v20, %v3711_v32  ;;  %v3758_v28 = vrot.slane %v3756_v22, 5  ;;  %v7219_v53 = vld [vmem:[#allocation8 + $0x80] sm:$0xff]   ;;  %p8912_p0 = scmp.ne.s32.totalorder %s8910_s30, 0  ;;  %s7376_s18 = sshll.u32 %s7508_s19, 4  ;;  %s7377_s18 = int_to_ptr.vmem [resolvable:$false] %s7376_s18 }
 0x333   : > { %6614 = vmatpush3.bf16.msra.mxu1 %v7206_v24  ;;  %v3734_v24 = vrot.slane %v3732_v14, 5  ;;  %v3730_v23 = vrot.slane %v3729_v41, 4  ;;  %v3743_v55 = vor.u32 %v3742_v7, %v3739_v29  ;;  %v3753_v42 = vor.u32 %v3752_v60, %v3748_v47  ;;  %v4044_v14 = vld [vmem:[#allocation2 + $0x18] sm:$0xe]  ;;  %v7227_v60 = vld [vmem:[#allocation8 + $0xb0] sm:$0xff]   ;;  %p7379_p12 = scmp.lt.s32.totalorder %s8768_s6, %s7377_s18 }
 0x334   : > { %6615 = vmatprep.subr.bf16.mxu1 %v7207_v51  ;;  %v3725_v36 = vsel %vm8073_vm6, %v3720_v33, %v3724_v26  ;;  %v4072_v19 = vrot.slane %v4070_v12, 4  ;;  %v4073_v52 = vrot.slane %v3662_v3, 5  ;;  %v4077_v21 = vrot.slane %v8551_v61, 5  ;;  %v7214_v26 = vld [vmem:[#allocation8 + $0x20] sm:$0xff]   ;;  %v7222_v33 = vld [vmem:[#allocation8 + $0x90] sm:$0xff]   ;;  %p7374_p5 = pnand %p7373_p11, %p8912_p0 }
 0x335   : > { %v3735_v37 = vsel %vm8073_vm6, %v3730_v23, %v3734_v24  ;;  %v3754_v39 = vrot.slane %v3753_v42, 4  ;;  %v5938_v43 = vrot.slane %v4043_v59, 9  ;;  %v5925_v0 = vcombine.low %v8508_v50, %v8510_v16  ;;  %v4045_v50 = vld [vmem:[#allocation2 + $0x24] sm:$0xe]  ;;  %v4042_v24 = vld [vmem:[#allocation2] sm:$0xe] }
 0x336   : > { %v5915_v45 = vcombine.low %v3725_v36, %v3735_v37  ;;  %v8574_v34 = vsel %vm8158_vm9, %v4072_v19, %v4073_v52  ;;  %v4079_v4 = vrot.slane %v4077_v21, 4  ;;  %v4080_v6 = vrot.slane %v3663_v15, 5  ;;  %v7225_v23 = vld [vmem:[#allocation8 + $0xa8] sm:$0xff]   ;;  %v7233_v37 = vld [vmem:[#allocation8 + $0xd8] sm:$0xff]   ;;  %v7234_v42 = vld [vmem:[#allocation8 + $0xe0] sm:$0xff]   ;;  %p7375_p8 = pneg %p7374_p5 }
 0x337   : > { %6616 = vmatpush3.bf16.msra.mxu1 %v7207_v51  ;;  %v3744_v51 = vrot.slane %v3743_v55, 4  ;;  %v3759_v57 = vsel %vm8073_vm6, %v3754_v39, %v3758_v28  ;;  %v8582_v5 = vsel %vm8158_vm9, %v5938_v43, %v4063_v44  ;;  %v5939_v8 = vrot.slane %v4044_v14, 9  ;;  %v7232_v55 = vld [vmem:[#allocation8 + $0xd0] sm:$0xff]   ;;  %v7237_v19 = vld [vmem:[#allocation8 + $0xf8] sm:$0xff]  }
 0x338   : > { %6617 = vmatprep.subr.bf16.mxu1 %v7208_v63  ;;  %v5942_v10 = vcombine.low %v8582_v5, %v8538_v13  ;;  %v8588_v11 = vsel %vm8158_vm9, %v4079_v4, %v4080_v6  ;;  %v5940_v30 = vrot.slane %v4045_v50, 9  ;;  %v4056_v41 = vrot.slane %v8510_v16, 5  ;;  %v7238_v36 = vld [vmem:[#allocation2 + $0xc] sm:$0xff]   ;;  %v7240_v4 = vld [vmem:[#allocation2 + $0x18] sm:$0xff]  }
 0x339   : > { %v3749_v48 = vsel %vm8073_vm6, %v3744_v51, %v3748_v47  ;;  %v4071_v44 = vsel %vm8158_vm9, %v5939_v8, %v4070_v12  ;;  %v5926_v27 = vcombine.low %v8519_v31, %v8521_v46  ;;  %v5927_v29 = vcombine.low %v8541_v56, %v8543_v62  ;;  %v7221_v47 = vld [vmem:[#allocation8 + $0x88] sm:$0xff]   ;;  %v7223_v56 = vld [vmem:[#allocation8 + $0x98] sm:$0xff]   ;;  %v7224_v62 = vld [vmem:[#allocation8 + $0xa0] sm:$0xff]  }
 0x33a   : > { %v5916_v3 = vcombine.low %v3749_v48, %v3759_v57  ;;  %v8595_v20 = vsel %vm8158_vm9, %v5940_v30, %v4077_v21  ;;  %v4059_v7 = vrot.slane %v8512_v18, 5  ;;  %v5937_v22 = vrot.slane %v4042_v24, 9  ;;  %v7235_v12 = vld [vmem:[#allocation8 + $0xe8] sm:$0xff]   ;;  %v8614_v28 = vld [vmem:[#allocation2 + $0x10] sm:$0xf] }
 0x33b   : > { %6618 = vmatpush3.bf16.msra.mxu1 %v7208_v63  ;;  %v7212_v63 = vld [vmem:[#allocation8 + $0x10] sm:$0xff]   ;;  %v5944_v15 = vcombine.low %v8595_v20, %v8588_v11  ;;  %v4058_v32 = vrot.slane %v4056_v41, 4  ;;  %v5928_v46 = vcombine.low %v8549_v38, %v8551_v61  ;;  %v7230_v38 = vld [vmem:[#allocation8 + $0xc0] sm:$0xff]   ;;  %v7231_v61 = vld [vmem:[#allocation8 + $0xc8] sm:$0xff]   ;;  %v4426_v39 = vshll.u32 %v8614_v28, 16 }
 0x33c   : > { %6619 = vmatprep.subr.bf16.mxu1 %v7209_v1  ;;  %v4057_v16 = vsel %vm8158_vm9, %v5937_v22, %v4056_v41  ;;  %v7236_v13 = vld [vmem:[#allocation8 + $0xf0] sm:$0xff]   ;;  %v7241_v5 = vld [vmem:[#allocation8 + $0x108] sm:$0xff]   ;;  %v8625_v30 = vld [vmem:[#allocation2 + $0x1c] sm:$0xf] }
 0x33d   : > { %v4060_v31 = vsel %vm8158_vm9, %v4058_v32, %v4059_v7  ;;  %v4428_v48 = vrot.slane %v4426_v39, 5  ;;  %v7242_v14 = vld [vmem:[#allocation8 + $0x110] sm:$0xff]   ;;  %v4410_v20 = vld [vmem:[#allocation2 + $0x24] sm:$0xf] }
 0x33e   : > { %v5941_v18 = vcombine.low %v4057_v16, %v4060_v31  ;;  %v7248_v50 = vld [vmem:[#allocation2 + $0x30] sm:$0xff]   ;;  %v4465_v41 = vshrl.u32 %v4410_v20, 16  ;;  %v4468_v24 = vshll.u32 %v4410_v20, 16  ;;  %v7245_v16 = vld [vmem:[#allocation8 + $0x128] sm:$0xff]   ;;  %v8633_v31 = vld [vmem:[#allocation2 + $0x20] sm:$0x1] }
 0x33f   : > { %6620 = vmatpush3.bf16.msra.mxu1 %v7209_v1  ;;  %v5943_v1 = vcombine.low %v4071_v44, %v8574_v34  ;;  %v8618_v34 = vld [vmem:[#allocation2 + $0x14] sm:$0x1]  ;;  %v4407_v44 = vld [vmem:[#allocation2 + $0x18] sm:$0xf] }
 0x340   : > { %6629 = vmatprep.subr.bf16.mxu1 %v7210_v35 }
 0x342   : > { %6622 = vmatmul.mubr.bf16.vlgmr.msra.gmra.mrb[0].mxu1 %v5914_v40  ;;  %v4404_v40 = vld [vmem:[#allocation2 + $0xc] sm:$0xf] }
 0x343   : > { %6630 = vmatpush3.bf16.msra.mxu1 %v7210_v35  ;;  %6625 = vmatprep.mubr.bf16.mxu1 %v5915_v45  ;;  %v7229_v35 = vld [vmem:[#allocation8 + $0xb8] sm:$0xff]   ;;  %v4417_v45 = vshrl.u32 %v4404_v40, 16  ;;  %v4420_v51 = vshll.u32 %v4404_v40, 16  ;;  %v7247_v40 = vld [vmem:[#allocation8 + $0x130] sm:$0xff]  }
 0x344   : > { %6631 = vmatprep.subr.bf16.mxu1 %v7211_v54 }
 0x345   : > { %v4419_v52 = vrot.slane %v4417_v45, 4  ;;  %v4422_v21 = vrot.slane %v4420_v51, 5 }
 0x347   : > { %6632 = vmatpush3.bf16.msra.mxu1 %v7211_v54  ;;  %v4430_v54 = vshrl.u32 %v8614_v28, 16  ;;  %v4423_v59 = vor.u32 %v4422_v21, %v4419_v52 }
 0x348   : > { %6633 = vmatprep.subr.bf16.mxu1 %v7212_v63 }
 0x349   : > { %v4432_v57 = vrot.slane %v4430_v54, 4  ;;  %v4424_v6 = vrot.slane %v4423_v59, 4 }
 0x34a   : > { %6626 = vmatmul.mubr.bf16.gmra.mrb[4].mxu1 %v5916_v3  ;;  %v4436_v3 = vshll.u32 %v8618_v34, 16 }
 0x34b   : > { %6634 = vmatpush3.bf16.msra.mxu1 %v7212_v63  ;;  %6645 = vmatprep.mubr.bf16.mxu1 %v5925_v0  ;;  %v7239_v63 = vld [vmem:[#allocation8 + $0x100] sm:$0xff]   ;;  %v4433_v43 = vor.u32 %v4432_v57, %v4428_v48  ;;  %v4429_v11 = vsel %vm8073_vm6, %v4424_v6, %v4428_v48 }
 0x34c   : > { %6635 = vmatprep.subr.bf16.mxu1 %v7213_v9  ;;  %v7246_v0 = vld [vmem:[#allocation2 + $0x24] sm:$0xff]  }
 0x34f   : > { %6636 = vmatpush3.bf16.msra.mxu1 %v7213_v9  ;;  %v4434_v9 = vrot.slane %v4433_v43, 4 }
 0x350   : > { %6637 = vmatprep.subr.bf16.mxu1 %v7214_v26 }
 0x353   : > { %6638 = vmatpush3.bf16.msra.mxu1 %v7214_v26 }
 0x354   : > { %6639 = vmatprep.subr.bf16.mxu1 %v7215_v25 }
 0x357   : > { %6640 = vmatpush3.bf16.msra.mxu1 %v7215_v25  ;;  %v4441_v25 = vshrl.u32 %v4407_v44, 16 }
 0x358   : > { %6641 = vmatprep.subr.bf16.mxu1 %v7216_v17 }
 0x35b   : > { %6642 = vmatpush3.bf16.msra.mxu1 %v7216_v17  ;;  %v4444_v17 = vshll.u32 %v4407_v44, 16 }
 0x35c   : > { %6643 = vmatprep.subr.bf16.mxu1 %v7217_v49 }
 0x35d   : > { %v4446_v22 = vrot.slane %v4444_v17, 5 }
 0x35f   : > { %6644 = vmatpush3.bf16.msra.mxu1 %v7217_v49  ;;  %v4450_v49 = vshll.u32 %v8625_v30, 16 }
 0x360   : > { %6653 = vmatprep.subr.bf16.mxu1 %v7219_v53 }
 0x361   : > { %v4452_v32 = vrot.slane %v4450_v49, 5  ;;  %v7251_v49 = vld [vmem:[#allocation8 + $0x148] sm:$0xff]  }
 0x362   : > { %6646 = vmatmul.mubr.bf16.vlgmr.msra.gmra.mrb[0].mxu1 %v5926_v27  ;;  %v7244_v27 = vld [vmem:[#allocation8 + $0x120] sm:$0xff]  }
 0x363   : > { %6654 = vmatpush3.bf16.msra.mxu1 %v7219_v53  ;;  %6649 = vmatprep.mubr.bf16.mxu1 %v5927_v29  ;;  %v4454_v53 = vshrl.u32 %v8625_v30, 16 }
 0x364   : > { %6655 = vmatprep.subr.bf16.mxu1 %v7221_v47 }
 0x367   : > { %6656 = vmatpush3.bf16.msra.mxu1 %v7221_v47  ;;  %v4443_v47 = vrot.slane %v4441_v25, 4 }
 0x368   : > { %6657 = vmatprep.subr.bf16.mxu1 %v7222_v33 }
 0x36a   : > { %6650 = vmatmul.mubr.bf16.gmra.mrb[4].mxu1 %v5928_v46  ;;  %v4467_v46 = vrot.slane %v4465_v41, 4 }
 0x36b   : > { %6658 = vmatpush3.bf16.msra.mxu1 %v7222_v33  ;;  %6669 = vmatprep.mubr.bf16.mxu1 %v5941_v18  ;;  %v4456_v33 = vrot.slane %v4454_v53, 4  ;;  %v4470_v18 = vrot.slane %v4468_v24, 5  ;;  %v4686_v24 = vrot.slane %v8618_v34, 5 }
 0x36c   : > { %6659 = vmatprep.subr.bf16.mxu1 %v7223_v56 }
 0x36f   : > { %6660 = vmatpush3.bf16.msra.mxu1 %v7223_v56 }
 0x370   : > { %6661 = vmatprep.subr.bf16.mxu1 %v7224_v62 }
 0x373   : > { %6662 = vmatpush3.bf16.msra.mxu1 %v7224_v62 }
 0x374   : > { %6663 = vmatprep.subr.bf16.mxu1 %v7225_v23 }
 0x377   : > { %6664 = vmatpush3.bf16.msra.mxu1 %v7225_v23  ;;  %v4413_v23 = vld [vmem:[#allocation2 + $0x30] sm:$0xf] }
 0x378   : > { %6665 = vmatprep.subr.bf16.mxu1 %v7227_v60 }
 0x37b   : > { %6666 = vmatpush3.bf16.msra.mxu1 %v7227_v60  ;;  %v8635_v60 = vld [vmem:[#allocation2 + $0x34] sm:$0xf] }
 0x37c   : > { %6667 = vmatprep.subr.bf16.mxu1 %v7229_v35 }
 0x37f   : > { %6668 = vmatpush3.bf16.msra.mxu1 %v7229_v35  ;;  %v8637_v35 = vld [vmem:[#allocation2 + $0x2c] sm:$0x1] }
 0x380   : > { %6677 = vmatprep.subr.bf16.mxu1 %v7230_v38  ;;  %v4484_v51 = vshll.u32 %v8637_v35, 16 }
 0x382   : > { %6670 = vmatmul.mubr.bf16.vlgmr.msra.gmra.mrb[0].mxu1 %v5942_v10  ;;  %v4438_v10 = vrot.slane %v4436_v3, 5  ;;  %v4486_v3 = vrot.slane %v4484_v51, 5  ;;  %v4668_v51 = vld [vmem:[#allocation2 + $0x30] sm:$0xe] }
 0x383   : > { %6678 = vmatpush3.bf16.msra.mxu1 %v7230_v38  ;;  %6673 = vmatprep.mubr.bf16.mxu1 %v5943_v1  ;;  %v7243_v1 = vld [vmem:[#allocation8 + $0x118] sm:$0xff]   ;;  %v4447_v38 = vor.u32 %v4446_v22, %v4443_v47 }
 0x384   : > { %6679 = vmatprep.subr.bf16.mxu1 %v7231_v61  ;;  %v4439_v8 = vsel %vm8073_vm6, %v4434_v9, %v4438_v10 }
 0x385   : > { %v5965_v26 = vcombine.low %v4429_v11, %v4439_v8  ;;  %v4448_v39 = vrot.slane %v4447_v38, 4 }
 0x387   : > { %6680 = vmatpush3.bf16.msra.mxu1 %v7231_v61  ;;  %v4457_v61 = vor.u32 %v4456_v33, %v4452_v32  ;;  %v7254_v33 = vld [vmem:[#allocation8 + $0x160] sm:$0xff]  }
 0x388   : > { %6681 = vmatprep.subr.bf16.mxu1 %v7232_v55 }
 0x389   : > { %v4458_v54 = vrot.slane %v4457_v61, 4 }
 0x38a   : > { %6674 = vmatmul.mubr.bf16.gmra.mrb[4].mxu1 %v5944_v15  ;;  %v8627_v15 = vld [vmem:[#allocation2 + $0x28] sm:$0xf] }
 0x38b   : > { %6682 = vmatpush3.bf16.msra.mxu1 %v7232_v55  ;;  %6693 = vmatprep.mubr.bf16.mxu1 %v7238_v36  ;;  %v4474_v29 = vshll.u32 %v8627_v15, 16  ;;  %v4478_v7 = vshrl.u32 %v8627_v15, 16  ;;  %v4460_v55 = vshll.u32 %v8633_v31, 16  ;;  %v4489_v36 = vshrl.u32 %v4413_v23, 16 }
 0x38c   : > { %6683 = vmatprep.subr.bf16.mxu1 %v7233_v37 }
 0x38d   : > { %v4476_v56 = vrot.slane %v4474_v29, 5  ;;  %v4480_v62 = vrot.slane %v4478_v7, 4  ;;  %v4491_v52 = vrot.slane %v4489_v36, 4  ;;  %v7252_v29 = vld [vmem:[#allocation8 + $0x150] sm:$0xff]   ;;  %v7257_v36 = vld [vmem:[#allocation8 + $0x178] sm:$0xff]  }
 0x38f   : > { %6684 = vmatpush3.bf16.msra.mxu1 %v7233_v37  ;;  %v4492_v37 = vshll.u32 %v4413_v23, 16  ;;  %v4481_v45 = vor.u32 %v4480_v62, %v4476_v56  ;;  %v4697_v62 = vrot.slane %v8627_v15, 5  ;;  %v4667_v23 = vld [vmem:[#allocation2 + $0x24] sm:$0xe]  ;;  %v4704_v15 = vrot.slane %v8635_v60, 5 }
 0x390   : > { %6685 = vmatprep.subr.bf16.mxu1 %v7234_v42 }
 0x391   : > { %v4494_v21 = vrot.slane %v4492_v37, 5  ;;  %v4482_v43 = vrot.slane %v4481_v45, 4  ;;  %v5979_v37 = vrot.slane %v4667_v23, 9 }
 0x393   : > { %6686 = vmatpush3.bf16.msra.mxu1 %v7234_v42  ;;  %v4498_v42 = vshll.u32 %v8635_v60, 16  ;;  %v4495_v6 = vor.u32 %v4494_v21, %v4491_v52  ;;  %v4487_v8 = vsel %vm8073_vm6, %v4482_v43, %v4486_v3  ;;  %v7259_v21 = vld [vmem:[#allocation8 + $0x188] sm:$0xff]   ;;  %v7261_v43 = vld [vmem:[#allocation8 + $0x198] sm:$0xff]   ;;  %v7262_v3 = vld [vmem:[#allocation8 + $0x1a0] sm:$0xff]  }
 0x394   : > { %6687 = vmatprep.subr.bf16.mxu1 %v7235_v12 }
 0x395   : > { %v4500_v48 = vrot.slane %v4498_v42, 5  ;;  %v4496_v20 = vrot.slane %v4495_v6, 4  ;;  %v4699_v42 = vrot.slane %v4697_v62, 4  ;;  %v7264_v6 = vld [vmem:[#allocation8 + $0x1b0] sm:$0xff]  }
 0x397   : > { %6688 = vmatpush3.bf16.msra.mxu1 %v7235_v12  ;;  %v4502_v12 = vshrl.u32 %v8635_v60, 16 }
 0x398   : > { %6689 = vmatprep.subr.bf16.mxu1 %v7236_v13 }
 0x399   : > { %v4504_v57 = vrot.slane %v4502_v12, 4  ;;  %v4700_v12 = vrot.slane %v8637_v35, 5 }
 0x39b   : > { %6690 = vmatpush3.bf16.msra.mxu1 %v7236_v13  ;;  %v4471_v13 = vor.u32 %v4470_v18, %v4467_v46  ;;  %v4505_v9 = vor.u32 %v4504_v57, %v4500_v48  ;;  %v4690_v46 = vrot.slane %v8625_v30, 5  ;;  %v7256_v18 = vld [vmem:[#allocation8 + $0x170] sm:$0xff]   ;;  %v4701_v45 = vsel %vm8158_vm9, %v4699_v42, %v4700_v12 }
 0x39c   : > { %6691 = vmatprep.subr.bf16.mxu1 %v7237_v19  ;;  %v7260_v57 = vld [vmem:[#allocation8 + $0x190] sm:$0xff]  }
 0x39d   : > { %v4472_v59 = vrot.slane %v4471_v13, 4  ;;  %v4506_v25 = vrot.slane %v4505_v9, 4  ;;  %v4692_v61 = vrot.slane %v4690_v46, 4  ;;  %v7258_v13 = vld [vmem:[#allocation8 + $0x180] sm:$0xff]  }
 0x39f   : > { %6692 = vmatpush3.bf16.msra.mxu1 %v7237_v19  ;;  %v4462_v19 = vrot.slane %v4460_v55, 5  ;;  %v4477_v11 = vsel %vm8073_vm6, %v4472_v59, %v4476_v56  ;;  %v4666_v56 = vld [vmem:[#allocation2 + $0x18] sm:$0xe]  ;;  %v4693_v55 = vrot.slane %v8633_v31, 5  ;;  %v4698_v31 = vsel %vm8158_vm9, %v5979_v37, %v4697_v62  ;;  %v8695_v62 = vld [vmem:[#allocation2 + $0x34] sm:$0xf] }
 0x3a0   : > { %6701 = vmatprep.subr.bf16.mxu1 %v7239_v63  ;;  %v5978_v38 = vrot.slane %v4666_v56, 9  ;;  %v5983_v35 = vcombine.low %v4698_v31, %v4701_v45  ;;  %v7266_v59 = vld [vmem:[#allocation2 + $0x18] sm:$0xff]   ;;  %v5037_v56 = vld [vmem:[#allocation2 + $0x30] sm:$0xf]  ;;  %v5101_v12 = vshll.u32 %v8695_v62, 16  ;;  %v7273_v45 = vld [vmem:[#allocation8 + $0x1e8] sm:$0xff]  }
 0x3a1   : > { %v5092_v37 = vshrl.u32 %v5037_v56, 16  ;;  %v5095_v42 = vshll.u32 %v5037_v56, 16 }
 0x3a2   : > { %6694 = vmatmul.mubr.bf16.vlgmr.msra.gmra.mrb[0].mxu1 %v7240_v4  ;;  %v8643_v4 = vld [vmem:[#allocation2 + $0x38] sm:$0x1]  ;;  %v4691_v30 = vsel %vm8158_vm9, %v5978_v38, %v4690_v46  ;;  %v8693_v46 = vld [vmem:[#allocation2 + $0x28] sm:$0xf] }
 0x3a3   : > { %6702 = vmatpush3.bf16.msra.mxu1 %v7239_v63  ;;  %6697 = vmatprep.mubr.bf16.mxu1 %v7246_v0  ;;  %v7249_v63 = vld [vmem:[#allocation8 + $0x138] sm:$0xff]   ;;  %v4453_v0 = vsel %vm8073_vm6, %v4448_v39, %v4452_v32  ;;  %v4508_v10 = vshll.u32 %v8643_v4, 16  ;;  %v4707_v52 = vrot.slane %v8643_v4, 5  ;;  %v7263_v4 = vld [vmem:[#allocation8 + $0x1a8] sm:$0xff]  }
 0x3a4   : > { %6703 = vmatprep.subr.bf16.mxu1 %v7241_v5  ;;  %v7253_v32 = vld [vmem:[#allocation8 + $0x158] sm:$0xff]  }
 0x3a5   : > { %v4510_v17 = vrot.slane %v4508_v10, 5 }
 0x3a7   : > { %6704 = vmatpush3.bf16.msra.mxu1 %v7241_v5  ;;  %v4463_v5 = vsel %vm8073_vm6, %v4458_v54, %v4462_v19  ;;  %v5980_v54 = vrot.slane %v4668_v51, 9  ;;  %v4706_v19 = vrot.slane %v4704_v15, 4  ;;  %v8701_v51 = vld [vmem:[#allocation2 + $0x2c] sm:$0x1] }
 0x3a8   : > { %6705 = vmatprep.subr.bf16.mxu1 %v7242_v14  ;;  %v5966_v44 = vcombine.low %v4453_v0, %v4463_v5  ;;  %v5031_v0 = vld [vmem:[#allocation2 + $0x18] sm:$0xf]  ;;  %v8682_v5 = vld [vmem:[#allocation2 + $0x1c] sm:$0xf] }
 0x3a9   : > { %v4705_v60 = vsel %vm8158_vm9, %v5980_v54, %v4704_v15  ;;  %v5044_v9 = vshrl.u32 %v5031_v0, 16  ;;  %v5047_v10 = vshll.u32 %v5031_v0, 16  ;;  %v5097_v54 = vrot.slane %v5095_v42, 5  ;;  %v7275_v0 = vld [vmem:[#allocation8 + $0x1f0] sm:$0xff]  }
 0x3aa   : > { %6698 = vmatmul.mubr.bf16.gmra.mrb[4].mxu1 %v7248_v50  ;;  %v4683_v50 = vrot.slane %v8614_v28, 5  ;;  %v4511_v28 = vsel %vm8073_vm6, %v4506_v25, %v4510_v17  ;;  %v7267_v25 = vld [vmem:[#allocation8 + $0x1c0] sm:$0xff]  }
 0x3ab   : > { %6706 = vmatpush3.bf16.msra.mxu1 %v7242_v14  ;;  %6717 = vmatprep.mubr.bf16.mxu1 %v5965_v26  ;;  %v7250_v14 = vld [vmem:[#allocation8 + $0x140] sm:$0xff]   ;;  %v4665_v26 = vld [vmem:[#allocation2 + $0xc] sm:$0xe] }
 0x3ac   : > { %6707 = vmatprep.subr.bf16.mxu1 %v7243_v1  ;;  %v5977_v53 = vrot.slane %v4665_v26, 9  ;;  %v4685_v41 = vrot.slane %v4683_v50, 4  ;;  %v5049_v26 = vrot.slane %v5047_v10, 5 }
 0x3ae   : > { %v4684_v7 = vsel %vm8158_vm9, %v5977_v53, %v4683_v50  ;;  %v4687_v47 = vsel %vm8158_vm9, %v4685_v41, %v4686_v24  ;;  %v5046_v50 = vrot.slane %v5044_v9, 4  ;;  %v7268_v41 = vld [vmem:[#allocation2 + $0x24] sm:$0xff]   ;;  %v7274_v24 = vld [vmem:[#allocation2 + $0x30] sm:$0xff]  }
 0x3af   : > { %6708 = vmatpush3.bf16.msra.mxu1 %v7243_v1  ;;  %v5967_v1 = vcombine.low %v4477_v11, %v4487_v8  ;;  %v5981_v34 = vcombine.low %v4684_v7, %v4687_v47  ;;  %v5057_v11 = vshrl.u32 %v8682_v5, 16  ;;  %v7265_v8 = vld [vmem:[#allocation8 + $0x1b8] sm:$0xff]   ;;  %v7270_v47 = vld [vmem:[#allocation8 + $0x1d0] sm:$0xff]  }
 0x3b0   : > { %6709 = vmatprep.subr.bf16.mxu1 %v7244_v27  ;;  %v5050_v17 = vor.u32 %v5049_v26, %v5046_v50 }
 0x3b3   : > { %6710 = vmatpush3.bf16.msra.mxu1 %v7244_v27  ;;  %v4501_v27 = vsel %vm8073_vm6, %v4496_v20, %v4500_v48  ;;  %v4708_v48 = vsel %vm8158_vm9, %v4706_v19, %v4707_v52  ;;  %v8686_v20 = vld [vmem:[#allocation2 + $0x20] sm:$0x1]  ;;  %v5103_v19 = vrot.slane %v5101_v12, 5  ;;  %v7280_v12 = vld [vmem:[#allocation8 + $0x210] sm:$0xff]  }
 0x3b4   : > { %6711 = vmatprep.subr.bf16.mxu1 %v7245_v16  ;;  %v5968_v22 = vcombine.low %v4501_v27, %v4511_v28  ;;  %v5063_v53 = vshll.u32 %v8686_v20, 16  ;;  %v7269_v27 = vld [vmem:[#allocation8 + $0x1c8] sm:$0xff]   ;;  %v5051_v28 = vrot.slane %v5050_v17, 4 }
 0x3b6   : > { %v5065_v7 = vrot.slane %v5063_v53, 5 }
 0x3b7   : > { %6712 = vmatpush3.bf16.msra.mxu1 %v7245_v16  ;;  %v7255_v16 = vld [vmem:[#allocation8 + $0x168] sm:$0xff]  }
 0x3b8   : > { %6713 = vmatprep.subr.bf16.mxu1 %v7247_v40 }
 0x3bb   : > { %6714 = vmatpush3.bf16.msra.mxu1 %v7247_v40  ;;  %v4694_v40 = vsel %vm8158_vm9, %v4692_v61, %v4693_v55  ;;  %v5077_v61 = vshll.u32 %v8693_v46, 16  ;;  %v5081_v55 = vshrl.u32 %v8693_v46, 16 }
 0x3bc   : > { %6715 = vmatprep.subr.bf16.mxu1 %v7249_v63  ;;  %v5982_v39 = vcombine.low %v4691_v30, %v4694_v40  ;;  %v5105_v30 = vshrl.u32 %v8695_v62, 16 }
 0x3bd   : > { %v5083_v31 = vrot.slane %v5081_v55, 4 }
 0x3be   : > { %v5107_v52 = vrot.slane %v5105_v30, 4 }
 0x3bf   : > { %6716 = vmatpush3.bf16.msra.mxu1 %v7249_v63  ;;  %v5984_v63 = vcombine.low %v4705_v60, %v4708_v48  ;;  %v8705_v60 = vld [vmem:[#allocation2 + $0x38] sm:$0x1] }
 0x3c0   : > { %6725 = vmatprep.subr.bf16.mxu1 %v7250_v14  ;;  %v5108_v9 = vor.u32 %v5107_v52, %v5103_v19  ;;  %v5111_v10 = vshll.u32 %v8705_v60, 16 }
 0x3c2   : > { %6718 = vmatmul.mubr.bf16.vlgmr.msra.gmra.mrb[0].mxu1 %v5966_v44  ;;  %v5113_v53 = vrot.slane %v5111_v10, 5 }
 0x3c3   : > { %6726 = vmatpush3.bf16.msra.mxu1 %v7250_v14  ;;  %6721 = vmatprep.mubr.bf16.mxu1 %v5967_v1  ;;  %v5053_v14 = vshll.u32 %v8682_v5, 16  ;;  %v5059_v1 = vrot.slane %v5057_v11, 4 }
 0x3c4   : > { %6727 = vmatprep.subr.bf16.mxu1 %v7251_v49 }
 0x3c5   : > { %v5055_v44 = vrot.slane %v5053_v14, 5 }
 0x3c7   : > { %6728 = vmatpush3.bf16.msra.mxu1 %v7251_v49  ;;  %v5060_v49 = vor.u32 %v5059_v1, %v5055_v44 }
 0x3c8   : > { %6729 = vmatprep.subr.bf16.mxu1 %v7252_v29 }
 0x3ca   : > { %6722 = vmatmul.mubr.bf16.gmra.mrb[4].mxu1 %v5968_v22  ;;  %v5056_v22 = vsel %vm8073_vm6, %v5051_v28, %v5055_v44 }
 0x3cb   : > { %6730 = vmatpush3.bf16.msra.mxu1 %v7252_v29  ;;  %6741 = vmatprep.mubr.bf16.mxu1 %v5981_v34  ;;  %v5061_v29 = vrot.slane %v5060_v49, 4  ;;  %v5109_v49 = vrot.slane %v5108_v9, 4 }
 0x3cc   : > { %6731 = vmatprep.subr.bf16.mxu1 %v7253_v32 }
 0x3cd   : > { %v5066_v34 = vsel %vm8073_vm6, %v5061_v29, %v5065_v7 }
 0x3cf   : > { %6732 = vmatpush3.bf16.msra.mxu1 %v7253_v32  ;;  %v7276_v32 = vld [vmem:[#allocation2 + $0x3c] sm:$0xff]  }
 0x3d0   : > { %6733 = vmatprep.subr.bf16.mxu1 %v7254_v33 }
 0x3d3   : > { %6734 = vmatpush3.bf16.msra.mxu1 %v7254_v33  ;;  %v6005_v33 = vcombine.low %v5056_v22, %v5066_v34  ;;  %v5114_v34 = vsel %vm8073_vm6, %v5109_v49, %v5113_v53 }
 0x3d4   : > { %6735 = vmatprep.subr.bf16.mxu1 %v7255_v16 }
 0x3d7   : > { %6736 = vmatpush3.bf16.msra.mxu1 %v7255_v16  ;;  %v5034_v16 = vld [vmem:[#allocation2 + $0x24] sm:$0xf] }
 0x3d8   : > { %6737 = vmatprep.subr.bf16.mxu1 %v7256_v18  ;;  %v5068_v23 = vshrl.u32 %v5034_v16, 16  ;;  %v5071_v38 = vshll.u32 %v5034_v16, 16 }
 0x3da   : > { %v5070_v40 = vrot.slane %v5068_v23, 4  ;;  %v5073_v15 = vrot.slane %v5071_v38, 5 }
 0x3db   : > { %6738 = vmatpush3.bf16.msra.mxu1 %v7256_v18  ;;  %v7271_v18 = vld [vmem:[#allocation8 + $0x1d8] sm:$0xff]  }
 0x3dc   : > { %6739 = vmatprep.subr.bf16.mxu1 %v7257_v36  ;;  %v5074_v48 = vor.u32 %v5073_v15, %v5070_v40 }
 0x3de   : > { %v5075_v14 = vrot.slane %v5074_v48, 4 }
 0x3df   : > { %6740 = vmatpush3.bf16.msra.mxu1 %v7257_v36  ;;  %v7272_v36 = vld [vmem:[#allocation8 + $0x1e0] sm:$0xff]  }
 0x3e0   : > { %6749 = vmatprep.subr.bf16.mxu1 %v7258_v13 }
 0x3e2   : > { %6742 = vmatmul.mubr.bf16.vlgmr.msra.gmra.mrb[0].mxu1 %v5982_v39  ;;  %v5040_v39 = vld [vmem:[#allocation2 + $0x3c] sm:$0xf] }
 0x3e3   : > { %6750 = vmatpush3.bf16.msra.mxu1 %v7258_v13  ;;  %6745 = vmatprep.mubr.bf16.mxu1 %v5983_v35  ;;  %v5079_v13 = vrot.slane %v5077_v61, 5  ;;  %v5094_v35 = vrot.slane %v5092_v37, 4  ;;  %v7279_v61 = vld [vmem:[#allocation8 + $0x208] sm:$0xff]   ;;  %v5313_v37 = vrot.slane %v8686_v20, 5 }
 0x3e4   : > { %6751 = vmatprep.subr.bf16.mxu1 %v7259_v21 }
 0x3e7   : > { %6752 = vmatpush3.bf16.msra.mxu1 %v7259_v21  ;;  %v8703_v21 = vld [vmem:[#allocation2 + $0x40] sm:$0xf] }
 0x3e8   : > { %6753 = vmatprep.subr.bf16.mxu1 %v7260_v57 }
 0x3ea   : > { %6746 = vmatmul.mubr.bf16.gmra.mrb[4].mxu1 %v5984_v63  ;;  %v5087_v63 = vshll.u32 %v8701_v51, 16 }
 0x3eb   : > { %6754 = vmatpush3.bf16.msra.mxu1 %v7260_v57  ;;  %6765 = vmatprep.mubr.bf16.mxu1 %v7266_v59  ;;  %v5084_v57 = vor.u32 %v5083_v31, %v5079_v13  ;;  %v5116_v59 = vshrl.u32 %v5040_v39, 16  ;;  %v7282_v31 = vld [vmem:[#allocation8 + $0x220] sm:$0xff]  }
 0x3ec   : > { %6755 = vmatprep.subr.bf16.mxu1 %v7261_v43 }
 0x3ed   : > { %v5085_v11 = vrot.slane %v5084_v57, 4  ;;  %v5118_v50 = vrot.slane %v5116_v59, 4  ;;  %v5320_v57 = vrot.slane %v8701_v51, 5 }
 0x3ef   : > { %6756 = vmatpush3.bf16.msra.mxu1 %v7261_v43  ;;  %v5119_v43 = vshll.u32 %v5040_v39, 16  ;;  %v7284_v39 = vld [vmem:[#allocation8 + $0x230] sm:$0xff]  }
 0x3f0   : > { %6757 = vmatprep.subr.bf16.mxu1 %v7262_v3 }
 0x3f1   : > { %v5121_v26 = vrot.slane %v5119_v43, 5 }
 0x3f3   : > { %6758 = vmatpush3.bf16.msra.mxu1 %v7262_v3  ;;  %v5125_v3 = vshll.u32 %v8703_v21, 16  ;;  %v5122_v28 = vor.u32 %v5121_v26, %v5118_v50  ;;  %v6113_v26 = vld [vmem:[%s5491_s17 + $0x8] sm:$0xff]  }
 0x3f4   : > { %6759 = vmatprep.subr.bf16.mxu1 %v7263_v4  ;;  %v6083_v49 = vunpack.c.l.bf16 %v6113_v26 }
 0x3f5   : > { %v5127_v44 = vrot.slane %v5125_v3, 5  ;;  %v5123_v56 = vrot.slane %v5122_v28, 4  ;;  %v5327_v3 = vrot.slane %v8705_v60, 5 }
 0x3f7   : > { %6760 = vmatpush3.bf16.msra.mxu1 %v7263_v4  ;;  %v5129_v4 = vshrl.u32 %v8703_v21, 16  ;;  %v5128_v42 = vsel %vm8073_vm6, %v5123_v56, %v5127_v44 }
 0x3f8   : > { %6761 = vmatprep.subr.bf16.mxu1 %v7264_v6 }
 0x3f9   : > { %v5131_v1 = vrot.slane %v5129_v4, 4 }
 0x3fb   : > { %6762 = vmatpush3.bf16.msra.mxu1 %v7264_v6  ;;  %v5098_v6 = vor.u32 %v5097_v54, %v5094_v35  ;;  %v5132_v29 = vor.u32 %v5131_v1, %v5127_v44  ;;  %v5293_v35 = vld [vmem:[#allocation2 + $0x24] sm:$0xe]  ;;  %v5324_v54 = vrot.slane %v8695_v62, 5  ;;  %v5331_v62 = vrot.slane %v8703_v21, 5  ;;  %v6035_v44 = vld [vmem:[%s8840_s5] ss:$0 sm:$0xff] }
 0x3fc   : > { %6763 = vmatprep.subr.bf16.mxu1 %v7265_v8  ;;  %v6018_v52 = vrot.slane %v5293_v35, 9  ;;  %v6078_v1 = vld [vmem:[%s5491_s17] sm:$0xff]  }
 0x3fd   : > { %v5099_v17 = vrot.slane %v5098_v6, 4  ;;  %v5133_v23 = vrot.slane %v5132_v29, 4  ;;  %v5326_v43 = vrot.slane %v5324_v54, 4  ;;  %v5295_v6 = vld [vmem:[#allocation2 + $0x3c] sm:$0xe]  ;;  %v6079_v58 = vunpack.c.l.bf16 %v6078_v1 }
 0x3fe   : > { %v6020_v10 = vrot.slane %v5295_v6, 9  ;;  %v6084_v29 = vunpack.c.h.bf16 %v6113_v26 }
 0x3ff   : > { %6764 = vmatpush3.bf16.msra.mxu1 %v7265_v8  ;;  %v5089_v8 = vrot.slane %v5087_v63, 5  ;;  %v5104_v22 = vsel %vm8073_vm6, %v5099_v17, %v5103_v19  ;;  %v5294_v19 = vld [vmem:[#allocation2 + $0x30] sm:$0xe]  ;;  %v7285_v63 = vld [vmem:[#allocation8 + $0x238] sm:$0xff]   ;;  %v6036_v17 = vld [vmem:[%s8908_s14] ss:$0 sm:$0xff] }
 0x400   : > { %6773 = vmatprep.subr.bf16.mxu1 %v7267_v25  ;;  %v6019_v59 = vrot.slane %v5294_v19, 9  ;;  %v5332_v21 = vsel %vm8158_vm9, %v6020_v10, %v5331_v62  ;;  %s7378_s14 = scalar_lea.vmem %s7377_s18, 1024 }
 0x401   : > { %p7380_p2 = scmp.lt.s32.totalorder %s7378_s14, %s7372_s20 }
 0x402   : > { %6766 = vmatmul.mubr.bf16.vlgmr.msra.gmra.mrb[0].mxu1 %v7268_v41  ;;  %v8711_v41 = vld [vmem:[#allocation2 + $0x44] sm:$0x1]  ;;  %v5325_v51 = vsel %vm8158_vm9, %v6019_v59, %v5324_v54 }
 0x403   : > { %6774 = vmatpush3.bf16.msra.mxu1 %v7267_v25  ;;  %6769 = vmatprep.mubr.bf16.mxu1 %v7274_v24  ;;  %v7277_v25 = vld [vmem:[#allocation8 + $0x1f8] sm:$0xff]   ;;  %v5080_v24 = vsel %vm8073_vm6, %v5075_v14, %v5079_v13  ;;  %v5135_v7 = vshll.u32 %v8711_v41, 16  ;;  %v5333_v14 = vrot.slane %v5331_v62, 4  ;;  %p7381_p6 = por %p7380_p2, %p7379_p12 }
 0x404   : > { %6775 = vmatprep.subr.bf16.mxu1 %v7269_v27  ;;  %v7281_v13 = vld [vmem:[#allocation8 + $0x218] sm:$0xff]  }
 0x405   : > { %v5137_v38 = vrot.slane %v5135_v7, 5  ;;  %p7382_p10 = pnand %p7381_p6, %p7375_p8 }
 0x407   : > { %6776 = vmatpush3.bf16.msra.mxu1 %v7269_v27  ;;  %v5090_v27 = vsel %vm8073_vm6, %v5085_v11, %v5089_v8  ;;  %v5334_v11 = vrot.slane %v8711_v41, 5 }
 0x408   : > { %6777 = vmatprep.subr.bf16.mxu1 %v7270_v47  ;;  %v6006_v16 = vcombine.low %v5080_v24, %v5090_v27 }
 0x409   : > { %v5335_v8 = vsel %vm8158_vm9, %v5333_v14, %v5334_v11 }
 0x40a   : > { %6770 = vmatmul.mubr.bf16.gmra.mrb[4].mxu1 %v7276_v32  ;;  %v5310_v32 = vrot.slane %v8682_v5, 5  ;;  %v5138_v5 = vsel %vm8073_vm6, %v5133_v23, %v5137_v38  ;;  %v6024_v50 = vcombine.low %v5332_v21, %v5335_v8  ;;  %v6115_v23 = vld [vmem:[%s5491_s17 + $0x18] sm:$0xff]  }
 0x40b   : > { %6778 = vmatpush3.bf16.msra.mxu1 %v7270_v47  ;;  %6789 = vmatprep.mubr.bf16.mxu1 %v6005_v33  ;;  %v7278_v47 = vld [vmem:[#allocation8 + $0x200] sm:$0xff]   ;;  %v5292_v33 = vld [vmem:[#allocation2 + $0x18] sm:$0xe]  ;;  %v6008_v15 = vcombine.low %v5128_v42, %v5138_v5  ;;  %v6091_v5 = vunpack.c.l.bf16 %v6115_v23 }
 0x40c   : > { %6779 = vmatprep.subr.bf16.mxu1 %v7271_v18  ;;  %v6017_v55 = vrot.slane %v5292_v33, 9 }
 0x40e   : > { %v5311_v30 = vsel %vm8158_vm9, %v6017_v55, %v5310_v32 }
 0x40f   : > { %6780 = vmatpush3.bf16.msra.mxu1 %v7271_v18  ;;  %v6007_v18 = vcombine.low %v5104_v22, %v5114_v34  ;;  %v6080_v34 = vunpack.c.h.bf16 %v6078_v1 }
 0x410   : > { %6781 = vmatprep.subr.bf16.mxu1 %v7272_v36 }
 0x413   : > { %6782 = vmatpush3.bf16.msra.mxu1 %v7272_v36  ;;  %v5312_v36 = vrot.slane %v5310_v32, 4 }
 0x414   : > { %6783 = vmatprep.subr.bf16.mxu1 %v7273_v45 }
 0x415   : > { %v5314_v40 = vsel %vm8158_vm9, %v5312_v36, %v5313_v37 }
 0x416   : > { %v6021_v20 = vcombine.low %v5311_v30, %v5314_v40 }
 0x417   : > { %6784 = vmatpush3.bf16.msra.mxu1 %v7273_v45  ;;  %v5317_v45 = vrot.slane %v8693_v46, 5 }
 0x418   : > { %6785 = vmatprep.subr.bf16.mxu1 %v7275_v0 }
 0x419   : > { %v5319_v48 = vrot.slane %v5317_v45, 4  ;;  %v5318_v46 = vsel %vm8158_vm9, %v6018_v52, %v5317_v45 }
 0x41b   : > { %6786 = vmatpush3.bf16.msra.mxu1 %v7275_v0  ;;  %v5321_v4 = vsel %vm8158_vm9, %v5319_v48, %v5320_v57  ;;  %v5328_v0 = vsel %vm8158_vm9, %v5326_v43, %v5327_v3 }
 0x41c   : > { %6787 = vmatprep.subr.bf16.mxu1 %v7277_v25  ;;  %v6022_v60 = vcombine.low %v5318_v46, %v5321_v4  ;;  %v6023_v9 = vcombine.low %v5325_v51, %v5328_v0 }
 0x41f   : > { %6788 = vmatpush3.bf16.msra.mxu1 %v7277_v25 }
 0x420   : > { %6797 = vmatprep.subr.bf16.mxu1 %v7278_v47 }
 0x422   : > { %6790 = vmatmul.mubr.bf16.vlgmr.msra.gmra.mrb[0].mxu1 %v6006_v16 }
 0x423   : > { %6798 = vmatpush3.bf16.msra.mxu1 %v7278_v47  ;;  %6793 = vmatprep.mubr.bf16.mxu1 %v6007_v18 }
 0x424   : > { %6799 = vmatprep.subr.bf16.mxu1 %v7279_v61 }
 0x427   : > { %6800 = vmatpush3.bf16.msra.mxu1 %v7279_v61  ;;  %v6114_v61 = vld [vmem:[%s5491_s17 + $0x10] sm:$0xff]   ;;  %s8766_s17 = scalar_lea.hbm %s8911_s1, %s6049_s21 }
 0x428   : > { %6801 = vmatprep.subr.bf16.mxu1 %v7280_v12  ;;  %v6088_v48 = vunpack.c.h.bf16 %v6114_v61 }
 0x42a   : > { %6794 = vmatmul.mubr.bf16.gmra.mrb[4].mxu1 %v6008_v15 }
 0x42b   : > { %6802 = vmatpush3.bf16.msra.mxu1 %v7280_v12  ;;  %6813 = vmatprep.mubr.bf16.mxu1 %v6021_v20  ;;  %v6087_v20 = vunpack.c.l.bf16 %v6114_v61 }
 0x42c   : > { %6803 = vmatprep.subr.bf16.mxu1 %v7281_v13 }
 0x42f   : > { %6804 = vmatpush3.bf16.msra.mxu1 %v7281_v13 }
 0x430   : > { %6805 = vmatprep.subr.bf16.mxu1 %v7282_v31 }
 0x433   : > { %6806 = vmatpush3.bf16.msra.mxu1 %v7282_v31 }
 0x434   : > { %6807 = vmatprep.subr.bf16.mxu1 %v7283_v2 }
 0x437   : > { %6808 = vmatpush3.bf16.msra.mxu1 %v7283_v2 }
 0x438   : > { %6809 = vmatprep.subr.bf16.mxu1 %v7284_v39 }
 0x43b   : > { %6810 = vmatpush3.bf16.msra.mxu1 %v7284_v39  ;;  %v6092_v39 = vunpack.c.h.bf16 %v6115_v23 }
 0x43c   : > { %6811 = vmatprep.subr.bf16.mxu1 %v7285_v63 }
 0x43f   : > { %6812 = vmatpush3.bf16.msra.mxu1 %v7285_v63 }
 0x442   : > { %6814 = vmatmul.mubr.bf16.vlgmr.msra.gmra.mrb[0].mxu1 %v6022_v60 }
 0x443   : > { %6817 = vmatprep.mubr.bf16.mxu1 %v6023_v9 }
 0x44a   : > { %6818 = vmatmul.mubr.bf16.gmra.mrb[4].mxu1 %v6024_v50 }
 0x515   : > { %v6815_v25 = vpop.f32.mrb[0].mxu1 }
 0x516   : > { %v5517_v53 = vmul.f32 %v6815_v25, %v6035_v44  ;;  %v5450_v41 = vpop.f32.mrb[1].mxu1 }
 0x517   : > { %v5515_v24 = vmul.f32 %v6035_v44, %v5450_v41  ;;  %v6816_v27 = vpop.f32.mrb[2].mxu1 }
 0x518   : > { %v5532_v28 = vadd.f32 %v6036_v17, %v5517_v53  ;;  %v5518_v7 = vmul.f32 %v6816_v27, %v6035_v44  ;;  %v5453_v47 = vpop.f32.mrb[3].mxu1 }
 0x519   : > { %v5530_v22 = vadd.f32 %v6036_v17, %v5515_v24  ;;  %v5516_v32 = vmul.f32 %v6035_v44, %v5453_v47 }
 0x51a   : > { %v5540_v33 = vadd.f32 %v6083_v49, %v5532_v28  ;;  %v5533_v16 = vadd.f32 %v6036_v17, %v5518_v7 }
 0x51b   : > { %v5538_v18 = vadd.f32 %v6079_v58, %v5530_v22  ;;  %v5531_v56 = vadd.f32 %v6036_v17, %v5516_v32 }
 0x51c   : > { %v5541_v38 = vadd.f32 %v6084_v29, %v5533_v16  ;;  %v5548_v37 = vmax.f32 %v5540_v33, 0.0 }
 0x51d   : > { %v5539_v55 = vadd.f32 %v6080_v34, %v5531_v56  ;;  %v6819_v36 = vpop.f32.mrb[4].mxu1  ;;  %v5546_v40 = vmax.f32 %v5538_v18, 0.0 }
 0x51e   : > { %v5549_v42 = vmax.f32 %v5541_v38, 0.0  ;;  %v5521_v12 = vmul.f32 %v6819_v36, %v6035_v44  ;;  %v5466_v30 = vpop.f32.mrb[5].mxu1 }
 0x51f   : > { %v5547_v15 = vmax.f32 %v5539_v55, 0.0  ;;  %v5519_v13 = vmul.f32 %v6035_v44, %v5466_v30  ;;  %v6820_v31 = vpop.f32.mrb[6].mxu1 }
 0x520   : > { %v6101_v2 = vpack.c.bf16 %v5549_v42, %v5548_v37  ;;  %v5536_v45 = vadd.f32 %v6036_v17, %v5521_v12  ;;  %v5522_v35 = vmul.f32 %v6820_v31, %v6035_v44  ;;  %v5469_v54 = vpop.f32.mrb[7].mxu1 }
 0x521   : > { %v6096_v19 = vpack.c.bf16 %v5547_v15, %v5546_v40  ;;  %v5534_v52 = vadd.f32 %v6036_v17, %v5519_v13  ;;  %v5520_v57 = vmul.f32 %v6035_v44, %v5469_v54 }
 0x522   : > { %6116 = vst [vmem:[%s7843_s16 + $0x8] sm:$0xff] %v6101_v2   ;;  %v5544_v63 = vadd.f32 %v6091_v5, %v5536_v45  ;;  %v5537_v59 = vadd.f32 %v6036_v17, %v5522_v35 }
 0x523   : > { %6097 = vst [vmem:[%s7843_s16] sm:$0xff] %v6096_v19   ;;  %v5542_v43 = vadd.f32 %v6087_v20, %v5534_v52  ;;  %v5535_v3 = vadd.f32 %v6036_v17, %v5520_v57 }
 0x524   : > { %v5545_v46 = vadd.f32 %v6092_v39, %v5537_v59  ;;  %v5552_v62 = vmax.f32 %v5544_v63, 0.0 }
 0x525   : > { %v5543_v4 = vadd.f32 %v6088_v48, %v5535_v3  ;;  %v5550_v0 = vmax.f32 %v5542_v43, 0.0 }
 0x526   : > { %v5553_v51 = vmax.f32 %v5545_v46, 0.0 }
 0x527   : > { %v5551_v6 = vmax.f32 %v5543_v4, 0.0 }
 0x528   : > { %v6111_v60 = vpack.c.bf16 %v5553_v51, %v5552_v62 }
 0x529   : > { %v6106_v9 = vpack.c.bf16 %v5551_v6, %v5550_v0 }
 0x52a   : > { %6118 = vst [vmem:[%s7843_s16 + $0x18] sm:$0xff] %v6111_v60  }
 0x52b   : > { %6117 = vst [vmem:[%s7843_s16 + $0x10] sm:$0xff] %v6106_v9  }
 0x52c   : > { %7385 = shalt.err (!%p7382_p10)
}
 0x52d   : > { %s7386_s9 = scalar_lea.hbm %s8766_s17, 512  ;;  %s7390_s15 = scalar_lea.hbm %s8911_s1, 4096 }
 0x52e   : > { %p7387_p1 = scmp.ne.s32.totalorder %s8766_s17, %s7386_s9  ;;  %p7391_p7 = scmp.lt.u32.totalorder %s8766_s17, %s8911_s1 }
 0x52f   : > { %p7392_p13 = scmp.lt.u32.totalorder %s7390_s15, %s7386_s9  ;;  %p7394_p11 = scmp.lt.u32.totalorder %s7386_s9, %s8766_s17 }
 0x530   : > { %p7388_p4 = pnand %p7387_p1, %p8912_p0 }
 0x531   : > { %p7393_p9 = por %p7392_p13, %p7391_p7 }
 0x532   : > { %p7389_p3 = pneg %p7388_p4 }
 0x533   : > { %p7395_p5 = por %p7394_p11, %p7393_p9 }
 0x535   : > { %p7396_p8 = pnand %p7395_p5, %p7389_p3 }
 0x537   : > { %7399 = shalt.err (!%p7396_p8)
}
 0x538   : > { %s7509_s21 = smov 64   ;;  %s7510_s8 = smov 4  }
 0x539   : > { %6991 = dma.vmem_to_hbm [thread:$0]  (%p8912_p0), %s8768_s6, 512, %s8766_s17, %s8774_s24, %s7509_s21, %s7509_s21, %s7510_s8  }
 0x53a PF: > { %s8913_s7 = sld [smem:[#allocation13_spill]]  ;;  %s8914_s20 = sld [smem:[#allocation17_spill]] }
 0x53b   : > { %p7013_p12 = scmp.ge.s32.totalorder %s7498_s11, 2 }
 0x540   : > { %s5626_s19 = sand.u32 1, %s8913_s7   ;;  %p8915_p2 = scmp.ne.s32.totalorder %s8914_s20, 0 }
 0x541   : > { %s5627_s18 = scalar_lea.sflag [#allocation5], %s5626_s19 }
 0x542   : > { %p7005_p6 = pnand %p7013_p12, %p8915_p2 }
 0x544   : > { %7453 = dma.done.wait (!%p7005_p6), %s5627_s18, 512  }
 0x545   : > { %7455 = vsyncadd (!%p7005_p6), %s5627_s18, 4294966784  ;;  %s24_s11 = sadd.s32 1, %s7498_s11   ;;  %s8916_s30 = sld [smem:[#allocation15_spill]] }
 0x546   : > { %p21_p10 = scmp.ge.s32.totalorder %s24_s11, 10   ;;  %s8917_s9 = sld [smem:[#allocation18_spill]] }
 0x547   : > { %s8918_s24 = smov %s7462_s25  ;;  %s8919_s25 = smov %s7466_s26 }
 0x548   : > { %s8920_s26 = smov %s7732_s4  ;;  %s8921_s27 = smov %s7474_s28 }
 0x549   : > { %s8922_s28 = smov %s7478_s29  ;;  %s8923_s29 = smov %s7727_s12 }
 0x54a   : > { %s8924_s8 = smov %s7494_s10  ;;  %s8925_s10 = smov %s8931_s22 }
 0x54b   :  { %23 = sbr.rel (!%p21_p10) target bundleno = 15 (0xf), region = 129 }
 0x552   :  { %5632 = vsyncpa [#allocation4], 1 }
 0x553   :  { %5634 = vsyncpa [#allocation4 + $0x1], 1 }
 0x554   :  { %5635 = vsyncpa [#allocation7], 1 }
 0x555   :  { %5636 = vsyncpa [#allocation5], 1 }
 0x556   :  { %5638 = vsyncpa [#allocation5 + $0x1], 1 }

// kernel: _pallas_forward.1
= control target key start
LH: loop header
LB: loop body
LE: loop exit
PB: predicated region body
PF: predicated region fallthrough
CT: control target
= control target key end

     0   :  { %s8835_s0 = inlined_call_operand.hbm [shape: bf16[2,16,16,128], index: 0, kind: input, shape index: {}]   ;;  %s8836_s1 = inlined_call_operand.hbm [shape: bf16[1152,128], index: 1, kind: input, shape index: {}]   ;;  %s8837_s2 = inlined_call_operand.vmem [shape: f32[1,128], index: 2, kind: input, shape index: {}]   ;;  %s8838_s3 = inlined_call_operand.vmem [shape: f32[1,128], index: 3, kind: input, shape index: {}]   ;;  %s8839_s4 = inlined_call_operand.hbm [shape: bf16[1152,128], index: 4, kind: input, shape index: {}]   ;;  %s8840_s5 = inlined_call_operand.vmem [shape: f32[1,128], index: 5, kind: input, shape index: {}]   ;;  %s8841_s6 = inlined_call_operand.vmem [shape: f32[1,128], index: 6, kind: input, shape index: {}]   ;;  %s8842_s7 = inlined_call_operand.hbm [shape: bf16[2,16,16,128], index: 7, kind: output, shape index: {}]  }
   0x1   :  { %8857 = sst [smem:[#allocation19_spill]] %s8836_s1 }
   0x2   :  { %8858 = sst [smem:[#allocation20_spill]] %s8839_s4 }
   0x3   :  { %8859 = sst [smem:[#allocation21_spill]] %s8841_s6 }
   0x4   :  { %8860 = sst [smem:[#allocation22_spill]] %s8842_s7 }
   0x5   :  { %12 = vsyncpa [#allocation4], 0 }
   0x6   :  { %14 = vsyncpa [#allocation4 + $0x1], 0 }
   0x7   :  { %15 = vsyncpa [#allocation7], 0 }
   0x8   :  { %16 = vsyncpa [#allocation5], 0 }
   0x9   :  { %18 = vsyncpa [#allocation5 + $0x1], 0  ;;  %s7551_s24 = smov 0   ;;  %s7553_s25 = smov 0  }
   0xa   :  { %s7555_s26 = smov 0   ;;  %s7557_s27 = smov 0  }
   0xb   :  { %s7559_s28 = smov 0   ;;  %s7561_s29 = smov 0  }
   0xc   :  { %s7563_s30 = smov 0   ;;  %s7565_s8 = smov 0  }
   0xd   :  { %s7567_s9 = smov 0   ;;  %s7569_s10 = smov 0  }
   0xe   :  { %s7571_s11 = smov 0  }
   0xf LB: > { %8861 = sst [smem:[#allocation13_spill]] %s7458_s24  ;;  %s5721_s12 = sadd.s32 4294967295, %s7498_s11   ;;  %s7498_s11 = sphi %s7571_s11, %s24_s11   ;;  %s7494_s10 = sphi %s7569_s10, %s8925_s10   ;;  %s7490_s9 = sphi %s7567_s9, %s8917_s9   ;;  %s7486_s8 = sphi %s7565_s8, %s8924_s8   ;;  %s7482_s30 = sphi %s7563_s30, %s8916_s30   ;;  %s7478_s29 = sphi %s7561_s29, %s8923_s29   ;;  %s7474_s28 = sphi %s7559_s28, %s8922_s28   ;;  %s7470_s27 = sphi %s7557_s27, %s8921_s27   ;;  %s7466_s26 = sphi %s7555_s26, %s8920_s26   ;;  %s7462_s25 = sphi %s7553_s25, %s8919_s25   ;;  %s7458_s24 = sphi %s7551_s24, %s8918_s24  }
  0x10   : > { %8862 = sst [smem:[#allocation14_spill]] %s7486_s8  ;;  %s5722_s13 = sadd.s32 4294967294, %s7498_s11  }
  0x11   : > { %8863 = sst [smem:[#allocation15_spill]] %s7490_s9  ;;  %p56_p0 = scmp.ne.s32.totalorder %s7474_s28, %s7470_s27 }
  0x12   : > { %p7607_p1 = scmp.eq.s32.totalorder %s5721_s12, 0  ;;  %p207_p2 = scmp.ne.s32.totalorder %s7466_s26, %s7462_s25 }
  0x13   : > { %p208_p4 = scmp.eq.s32.totalorder %s5721_s12, 7  ;;  %p213_p5 = scmp.ne.s32.totalorder %s7462_s25, %s7458_s24 }
  0x14   : > { %s8864_s14 = scalar_select %p7607_p1, 1, 0 }
  0x15   : > { %p7616_p3 = por %p7607_p1, %p56_p0  ;;  %p214_p6 = scmp.eq.s32.totalorder %s5722_s13, 7 }
  0x16   : > { %p7622_p7 = por %p208_p4, %p207_p2  ;;  %p5723_p8 = scmp.ge.s32.totalorder %s7498_s11, 1 }
  0x17   : > { %s8865_s16 = scalar_select %p7616_p3, 1, 0 }
  0x18   : > { %s8866_s17 = scalar_select %p7622_p7, 1, 0 }
  0x19   : > { %p7627_p9 = por %p214_p6, %p213_p5  ;;  %p221_p10 = scmp.lt.s32.totalorder %s7498_s11, 9 }
  0x1a   : > { %8867 = sst [smem:[#allocation16_spill]] %s8866_s17  ;;  %s7500_s20 = smov [#allocation6]  }
  0x1b   : > { %s8868_s18 = scalar_select %p7627_p9, 1, 0 }
  0x1c   : > { %p7632_p11 = pnand %p5723_p8, %p221_p10  ;;  %s233_s21 = sshll.u32 %s7500_s20, 4  ;;  %s234_s21 = int_to_ptr.vmem [resolvable:$true] %s233_s21 }
  0x1d   : > { %8869 = sst [smem:[#allocation17_spill]] %s8868_s18  ;;  %s7501_s23 = smov [#allocation8]  }
  0x1e   : > { %s8870_s19 = scalar_select %p7632_p11, 1, 0 }
  0x1f   : > { %p6993_p12 = pneg %p7632_p11  ;;  %s252_s27 = sshll.u32 %s7501_s23, 4  ;;  %s7644_s27 = int_to_ptr.vmem [resolvable:$true] %s252_s27 }
  0x20   : > { %s8872_s1 = sld [smem:[#allocation19_spill]] }
  0x21   : > { %p7640_p13 = pnand %p6993_p12, %p7607_p1 }
  0x23   : > { %p7288_p2 = pneg %p7640_p13 }
  0x26   : > { %s7286_s15 = scalar_lea.hbm %s8872_s1, 9216 }
  0x27   : > { %p7287_p0 = scmp.ne.s32.totalorder %s8872_s1, %s7286_s15  ;;  %p7293_p6 = scmp.lt.u32.totalorder %s7286_s15, %s8872_s1 }
  0x29   : > { %p7289_p4 = pnand %p7288_p2, %p7287_p0 }
  0x2b   : > { %p7290_p5 = pneg %p7289_p4 }
  0x2d   : > { %p7295_p8 = pnand %p7293_p6, %p7290_p5 }
  0x2f   : > { %7298 = shalt.err (!%p7295_p8)
}
  0x30   : > { %s7299_s23 = scalar_lea.vmem %s234_s21, 9216  ;;  %p7307_p7 = scmp.lt.s32.totalorder %s234_s21, %s234_s21 }
  0x31   : > { %p7300_p10 = scmp.ne.s32.totalorder %s234_s21, %s7299_s23  ;;  %p7308_p1 = scmp.lt.s32.totalorder %s7299_s23, %s7299_s23 }
  0x33   : > { %p7302_p12 = pnand %p7300_p10, %p7288_p2  ;;  %p7309_p3 = por %p7308_p1, %p7307_p7 }
  0x35   : > { %p7303_p9 = pneg %p7302_p12 }
  0x37   : > { %p7310_p11 = pnand %p7309_p3, %p7303_p9 }
  0x39   : > { %7313 = shalt.err (!%p7310_p11)
}
  0x3a   : > { %s8853_s18 = smov 64   ;;  %s8854_s12 = smov 4  }
  0x3b   : > { %6996 = dma.hbm_to_vmem [thread:$0]  (!%p7640_p13), %s8872_s1, 9216, %s234_s21, [#allocation7], %s8853_s18, %s8853_s18, %s8854_s12  }
  0x3c   : > { %s8873_s4 = sld [smem:[#allocation20_spill]] }
  0x42   : > { %s7314_s20 = scalar_lea.hbm %s8873_s4, 9216 }
  0x43   : > { %p7315_p1 = scmp.ne.s32.totalorder %s8873_s4, %s7314_s20  ;;  %p7321_p9 = scmp.lt.u32.totalorder %s7314_s20, %s8873_s4 }
  0x45   : > { %p7317_p3 = pnand %p7315_p1, %p7288_p2 }
  0x47   : > { %p7318_p7 = pneg %p7317_p3 }
  0x49   : > { %p7323_p11 = pnand %p7321_p9, %p7318_p7 }
  0x4b   : > { %7326 = shalt.err (!%p7323_p11)
}
  0x4c   : > { %s7327_s21 = scalar_lea.vmem %s7644_s27, 9216  ;;  %p7335_p6 = scmp.lt.s32.totalorder %s7644_s27, %s7644_s27 }
  0x4d   : > { %p7328_p0 = scmp.ne.s32.totalorder %s7644_s27, %s7327_s21  ;;  %p7336_p8 = scmp.lt.s32.totalorder %s7327_s21, %s7327_s21 }
  0x4f   : > { %p7330_p4 = pnand %p7328_p0, %p7288_p2  ;;  %p7337_p10 = por %p7336_p8, %p7335_p6 }
  0x51   : > { %p7331_p5 = pneg %p7330_p4 }
  0x53   : > { %p7338_p12 = pnand %p7337_p10, %p7331_p5 }
  0x55   : > { %7341 = shalt.err (!%p7338_p12)
}
  0x56   : > { %6999 = dma.hbm_to_vmem [thread:$0]  (!%p7640_p13), %s8873_s4, 9216, %s7644_s27, [#allocation7], %s8853_s18, %s8853_s18, %s8854_s12  }
  0x57   : > { %s33_s17 = sadd.s32 1, %s7490_s9  ;;  %s36_s22 = sadd.s32 1, %s7494_s10 }
  0x58   : > { %p34_p2 = scmp.ge.s32.totalorder %s33_s17, 4  ;;  %s43_s7 = sadd.s32 1, %s7478_s29 }
  0x59   : > { %p50_p1 = scmp.ne.s32.totalorder %s7478_s29, %s7474_s28  ;;  %p51_p3 = scmp.eq.s32.totalorder %s7498_s11, 0 }
  0x5a   : > { %s8927_s17 = smov (%p34_p2, %s33_s17), 0  ;;  %s8929_s22 = smov (!%p34_p2, %s36_s22), %s7494_s10 }
  0x5b   : > { %8874 = sst [smem:[#allocation18_spill]] %s8927_s17  ;;  %p7708_p7 = por %p51_p3, %p50_p1 }
  0x5c   : > { %s193_s15 = ssub.s32 %s7490_s9, %s8927_s17  ;;  %p38_p13 = scmp.ge.s32.totalorder %s8929_s22, 2 }
  0x5d   : > { %p7010_p9 = scmp.lt.s32.totalorder %s7498_s11, 8  ;;  %s272_s27 = sand.u32 1, %s7478_s29  }
  0x5e   : > { %s6052_s13 = sshll.u32 %s7494_s10, 11  ;;  %s8931_s22 = smov (%p38_p13, %s8929_s22), 0 }
  0x5f   : > { %s5727_s20 = sshll.u32 %s272_s27, 7  ;;  %s40_s23 = ssub.s32 %s7494_s10, %s8931_s22 }
  0x60   : > { %p41_p11 = scmp.eq.s32.totalorder %s40_s23, 0  ;;  %s194_s21 = sor.u32 %s193_s15, %s40_s23 }
  0x61   : > { %p195_p0 = scmp.eq.s32.totalorder %s194_s21, 0  ;;  %s7724_s18 = scalar_lea.hbm %s8835_s0, %s6052_s13 }
  0x62   : > { %s7727_s12 = scalar_select %p41_p11, %s7478_s29, %s43_s7  }
  0x63   : > { %s8876_s1 = sadd.s32 1, %s7466_s26  ;;  %s276_s17 = scalar_lea.vmem [#allocation3], %s5727_s20 }
  0x64   : > { %s7732_s4 = scalar_select %p195_p0, %s7466_s26, %s8876_s1  }
  0x65   : > { %s283_s9 = sshll.u32 %s276_s17, 4  ;;  %p7738_p4 = pnand %p7010_p9, %p7708_p7  ;;  %s7742_s9 = int_to_ptr.vmem [resolvable:$true] %s283_s9 }
  0x66   : > { %s7744_s13 = scalar_lea.sflag [#allocation4], %s272_s27  ;;  %s7342_s7 = scalar_lea.hbm %s7724_s18, 2048 }
  0x67   : > { %p7343_p5 = scmp.ne.s32.totalorder %s7724_s18, %s7342_s7  ;;  %p7344_p6 = pneg %p7738_p4 }
  0x68   : > { %s7347_s24 = scalar_lea.hbm %s8835_s0, 4096  ;;  %p7348_p12 = scmp.lt.u32.totalorder %s7724_s18, %s8835_s0 }
  0x69   : > { %p7345_p8 = pnand %p7344_p6, %p7343_p5  ;;  %p7349_p2 = scmp.lt.u32.totalorder %s7347_s24, %s7342_s7 }
  0x6a   : > { %p7351_p3 = scmp.lt.u32.totalorder %s7342_s7, %s7724_s18 }
  0x6b   : > { %p7346_p10 = pneg %p7345_p8  ;;  %p7350_p1 = por %p7349_p2, %p7348_p12 }
  0x6d   : > { %p7352_p7 = por %p7351_p3, %p7350_p1 }
  0x6f   : > { %p7353_p13 = pnand %p7352_p7, %p7346_p10 }
  0x71   : > { %7356 = shalt.err (!%p7353_p13)
}
  0x72   : > { %s7357_s27 = scalar_lea.vmem %s7742_s9, 2048  ;;  %s7504_s21 = smov [#allocation3]  }
  0x73   : > { %p7358_p9 = scmp.ne.s32.totalorder %s7742_s9, %s7357_s27  ;;  %s7362_s6 = sshll.u32 %s7504_s21, 4  ;;  %s7363_s6 = int_to_ptr.vmem [resolvable:$false] %s7362_s6 }
  0x74   : > { %s7364_s8 = scalar_lea.vmem %s7363_s6, 4096  ;;  %p7365_p5 = scmp.lt.s32.totalorder %s7742_s9, %s7363_s6 }
  0x75   : > { %p7360_p11 = pnand %p7358_p9, %p7344_p6  ;;  %p7366_p8 = scmp.lt.s32.totalorder %s7364_s8, %s7357_s27 }
  0x77   : > { %p7361_p0 = pneg %p7360_p11  ;;  %p7367_p12 = por %p7366_p8, %p7365_p5 }
  0x79   : > { %p7368_p2 = pnand %p7367_p12, %p7361_p0 }
  0x7b   : > { %7371 = shalt.err (!%p7368_p2)
}
  0x7c   : > { %s8878_s7 = smov 4   ;;  %s8879_s1 = smov 64  }
  0x7d   : > { %7003 = dma.hbm_to_vmem [thread:$0]  (!%p7738_p4), %s7724_s18, 2048, %s7742_s9, %s7744_s13, %s8879_s1, %s8879_s1, %s8878_s7  }
  0x7e   : > { %p8880_p6 = scmp.ne.s32.totalorder %s8870_s19, 0 }
  0x7f   : > { %s297_s17 = sand.u32 (!%p8880_p6), 1, %s7474_s28   ;;  %p8881_p10 = scmp.ne.s32.totalorder (!%p8880_p6), %s8865_s16, 0 }
  0x80   : > { %295 = sbr.rel (%p8880_p6) target bundleno = 1338 (0x53a), region = 48  ;;  %s5731_s24 = sshll.u32 (!%p8880_p6), %s297_s17, 7 }
  0x81   : > { %s298_s20 = scalar_lea.sflag (!%p8880_p6), [#allocation4], %s297_s17  ;;  %s7778_s23 = scalar_lea.vmem (!%p8880_p6), [#allocation3], %s5731_s24 }
  0x87   : > { %7445 = dma.done.wait (%p8881_p10), %s298_s20, 2048  }
  0x88   : > { %7447 = vsyncadd (%p8881_p10), %s298_s20, 4294965248  ;;  %p8882_p1 = scmp.ne.s32.totalorder %s8864_s14, 0 }
  0x8a   : > { %7449 = dma.done.wait (%p8882_p1), [#allocation7], 18432  }
  0x8b   : > { %7451 = vsyncadd (%p8882_p1), [#allocation7], 4294948864  ;;  %s337_s9 = sand.u32 1, %s7462_s25   ;;  %s5735_s19 = sshll.u32 %s7482_s30, 2  ;;  %v7505_v0 = vmov 0   ;;  %vm343_vm0 = vcmask 1040384  }
  0x8c   : > { %s7792_s18 = sshll.u32 %s337_s9, 5  ;;  %397 = vst [vmem:[#allocation2 + $0x4] sm:$0xf] %v7505_v0  ;;  %400 = vst [vmem:[#allocation2 + $0x10] sm:$0xf] %v7505_v0  ;;  %p409_p4 = scmp.gt.s32.totalorder %s7482_s30, 0 }
  0x8d   : > { %404 = vst [vmem:[#allocation2 + $0x4c] sm:$0xf] %v7505_v0  ;;  %407 = vst [vmem:[#allocation2 + $0x58] sm:$0xf] %v7505_v0  ;;  %vm344_vm1 = vsmask.f32 256 }
  0x8e   : > { %p410_p3 = scmp.lt.s32.totalorder %s7482_s30, 3  ;;  %vm370_vm2 = vsmask.f32 7938  ;;  %vm7801_vm3 = vmand %vm343_vm0, %vm344_vm1  ;;  %v346_v3 = vld [vmem:[#allocation2] sm:$0x1]  ;;  %s7843_s16 = scalar_lea.vmem [#allocation9], %s7792_s18 }
  0x8f   : > { %vm7806_vm4 = vmand %vm343_vm0, %vm370_vm2  ;;  %v349_v4 = vld [vmem:[#allocation2 + $0xc] sm:$0x1]  ;;  %v364_v5 = vld [vmem:[#allocation2 + $0x48] sm:$0x1]  ;;  %v347_v6 = vsel %vm7801_vm3, 0, %v346_v3 }
  0x90   : > { %p7796_p7 = pnand %p410_p3, %p409_p4  ;;  %v350_v7 = vsel %vm7801_vm3, 0, %v349_v4  ;;  %v365_v8 = vsel %vm7801_vm3, 0, %v364_v5  ;;  %v367_v9 = vld [vmem:[#allocation2 + $0x54] sm:$0x1]  ;;  %348 = vst [vmem:[#allocation2] sm:$0x1] %v347_v6 }
  0x91   : > { %351 = vst [vmem:[#allocation2 + $0xc] sm:$0x1] %v350_v7  ;;  %366 = vst [vmem:[#allocation2 + $0x48] sm:$0x1] %v365_v8  ;;  %v368_v10 = vsel %vm7801_vm3, 0, %v367_v9  ;;  %s5736_s15 = sadd.s32 (!%p7796_p7), 4294967294, %s5735_s19 }
  0x92   : > { %v372_v11 = vld [vmem:[#allocation2 + $0x8] sm:$0x1]  ;;  %v375_v12 = vld [vmem:[#allocation2 + $0x14] sm:$0x1]  ;;  %369 = vst [vmem:[#allocation2 + $0x54] sm:$0x1] %v368_v10 }
  0x93   : > { %v373_v13 = vsel %vm7806_vm4, 0, %v372_v11  ;;  %v376_v14 = vsel %vm7806_vm4, 0, %v375_v12  ;;  %v390_v15 = vld [vmem:[#allocation2 + $0x50] sm:$0x1]  ;;  %v393_v16 = vld [vmem:[#allocation2 + $0x5c] sm:$0x1] }
  0x94   : > { %396 = vst [vmem:[#allocation2] sm:$0xf] %v7505_v0  ;;  %399 = vst [vmem:[#allocation2 + $0xc] sm:$0xf] %v7505_v0  ;;  %v391_v17 = vsel %vm7806_vm4, 0, %v390_v15  ;;  %v394_v18 = vsel %vm7806_vm4, 0, %v393_v16 }
  0x95   : > { %403 = vst [vmem:[#allocation2 + $0x48] sm:$0xf] %v7505_v0  ;;  %374 = vst [vmem:[#allocation2 + $0x8] sm:$0x1] %v373_v13  ;;  %v352_v19 = vld [vmem:[#allocation2 + $0x18] sm:$0x1] }
  0x96   : > { %377 = vst [vmem:[#allocation2 + $0x14] sm:$0x1] %v376_v14  ;;  %v355_v20 = vld [vmem:[#allocation2 + $0x24] sm:$0x1]  ;;  %406 = vst [vmem:[#allocation2 + $0x54] sm:$0xf] %v7505_v0 }
  0x97   : > { %392 = vst [vmem:[#allocation2 + $0x50] sm:$0x1] %v391_v17  ;;  %395 = vst [vmem:[#allocation2 + $0x5c] sm:$0x1] %v394_v18  ;;  %v353_v21 = vsel %vm7801_vm3, 0, %v352_v19  ;;  %v356_v22 = vsel %vm7801_vm3, 0, %v355_v20 }
  0x98   : > { %v358_v23 = vld [vmem:[#allocation2 + $0x30] sm:$0x1]  ;;  %v361_v24 = vld [vmem:[#allocation2 + $0x3c] sm:$0x1]  ;;  %398 = vst [vmem:[#allocation2 + $0x8] sm:$0x1] %v7505_v0 }
  0x99   : > { %401 = vst [vmem:[#allocation2 + $0x14] sm:$0x1] %v7505_v0  ;;  %354 = vst [vmem:[#allocation2 + $0x18] sm:$0x1] %v353_v21  ;;  %v359_v25 = vsel %vm7801_vm3, 0, %v358_v23  ;;  %v362_v26 = vsel %vm7801_vm3, 0, %v361_v24 }
  0x9a   : > { %357 = vst [vmem:[#allocation2 + $0x24] sm:$0x1] %v356_v22  ;;  %v378_v27 = vld [vmem:[#allocation2 + $0x20] sm:$0x1]  ;;  %v381_v28 = vld [vmem:[#allocation2 + $0x2c] sm:$0x1] }
  0x9b   : > { %405 = vst [vmem:[#allocation2 + $0x50] sm:$0x1] %v7505_v0  ;;  %408 = vst [vmem:[#allocation2 + $0x5c] sm:$0x1] %v7505_v0  ;;  %v379_v29 = vsel %vm7806_vm4, 0, %v378_v27  ;;  %v382_v30 = vsel %vm7806_vm4, 0, %v381_v28 }
  0x9c   : > { %360 = vst [vmem:[#allocation2 + $0x30] sm:$0x1] %v359_v25  ;;  %363 = vst [vmem:[#allocation2 + $0x3c] sm:$0x1] %v362_v26  ;;  %v384_v31 = vld [vmem:[#allocation2 + $0x38] sm:$0x1] }
  0x9d   : > { %v387_v32 = vld [vmem:[#allocation2 + $0x44] sm:$0x1]  ;;  %380 = vst [vmem:[#allocation2 + $0x20] sm:$0x1] %v379_v29  ;;  %383 = vst [vmem:[#allocation2 + $0x2c] sm:$0x1] %v382_v30 }
  0x9e   : > { %v385_v33 = vsel %vm7806_vm4, 0, %v384_v31  ;;  %v388_v34 = vsel %vm7806_vm4, 0, %v387_v32  ;;  %414 = sbr.rel (%p7796_p7) target bundleno = 194 (0xc2), region = 64  ;;  %s6053_s13 = sshll.u32 (!%p7796_p7), %s5736_s15, 3  ;;  %vm597_vm5 = vcmask (!%p7796_p7), 1043456  }
  0x9f   : > { %386 = vst [vmem:[#allocation2 + $0x38] sm:$0x1] %v385_v33  ;;  %389 = vst [vmem:[#allocation2 + $0x44] sm:$0x1] %v388_v34  ;;  %s7850_s27 = scalar_lea.vmem (!%p7796_p7), %s7778_s23, %s6053_s13 [#allocation3]  ;;  %vm435_vm6 = vsmask.f32 (!%p7796_p7), 4368 }
  0xa0   : > { %v419_v35 = vld [vmem:[%s7850_s27] sm:$0xf] (!%p7796_p7)  ;;  %v420_v36 = vld [vmem:[%s7850_s27 + $0x4] sm:$0xf] (!%p7796_p7)  ;;  %v421_v37 = vld [vmem:[%s7850_s27 + $0x8] sm:$0xf] (!%p7796_p7) }
  0xa1   : > { %v438_v38 = vshrl.u32 (!%p7796_p7), %v419_v35, 16  ;;  %v441_v39 = vshll.u32 (!%p7796_p7), %v419_v35, 16  ;;  %v446_v40 = vshrl.u32 (!%p7796_p7), %v420_v36, 16  ;;  %v449_v41 = vshll.u32 (!%p7796_p7), %v420_v36, 16  ;;  %v422_v42 = vld [vmem:[%s7850_s27 + $0xc] sm:$0xf] (!%p7796_p7)  ;;  %vm7859_vm7 = vmand (!%p7796_p7), %vm597_vm5, %vm370_vm2 }
  0xa2   : > { %v599_v43 = vld [vmem:[#allocation2] sm:$0xf] (!%p7796_p7)  ;;  %v455_v44 = vshrl.u32 (!%p7796_p7), %v421_v37, 16  ;;  %v458_v45 = vshll.u32 (!%p7796_p7), %v421_v37, 16  ;;  %v463_v46 = vshrl.u32 (!%p7796_p7), %v422_v42, 16  ;;  %v466_v47 = vshll.u32 (!%p7796_p7), %v422_v42, 16  ;;  %vm7866_vm8 = vmor (!%p7796_p7), %vm344_vm1, %vm435_vm6 }
  0xa3   : > { %v423_v48 = vld [vmem:[%s7850_s27 + $0x10] sm:$0xf] (!%p7796_p7)  ;;  %v440_v49 = vrot.slane (!%p7796_p7), %v438_v38, 7  ;;  %v448_v51 = vrot.slane (!%p7796_p7), %v446_v40, 7  ;;  %v424_v54 = vld [vmem:[%s7850_s27 + $0x14] sm:$0xf] (!%p7796_p7) }
  0xa4   : > { %v472_v52 = vshrl.u32 (!%p7796_p7), %v423_v48, 16  ;;  %v475_v53 = vshll.u32 (!%p7796_p7), %v423_v48, 16  ;;  %v603_v56 = vld [vmem:[#allocation2 + $0x8] sm:$0x1] (!%p7796_p7)  ;;  %v457_v57 = vrot.slane (!%p7796_p7), %v455_v44, 7  ;;  %v465_v58 = vrot.slane (!%p7796_p7), %v463_v46, 7 }
  0xa5   : > { %v480_v59 = vshrl.u32 %v424_v54, 16  ;;  %v483_v60 = vshll.u32 %v424_v54, 16  ;;  %v443_v61 = vor.u32 %v441_v39, %v440_v49  ;;  %v444_v62 = vrot.slane %v440_v49, 4  ;;  %v606_v2 = vld [vmem:[#allocation2 + $0xc] sm:$0xf] }
  0xa6   : > { %v451_v63 = vor.u32 %v449_v41, %v448_v51  ;;  %v453_v0 = vrot.slane %v448_v51, 4  ;;  %v610_v3 = vld [vmem:[#allocation2 + $0x14] sm:$0x1]  ;;  %v460_v4 = vor.u32 %v458_v45, %v457_v57  ;;  %v461_v5 = vrot.slane %v457_v57, 4  ;;  %v425_v8 = vld [vmem:[%s7850_s27 + $0x18] sm:$0xf] }
  0xa7   : > { %v468_v6 = vor.u32 %v466_v47, %v465_v58  ;;  %v470_v7 = vrot.slane %v465_v58, 4  ;;  %v600_v9 = vsel %vm7859_vm7, %v443_v61, %v599_v43  ;;  %v474_v12 = vrot.slane %v472_v52, 7  ;;  %v613_v13 = vld [vmem:[#allocation2 + $0x18] sm:$0xf]  ;;  %v426_v14 = vld [vmem:[%s7850_s27 + $0x1c] sm:$0xf] }
  0xa8   : > { %v452_v10 = vsel %vm7866_vm8, %v444_v62, %v451_v63  ;;  %v604_v11 = vsel %vm7801_vm3, %v453_v0, %v603_v56  ;;  %601 = vst [vmem:[#allocation2] sm:$0xf] %v600_v9  ;;  %v607_v15 = vsel %vm7859_vm7, %v460_v4, %v606_v2  ;;  %v482_v18 = vrot.slane %v480_v59, 7  ;;  %v617_v19 = vld [vmem:[#allocation2 + $0x20] sm:$0x1] }
  0xa9   : > { %602 = vst [vmem:[#allocation2 + $0x4] sm:$0xf] %v452_v10  ;;  %605 = vst [vmem:[#allocation2 + $0x8] sm:$0x1] %v604_v11  ;;  %v469_v16 = vsel %vm7866_vm8, %v461_v5, %v468_v6  ;;  %v611_v17 = vsel %vm7801_vm3, %v470_v7, %v610_v3  ;;  %v427_v20 = vld [vmem:[%s7850_s27 + $0x20] sm:$0xf]  ;;  %v477_v21 = vor.u32 %v475_v53, %v474_v12 }
  0xaa   : > { %608 = vst [vmem:[#allocation2 + $0xc] sm:$0xf] %v607_v15  ;;  %609 = vst [vmem:[#allocation2 + $0x10] sm:$0xf] %v469_v16  ;;  %v478_v22 = vrot.slane %v474_v12, 4  ;;  %v489_v23 = vshrl.u32 %v425_v8, 16  ;;  %v485_v26 = vor.u32 %v483_v60, %v482_v18 }
  0xab   : > { %612 = vst [vmem:[#allocation2 + $0x14] sm:$0x1] %v611_v17  ;;  %v492_v24 = vshll.u32 %v425_v8, 16  ;;  %v428_v25 = vld [vmem:[%s7850_s27 + $0x24] sm:$0xf]  ;;  %v487_v27 = vrot.slane %v482_v18, 4  ;;  %v614_v30 = vsel %vm7859_vm7, %v477_v21, %v613_v13 }
  0xac   : > { %v497_v28 = vshrl.u32 %v426_v14, 16  ;;  %v500_v29 = vshll.u32 %v426_v14, 16  ;;  %v491_v31 = vrot.slane %v489_v23, 7  ;;  %v506_v32 = vshrl.u32 %v427_v20, 16  ;;  %v429_v34 = vld [vmem:[%s7850_s27 + $0x28] sm:$0xf] }
  0xad   : > { %v509_v33 = vshll.u32 %v427_v20, 16  ;;  %615 = vst [vmem:[#allocation2 + $0x18] sm:$0xf] %v614_v30  ;;  %v486_v35 = vsel %vm7866_vm8, %v478_v22, %v485_v26  ;;  %v618_v36 = vsel %vm7801_vm3, %v487_v27, %v617_v19  ;;  %v620_v37 = vld [vmem:[#allocation2 + $0x24] sm:$0xf]  ;;  %v514_v40 = vshrl.u32 %v428_v25, 16 }
  0xae   : > { %v499_v38 = vrot.slane %v497_v28, 7  ;;  %v624_v39 = vld [vmem:[#allocation2 + $0x2c] sm:$0x1]  ;;  %616 = vst [vmem:[#allocation2 + $0x1c] sm:$0xf] %v486_v35  ;;  %v494_v41 = vor.u32 %v492_v24, %v491_v31  ;;  %v495_v42 = vrot.slane %v491_v31, 4 }
  0xaf   : > { %619 = vst [vmem:[#allocation2 + $0x20] sm:$0x1] %v618_v36  ;;  %v508_v43 = vrot.slane %v506_v32, 7  ;;  %v627_v44 = vld [vmem:[#allocation2 + $0x30] sm:$0xf]  ;;  %v517_v45 = vshll.u32 %v428_v25, 16 }
  0xb0   : > { %v502_v46 = vor.u32 %v500_v29, %v499_v38  ;;  %v504_v47 = vrot.slane %v499_v38, 4  ;;  %v516_v48 = vrot.slane %v514_v40, 7  ;;  %v523_v49 = vshrl.u32 %v429_v34, 16  ;;  %v430_v51 = vld [vmem:[%s7850_s27 + $0x2c] sm:$0xf] }
  0xb1   : > { %v621_v52 = vsel %vm7859_vm7, %v494_v41, %v620_v37  ;;  %v511_v53 = vor.u32 %v509_v33, %v508_v43  ;;  %v512_v54 = vrot.slane %v508_v43, 4  ;;  %v631_v56 = vld [vmem:[#allocation2 + $0x38] sm:$0x1]  ;;  %v526_v57 = vshll.u32 %v429_v34, 16  ;;  %v431_v58 = vld [vmem:[%s7850_s27 + $0x30] sm:$0xf] }
  0xb2   : > { %622 = vst [vmem:[#allocation2 + $0x24] sm:$0xf] %v621_v52  ;;  %v503_v59 = vsel %vm7866_vm8, %v495_v42, %v502_v46  ;;  %v625_v60 = vsel %vm7801_vm3, %v504_v47, %v624_v39  ;;  %v519_v61 = vor.u32 %v517_v45, %v516_v48  ;;  %v521_v62 = vrot.slane %v516_v48, 4  ;;  %v432_v63 = vld [vmem:[%s7850_s27 + $0x34] sm:$0xf] }
  0xb3   : > { %623 = vst [vmem:[#allocation2 + $0x28] sm:$0xf] %v503_v59  ;;  %626 = vst [vmem:[#allocation2 + $0x2c] sm:$0x1] %v625_v60  ;;  %v628_v0 = vsel %vm7859_vm7, %v511_v53, %v627_v44  ;;  %v525_v2 = vrot.slane %v523_v49, 7  ;;  %v531_v3 = vshrl.u32 %v430_v51, 16 }
  0xb4   : > { %v534_v4 = vshll.u32 %v430_v51, 16  ;;  %v433_v5 = vld [vmem:[%s7850_s27 + $0x38] sm:$0xf]  ;;  %629 = vst [vmem:[#allocation2 + $0x30] sm:$0xf] %v628_v0  ;;  %v520_v6 = vsel %vm7866_vm8, %v512_v54, %v519_v61  ;;  %v632_v7 = vsel %vm7801_vm3, %v521_v62, %v631_v56  ;;  %v540_v9 = vshrl.u32 %v431_v58, 16 }
  0xb5   : > { %v634_v8 = vld [vmem:[#allocation2 + $0x3c] sm:$0xf]  ;;  %v543_v10 = vshll.u32 %v431_v58, 16  ;;  %630 = vst [vmem:[#allocation2 + $0x34] sm:$0xf] %v520_v6  ;;  %v528_v11 = vor.u32 %v526_v57, %v525_v2  ;;  %v529_v12 = vrot.slane %v525_v2, 4 }
  0xb6   : > { %633 = vst [vmem:[#allocation2 + $0x38] sm:$0x1] %v632_v7  ;;  %v533_v13 = vrot.slane %v531_v3, 7  ;;  %v548_v14 = vshrl.u32 %v432_v63, 16  ;;  %v434_v15 = vld [vmem:[%s7850_s27 + $0x3c] sm:$0xf] }
  0xb7   : > { %v638_v16 = vld [vmem:[#allocation2 + $0x44] sm:$0x1]  ;;  %v542_v17 = vrot.slane %v540_v9, 7  ;;  %v551_v18 = vshll.u32 %v432_v63, 16  ;;  %v557_v19 = vshrl.u32 %v433_v5, 16  ;;  %v560_v20 = vshll.u32 %v433_v5, 16 }
  0xb8   : > { %v635_v21 = vsel %vm7859_vm7, %v528_v11, %v634_v8  ;;  %v536_v22 = vor.u32 %v534_v4, %v533_v13  ;;  %v538_v23 = vrot.slane %v533_v13, 4  ;;  %v641_v24 = vld [vmem:[#allocation2 + $0x48] sm:$0xf]  ;;  %v550_v25 = vrot.slane %v548_v14, 7  ;;  %v645_v28 = vld [vmem:[#allocation2 + $0x50] sm:$0x1] }
  0xb9   : > { %636 = vst [vmem:[#allocation2 + $0x3c] sm:$0xf] %v635_v21  ;;  %v545_v26 = vor.u32 %v543_v10, %v542_v17  ;;  %v546_v27 = vrot.slane %v542_v17, 4  ;;  %v559_v29 = vrot.slane %v557_v19, 7  ;;  %v565_v30 = vshrl.u32 %v434_v15, 16 }
  0xba   : > { %v537_v31 = vsel %vm7866_vm8, %v529_v12, %v536_v22  ;;  %v639_v32 = vsel %vm7801_vm3, %v538_v23, %v638_v16  ;;  %v553_v33 = vor.u32 %v551_v18, %v550_v25  ;;  %v555_v34 = vrot.slane %v550_v25, 4  ;;  %v648_v35 = vld [vmem:[#allocation2 + $0x54] sm:$0xf]  ;;  %v652_v43 = vld [vmem:[#allocation2 + $0x5c] sm:$0x1] }
  0xbb   : > { %637 = vst [vmem:[#allocation2 + $0x40] sm:$0xf] %v537_v31  ;;  %640 = vst [vmem:[#allocation2 + $0x44] sm:$0x1] %v639_v32  ;;  %v642_v36 = vsel %vm7859_vm7, %v545_v26, %v641_v24  ;;  %v562_v37 = vor.u32 %v560_v20, %v559_v29  ;;  %v567_v38 = vrot.slane %v565_v30, 7  ;;  %v563_v41 = vrot.slane %v559_v29, 4 }
  0xbc   : > { %643 = vst [vmem:[#allocation2 + $0x48] sm:$0xf] %v642_v36  ;;  %v554_v39 = vsel %vm7866_vm8, %v546_v27, %v553_v33  ;;  %v646_v40 = vsel %vm7801_vm3, %v555_v34, %v645_v28  ;;  %v568_v42 = vshll.u32 %v434_v15, 16 }
  0xbd   : > { %644 = vst [vmem:[#allocation2 + $0x4c] sm:$0xf] %v554_v39  ;;  %647 = vst [vmem:[#allocation2 + $0x50] sm:$0x1] %v646_v40  ;;  %v649_v44 = vsel %vm7859_vm7, %v562_v37, %v648_v35  ;;  %v572_v45 = vrot.slane %v567_v38, 4 }
  0xbe   : > { %650 = vst [vmem:[#allocation2 + $0x54] sm:$0xf] %v649_v44  ;;  %v570_v46 = vor.u32 %v568_v42, %v567_v38 }
  0xbf   : > { %v653_v47 = vsel %vm7801_vm3, %v572_v45, %v652_v43 }
  0xc0   : > { %v571_v48 = vsel %vm7866_vm8, %v563_v41, %v570_v46  ;;  %654 = vst [vmem:[#allocation2 + $0x5c] sm:$0x1] %v653_v47 }
  0xc1   : > { %651 = vst [vmem:[#allocation2 + $0x58] sm:$0xf] %v571_v48 }
  0xc2 PF: > { %p5739_p13 = scmp.ne.s32.totalorder %s7482_s30, 0 }
  0xc3   : > { %v659_v50 = vld [vmem:[%s7778_s23] sm:$0xf] (!%p5739_p13)  ;;  %vm794_vm9 = vcmask (!%p5739_p13), 1043456   ;;  %v660_v52 = vld [vmem:[%s7778_s23 + $0x4] sm:$0xf] (!%p5739_p13) }
  0xc4   : > { %658 = sbr.rel (%p5739_p13) target bundleno = 224 (0xe0), region = 68  ;;  %v674_v49 = vshrl.u32 (!%p5739_p13), %v659_v50, 16  ;;  %v677_v51 = vshll.u32 (!%p5739_p13), %v659_v50, 16  ;;  %vm671_vm10 = vsmask.f32 (!%p5739_p13), 4368  ;;  %v682_v55 = vshrl.u32 (!%p5739_p13), %v660_v52, 16  ;;  %vm7935_vm11 = vmand (!%p5739_p13), %vm794_vm9, %vm370_vm2 }
  0xc5   : > { %v685_v53 = vshll.u32 (!%p5739_p13), %v660_v52, 16  ;;  %v661_v54 = vld [vmem:[%s7778_s23 + $0x8] sm:$0xf] (!%p5739_p13)  ;;  %v796_v57 = vld [vmem:[#allocation2 + $0x18] sm:$0xf] (!%p5739_p13)  ;;  %vm7941_vm12 = vmor (!%p5739_p13), %vm344_vm1, %vm671_vm10 }
  0xc6   : > { %v676_v56 = vrot.slane (!%p5739_p13), %v674_v49, 7  ;;  %v691_v58 = vshrl.u32 (!%p5739_p13), %v661_v54, 16  ;;  %v694_v59 = vshll.u32 (!%p5739_p13), %v661_v54, 16  ;;  %v684_v61 = vrot.slane (!%p5739_p13), %v682_v55, 7  ;;  %v800_v62 = vld [vmem:[#allocation2 + $0x20] sm:$0x1] (!%p5739_p13) }
  0xc7   : > { %v662_v63 = vld [vmem:[%s7778_s23 + $0xc] sm:$0xf] (!%p5739_p13)  ;;  %v663_v6 = vld [vmem:[%s7778_s23 + $0x10] sm:$0xf] (!%p5739_p13)  ;;  %v803_v9 = vld [vmem:[#allocation2 + $0x24] sm:$0xf] (!%p5739_p13) }
  0xc8   : > { %v679_v0 = vor.u32 (!%p5739_p13), %v677_v51, %v676_v56  ;;  %v680_v3 = vrot.slane (!%p5739_p13), %v676_v56, 4  ;;  %v693_v4 = vrot.slane (!%p5739_p13), %v691_v58, 7  ;;  %v699_v5 = vshrl.u32 (!%p5739_p13), %v662_v63, 16  ;;  %v664_v16 = vld [vmem:[%s7778_s23 + $0x14] sm:$0xf] (!%p5739_p13) }
  0xc9   : > { %v687_v7 = vor.u32 (!%p5739_p13), %v685_v53, %v684_v61  ;;  %v689_v8 = vrot.slane (!%p5739_p13), %v684_v61, 4  ;;  %v702_v10 = vshll.u32 (!%p5739_p13), %v662_v63, 16  ;;  %v708_v11 = vshrl.u32 (!%p5739_p13), %v663_v6, 16  ;;  %v807_v19 = vld [vmem:[#allocation2 + $0x2c] sm:$0x1] (!%p5739_p13) }
  0xca   : > { %v797_v12 = vsel (!%p5739_p13), %vm7935_vm11, %v679_v0, %v796_v57  ;;  %v696_v13 = vor.u32 (!%p5739_p13), %v694_v59, %v693_v4  ;;  %v697_v14 = vrot.slane (!%p5739_p13), %v693_v4, 4  ;;  %v701_v15 = vrot.slane (!%p5739_p13), %v699_v5, 7  ;;  %v665_v22 = vld [vmem:[%s7778_s23 + $0x18] sm:$0xf] (!%p5739_p13)  ;;  %v810_v26 = vld [vmem:[#allocation2 + $0x30] sm:$0xf] (!%p5739_p13) }
  0xcb   : > { %798 = vst [vmem:[#allocation2 + $0x18] sm:$0xf] %v797_v12  ;;  %v688_v17 = vsel %vm7941_vm12, %v680_v3, %v687_v7  ;;  %v801_v18 = vsel %vm7801_vm3, %v689_v8, %v800_v62  ;;  %v710_v20 = vrot.slane %v708_v11, 7  ;;  %v711_v21 = vshll.u32 %v663_v6, 16  ;;  %v666_v28 = vld [vmem:[%s7778_s23 + $0x1c] sm:$0xf] }
  0xcc   : > { %799 = vst [vmem:[#allocation2 + $0x1c] sm:$0xf] %v688_v17  ;;  %802 = vst [vmem:[#allocation2 + $0x20] sm:$0x1] %v801_v18  ;;  %v804_v23 = vsel %vm7935_vm11, %v696_v13, %v803_v9  ;;  %v704_v24 = vor.u32 %v702_v10, %v701_v15  ;;  %v706_v25 = vrot.slane %v701_v15, 4  ;;  %v716_v27 = vshrl.u32 %v664_v16, 16 }
  0xcd   : > { %805 = vst [vmem:[#allocation2 + $0x24] sm:$0xf] %v804_v23  ;;  %v713_v29 = vor.u32 %v711_v21, %v710_v20  ;;  %v714_v30 = vrot.slane %v710_v20, 4  ;;  %v719_v31 = vshll.u32 %v664_v16, 16  ;;  %v725_v32 = vshrl.u32 %v665_v22, 16 }
  0xce   : > { %v667_v33 = vld [vmem:[%s7778_s23 + $0x20] sm:$0xf]  ;;  %v705_v34 = vsel %vm7941_vm12, %v697_v14, %v704_v24  ;;  %v808_v35 = vsel %vm7801_vm3, %v706_v25, %v807_v19  ;;  %v718_v36 = vrot.slane %v716_v27, 7  ;;  %v728_v37 = vshll.u32 %v665_v22, 16  ;;  %v668_v38 = vld [vmem:[%s7778_s23 + $0x24] sm:$0xf] }
  0xcf   : > { %806 = vst [vmem:[#allocation2 + $0x28] sm:$0xf] %v705_v34  ;;  %809 = vst [vmem:[#allocation2 + $0x2c] sm:$0x1] %v808_v35  ;;  %v811_v39 = vsel %vm7935_vm11, %v713_v29, %v810_v26  ;;  %v814_v40 = vld [vmem:[#allocation2 + $0x38] sm:$0x1] }
  0xd0   : > { %v727_v41 = vrot.slane %v725_v32, 7  ;;  %v733_v42 = vshrl.u32 %v666_v28, 16  ;;  %v736_v43 = vshll.u32 %v666_v28, 16  ;;  %812 = vst [vmem:[#allocation2 + $0x30] sm:$0xf] %v811_v39  ;;  %v721_v44 = vor.u32 %v719_v31, %v718_v36 }
  0xd1   : > { %v723_v45 = vrot.slane %v718_v36, 4  ;;  %v817_v46 = vld [vmem:[#allocation2 + $0x3c] sm:$0xf]  ;;  %v742_v47 = vshrl.u32 %v667_v33, 16  ;;  %v745_v48 = vshll.u32 %v667_v33, 16  ;;  %v750_v52 = vshrl.u32 %v668_v38, 16 }
  0xd2   : > { %v730_v50 = vor.u32 %v728_v37, %v727_v41  ;;  %v731_v49 = vrot.slane %v727_v41, 4  ;;  %v735_v51 = vrot.slane %v733_v42, 7  ;;  %v669_v55 = vld [vmem:[%s7778_s23 + $0x28] sm:$0xf]  ;;  %v722_v53 = vsel %vm7941_vm12, %v714_v30, %v721_v44  ;;  %v821_v56 = vld [vmem:[#allocation2 + $0x44] sm:$0x1] }
  0xd3   : > { %v815_v54 = vsel %vm7801_vm3, %v723_v45, %v814_v40  ;;  %v744_v57 = vrot.slane %v742_v47, 7  ;;  %v753_v58 = vshll.u32 %v668_v38, 16  ;;  %813 = vst [vmem:[#allocation2 + $0x34] sm:$0xf] %v722_v53  ;;  %v824_v63 = vld [vmem:[#allocation2 + $0x48] sm:$0xf] }
  0xd4   : > { %816 = vst [vmem:[#allocation2 + $0x38] sm:$0x1] %v815_v54  ;;  %v818_v59 = vsel %vm7935_vm11, %v730_v50, %v817_v46  ;;  %v738_v61 = vor.u32 %v736_v43, %v735_v51  ;;  %v740_v62 = vrot.slane %v735_v51, 4  ;;  %v752_v0 = vrot.slane %v750_v52, 7  ;;  %v670_v3 = vld [vmem:[%s7778_s23 + $0x2c] sm:$0xf] }
  0xd5   : > { %819 = vst [vmem:[#allocation2 + $0x3c] sm:$0xf] %v818_v59  ;;  %v747_v4 = vor.u32 %v745_v48, %v744_v57  ;;  %v748_v5 = vrot.slane %v744_v57, 4  ;;  %v828_v6 = vld [vmem:[#allocation2 + $0x50] sm:$0x1]  ;;  %v759_v7 = vshrl.u32 %v669_v55, 16 }
  0xd6   : > { %v762_v8 = vshll.u32 %v669_v55, 16  ;;  %v739_v9 = vsel %vm7941_vm12, %v731_v49, %v738_v61  ;;  %v822_v10 = vsel %vm7801_vm3, %v740_v62, %v821_v56  ;;  %v755_v11 = vor.u32 %v753_v58, %v752_v0  ;;  %v831_v19 = vld [vmem:[#allocation2 + $0x54] sm:$0xf]  ;;  %v835_v23 = vld [vmem:[#allocation2 + $0x5c] sm:$0x1] }
  0xd7   : > { %v757_v12 = vrot.slane %v752_v0, 4  ;;  %820 = vst [vmem:[#allocation2 + $0x40] sm:$0xf] %v739_v9  ;;  %823 = vst [vmem:[#allocation2 + $0x44] sm:$0x1] %v822_v10  ;;  %v825_v13 = vsel %vm7935_vm11, %v747_v4, %v824_v63  ;;  %v761_v14 = vrot.slane %v759_v7, 7 }
  0xd8   : > { %v767_v15 = vshrl.u32 %v670_v3, 16  ;;  %v770_v16 = vshll.u32 %v670_v3, 16  ;;  %826 = vst [vmem:[#allocation2 + $0x48] sm:$0xf] %v825_v13  ;;  %v756_v17 = vsel %vm7941_vm12, %v748_v5, %v755_v11 }
  0xd9   : > { %v829_v18 = vsel %vm7801_vm3, %v757_v12, %v828_v6  ;;  %827 = vst [vmem:[#allocation2 + $0x4c] sm:$0xf] %v756_v17  ;;  %v764_v20 = vor.u32 %v762_v8, %v761_v14  ;;  %v765_v21 = vrot.slane %v761_v14, 4 }
  0xda   : > { %830 = vst [vmem:[#allocation2 + $0x50] sm:$0x1] %v829_v18  ;;  %v769_v22 = vrot.slane %v767_v15, 7 }
  0xdb   : > { %v832_v24 = vsel %vm7935_vm11, %v764_v20, %v831_v19 }
  0xdc   : > { %v772_v25 = vor.u32 %v770_v16, %v769_v22  ;;  %v774_v26 = vrot.slane %v769_v22, 4  ;;  %833 = vst [vmem:[#allocation2 + $0x54] sm:$0xf] %v832_v24 }
  0xde   : > { %v773_v27 = vsel %vm7941_vm12, %v765_v21, %v772_v25  ;;  %v836_v28 = vsel %vm7801_vm3, %v774_v26, %v835_v23 }
  0xdf   : > { %834 = vst [vmem:[#allocation2 + $0x58] sm:$0xf] %v773_v27  ;;  %837 = vst [vmem:[#allocation2 + $0x5c] sm:$0x1] %v836_v28 }
  0xe0 PF: > { %p5740_p9 = scmp.ne.s32.totalorder %s7482_s30, 3 }
  0xe1   : > { %v5741_v60 = vld [vmem:[%s7778_s23 + $0x50] sm:$0xf] (!%p5740_p9)  ;;  %vm977_vm13 = vcmask (!%p5740_p9), 1043456   ;;  %v5742_v2 = vld [vmem:[%s7778_s23 + $0x54] sm:$0xf] (!%p5740_p9) }
  0xe2   : > { %841 = sbr.rel (%p5740_p9) target bundleno = 254 (0xfe), region = 72  ;;  %v858_v29 = vshrl.u32 (!%p5740_p9), %v5741_v60, 16  ;;  %v861_v30 = vshll.u32 (!%p5740_p9), %v5741_v60, 16  ;;  %vm855_vm14 = vsmask.f32 (!%p5740_p9), 4368  ;;  %v866_v31 = vshrl.u32 (!%p5740_p9), %v5742_v2, 16  ;;  %vm7996_vm15 = vmand (!%p5740_p9), %vm977_vm13, %vm370_vm2 }
  0xe3   : > { %v869_v32 = vshll.u32 (!%p5740_p9), %v5742_v2, 16  ;;  %v5743_v33 = vld [vmem:[%s7778_s23 + $0x58] sm:$0xf] (!%p5740_p9)  ;;  %v979_v35 = vld [vmem:[#allocation2] sm:$0xf] (!%p5740_p9)  ;;  %vm8002_vm0 = vmor (!%p5740_p9), %vm344_vm1, %vm855_vm14 }
  0xe4   : > { %v860_v34 = vrot.slane (!%p5740_p9), %v858_v29, 7  ;;  %v875_v36 = vshrl.u32 (!%p5740_p9), %v5743_v33, 16  ;;  %v878_v37 = vshll.u32 (!%p5740_p9), %v5743_v33, 16  ;;  %v868_v39 = vrot.slane (!%p5740_p9), %v866_v31, 7  ;;  %v983_v40 = vld [vmem:[#allocation2 + $0x8] sm:$0x1] (!%p5740_p9) }
  0xe5   : > { %v5744_v41 = vld [vmem:[%s7778_s23 + $0x5c] sm:$0xf] (!%p5740_p9)  ;;  %v5745_v47 = vld [vmem:[%s7778_s23 + $0x60] sm:$0xf] (!%p5740_p9)  ;;  %v986_v49 = vld [vmem:[#allocation2 + $0xc] sm:$0xf] (!%p5740_p9) }
  0xe6   : > { %v863_v42 = vor.u32 (!%p5740_p9), %v861_v30, %v860_v34  ;;  %v864_v44 = vrot.slane (!%p5740_p9), %v860_v34, 4  ;;  %v877_v45 = vrot.slane (!%p5740_p9), %v875_v36, 7  ;;  %v883_v46 = vshrl.u32 (!%p5740_p9), %v5744_v41, 16  ;;  %v5746_v57 = vld [vmem:[%s7778_s23 + $0x64] sm:$0xf] (!%p5740_p9) }
  0xe7   : > { %v871_v48 = vor.u32 (!%p5740_p9), %v869_v32, %v868_v39  ;;  %v873_v50 = vrot.slane (!%p5740_p9), %v868_v39, 4  ;;  %v886_v51 = vshll.u32 (!%p5740_p9), %v5744_v41, 16  ;;  %v892_v52 = vshrl.u32 (!%p5740_p9), %v5745_v47, 16  ;;  %v990_v61 = vld [vmem:[#allocation2 + $0x14] sm:$0x1] (!%p5740_p9) }
  0xe8   : > { %v980_v55 = vsel (!%p5740_p9), %vm7996_vm15, %v863_v42, %v979_v35  ;;  %v880_v53 = vor.u32 (!%p5740_p9), %v878_v37, %v877_v45  ;;  %v881_v54 = vrot.slane (!%p5740_p9), %v877_v45, 4  ;;  %v885_v56 = vrot.slane (!%p5740_p9), %v883_v46, 7  ;;  %v5747_v0 = vld [vmem:[%s7778_s23 + $0x68] sm:$0xf] (!%p5740_p9)  ;;  %v993_v6 = vld [vmem:[#allocation2 + $0x18] sm:$0xf] (!%p5740_p9) }
  0xe9   : > { %981 = vst [vmem:[#allocation2] sm:$0xf] %v980_v55  ;;  %v872_v58 = vsel %vm8002_vm0, %v864_v44, %v871_v48  ;;  %v984_v59 = vsel %vm7801_vm3, %v873_v50, %v983_v40  ;;  %v894_v62 = vrot.slane %v892_v52, 7  ;;  %v895_v63 = vshll.u32 %v5745_v47, 16  ;;  %v5748_v8 = vld [vmem:[%s7778_s23 + $0x6c] sm:$0xf] }
  0xea   : > { %982 = vst [vmem:[#allocation2 + $0x4] sm:$0xf] %v872_v58  ;;  %985 = vst [vmem:[#allocation2 + $0x8] sm:$0x1] %v984_v59  ;;  %v987_v3 = vsel %vm7996_vm15, %v880_v53, %v986_v49  ;;  %v888_v4 = vor.u32 %v886_v51, %v885_v56  ;;  %v890_v5 = vrot.slane %v885_v56, 4  ;;  %v900_v7 = vshrl.u32 %v5746_v57, 16 }
  0xeb   : > { %988 = vst [vmem:[#allocation2 + $0xc] sm:$0xf] %v987_v3  ;;  %v897_v9 = vor.u32 %v895_v63, %v894_v62  ;;  %v898_v10 = vrot.slane %v894_v62, 4  ;;  %v903_v11 = vshll.u32 %v5746_v57, 16  ;;  %v909_v12 = vshrl.u32 %v5747_v0, 16 }
  0xec   : > { %v5749_v13 = vld [vmem:[%s7778_s23 + $0x70] sm:$0xf]  ;;  %v889_v14 = vsel %vm8002_vm0, %v881_v54, %v888_v4  ;;  %v991_v15 = vsel %vm7801_vm3, %v890_v5, %v990_v61  ;;  %v902_v16 = vrot.slane %v900_v7, 7  ;;  %v912_v17 = vshll.u32 %v5747_v0, 16  ;;  %v5750_v18 = vld [vmem:[%s7778_s23 + $0x74] sm:$0xf] }
  0xed   : > { %989 = vst [vmem:[#allocation2 + $0x10] sm:$0xf] %v889_v14  ;;  %992 = vst [vmem:[#allocation2 + $0x14] sm:$0x1] %v991_v15  ;;  %v994_v19 = vsel %vm7996_vm15, %v897_v9, %v993_v6  ;;  %v997_v20 = vld [vmem:[#allocation2 + $0x20] sm:$0x1] }
  0xee   : > { %v911_v21 = vrot.slane %v909_v12, 7  ;;  %v917_v22 = vshrl.u32 %v5748_v8, 16  ;;  %v920_v23 = vshll.u32 %v5748_v8, 16  ;;  %995 = vst [vmem:[#allocation2 + $0x18] sm:$0xf] %v994_v19  ;;  %v905_v24 = vor.u32 %v903_v11, %v902_v16 }
  0xef   : > { %v907_v25 = vrot.slane %v902_v16, 4  ;;  %v1000_v26 = vld [vmem:[#allocation2 + $0x24] sm:$0xf]  ;;  %v926_v27 = vshrl.u32 %v5749_v13, 16  ;;  %v929_v28 = vshll.u32 %v5749_v13, 16  ;;  %v934_v2 = vshrl.u32 %v5750_v18, 16 }
  0xf0   : > { %v914_v60 = vor.u32 %v912_v17, %v911_v21  ;;  %v915_v29 = vrot.slane %v911_v21, 4  ;;  %v919_v30 = vrot.slane %v917_v22, 7  ;;  %v5751_v31 = vld [vmem:[%s7778_s23 + $0x78] sm:$0xf]  ;;  %v906_v32 = vsel %vm8002_vm0, %v898_v10, %v905_v24  ;;  %v1004_v34 = vld [vmem:[#allocation2 + $0x2c] sm:$0x1] }
  0xf1   : > { %v998_v33 = vsel %vm7801_vm3, %v907_v25, %v997_v20  ;;  %v928_v35 = vrot.slane %v926_v27, 7  ;;  %v937_v36 = vshll.u32 %v5750_v18, 16  ;;  %996 = vst [vmem:[#allocation2 + $0x1c] sm:$0xf] %v906_v32  ;;  %v1007_v41 = vld [vmem:[#allocation2 + $0x30] sm:$0xf] }
  0xf2   : > { %999 = vst [vmem:[#allocation2 + $0x20] sm:$0x1] %v998_v33  ;;  %v1001_v37 = vsel %vm7996_vm15, %v914_v60, %v1000_v26  ;;  %v922_v39 = vor.u32 %v920_v23, %v919_v30  ;;  %v924_v40 = vrot.slane %v919_v30, 4  ;;  %v936_v42 = vrot.slane %v934_v2, 7  ;;  %v5752_v44 = vld [vmem:[%s7778_s23 + $0x7c] sm:$0xf] }
  0xf3   : > { %1002 = vst [vmem:[#allocation2 + $0x24] sm:$0xf] %v1001_v37  ;;  %v931_v45 = vor.u32 %v929_v28, %v928_v35  ;;  %v932_v46 = vrot.slane %v928_v35, 4  ;;  %v1011_v47 = vld [vmem:[#allocation2 + $0x38] sm:$0x1]  ;;  %v943_v48 = vshrl.u32 %v5751_v31, 16 }
  0xf4   : > { %v946_v50 = vshll.u32 %v5751_v31, 16  ;;  %v923_v49 = vsel %vm8002_vm0, %v915_v29, %v922_v39  ;;  %v1005_v51 = vsel %vm7801_vm3, %v924_v40, %v1004_v34  ;;  %v939_v52 = vor.u32 %v937_v36, %v936_v42  ;;  %v1014_v61 = vld [vmem:[#allocation2 + $0x3c] sm:$0xf]  ;;  %v1018_v3 = vld [vmem:[#allocation2 + $0x44] sm:$0x1] }
  0xf5   : > { %v941_v55 = vrot.slane %v936_v42, 4  ;;  %1003 = vst [vmem:[#allocation2 + $0x28] sm:$0xf] %v923_v49  ;;  %1006 = vst [vmem:[#allocation2 + $0x2c] sm:$0x1] %v1005_v51  ;;  %v1008_v53 = vsel %vm7996_vm15, %v931_v45, %v1007_v41  ;;  %v945_v54 = vrot.slane %v943_v48, 7 }
  0xf6   : > { %v951_v56 = vshrl.u32 %v5752_v44, 16  ;;  %v954_v57 = vshll.u32 %v5752_v44, 16  ;;  %1009 = vst [vmem:[#allocation2 + $0x30] sm:$0xf] %v1008_v53  ;;  %v940_v58 = vsel %vm8002_vm0, %v932_v46, %v939_v52 }
  0xf7   : > { %v1012_v59 = vsel %vm7801_vm3, %v941_v55, %v1011_v47  ;;  %1010 = vst [vmem:[#allocation2 + $0x34] sm:$0xf] %v940_v58  ;;  %v948_v62 = vor.u32 %v946_v50, %v945_v54  ;;  %v949_v63 = vrot.slane %v945_v54, 4 }
  0xf8   : > { %1013 = vst [vmem:[#allocation2 + $0x38] sm:$0x1] %v1012_v59  ;;  %v953_v0 = vrot.slane %v951_v56, 7 }
  0xf9   : > { %v1015_v4 = vsel %vm7996_vm15, %v948_v62, %v1014_v61 }
  0xfa   : > { %v956_v5 = vor.u32 %v954_v57, %v953_v0  ;;  %v958_v6 = vrot.slane %v953_v0, 4  ;;  %1016 = vst [vmem:[#allocation2 + $0x3c] sm:$0xf] %v1015_v4 }
  0xfc   : > { %v957_v7 = vsel %vm8002_vm0, %v949_v63, %v956_v5  ;;  %v1019_v8 = vsel %vm7801_vm3, %v958_v6, %v1018_v3 }
  0xfd   : > { %1017 = vst [vmem:[#allocation2 + $0x40] sm:$0xf] %v957_v7  ;;  %1020 = vst [vmem:[#allocation2 + $0x44] sm:$0x1] %v1019_v8 }
  0xfe PF: > { %v7111_v9 = vld [vmem:[#allocation6 + $0x40] sm:$0xff]   ;;  %v7112_v10 = vld [vmem:[#allocation6 + $0x48] sm:$0xff]   ;;  %v7113_v11 = vld [vmem:[#allocation6 + $0x50] sm:$0xff]   ;;  %vm1055_vm4 = vsmask.f32 3328  ;;  %vm1554_vm7 = vcmask 1042432  }
  0xff   : > { %6353 = vmatprep.subr.bf16.mxu0 %v7111_v9  ;;  %v7114_v38 = vld [vmem:[#allocation6 + $0x58] sm:$0xff]   ;;  %v8052_v13 = vld [vmem:[#allocation2 + $0x4] sm:$0xf]  ;;  %v8054_v43 = vld [vmem:[#allocation2 + $0x8] sm:$0x1]  ;;  %vm1555_vm8 = vcmask 1046532  }
 0x100   : > { %6354 = vmatpush3.bf16.msra.mxu0 %v7111_v9  ;;  %vm1056_vm5 = vsmask.f32 7440  ;;  %v1068_v16 = vshll.u32 %v8052_v13, 16  ;;  %v1072_v17 = vshrl.u32 %v8052_v13, 16  ;;  %v1078_v18 = vshll.u32 %v8054_v43, 16  ;;  %v7115_v22 = vld [vmem:[#allocation6 + $0x60] sm:$0xff]   ;;  %vm8158_vm9 = vmor %vm1554_vm7, %vm1555_vm8 }
 0x101   : > { %6355 = vmatprep.subr.bf16.mxu0 %v7112_v10  ;;  %v8061_v21 = vld [vmem:[#allocation2 + $0xc] sm:$0xf]  ;;  %v8063_v25 = vld [vmem:[#allocation2 + $0x10] sm:$0xf]  ;;  %v8066_v28 = vld [vmem:[#allocation2 + $0x14] sm:$0x1] }
 0x102   : > { %v1070_v23 = vrot.slane %v1068_v16, 5  ;;  %v1074_v24 = vrot.slane %v1072_v17, 4  ;;  %v1083_v26 = vshrl.u32 %v8061_v21, 16  ;;  %v1086_v60 = vshll.u32 %v8061_v21, 16  ;;  %vm8073_vm6 = vmor %vm1055_vm4, %vm1056_vm5  ;;  %v7116_v40 = vld [vmem:[#allocation6 + $0x68] sm:$0xff]   ;;  %v7117_v51 = vld [vmem:[#allocation6 + $0x70] sm:$0xff]  }
 0x103   : > { %v1092_v29 = vshll.u32 %v8063_v25, 16  ;;  %v1096_v30 = vshrl.u32 %v8063_v25, 16  ;;  %v1080_v32 = vrot.slane %v1078_v18, 5  ;;  %v1102_v34 = vshll.u32 %v8066_v28, 16  ;;  %v8082_v48 = vld [vmem:[#allocation2 + $0x18] sm:$0xf] }
 0x104   : > { %6356 = vmatpush3.bf16.msra.mxu0 %v7112_v10  ;;  %v1075_v31 = vor.u32 %v1074_v24, %v1070_v23  ;;  %v1085_v33 = vrot.slane %v1083_v26, 4  ;;  %v1088_v36 = vrot.slane %v1086_v60, 5  ;;  %v8084_v50 = vld [vmem:[#allocation2 + $0x1c] sm:$0xf]  ;;  %v8086_v49 = vld [vmem:[#allocation2 + $0x20] sm:$0x1] }
 0x105   : > { %6357 = vmatprep.subr.bf16.mxu0 %v7113_v11  ;;  %v8050_v12 = vld [vmem:[#allocation2] sm:$0xf]  ;;  %v1094_v37 = vrot.slane %v1092_v29, 5  ;;  %v1098_v39 = vrot.slane %v1096_v30, 4  ;;  %v1104_v46 = vrot.slane %v1102_v34, 5  ;;  %v1107_v54 = vshrl.u32 %v8082_v48, 16 }
 0x106   : > { %v1059_v14 = vshrl.u32 %v8050_v12, 16  ;;  %v1062_v15 = vshll.u32 %v8050_v12, 16  ;;  %v1076_v41 = vrot.slane %v1075_v31, 4  ;;  %v1089_v44 = vor.u32 %v1088_v36, %v1085_v33  ;;  %v8095_v63 = vld [vmem:[#allocation2 + $0x24] sm:$0xf]  ;;  %v7118_v3 = vld [vmem:[#allocation6 + $0x78] sm:$0xff]  }
 0x107   : > { %v1099_v45 = vor.u32 %v1098_v39, %v1094_v37  ;;  %v1110_v56 = vshll.u32 %v8082_v48, 16  ;;  %v1116_v57 = vshll.u32 %v8084_v50, 16  ;;  %v1120_v58 = vshrl.u32 %v8084_v50, 16  ;;  %v8097_v0 = vld [vmem:[#allocation2 + $0x28] sm:$0xf] }
 0x108   : > { %6358 = vmatpush3.bf16.msra.mxu0 %v7113_v11  ;;  %v1061_v19 = vrot.slane %v1059_v14, 4  ;;  %v1064_v20 = vrot.slane %v1062_v15, 5  ;;  %v1081_v47 = vsel %vm8073_vm6, %v1076_v41, %v1080_v32  ;;  %v1090_v55 = vrot.slane %v1089_v44, 4  ;;  %v8101_v8 = vld [vmem:[#allocation2 + $0x2c] sm:$0x1] }
 0x109   : > { %6359 = vmatprep.subr.bf16.mxu0 %v7114_v38  ;;  %v1100_v53 = vrot.slane %v1099_v45, 4  ;;  %v1126_v59 = vshll.u32 %v8086_v49, 16  ;;  %v1109_v62 = vrot.slane %v1107_v54, 4  ;;  %v1112_v5 = vrot.slane %v1110_v56, 5  ;;  %v8108_v18 = vld [vmem:[#allocation2 + $0x30] sm:$0xf] }
 0x10a   : > { %v1065_v27 = vor.u32 %v1064_v20, %v1061_v19  ;;  %v1095_v61 = vsel %vm8073_vm6, %v1090_v55, %v1094_v37  ;;  %v1118_v6 = vrot.slane %v1116_v57, 5  ;;  %v1122_v7 = vrot.slane %v1120_v58, 4  ;;  %v8113_v30 = vld [vmem:[#allocation2 + $0x38] sm:$0x1]  ;;  %v8122_v41 = vld [vmem:[#allocation2 + $0x3c] sm:$0xf] }
 0x10b   : > { %v1105_v4 = vsel %vm8073_vm6, %v1100_v53, %v1104_v46  ;;  %v1128_v9 = vrot.slane %v1126_v59, 5  ;;  %v1131_v10 = vshrl.u32 %v8095_v63, 16  ;;  %v1134_v11 = vshll.u32 %v8095_v63, 16  ;;  %v8127_v54 = vld [vmem:[#allocation2 + $0x44] sm:$0x1] }
 0x10c   : > { %6360 = vmatpush3.bf16.msra.mxu0 %v7114_v38  ;;  %v1066_v35 = vrot.slane %v1065_v27, 4  ;;  %v1140_v38 = vshll.u32 %v8097_v0, 16  ;;  %v1113_v14 = vor.u32 %v1112_v5, %v1109_v62  ;;  %v1123_v15 = vor.u32 %v1122_v7, %v1118_v6 }
 0x10d   : > { %6361 = vmatprep.subr.bf16.mxu0 %v7115_v22  ;;  %v1144_v16 = vshrl.u32 %v8097_v0, 16  ;;  %v1150_v17 = vshll.u32 %v8101_v8, 16  ;;  %v1133_v19 = vrot.slane %v1131_v10, 4  ;;  %v1136_v20 = vrot.slane %v1134_v11, 5 }
 0x10e   : > { %v1071_v42 = vsel %vm8073_vm6, %v1066_v35, %v1070_v23  ;;  %v8110_v23 = vld [vmem:[#allocation2 + $0x34] sm:$0xf]  ;;  %v1155_v24 = vshrl.u32 %v8108_v18, 16  ;;  %v5754_v26 = vcombine.low %v1095_v61, %v1105_v4  ;;  %v1114_v27 = vrot.slane %v1113_v14, 4  ;;  %v7119_v35 = vld [vmem:[#allocation6] sm:$0xff]  }
 0x10f   : > { %v5753_v52 = vcombine.low %v1071_v42, %v1081_v47  ;;  %v1124_v60 = vrot.slane %v1123_v15, 4  ;;  %v1146_v29 = vrot.slane %v1144_v16, 4  ;;  %v1137_v31 = vor.u32 %v1136_v20, %v1133_v19  ;;  %v8124_v47 = vld [vmem:[#allocation2 + $0x40] sm:$0xf]  ;;  %v7121_v16 = vld [vmem:[#allocation6 + $0x10] sm:$0xff]  }
 0x110   : > { %6362 = vmatpush3.bf16.msra.mxu0 %v7115_v22  ;;  %v1142_v22 = vrot.slane %v1140_v38, 5  ;;  %v1157_v32 = vrot.slane %v1155_v24, 4  ;;  %v1158_v33 = vshll.u32 %v8108_v18, 16  ;;  %v1164_v34 = vshll.u32 %v8110_v23, 16 }
 0x111   : > { %6363 = vmatprep.subr.bf16.mxu0 %v7116_v40  ;;  %6369 = vmatprep.mubr.bf16.mxu0 %v5753_v52  ;;  %v1119_v36 = vsel %vm8073_vm6, %v1114_v27, %v1118_v6  ;;  %v1129_v37 = vsel %vm8073_vm6, %v1124_v60, %v1128_v9  ;;  %v1138_v42 = vrot.slane %v1137_v31, 4  ;;  %v1152_v44 = vrot.slane %v1150_v17, 5 }
 0x112   : > { %v1147_v39 = vor.u32 %v1146_v29, %v1142_v22  ;;  %v1160_v45 = vrot.slane %v1158_v33, 5  ;;  %v1166_v46 = vrot.slane %v1164_v34, 5  ;;  %v1174_v53 = vshll.u32 %v8113_v30, 16  ;;  %v7123_v34 = vld [vmem:[#allocation6 + $0x20] sm:$0xff]  }
 0x113   : > { %v1179_v56 = vshrl.u32 %v8122_v41, 16  ;;  %v5755_v57 = vcombine.low %v1119_v36, %v1129_v37  ;;  %v1182_v59 = vshll.u32 %v8122_v41, 16  ;;  %v1188_v61 = vshll.u32 %v8124_v47, 16  ;;  %v7124_v37 = vld [vmem:[#allocation6 + $0x28] sm:$0xff]  }
 0x114   : > { %6364 = vmatpush3.bf16.msra.mxu0 %v7116_v40  ;;  %v1168_v40 = vshrl.u32 %v8110_v23, 16  ;;  %v1148_v52 = vrot.slane %v1147_v39, 4  ;;  %v1161_v58 = vor.u32 %v1160_v45, %v1157_v32  ;;  %v1176_v4 = vrot.slane %v1174_v53, 5  ;;  %v7125_v39 = vld [vmem:[#allocation6 + $0x30] sm:$0xff]   ;;  %v7130_v45 = vld [vmem:[#allocation6 + $0x88] sm:$0xff]  }
 0x115   : > { %6365 = vmatprep.subr.bf16.mxu0 %v7117_v51  ;;  %v1181_v5 = vrot.slane %v1179_v56, 4  ;;  %v1184_v7 = vrot.slane %v1182_v59, 5  ;;  %v1190_v10 = vrot.slane %v1188_v61, 5  ;;  %v1192_v11 = vshrl.u32 %v8124_v47, 16  ;;  %v7136_v61 = vld [vmem:[#allocation6 + $0xa8] sm:$0xff]  }
 0x116   : > { %v1170_v55 = vrot.slane %v1168_v40, 4  ;;  %v1162_v6 = vrot.slane %v1161_v58, 4  ;;  %v1198_v38 = vshll.u32 %v8127_v54, 16  ;;  %v1153_v14 = vsel %vm8073_vm6, %v1148_v52, %v1152_v44  ;;  %v7126_v40 = vld [vmem:[#allocation6 + $0x38] sm:$0xff]   ;;  %v1536_v52 = vld [vmem:[#allocation2] sm:$0xe] }
 0x117   : > { %v1185_v15 = vor.u32 %v1184_v7, %v1181_v5  ;;  %v1194_v20 = vrot.slane %v1192_v11, 4  ;;  %v5767_v36 = vcombine.low %v8050_v12, %v8052_v13  ;;  %v5768_v44 = vcombine.low %v8061_v21, %v8063_v25  ;;  %v7138_v5 = vld [vmem:[#allocation6 + $0xb0] sm:$0xff]   ;;  %v1538_v7 = vld [vmem:[#allocation2 + $0x18] sm:$0xe] }
 0x118   : > { %6366 = vmatpush3.bf16.msra.mxu0 %v7117_v51  ;;  %v7120_v51 = vld [vmem:[#allocation6 + $0x8] sm:$0xff]   ;;  %v1171_v62 = vor.u32 %v1170_v55, %v1166_v46  ;;  %v1167_v17 = vsel %vm8073_vm6, %v1162_v6, %v1166_v46  ;;  %v1200_v29 = vrot.slane %v1198_v38, 5  ;;  %v5769_v12 = vcombine.low %v8082_v48, %v8084_v50  ;;  %v7131_v46 = vld [vmem:[#allocation6 + $0x90] sm:$0xff]   ;;  %v7132_v48 = vld [vmem:[#allocation6 + $0x98] sm:$0xff]  }
 0x119   : > { %6367 = vmatprep.subr.bf16.mxu0 %v7118_v3  ;;  %v1186_v60 = vrot.slane %v1185_v15, 4  ;;  %v5770_v55 = vcombine.low %v8095_v63, %v8097_v0  ;;  %v5771_v21 = vcombine.low %v8108_v18, %v8110_v23  ;;  %v5781_v53 = vrot.slane %v1536_v52, 9  ;;  %v7146_v52 = vld [vmem:[#allocation6 + $0xe8] sm:$0xff]  }
 0x11a   : > { %v1172_v9 = vrot.slane %v1171_v62, 4  ;;  %v5772_v59 = vcombine.low %v8122_v41, %v8124_v47  ;;  %v1537_v62 = vld [vmem:[#allocation2 + $0xc] sm:$0xe]  ;;  %v1573_v6 = vrot.slane %v8084_v50, 5  ;;  %v1576_v38 = vrot.slane %v8086_v49, 5 }
 0x11b   : > { %v1191_v32 = vsel %vm8073_vm6, %v1186_v60, %v1190_v10  ;;  %v5782_v41 = vrot.slane %v1537_v62, 9  ;;  %v1539_v50 = vld [vmem:[#allocation2 + $0x24] sm:$0xe]  ;;  %vm3580_vm10 = vcmask 1043456   ;;  %vm3458_vm11 = vsmask.f32 4368 }
 0x11c   : > { %6368 = vmatpush3.bf16.msra.mxu0 %v7118_v3  ;;  %v1143_v3 = vsel %vm8073_vm6, %v1138_v42, %v1142_v22  ;;  %v1177_v19 = vsel %vm8073_vm6, %v1172_v9, %v1176_v4  ;;  %v7122_v22 = vld [vmem:[#allocation6 + $0x18] sm:$0xff]   ;;  %v7128_v42 = vld [vmem:[#allocation6 + $0x80] sm:$0xff]   ;;  %v1566_v4 = vrot.slane %v8063_v25, 5  ;;  %v1569_v9 = vrot.slane %v8066_v28, 5  ;;  %vm8445_vm12 = vmand %vm3580_vm10, %vm370_vm2 }
 0x11d   : > { %6381 = vmatprep.subr.bf16.mxu0 %v7119_v35  ;;  %v5756_v24 = vcombine.low %v1143_v3, %v1153_v14  ;;  %v5757_v27 = vcombine.low %v1167_v17, %v1177_v19  ;;  %v5783_v3 = vrot.slane %v1538_v7, 9  ;;  %v1575_v14 = vrot.slane %v1573_v6, 4  ;;  %v7141_v28 = vld [vmem:[#allocation6 + $0xc0] sm:$0xff]   ;;  %v8202_v7 = vld [vmem:[#allocation2 + $0x14] sm:$0x1]  ;;  %vm8452_vm13 = vmor %vm344_vm1, %vm3458_vm11 }
 0x11e   : > { %v1568_v11 = vrot.slane %v1566_v4, 4  ;;  %v1567_v25 = vsel %vm8158_vm9, %v5782_v41, %v1566_v4  ;;  %v1587_v19 = vrot.slane %v8110_v23, 5  ;;  %v5784_v60 = vrot.slane %v1539_v50, 9 }
 0x11f   : > { %6370 = vmatmul.mubr.bf16.vlgmr.msra.gmra.mrb[0].mxu0 %v5754_v26  ;;  %v1195_v26 = vor.u32 %v1194_v20, %v1190_v10  ;;  %v7140_v10 = vld [vmem:[#allocation6 + $0xb8] sm:$0xff]   ;;  %v1574_v17 = vsel %vm8158_vm9, %v5783_v3, %v1573_v6  ;;  %v1577_v49 = vsel %vm8158_vm9, %v1575_v14, %v1576_v38  ;;  %v1540_v20 = vld [vmem:[#allocation2 + $0x30] sm:$0xe] }
 0x120   : > { %6382 = vmatpush3.bf16.msra.mxu0 %v7119_v35  ;;  %6373 = vmatprep.mubr.bf16.mxu0 %v5755_v57  ;;  %v1562_v57 = vrot.slane %v8054_v43, 5  ;;  %v1570_v15 = vsel %vm8158_vm9, %v1568_v11, %v1569_v9  ;;  %v7153_v9 = vld [vmem:[#allocation6 + $0x110] sm:$0xff]   ;;  %v2024_v11 = vshll.u32 %v8202_v7, 16  ;;  %v1989_v38 = vld [vmem:[#allocation2 + $0x18] sm:$0xf] }
 0x121   : > { %6383 = vmatprep.subr.bf16.mxu0 %v7120_v51  ;;  %v1196_v31 = vrot.slane %v1195_v26, 4  ;;  %v1583_v26 = vrot.slane %v8101_v8, 5  ;;  %v7157_v3 = vld [vmem:[#allocation2 + $0x30] sm:$0xff]   ;;  %v8205_v14 = vld [vmem:[#allocation2 + $0x1c] sm:$0xf]  ;;  %v2029_v50 = vshrl.u32 %v1989_v38, 16 }
 0x123   : > { %v1201_v33 = vsel %vm8073_vm6, %v1196_v31, %v1200_v29  ;;  %v1589_v31 = vrot.slane %v1587_v19, 4 }
 0x124   : > { %6384 = vmatpush3.bf16.msra.mxu0 %v7120_v51  ;;  %v5758_v35 = vcombine.low %v1191_v32, %v1201_v33  ;;  %v1559_v51 = vrot.slane %v8052_v13, 5  ;;  %v7134_v13 = vld [vmem:[#allocation6 + $0xa0] sm:$0xff]   ;;  %v1590_v32 = vrot.slane %v8113_v30, 5  ;;  %v7143_v33 = vld [vmem:[#allocation6 + $0xd0] sm:$0xff]   ;;  %v1541_v30 = vld [vmem:[#allocation2 + $0x3c] sm:$0xe] }
 0x125   : > { %6385 = vmatprep.subr.bf16.mxu0 %v7121_v16 }
 0x126   : > { %v1561_v56 = vrot.slane %v1559_v51, 4  ;;  %v1560_v63 = vsel %vm8158_vm9, %v5781_v53, %v1559_v51  ;;  %v8198_v53 = vld [vmem:[#allocation2 + $0x10] sm:$0xf] }
 0x127   : > { %6374 = vmatmul.mubr.bf16.gmra.mrb[4].mxu0 %v5756_v24  ;;  %v5788_v24 = vcombine.low %v1567_v25, %v1570_v15  ;;  %v1992_v25 = vld [vmem:[#allocation2 + $0x24] sm:$0xf]  ;;  %v7159_v15 = vld [vmem:[#allocation2 + $0x3c] sm:$0xff]  }
 0x128   : > { %6386 = vmatpush3.bf16.msra.mxu0 %v7121_v16  ;;  %6377 = vmatprep.mubr.bf16.mxu0 %v5757_v27  ;;  %v1563_v18 = vsel %vm8158_vm9, %v1561_v56, %v1562_v57  ;;  %v1580_v16 = vrot.slane %v8097_v0, 5  ;;  %v5789_v27 = vcombine.low %v1574_v17, %v1577_v49  ;;  %v7142_v0 = vld [vmem:[#allocation6 + $0xc8] sm:$0xff]   ;;  %v7150_v56 = vld [vmem:[#allocation6 + $0x100] sm:$0xff]   ;;  %v7154_v17 = vld [vmem:[#allocation6 + $0x118] sm:$0xff]  }
 0x129   : > { %6387 = vmatprep.subr.bf16.mxu0 %v7122_v22  ;;  %v5787_v43 = vcombine.low %v1560_v63, %v1563_v18  ;;  %v2014_v63 = vshll.u32 %v8198_v53, 16  ;;  %v2018_v18 = vshrl.u32 %v8198_v53, 16 }
 0x12a   : > { %v1582_v29 = vrot.slane %v1580_v16, 4  ;;  %v1581_v23 = vsel %vm8158_vm9, %v5784_v60, %v1580_v16  ;;  %v2032_v16 = vshll.u32 %v1989_v38, 16  ;;  %v2056_v60 = vshll.u32 %v1992_v25, 16 }
 0x12b   : > { %v2020_v6 = vrot.slane %v2018_v18, 4 }
 0x12c   : > { %6388 = vmatpush3.bf16.msra.mxu0 %v7122_v22  ;;  %v5785_v22 = vrot.slane %v1540_v20, 9  ;;  %v1584_v8 = vsel %vm8158_vm9, %v1582_v29, %v1583_v26  ;;  %v2026_v20 = vrot.slane %v2024_v11, 5  ;;  %v2042_v26 = vshrl.u32 %v8205_v14, 16 }
 0x12d   : > { %6389 = vmatprep.subr.bf16.mxu0 %v7123_v34 }
 0x12f   : > { %6378 = vmatmul.mubr.bf16.gmra.mrb[8].mxu0 %v5758_v35  ;;  %v1588_v35 = vsel %vm8158_vm9, %v5785_v22, %v1587_v19  ;;  %v2031_v22 = vrot.slane %v2029_v50, 4 }
 0x130   : > { %6390 = vmatpush3.bf16.msra.mxu0 %v7123_v34  ;;  %6397 = vmatprep.mubr.bf16.mxu0 %v5767_v36  ;;  %v1594_v34 = vrot.slane %v8124_v47, 5  ;;  %v1591_v36 = vsel %vm8158_vm9, %v1589_v31, %v1590_v32  ;;  %v2034_v31 = vrot.slane %v2032_v16, 5  ;;  %v7156_v32 = vld [vmem:[#allocation6 + $0x120] sm:$0xff]   ;;  %v7162_v16 = vld [vmem:[#allocation6 + $0x138] sm:$0xff]  }
 0x131   : > { %6391 = vmatprep.subr.bf16.mxu0 %v7124_v37 }
 0x134   : > { %6392 = vmatpush3.bf16.msra.mxu0 %v7124_v37  ;;  %v5790_v37 = vcombine.low %v1581_v23, %v1584_v8  ;;  %v8217_v8 = vld [vmem:[#allocation2 + $0x20] sm:$0x1] }
 0x135   : > { %6393 = vmatprep.subr.bf16.mxu0 %v7125_v39 }
 0x138   : > { %6394 = vmatpush3.bf16.msra.mxu0 %v7125_v39  ;;  %v1597_v39 = vrot.slane %v8127_v54, 5  ;;  %v7149_v54 = vld [vmem:[#allocation2 + $0xc] sm:$0xff]  }
 0x139   : > { %6395 = vmatprep.subr.bf16.mxu0 %v7126_v40 }
 0x13c   : > { %6396 = vmatpush3.bf16.msra.mxu0 %v7126_v40  ;;  %v5791_v40 = vcombine.low %v1588_v35, %v1591_v36  ;;  %v2044_v36 = vrot.slane %v2042_v26, 4  ;;  %v8239_v26 = vld [vmem:[#allocation2 + $0x4c] sm:$0xf] }
 0x13d   : > { %6409 = vmatprep.subr.bf16.mxu0 %v7128_v42 }
 0x13f   : > { %6398 = vmatmul.mubr.bf16.vlgmr.msra.gmra.mrb[0].mxu0 %v5768_v44  ;;  %v1596_v44 = vrot.slane %v1594_v34, 4 }
 0x140   : > { %6410 = vmatpush3.bf16.msra.mxu0 %v7128_v42  ;;  %6401 = vmatprep.mubr.bf16.mxu0 %v5769_v12  ;;  %v5786_v42 = vrot.slane %v1541_v30, 9  ;;  %v7144_v12 = vld [vmem:[#allocation6 + $0xd8] sm:$0xff]  }
 0x141   : > { %6411 = vmatprep.subr.bf16.mxu0 %v7130_v45 }
 0x142   : > { %v1595_v47 = vsel %vm8158_vm9, %v5786_v42, %v1594_v34  ;;  %v7161_v34 = vld [vmem:[#allocation2 + $0x48] sm:$0xff]  }
 0x144   : > { %6412 = vmatpush3.bf16.msra.mxu0 %v7130_v45  ;;  %v1598_v45 = vsel %vm8158_vm9, %v1596_v44, %v1597_v39  ;;  %v8221_v39 = vld [vmem:[#allocation2 + $0x2c] sm:$0x1]  ;;  %v1995_v44 = vld [vmem:[#allocation2 + $0x30] sm:$0xf] }
 0x145   : > { %6413 = vmatprep.subr.bf16.mxu0 %v7131_v46  ;;  %v5792_v51 = vcombine.low %v1595_v47, %v1598_v45  ;;  %v2035_v47 = vor.u32 %v2034_v31, %v2031_v22  ;;  %v2048_v45 = vshll.u32 %v8217_v8, 16 }
 0x147   : > { %6402 = vmatmul.mubr.bf16.gmra.mrb[4].mxu0 %v5770_v55  ;;  %v7147_v55 = vld [vmem:[#allocation6 + $0xf0] sm:$0xff]  }
 0x148   : > { %6414 = vmatpush3.bf16.msra.mxu0 %v7131_v46  ;;  %6405 = vmatprep.mubr.bf16.mxu0 %v5771_v21  ;;  %v7145_v46 = vld [vmem:[#allocation6 + $0xe0] sm:$0xff]   ;;  %v7148_v21 = vld [vmem:[#allocation6 + $0xf8] sm:$0xff]  }
 0x149   : > { %6415 = vmatprep.subr.bf16.mxu0 %v7132_v48 }
 0x14c   : > { %6416 = vmatpush3.bf16.msra.mxu0 %v7132_v48  ;;  %v1986_v48 = vld [vmem:[#allocation2 + $0xc] sm:$0xf] }
 0x14d   : > { %6417 = vmatprep.subr.bf16.mxu0 %v7134_v13  ;;  %v2005_v57 = vshrl.u32 %v1986_v48, 16 }
 0x14f   : > { %6406 = vmatmul.mubr.bf16.gmra.mrb[8].mxu0 %v5772_v59  ;;  %v7151_v59 = vld [vmem:[#allocation2 + $0x18] sm:$0xff]   ;;  %v2007_v62 = vrot.slane %v2005_v57, 4 }
 0x150   : > { %6418 = vmatpush3.bf16.msra.mxu0 %v7134_v13  ;;  %6425 = vmatprep.mubr.bf16.mxu0 %v5787_v43  ;;  %v2008_v13 = vshll.u32 %v1986_v48, 16  ;;  %v7155_v43 = vld [vmem:[#allocation2 + $0x24] sm:$0xff]   ;;  %v1998_v48 = vld [vmem:[#allocation2 + $0x3c] sm:$0xf] }
 0x151   : > { %6419 = vmatprep.subr.bf16.mxu0 %v7136_v61 }
 0x152   : > { %v2010_v4 = vrot.slane %v2008_v13, 5  ;;  %v2080_v13 = vshll.u32 %v1995_v44, 16 }
 0x154   : > { %6420 = vmatpush3.bf16.msra.mxu0 %v7136_v61  ;;  %v7152_v61 = vld [vmem:[#allocation6 + $0x108] sm:$0xff]  }
 0x155   : > { %6421 = vmatprep.subr.bf16.mxu0 %v7138_v5 }
 0x158   : > { %6422 = vmatpush3.bf16.msra.mxu0 %v7138_v5  ;;  %v2016_v5 = vrot.slane %v2014_v63, 5 }
 0x159   : > { %6423 = vmatprep.subr.bf16.mxu0 %v7140_v10 }
 0x15a   : > { %v2021_v41 = vor.u32 %v2020_v6, %v2016_v5 }
 0x15c   : > { %6424 = vmatpush3.bf16.msra.mxu0 %v7140_v10  ;;  %v2011_v10 = vor.u32 %v2010_v4, %v2007_v62  ;;  %v2022_v19 = vrot.slane %v2021_v41, 4  ;;  %v2101_v62 = vshrl.u32 %v1998_v48, 16  ;;  %v2104_v4 = vshll.u32 %v1998_v48, 16  ;;  %v7164_v48 = vld [vmem:[#allocation6 + $0x148] sm:$0xff]  }
 0x15d   : > { %6437 = vmatprep.subr.bf16.mxu0 %v7141_v28 }
 0x15e   : > { %v2012_v49 = vrot.slane %v2011_v10, 4  ;;  %v2027_v23 = vsel %vm8073_vm6, %v2022_v19, %v2026_v20  ;;  %v2106_v19 = vrot.slane %v2104_v4, 5 }
 0x15f   : > { %6426 = vmatmul.mubr.bf16.vlgmr.msra.gmra.mrb[0].mxu0 %v5788_v24  ;;  %v2038_v24 = vshll.u32 %v8205_v14, 16 }
 0x160   : > { %6438 = vmatpush3.bf16.msra.mxu0 %v7141_v28  ;;  %6429 = vmatprep.mubr.bf16.mxu0 %v5789_v27  ;;  %v8207_v28 = vld [vmem:[#allocation2 + $0x28] sm:$0xf]  ;;  %v2053_v27 = vshrl.u32 %v1992_v25, 16  ;;  %v2082_v25 = vrot.slane %v2080_v13, 5 }
 0x161   : > { %6439 = vmatprep.subr.bf16.mxu0 %v7142_v0  ;;  %v2062_v29 = vshll.u32 %v8207_v28, 16  ;;  %v8219_v35 = vrot.slane %v2038_v24, 5 }
 0x162   : > { %v2055_v30 = vrot.slane %v2053_v27, 4 }
 0x164   : > { %6440 = vmatpush3.bf16.msra.mxu0 %v7142_v0  ;;  %v2066_v0 = vshrl.u32 %v8207_v28, 16 }
 0x165   : > { %6441 = vmatprep.subr.bf16.mxu0 %v7143_v33 }
 0x166   : > { %v2068_v42 = vrot.slane %v2066_v0, 4  ;;  %v8247_v0 = vld [vmem:[#allocation2 + $0x44] sm:$0x1] }
 0x167   : > { %6430 = vmatmul.mubr.bf16.gmra.mrb[4].mxu0 %v5790_v37  ;;  %v2058_v37 = vrot.slane %v2056_v60, 5 }
 0x168   : > { %6442 = vmatpush3.bf16.msra.mxu0 %v7143_v33  ;;  %6433 = vmatprep.mubr.bf16.mxu0 %v5791_v40  ;;  %v2017_v33 = vsel %vm8073_vm6, %v2012_v49, %v2016_v5  ;;  %v8223_v40 = vrot.slane %v2062_v29, 5  ;;  %v2103_v49 = vrot.slane %v2101_v62, 4 }
 0x169   : > { %6443 = vmatprep.subr.bf16.mxu0 %v7144_v12 }
 0x16a   : > { %v2069_v57 = vor.u32 %v2068_v42, %v8223_v40 }
 0x16c   : > { %6444 = vmatpush3.bf16.msra.mxu0 %v7144_v12  ;;  %v5815_v12 = vcombine.low %v2017_v33, %v2027_v23  ;;  %v2070_v38 = vrot.slane %v2069_v57, 4 }
 0x16d   : > { %6445 = vmatprep.subr.bf16.mxu0 %v7145_v46 }
 0x16f   : > { %6434 = vmatmul.mubr.bf16.gmra.mrb[8].mxu0 %v5792_v51  ;;  %v7158_v51 = vld [vmem:[#allocation6 + $0x128] sm:$0xff]  }
 0x170   : > { %6446 = vmatpush3.bf16.msra.mxu0 %v7145_v46  ;;  %6453 = vmatprep.mubr.bf16.mxu0 %v7149_v54  ;;  %v8226_v46 = vld [vmem:[#allocation2 + $0x34] sm:$0xf]  ;;  %v2045_v54 = vor.u32 %v2044_v36, %v8219_v35  ;;  %v2138_v36 = vshrl.u32 %v8239_v26, 16 }
 0x171   : > { %6447 = vmatprep.subr.bf16.mxu0 %v7146_v52  ;;  %v2086_v63 = vshll.u32 %v8226_v46, 16  ;;  %v2090_v18 = vshrl.u32 %v8226_v46, 16 }
 0x173   : > { %v2092_v50 = vrot.slane %v2090_v18, 4  ;;  %v8257_v18 = vld [vmem:[#allocation2 + $0x50] sm:$0x1] }
 0x174   : > { %6448 = vmatpush3.bf16.msra.mxu0 %v7146_v52  ;;  %v2059_v52 = vor.u32 %v2058_v37, %v2055_v30  ;;  %v7163_v30 = vld [vmem:[#allocation6 + $0x140] sm:$0xff]   ;;  %v2107_v37 = vor.u32 %v2106_v19, %v2103_v49  ;;  %v2144_v4 = vshll.u32 %v8257_v18, 16  ;;  %v2358_v19 = vrot.slane %v8202_v7, 5 }
 0x175   : > { %6449 = vmatprep.subr.bf16.mxu0 %v7147_v55 }
 0x176   : > { %v2060_v10 = vrot.slane %v2059_v52, 4  ;;  %v2108_v57 = vrot.slane %v2107_v37, 4  ;;  %v7170_v37 = vld [vmem:[#allocation6 + $0x178] sm:$0xff]  }
 0x178   : > { %6450 = vmatpush3.bf16.msra.mxu0 %v7147_v55  ;;  %v2072_v55 = vshll.u32 %v8221_v39, 16  ;;  %v2065_v22 = vsel %vm8073_vm6, %v2060_v10, %v8223_v40  ;;  %v2355_v10 = vrot.slane %v8198_v53, 5 }
 0x179   : > { %6451 = vmatprep.subr.bf16.mxu0 %v7148_v21 }
 0x17a   : > { %v2074_v41 = vrot.slane %v2072_v55, 5  ;;  %v2357_v49 = vrot.slane %v2355_v10, 4 }
 0x17c   : > { %6452 = vmatpush3.bf16.msra.mxu0 %v7148_v21  ;;  %v2077_v21 = vshrl.u32 %v1995_v44, 16  ;;  %v2075_v31 = vsel %vm8073_vm6, %v2070_v38, %v2074_v41  ;;  %v2120_v44 = vshll.u32 %v8247_v0, 16  ;;  %v2329_v41 = vld [vmem:[#allocation2 + $0xc] sm:$0xe] }
 0x17d   : > { %6465 = vmatprep.subr.bf16.mxu0 %v7150_v56  ;;  %v5817_v40 = vcombine.low %v2065_v22, %v2075_v31  ;;  %v7168_v22 = vld [vmem:[#allocation6 + $0x168] sm:$0xff]   ;;  %v2362_v31 = vrot.slane %v8205_v14, 5 }
 0x17e   : > { %v2079_v11 = vrot.slane %v2077_v21, 4  ;;  %v2140_v21 = vrot.slane %v2138_v36, 4 }
 0x17f   : > { %6454 = vmatmul.mubr.bf16.vlgmr.msra.gmra.mrb[0].mxu0 %v7151_v59  ;;  %v2036_v59 = vrot.slane %v2035_v47, 4  ;;  %v2364_v36 = vrot.slane %v2362_v31, 4 }
 0x180   : > { %6466 = vmatpush3.bf16.msra.mxu0 %v7150_v56  ;;  %6457 = vmatprep.mubr.bf16.mxu0 %v7155_v43  ;;  %v8230_v56 = vld [vmem:[#allocation2 + $0x40] sm:$0xf]  ;;  %v2050_v43 = vrot.slane %v2048_v45, 5 }
 0x181   : > { %6467 = vmatprep.subr.bf16.mxu0 %v7152_v61  ;;  %v2110_v5 = vshll.u32 %v8230_v56, 16  ;;  %v2114_v6 = vshrl.u32 %v8230_v56, 16  ;;  %v2041_v27 = vsel %vm8073_vm6, %v2036_v59, %v8219_v35  ;;  %v2134_v35 = vshll.u32 %v8239_v26, 16 }
 0x183   : > { %v2112_v20 = vrot.slane %v2110_v5, 5  ;;  %v2116_v24 = vrot.slane %v2114_v6, 4  ;;  %v2136_v55 = vrot.slane %v2134_v35, 5  ;;  %v7165_v5 = vld [vmem:[#allocation6 + $0x150] sm:$0xff]  }
 0x184   : > { %6468 = vmatpush3.bf16.msra.mxu0 %v7152_v61  ;;  %v7160_v61 = vld [vmem:[#allocation6 + $0x130] sm:$0xff]  }
 0x185   : > { %6469 = vmatprep.subr.bf16.mxu0 %v7153_v9  ;;  %v2117_v42 = vor.u32 %v2116_v24, %v2112_v20  ;;  %v2141_v62 = vor.u32 %v2140_v21, %v2136_v55  ;;  %v2113_v6 = vsel %vm8073_vm6, %v2108_v57, %v2112_v20  ;;  %v7167_v24 = vld [vmem:[#allocation6 + $0x160] sm:$0xff]  }
 0x187   : > { %6458 = vmatmul.mubr.bf16.gmra.mrb[4].mxu0 %v7157_v3  ;;  %v8237_v3 = vld [vmem:[#allocation2 + $0x38] sm:$0x1]  ;;  %v2118_v13 = vrot.slane %v2117_v42, 4 }
 0x188   : > { %6470 = vmatpush3.bf16.msra.mxu0 %v7153_v9  ;;  %6461 = vmatprep.mubr.bf16.mxu0 %v7159_v15  ;;  %v2046_v9 = vrot.slane %v2045_v54, 4  ;;  %v2088_v15 = vrot.slane %v2086_v63, 5  ;;  %v2096_v29 = vshll.u32 %v8237_v3, 16  ;;  %v2122_v63 = vrot.slane %v2120_v44, 5 }
 0x189   : > { %6471 = vmatprep.subr.bf16.mxu0 %v7154_v17  ;;  %v2379_v57 = vrot.slane %v8237_v3, 5 }
 0x18a   : > { %v2051_v60 = vsel %vm8073_vm6, %v2046_v9, %v2050_v43  ;;  %v2093_v33 = vor.u32 %v2092_v50, %v2088_v15  ;;  %v2123_v9 = vsel %vm8073_vm6, %v2118_v13, %v2122_v63  ;;  %v2146_v50 = vrot.slane %v2144_v4, 5 }
 0x18b   : > { %v5819_v38 = vcombine.low %v2113_v6, %v2123_v9 }
 0x18c   : > { %6472 = vmatpush3.bf16.msra.mxu0 %v7154_v17  ;;  %v2001_v17 = vld [vmem:[#allocation2 + $0x48] sm:$0xf]  ;;  %v2094_v45 = vrot.slane %v2093_v33, 4  ;;  %v2330_v33 = vld [vmem:[#allocation2 + $0x18] sm:$0xe] }
 0x18d   : > { %6473 = vmatprep.subr.bf16.mxu0 %v7156_v32  ;;  %v2125_v23 = vshrl.u32 %v2001_v17, 16  ;;  %v5830_v35 = vrot.slane %v2330_v33, 9 }
 0x18f   : > { %6462 = vmatmul.mubr.bf16.gmra.mrb[8].mxu0 %v7161_v34  ;;  %v2128_v34 = vshll.u32 %v2001_v17, 16  ;;  %v2127_v54 = vrot.slane %v2125_v23, 4  ;;  %v5829_v17 = vrot.slane %v2329_v41, 9  ;;  %v2369_v23 = vrot.slane %v8207_v28, 5 }
 0x190   : > { %6474 = vmatpush3.bf16.msra.mxu0 %v7156_v32  ;;  %6481 = vmatprep.mubr.bf16.mxu0 %v5815_v12  ;;  %v2083_v32 = vor.u32 %v2082_v25, %v2079_v11  ;;  %v5816_v12 = vcombine.low %v2041_v27, %v2051_v60  ;;  %v2359_v60 = vsel %vm8158_vm9, %v2357_v49, %v2358_v19  ;;  %v2376_v28 = vrot.slane %v8226_v46, 5  ;;  %v7172_v46 = vld [vmem:[#allocation6 + $0x188] sm:$0xff]   ;;  %v2782_v49 = vld [vmem:[#allocation2 + $0x18] sm:$0xf]  ;;  %v8308_v19 = vld [vmem:[#allocation2 + $0x1c] sm:$0xf] }
 0x191   : > { %6475 = vmatprep.subr.bf16.mxu0 %v7158_v51  ;;  %v2130_v52 = vrot.slane %v2128_v34, 5  ;;  %v2356_v27 = vsel %vm8158_vm9, %v5829_v17, %v2355_v10  ;;  %v2331_v34 = vld [vmem:[#allocation2 + $0x24] sm:$0xe]  ;;  %v2371_v44 = vrot.slane %v2369_v23, 4  ;;  %v2363_v14 = vsel %vm8158_vm9, %v5830_v35, %v2362_v31  ;;  %v7178_v17 = vld [vmem:[#allocation6 + $0x1b8] sm:$0xff]   ;;  %v7183_v35 = vld [vmem:[#allocation6 + $0x1d0] sm:$0xff]  }
 0x192   : > { %v2084_v47 = vrot.slane %v2083_v32, 4  ;;  %v5835_v7 = vcombine.low %v2356_v27, %v2359_v60  ;;  %v7169_v32 = vld [vmem:[#allocation6 + $0x170] sm:$0xff]   ;;  %v5831_v42 = vrot.slane %v2331_v34, 9  ;;  %v2393_v41 = vrot.slane %v8257_v18, 5  ;;  %v8312_v34 = vld [vmem:[#allocation2 + $0x20] sm:$0x1] }
 0x193   : > { %v7177_v18 = vld [vmem:[#allocation6 + $0x1b0] sm:$0xff]   ;;  %v2810_v27 = vshll.u32 %v8308_v19, 16  ;;  %v2814_v60 = vshrl.u32 %v8308_v19, 16 }
 0x194   : > { %6476 = vmatpush3.bf16.msra.mxu0 %v7158_v51  ;;  %v2098_v51 = vrot.slane %v2096_v29, 5  ;;  %v2089_v59 = vsel %vm8073_vm6, %v2084_v47, %v2088_v15  ;;  %v2142_v15 = vrot.slane %v2141_v62, 4  ;;  %v7171_v47 = vld [vmem:[#allocation6 + $0x180] sm:$0xff]   ;;  %v7173_v62 = vld [vmem:[#allocation6 + $0x190] sm:$0xff]  }
 0x195   : > { %6477 = vmatprep.subr.bf16.mxu0 %v7160_v61  ;;  %v2812_v33 = vrot.slane %v2810_v27, 5 }
 0x196   : > { %v2099_v43 = vsel %vm8073_vm6, %v2094_v45, %v2098_v51  ;;  %v2147_v53 = vsel %vm8073_vm6, %v2142_v15, %v2146_v50  ;;  %v2332_v51 = vld [vmem:[#allocation2 + $0x30] sm:$0xe]  ;;  %v7179_v50 = vld [vmem:[#allocation2 + $0x18] sm:$0xff]  }
 0x197   : > { %v5818_v11 = vcombine.low %v2089_v59, %v2099_v43  ;;  %v5832_v21 = vrot.slane %v2332_v51, 9  ;;  %v2386_v59 = vrot.slane %v8247_v0, 5  ;;  %v2334_v0 = vld [vmem:[#allocation2 + $0x48] sm:$0xe] }
 0x198   : > { %6478 = vmatpush3.bf16.msra.mxu0 %v7160_v61  ;;  %v2131_v61 = vor.u32 %v2130_v52, %v2127_v54  ;;  %v2333_v54 = vld [vmem:[#allocation2 + $0x3c] sm:$0xe]  ;;  %v5834_v9 = vrot.slane %v2334_v0, 9 }
 0x199   : > { %6479 = vmatprep.subr.bf16.mxu0 %v7162_v16  ;;  %v5833_v13 = vrot.slane %v2333_v54, 9  ;;  %v2791_v0 = vld [vmem:[#allocation2 + $0x3c] sm:$0xf] }
 0x19a   : > { %v2132_v25 = vrot.slane %v2131_v61, 4  ;;  %v2390_v61 = vrot.slane %v8239_v26, 5 }
 0x19c   : > { %6480 = vmatpush3.bf16.msra.mxu0 %v7162_v16  ;;  %v7166_v16 = vld [vmem:[#allocation6 + $0x158] sm:$0xff]   ;;  %v2137_v20 = vsel %vm8073_vm6, %v2132_v25, %v2136_v55  ;;  %v2392_v10 = vrot.slane %v2390_v61, 4  ;;  %v2391_v26 = vsel %vm8158_vm9, %v5834_v9, %v2390_v61  ;;  %v7175_v25 = vld [vmem:[#allocation6 + $0x1a0] sm:$0xff]   ;;  %v8327_v61 = vld [vmem:[#allocation2 + $0x2c] sm:$0x1] }
 0x19d   : > { %6493 = vmatprep.subr.bf16.mxu0 %v7163_v30  ;;  %v5820_v29 = vcombine.low %v2137_v20, %v2147_v53  ;;  %v7180_v20 = vld [vmem:[#allocation6 + $0x1c0] sm:$0xff]   ;;  %v2801_v53 = vshrl.u32 %v2782_v49, 16 }
 0x19f   : > { %6482 = vmatmul.mubr.bf16.vlgmr.msra.gmra.mrb[0].mxu0 %v5816_v12  ;;  %v2372_v12 = vrot.slane %v8221_v39, 5  ;;  %v2383_v39 = vrot.slane %v8230_v56, 5  ;;  %v2377_v56 = vsel %vm8158_vm9, %v5832_v21, %v2376_v28  ;;  %v2803_v31 = vrot.slane %v2801_v53, 4 }
 0x1a0   : > { %6494 = vmatpush3.bf16.msra.mxu0 %v7163_v30  ;;  %6485 = vmatprep.mubr.bf16.mxu0 %v5817_v40  ;;  %v2365_v30 = vrot.slane %v8217_v8, 5  ;;  %v2370_v8 = vsel %vm8158_vm9, %v5831_v42, %v2369_v23  ;;  %v2816_v23 = vrot.slane %v2814_v60, 4  ;;  %v2785_v42 = vld [vmem:[#allocation2 + $0x24] sm:$0xf] }
 0x1a1   : > { %6495 = vmatprep.subr.bf16.mxu0 %v7164_v48  ;;  %v2373_v45 = vsel %vm8158_vm9, %v2371_v44, %v2372_v12  ;;  %v2385_v63 = vrot.slane %v2383_v39, 4  ;;  %v2384_v3 = vsel %vm8158_vm9, %v5833_v13, %v2383_v39  ;;  %v7187_v44 = vld [vmem:[#allocation2 + $0x3c] sm:$0xff]   ;;  %v7189_v12 = vld [vmem:[#allocation2 + $0x48] sm:$0xff]  }
 0x1a2   : > { %v2366_v40 = vsel %vm8158_vm9, %v2364_v36, %v2365_v30  ;;  %v5837_v55 = vcombine.low %v2370_v8, %v2373_v45  ;;  %v2817_v30 = vor.u32 %v2816_v23, %v2812_v33  ;;  %v8317_v8 = vld [vmem:[#allocation2 + $0x34] sm:$0xf]  ;;  %v7184_v45 = vld [vmem:[#allocation6 + $0x1d8] sm:$0xff]  }
 0x1a3   : > { %v5836_v52 = vcombine.low %v2363_v14, %v2366_v40  ;;  %v2387_v4 = vsel %vm8158_vm9, %v2385_v63, %v2386_v59  ;;  %v8315_v14 = vld [vmem:[#allocation2 + $0x28] sm:$0xf]  ;;  %v2825_v40 = vshrl.u32 %v2785_v42, 16  ;;  %v7186_v59 = vld [vmem:[#allocation6 + $0x1e0] sm:$0xff]  }
 0x1a4   : > { %6496 = vmatpush3.bf16.msra.mxu0 %v7164_v48  ;;  %v2378_v48 = vrot.slane %v2376_v28, 4  ;;  %v5839_v6 = vcombine.low %v2384_v3, %v2387_v4  ;;  %v2828_v28 = vshll.u32 %v2785_v42, 16  ;;  %v2818_v39 = vrot.slane %v2817_v30, 4 }
 0x1a5   : > { %6497 = vmatprep.subr.bf16.mxu0 %v7165_v5  ;;  %v2827_v13 = vrot.slane %v2825_v40, 4 }
 0x1a6   : > { %v2380_v43 = vsel %vm8158_vm9, %v2378_v48, %v2379_v57  ;;  %v2858_v57 = vshll.u32 %v8317_v8, 16  ;;  %v2830_v63 = vrot.slane %v2828_v28, 5  ;;  %v7192_v28 = vld [vmem:[#allocation6 + $0x1f8] sm:$0xff]  }
 0x1a7   : > { %6486 = vmatmul.mubr.bf16.gmra.mrb[4].mxu0 %v5818_v11  ;;  %v7174_v11 = vld [vmem:[#allocation6 + $0x198] sm:$0xff]  }
 0x1a8   : > { %6498 = vmatpush3.bf16.msra.mxu0 %v7165_v5  ;;  %6489 = vmatprep.mubr.bf16.mxu0 %v5819_v38  ;;  %v5838_v5 = vcombine.low %v2377_v56, %v2380_v43  ;;  %v2394_v38 = vsel %vm8158_vm9, %v2392_v10, %v2393_v41  ;;  %v8331_v9 = vrot.slane %v2858_v57, 5  ;;  %v8333_v41 = vld [vmem:[#allocation2 + $0x40] sm:$0xf] }
 0x1a9   : > { %6499 = vmatprep.subr.bf16.mxu0 %v7166_v16  ;;  %v5840_v15 = vcombine.low %v2391_v26, %v2394_v38  ;;  %v2831_v26 = vor.u32 %v2830_v63, %v2827_v13  ;;  %v2844_v38 = vshll.u32 %v8327_v61, 16  ;;  %v2886_v60 = vshrl.u32 %v8333_v41, 16 }
 0x1ab   : > { %v2888_v40 = vrot.slane %v2886_v60, 4  ;;  %v8370_v60 = vld [vmem:[#allocation2 + $0x5c] sm:$0x1] }
 0x1ac   : > { %6500 = vmatpush3.bf16.msra.mxu0 %v7166_v16  ;;  %v7176_v16 = vld [vmem:[#allocation6 + $0x1a8] sm:$0xff]  }
 0x1ad   : > { %6501 = vmatprep.subr.bf16.mxu0 %v7167_v24 }
 0x1af   : > { %6490 = vmatmul.mubr.bf16.gmra.mrb[8].mxu0 %v5820_v29  ;;  %v7181_v29 = vld [vmem:[#allocation2 + $0x24] sm:$0xff]  }
 0x1b0   : > { %6502 = vmatpush3.bf16.msra.mxu0 %v7167_v24  ;;  %6509 = vmatprep.mubr.bf16.mxu0 %v5835_v7  ;;  %v2804_v24 = vshll.u32 %v2782_v49, 16  ;;  %v7185_v7 = vld [vmem:[#allocation2 + $0x30] sm:$0xff]   ;;  %v2794_v49 = vld [vmem:[#allocation2 + $0x48] sm:$0xf] }
 0x1b1   : > { %6503 = vmatprep.subr.bf16.mxu0 %v7168_v22 }
 0x1b4   : > { %6504 = vmatpush3.bf16.msra.mxu0 %v7168_v22  ;;  %v7182_v22 = vld [vmem:[#allocation6 + $0x1c8] sm:$0xff]  }
 0x1b5   : > { %6505 = vmatprep.subr.bf16.mxu0 %v7169_v32 }
 0x1b8   : > { %6506 = vmatpush3.bf16.msra.mxu0 %v7169_v32  ;;  %v2806_v32 = vrot.slane %v2804_v24, 5 }
 0x1b9   : > { %6507 = vmatprep.subr.bf16.mxu0 %v7170_v37 }
 0x1ba   : > { %v2807_v36 = vor.u32 %v2806_v32, %v2803_v31  ;;  %v2897_v31 = vshrl.u32 %v2794_v49, 16  ;;  %v2900_v32 = vshll.u32 %v2794_v49, 16  ;;  %v7194_v49 = vld [vmem:[#allocation6 + $0x208] sm:$0xff]  }
 0x1bc   : > { %6508 = vmatpush3.bf16.msra.mxu0 %v7170_v37  ;;  %v2820_v37 = vshll.u32 %v8312_v34, 16  ;;  %v2808_v51 = vrot.slane %v2807_v36, 4 }
 0x1bd   : > { %6521 = vmatprep.subr.bf16.mxu0 %v7171_v47 }
 0x1be   : > { %v2822_v54 = vrot.slane %v2820_v37, 5  ;;  %v2813_v56 = vsel %vm8073_vm6, %v2808_v51, %v2812_v33  ;;  %v2899_v51 = vrot.slane %v2897_v31, 4 }
 0x1bf   : > { %6510 = vmatmul.mubr.bf16.vlgmr.msra.gmra.mrb[0].mxu0 %v5836_v52  ;;  %v2834_v52 = vshll.u32 %v8315_v14, 16 }
 0x1c0   : > { %6522 = vmatpush3.bf16.msra.mxu0 %v7171_v47  ;;  %6513 = vmatprep.mubr.bf16.mxu0 %v5837_v55  ;;  %v2788_v47 = vld [vmem:[#allocation2 + $0x30] sm:$0xf]  ;;  %v2838_v55 = vshrl.u32 %v8315_v14, 16  ;;  %v2823_v43 = vsel %vm8073_vm6, %v2818_v39, %v2822_v54  ;;  %v2902_v39 = vrot.slane %v2900_v32, 5  ;;  %v2940_v32 = vshll.u32 %v8370_v60, 16 }
 0x1c1   : > { %6523 = vmatprep.subr.bf16.mxu0 %v7172_v46  ;;  %v2849_v21 = vshrl.u32 %v2788_v47, 16  ;;  %v2852_v48 = vshll.u32 %v2788_v47, 16  ;;  %v8329_v3 = vrot.slane %v2834_v52, 5  ;;  %v8349_v47 = vld [vmem:[#allocation2 + $0x44] sm:$0x1] }
 0x1c2   : > { %v2840_v4 = vrot.slane %v2838_v55, 4  ;;  %v8351_v55 = vld [vmem:[#allocation2 + $0x58] sm:$0xf] }
 0x1c4   : > { %6524 = vmatpush3.bf16.msra.mxu0 %v7172_v46  ;;  %v2862_v46 = vshrl.u32 %v8317_v8, 16 }
 0x1c5   : > { %6525 = vmatprep.subr.bf16.mxu0 %v7173_v62 }
 0x1c6   : > { %v2864_v10 = vrot.slane %v2862_v46, 4  ;;  %v8358_v46 = vld [vmem:[#allocation2 + $0x50] sm:$0x1] }
 0x1c7   : > { %6514 = vmatmul.mubr.bf16.gmra.mrb[4].mxu0 %v5838_v5  ;;  %v2851_v5 = vrot.slane %v2849_v21, 4 }
 0x1c8   : > { %6526 = vmatpush3.bf16.msra.mxu0 %v7173_v62  ;;  %6517 = vmatprep.mubr.bf16.mxu0 %v5839_v6  ;;  %v7191_v62 = vld [vmem:[#allocation2 + $0x54] sm:$0xff]   ;;  %v2854_v6 = vrot.slane %v2852_v48, 5  ;;  %v2865_v24 = vor.u32 %v2864_v10, %v8331_v9 }
 0x1c9   : > { %6527 = vmatprep.subr.bf16.mxu0 %v7174_v11 }
 0x1ca   : > { %v2855_v53 = vor.u32 %v2854_v6, %v2851_v5  ;;  %v2903_v5 = vor.u32 %v2902_v39, %v2899_v51  ;;  %v3154_v39 = vrot.slane %v8312_v34, 5 }
 0x1cc   : > { %6528 = vmatpush3.bf16.msra.mxu0 %v7174_v11  ;;  %v5863_v11 = vcombine.low %v2813_v56, %v2823_v43  ;;  %v2856_v42 = vrot.slane %v2855_v53, 4  ;;  %v2892_v56 = vshll.u32 %v8349_v47, 16  ;;  %v2904_v53 = vrot.slane %v2903_v5, 4  ;;  %v7200_v5 = vld [vmem:[#allocation6 + $0x238] sm:$0xff]  }
 0x1cd   : > { %6529 = vmatprep.subr.bf16.mxu0 %v7175_v25 }
 0x1ce   : > { %v2861_v13 = vsel %vm8073_vm6, %v2856_v42, %v8331_v9  ;;  %v2916_v9 = vshll.u32 %v8358_v46, 16 }
 0x1cf   : > { %6518 = vmatmul.mubr.bf16.gmra.mrb[8].mxu0 %v5840_v15  ;;  %v7188_v15 = vld [vmem:[#allocation6 + $0x1e8] sm:$0xff]  }
 0x1d0   : > { %6530 = vmatpush3.bf16.msra.mxu0 %v7175_v25  ;;  %6537 = vmatprep.mubr.bf16.mxu0 %v7179_v50  ;;  %v8336_v25 = vld [vmem:[#allocation2 + $0x38] sm:$0x1]  ;;  %v2873_v50 = vshrl.u32 %v2791_v0, 16 }
 0x1d1   : > { %6531 = vmatprep.subr.bf16.mxu0 %v7176_v16  ;;  %v2868_v27 = vshll.u32 %v8336_v25, 16 }
 0x1d2   : > { %v2875_v36 = vrot.slane %v2873_v50, 4 }
 0x1d4   : > { %6532 = vmatpush3.bf16.msra.mxu0 %v7176_v16  ;;  %v2841_v16 = vor.u32 %v2840_v4, %v8329_v3  ;;  %v2934_v4 = vshrl.u32 %v8351_v55, 16 }
 0x1d5   : > { %6533 = vmatprep.subr.bf16.mxu0 %v7177_v18 }
 0x1d8   : > { %6534 = vmatpush3.bf16.msra.mxu0 %v7177_v18  ;;  %v2876_v18 = vshll.u32 %v2791_v0, 16  ;;  %v7193_v0 = vld [vmem:[#allocation6 + $0x200] sm:$0xff]  }
 0x1d9   : > { %6535 = vmatprep.subr.bf16.mxu0 %v7178_v17 }
 0x1da   : > { %v2878_v30 = vrot.slane %v2876_v18, 5 }
 0x1dc   : > { %6536 = vmatpush3.bf16.msra.mxu0 %v7178_v17  ;;  %v2882_v17 = vshll.u32 %v8333_v41, 16  ;;  %v2879_v57 = vor.u32 %v2878_v30, %v2875_v36  ;;  %v3151_v36 = vrot.slane %v8308_v19, 5  ;;  %v3125_v30 = vld [vmem:[#allocation2 + $0x18] sm:$0xe] }
 0x1dd   : > { %6549 = vmatprep.subr.bf16.mxu0 %v7180_v20 }
 0x1de   : > { %v8347_v37 = vrot.slane %v2882_v17, 5  ;;  %v2936_v17 = vrot.slane %v2934_v4, 4  ;;  %v3153_v51 = vrot.slane %v3151_v36, 4 }
 0x1df   : > { %6538 = vmatmul.mubr.bf16.vlgmr.msra.gmra.mrb[0].mxu0 %v7181_v29  ;;  %v2832_v29 = vrot.slane %v2831_v26, 4  ;;  %v2880_v26 = vrot.slane %v2879_v57, 4 }
 0x1e0   : > { %6550 = vmatpush3.bf16.msra.mxu0 %v7180_v20  ;;  %6541 = vmatprep.mubr.bf16.mxu0 %v7185_v7  ;;  %v8340_v20 = vld [vmem:[#allocation2 + $0x4c] sm:$0xf]  ;;  %v2846_v7 = vrot.slane %v2844_v38, 5 }
 0x1e1   : > { %6551 = vmatprep.subr.bf16.mxu0 %v7182_v22  ;;  %v2906_v33 = vshll.u32 %v8340_v20, 16  ;;  %v2910_v23 = vshrl.u32 %v8340_v20, 16  ;;  %v2837_v21 = vsel %vm8073_vm6, %v2832_v29, %v8329_v3  ;;  %v2930_v3 = vshll.u32 %v8351_v55, 16 }
 0x1e2   : > { %v2885_v29 = vsel %vm8073_vm6, %v2880_v26, %v8347_v37 }
 0x1e3   : > { %v2908_v54 = vrot.slane %v2906_v33, 5  ;;  %v2912_v52 = vrot.slane %v2910_v23, 4  ;;  %v2932_v18 = vrot.slane %v2930_v3, 5  ;;  %v7195_v33 = vld [vmem:[#allocation6 + $0x210] sm:$0xff]  }
 0x1e4   : > { %6552 = vmatpush3.bf16.msra.mxu0 %v7182_v22  ;;  %v7190_v22 = vld [vmem:[#allocation6 + $0x1f0] sm:$0xff]  }
 0x1e5   : > { %6553 = vmatprep.subr.bf16.mxu0 %v7183_v35  ;;  %v2913_v6 = vor.u32 %v2912_v52, %v2908_v54  ;;  %v2937_v31 = vor.u32 %v2936_v17, %v2932_v18  ;;  %v2909_v23 = vsel %vm8073_vm6, %v2904_v53, %v2908_v54  ;;  %v7197_v52 = vld [vmem:[#allocation6 + $0x220] sm:$0xff]  }
 0x1e7   : > { %6542 = vmatmul.mubr.bf16.gmra.mrb[4].mxu0 %v7187_v44  ;;  %v2866_v44 = vrot.slane %v2865_v24, 4  ;;  %v2914_v24 = vrot.slane %v2913_v6, 4 }
 0x1e8   : > { %6554 = vmatpush3.bf16.msra.mxu0 %v7183_v35  ;;  %6545 = vmatprep.mubr.bf16.mxu0 %v7189_v12  ;;  %v2842_v35 = vrot.slane %v2841_v16, 4  ;;  %v2870_v12 = vrot.slane %v2868_v27, 5  ;;  %v2918_v27 = vrot.slane %v2916_v9, 5 }
 0x1e9   : > { %6555 = vmatprep.subr.bf16.mxu0 %v7184_v45 }
 0x1ea   : > { %v2847_v48 = vsel %vm8073_vm6, %v2842_v35, %v2846_v7  ;;  %v2871_v63 = vsel %vm8073_vm6, %v2866_v44, %v2870_v12  ;;  %v2919_v35 = vsel %vm8073_vm6, %v2914_v24, %v2918_v27  ;;  %v2938_v12 = vrot.slane %v2937_v31, 4 }
 0x1eb   : > { %v5864_v10 = vcombine.low %v2837_v21, %v2847_v48  ;;  %v5867_v42 = vcombine.low %v2909_v23, %v2919_v35  ;;  %v3155_v48 = vsel %vm8158_vm9, %v3153_v51, %v3154_v39  ;;  %v3182_v24 = vrot.slane %v8358_v46, 5 }
 0x1ec   : > { %6556 = vmatpush3.bf16.msra.mxu0 %v7184_v45  ;;  %v2797_v45 = vld [vmem:[#allocation2 + $0x54] sm:$0xf]  ;;  %v3189_v23 = vrot.slane %v8370_v60, 5  ;;  %v8430_v60 = vld [vmem:[%s8838_s3] ss:$0 sm:$0xff] }
 0x1ed   : > { %6557 = vmatprep.subr.bf16.mxu0 %v7186_v59  ;;  %v2921_v43 = vshrl.u32 %v2797_v45, 16 }
 0x1ef   : > { %6546 = vmatmul.mubr.bf16.gmra.mrb[8].mxu0 %v7191_v62  ;;  %v2924_v62 = vshll.u32 %v2797_v45, 16  ;;  %v2923_v50 = vrot.slane %v2921_v43, 4  ;;  %v5877_v45 = vrot.slane %v3125_v30, 9  ;;  %v3165_v43 = vrot.slane %v8317_v8, 5  ;;  %v8425_v30 = vld [vmem:[%s8837_s2] ss:$0 sm:$0xff] }
 0x1f0   : > { %6558 = vmatpush3.bf16.msra.mxu0 %v7186_v59  ;;  %6565 = vmatprep.mubr.bf16.mxu0 %v5863_v11  ;;  %v2889_v59 = vor.u32 %v2888_v40, %v8347_v37  ;;  %v5865_v11 = vcombine.low %v2861_v13, %v2871_v63  ;;  %v2942_v40 = vrot.slane %v2940_v32, 5  ;;  %v7198_v13 = vld [vmem:[#allocation6 + $0x228] sm:$0xff]   ;;  %v3158_v63 = vrot.slane %v8315_v14, 5 }
 0x1f1   : > { %6559 = vmatprep.subr.bf16.mxu0 %v7188_v15  ;;  %v2926_v16 = vrot.slane %v2924_v62, 5  ;;  %v3152_v21 = vsel %vm8158_vm9, %v5877_v45, %v3151_v36  ;;  %v3127_v62 = vld [vmem:[#allocation2 + $0x30] sm:$0xe]  ;;  %v3167_v9 = vrot.slane %v3165_v43, 4  ;;  %v3172_v8 = vrot.slane %v8333_v41, 5 }
 0x1f2   : > { %v2890_v38 = vrot.slane %v2889_v59, 4  ;;  %v2943_v19 = vsel %vm8073_vm6, %v2938_v12, %v2942_v40  ;;  %v5883_v34 = vcombine.low %v3152_v21, %v3155_v48  ;;  %v7199_v59 = vld [vmem:[#allocation6 + $0x230] sm:$0xff]   ;;  %v3160_v4 = vrot.slane %v3158_v63, 4 }
 0x1f3   : > { %v5879_v6 = vrot.slane %v3127_v62, 9  ;;  %v3174_v17 = vrot.slane %v3172_v8, 4 }
 0x1f4   : > { %6560 = vmatpush3.bf16.msra.mxu0 %v7188_v15  ;;  %v2894_v15 = vrot.slane %v2892_v56, 5  ;;  %v3126_v56 = vld [vmem:[#allocation2 + $0x24] sm:$0xe] }
 0x1f5   : > { %6561 = vmatprep.subr.bf16.mxu0 %v7190_v22  ;;  %v5878_v3 = vrot.slane %v3126_v56, 9  ;;  %v3166_v26 = vsel %vm8158_vm9, %v5879_v6, %v3165_v43 }
 0x1f6   : > { %v2895_v7 = vsel %vm8073_vm6, %v2890_v38, %v2894_v15  ;;  %v3128_v38 = vld [vmem:[#allocation2 + $0x3c] sm:$0xe]  ;;  %v3179_v15 = vrot.slane %v8340_v20, 5 }
 0x1f7   : > { %v5866_v37 = vcombine.low %v2885_v29, %v2895_v7  ;;  %v3159_v14 = vsel %vm8158_vm9, %v5878_v3, %v3158_v63  ;;  %v3186_v29 = vrot.slane %v8351_v55, 5 }
 0x1f8   : > { %6562 = vmatpush3.bf16.msra.mxu0 %v7190_v22  ;;  %v2927_v22 = vor.u32 %v2926_v16, %v2923_v50  ;;  %v3181_v41 = vrot.slane %v3179_v15, 4 }
 0x1f9   : > { %6563 = vmatprep.subr.bf16.mxu0 %v7192_v28 }
 0x1fa   : > { %v2928_v44 = vrot.slane %v2927_v22, 4  ;;  %v3130_v22 = vld [vmem:[#allocation2 + $0x54] sm:$0xe] }
 0x1fb   : > { %v5882_v46 = vrot.slane %v3130_v22, 9 }
 0x1fc   : > { %6564 = vmatpush3.bf16.msra.mxu0 %v7192_v28  ;;  %v7196_v28 = vld [vmem:[#allocation6 + $0x218] sm:$0xff]   ;;  %v2933_v54 = vsel %vm8073_vm6, %v2928_v44, %v2932_v18  ;;  %v5880_v18 = vrot.slane %v3128_v38, 9 }
 0x1fd   : > { %6577 = vmatprep.subr.bf16.mxu0 %v7193_v0  ;;  %v5868_v57 = vcombine.low %v2933_v54, %v2943_v19  ;;  %v3187_v35 = vsel %vm8158_vm9, %v5882_v46, %v3186_v29  ;;  %v3585_v46 = vld [vmem:[#allocation2 + $0x8] sm:$0x1] }
 0x1fe   : > { %v3173_v27 = vsel %vm8158_vm9, %v5880_v18, %v3172_v8 }
 0x1ff   : > { %6566 = vmatmul.mubr.bf16.vlgmr.msra.gmra.mrb[0].mxu0 %v5864_v10  ;;  %v3168_v10 = vrot.slane %v8336_v25, 5  ;;  %v3129_v25 = vld [vmem:[#allocation2 + $0x48] sm:$0xe] }
 0x200   : > { %6578 = vmatpush3.bf16.msra.mxu0 %v7193_v0  ;;  %6569 = vmatprep.mubr.bf16.mxu0 %v5865_v11  ;;  %v3161_v0 = vrot.slane %v8327_v61, 5  ;;  %v5881_v53 = vrot.slane %v3129_v25, 9 }
 0x201   : > { %6579 = vmatprep.subr.bf16.mxu0 %v7194_v49  ;;  %v3169_v61 = vsel %vm8158_vm9, %v3167_v9, %v3168_v10 }
 0x202   : > { %v3162_v11 = vsel %vm8158_vm9, %v3160_v4, %v3161_v0  ;;  %v5885_v16 = vcombine.low %v3166_v26, %v3169_v61  ;;  %v3180_v7 = vsel %vm8158_vm9, %v5881_v53, %v3179_v15  ;;  %v3588_v15 = vld [vmem:[#allocation2 + $0xc] sm:$0xf] }
 0x203   : > { %v5884_v50 = vcombine.low %v3159_v14, %v3162_v11 }
 0x204   : > { %6580 = vmatpush3.bf16.msra.mxu0 %v7194_v49  ;;  %v3175_v49 = vrot.slane %v8349_v47, 5  ;;  %v3183_v47 = vsel %vm8158_vm9, %v3181_v41, %v3182_v24 }
 0x205   : > { %6581 = vmatprep.subr.bf16.mxu0 %v7195_v33  ;;  %v5887_v32 = vcombine.low %v3180_v7, %v3183_v47 }
 0x206   : > { %v3176_v20 = vsel %vm8158_vm9, %v3174_v17, %v3175_v49 }
 0x207   : > { %6570 = vmatmul.mubr.bf16.gmra.mrb[4].mxu0 %v5866_v37  ;;  %v5886_v31 = vcombine.low %v3173_v27, %v3176_v20 }
 0x208   : > { %6582 = vmatpush3.bf16.msra.mxu0 %v7195_v33  ;;  %6573 = vmatprep.mubr.bf16.mxu0 %v5867_v42  ;;  %v3188_v33 = vrot.slane %v3186_v29, 4  ;;  %v3592_v29 = vld [vmem:[#allocation2 + $0x14] sm:$0x1] }
 0x209   : > { %6583 = vmatprep.subr.bf16.mxu0 %v7196_v28 }
 0x20a   : > { %v3190_v55 = vsel %vm8158_vm9, %v3188_v33, %v3189_v23  ;;  %v7201_v23 = vld [vmem:[#allocation2] sm:$0xf] }
 0x20b   : > { %v5888_v36 = vcombine.low %v3187_v35, %v3190_v55 }
 0x20c   : > { %6584 = vmatpush3.bf16.msra.mxu0 %v7196_v28 }
 0x20d   : > { %6585 = vmatprep.subr.bf16.mxu0 %v7197_v52 }
 0x20f   : > { %6574 = vmatmul.mubr.bf16.gmra.mrb[8].mxu0 %v5868_v57 }
 0x210   : > { %6586 = vmatpush3.bf16.msra.mxu0 %v7197_v52  ;;  %6593 = vmatprep.mubr.bf16.mxu0 %v5883_v34 }
 0x211   : > { %6587 = vmatprep.subr.bf16.mxu0 %v7198_v13 }
 0x214   : > { %6588 = vmatpush3.bf16.msra.mxu0 %v7198_v13 }
 0x215   : > { %6589 = vmatprep.subr.bf16.mxu0 %v7199_v59 }
 0x218   : > { %6590 = vmatpush3.bf16.msra.mxu0 %v7199_v59 }
 0x219   : > { %6591 = vmatprep.subr.bf16.mxu0 %v7200_v5 }
 0x21c   : > { %6592 = vmatpush3.bf16.msra.mxu0 %v7200_v5 }
 0x21f   : > { %6594 = vmatmul.mubr.bf16.vlgmr.msra.gmra.mrb[0].mxu0 %v5884_v50 }
 0x220   : > { %6597 = vmatprep.mubr.bf16.mxu0 %v5885_v16 }
 0x227   : > { %6598 = vmatmul.mubr.bf16.gmra.mrb[4].mxu0 %v5886_v31 }
 0x228   : > { %6601 = vmatprep.mubr.bf16.mxu0 %v5887_v32 }
 0x22f   : > { %6602 = vmatmul.mubr.bf16.gmra.mrb[8].mxu0 %v5888_v36 }
 0x2f2   : > { %v6595_v37 = vpop.f32.mrb[0].mxu0 }
 0x2f3   : > { %v3381_v42 = vmul.f32 %v6595_v37, %v8425_v30  ;;  %v3313_v44 = vpop.f32.mrb[1].mxu0 }
 0x2f4   : > { %v3379_v12 = vmul.f32 %v8425_v30, %v3313_v44  ;;  %v6596_v40 = vpop.f32.mrb[2].mxu0 }
 0x2f5   : > { %v3400_v28 = vadd.f32 %v8430_v60, %v3381_v42  ;;  %v3382_v45 = vmul.f32 %v6596_v40, %v8425_v30  ;;  %v3316_v51 = vpop.f32.mrb[3].mxu0 }
 0x2f6   : > { %v3398_v39 = vadd.f32 %v8430_v60, %v3379_v12  ;;  %v3380_v54 = vmul.f32 %v8425_v30, %v3316_v51 }
 0x2f7   : > { %v3412_v19 = vmax.f32 %v3400_v28, 0.0  ;;  %v3401_v52 = vadd.f32 %v8430_v60, %v3382_v45 }
 0x2f8   : > { %v3410_v21 = vmax.f32 %v3398_v39, 0.0  ;;  %v3399_v48 = vadd.f32 %v8430_v60, %v3380_v54 }
 0x2f9   : > { %v6056_v57 = vpack.c.bf16 %v3412_v19, %v3412_v19  ;;  %v3413_v34 = vmax.f32 %v3401_v52, 0.0 }
 0x2fa   : > { %v6054_v13 = vpack.c.bf16 %v3410_v21, %v3410_v21  ;;  %v3411_v63 = vmax.f32 %v3399_v48, 0.0  ;;  %v6599_v59 = vpop.f32.mrb[4].mxu0 }
 0x2fb   : > { %v3478_v56 = vshrl.u32 %v6056_v57, 16  ;;  %v3481_v43 = vshll.u32 %v6056_v57, 16  ;;  %v6057_v62 = vpack.c.bf16 %v3413_v34, %v3413_v34  ;;  %v3385_v3 = vmul.f32 %v6599_v59, %v8425_v30  ;;  %v3329_v4 = vpop.f32.mrb[5].mxu0 }
 0x2fc   : > { %v3461_v0 = vshrl.u32 %v6054_v13, 16  ;;  %v3464_v5 = vshll.u32 %v6054_v13, 16  ;;  %v6055_v6 = vpack.c.bf16 %v3411_v63, %v3411_v63  ;;  %v3383_v9 = vmul.f32 %v8425_v30, %v3329_v4  ;;  %v6600_v10 = vpop.f32.mrb[6].mxu0  ;;  %v3602_v63 = vld [vmem:[#allocation2 + $0x24] sm:$0xf] }
 0x2fd   : > { %v3480_v14 = vrot.slane %v3478_v56, 7  ;;  %v3486_v11 = vshrl.u32 %v6057_v62, 16  ;;  %v3489_v8 = vshll.u32 %v6057_v62, 16  ;;  %v3404_v26 = vadd.f32 %v8430_v60, %v3385_v3  ;;  %v3332_v61 = vpop.f32.mrb[7].mxu0  ;;  %v3595_v4 = vld [vmem:[#allocation2 + $0x18] sm:$0xf] }
 0x2fe   : > { %v3463_v25 = vrot.slane %v3461_v0, 7  ;;  %v3469_v50 = vshrl.u32 %v6055_v6, 16  ;;  %v3472_v16 = vshll.u32 %v6055_v6, 16  ;;  %v3402_v18 = vadd.f32 %v8430_v60, %v3383_v9 }
 0x2ff   : > { %v3483_v17 = vor.u32 %v3481_v43, %v3480_v14  ;;  %v3484_v49 = vrot.slane %v3480_v14, 4  ;;  %v3488_v53 = vrot.slane %v3486_v11, 7  ;;  %v3416_v41 = vmax.f32 %v3404_v26, 0.0 }
 0x300   : > { %v3466_v24 = vor.u32 %v3464_v5, %v3463_v25  ;;  %v3467_v27 = vrot.slane %v3463_v25, 4  ;;  %v3471_v7 = vrot.slane %v3469_v50, 7  ;;  %v3414_v47 = vmax.f32 %v3402_v18, 0.0 }
 0x301   : > { %v3589_v22 = vsel %vm8445_vm12, %v3483_v17, %v3588_v15  ;;  %v3491_v31 = vor.u32 %v3489_v8, %v3488_v53  ;;  %v3493_v32 = vrot.slane %v3488_v53, 4  ;;  %v6060_v33 = vpack.c.bf16 %v3416_v41, %v3416_v41 }
 0x302   : > { %3590 = vst [vmem:[#allocation2 + $0xc] sm:$0xf] %v3589_v22  ;;  %v3582_v35 = vsel %vm8445_vm12, %v3466_v24, %v7201_v23  ;;  %v3474_v55 = vor.u32 %v3472_v16, %v3471_v7  ;;  %v3476_v36 = vrot.slane %v3471_v7, 4  ;;  %v6058_v37 = vpack.c.bf16 %v3414_v47, %v3414_v47  ;;  %v6603_v42 = vpop.f32.mrb[8].mxu0 }
 0x303   : > { %3583 = vst [vmem:[#allocation2] sm:$0xf] %v3582_v35  ;;  %v3492_v44 = vsel %vm8452_vm13, %v3484_v49, %v3491_v31  ;;  %v3593_v12 = vsel %vm7801_vm3, %v3493_v32, %v3592_v29  ;;  %v3512_v40 = vshrl.u32 %v6060_v33, 16  ;;  %v3515_v28 = vshll.u32 %v6060_v33, 16  ;;  %v3345_v45 = vpop.f32.mrb[9].mxu0 }
 0x304   : > { %3591 = vst [vmem:[#allocation2 + $0x10] sm:$0xf] %v3492_v44  ;;  %3594 = vst [vmem:[#allocation2 + $0x14] sm:$0x1] %v3593_v12  ;;  %v3475_v51 = vsel %vm8452_vm13, %v3467_v27, %v3474_v55  ;;  %v3586_v39 = vsel %vm7801_vm3, %v3476_v36, %v3585_v46  ;;  %v3495_v54 = vshrl.u32 %v6058_v37, 16  ;;  %v3498_v19 = vshll.u32 %v6058_v37, 16 }
 0x305   : > { %v6604_v52 = vpop.f32.mrb[10].mxu0  ;;  %3584 = vst [vmem:[#allocation2 + $0x4] sm:$0xf] %v3475_v51  ;;  %3587 = vst [vmem:[#allocation2 + $0x8] sm:$0x1] %v3586_v39  ;;  %v3514_v21 = vrot.slane %v3512_v40, 7  ;;  %v3386_v48 = vmul.f32 %v6600_v10, %v8425_v30  ;;  %v3384_v57 = vmul.f32 %v8425_v30, %v3332_v61  ;;  %v3389_v34 = vmul.f32 %v6603_v42, %v8425_v30 }
 0x306   : > { %v3348_v13 = vpop.f32.mrb[11].mxu0  ;;  %v3497_v59 = vrot.slane %v3495_v54, 7  ;;  %v3387_v56 = vmul.f32 %v8425_v30, %v3345_v45  ;;  %v3390_v43 = vmul.f32 %v6604_v52, %v8425_v30  ;;  %v3599_v35 = vld [vmem:[#allocation2 + $0x20] sm:$0x1]  ;;  %v3616_v45 = vld [vmem:[#allocation2 + $0x3c] sm:$0xf] }
 0x307   : > { %v3388_v62 = vmul.f32 %v8425_v30, %v3348_v13  ;;  %v3517_v3 = vor.u32 %v3515_v28, %v3514_v21  ;;  %v3405_v0 = vadd.f32 %v8430_v60, %v3386_v48  ;;  %v3403_v5 = vadd.f32 %v8430_v60, %v3384_v57  ;;  %v3609_v51 = vld [vmem:[#allocation2 + $0x30] sm:$0xf] }
 0x308   : > { %v3500_v6 = vor.u32 %v3498_v19, %v3497_v59  ;;  %v3408_v9 = vadd.f32 %v8430_v60, %v3389_v34  ;;  %v3406_v10 = vadd.f32 %v8430_v60, %v3387_v56  ;;  %v3409_v26 = vadd.f32 %v8430_v60, %v3390_v43  ;;  %v3620_v43 = vld [vmem:[#allocation2 + $0x44] sm:$0x1] }
 0x309   : > { %v3603_v14 = vsel %vm8445_vm12, %v3517_v3, %v3602_v63  ;;  %v3417_v11 = vmax.f32 %v3405_v0, 0.0  ;;  %v3415_v8 = vmax.f32 %v3403_v5, 0.0  ;;  %v3407_v25 = vadd.f32 %v8430_v60, %v3388_v62  ;;  %v3606_v60 = vld [vmem:[#allocation2 + $0x2c] sm:$0x1] }
 0x30a   : > { %3604 = vst [vmem:[#allocation2 + $0x24] sm:$0xf] %v3603_v14  ;;  %v3596_v30 = vsel %vm8445_vm12, %v3500_v6, %v3595_v4  ;;  %v3420_v61 = vmax.f32 %v3408_v9, 0.0  ;;  %v3418_v15 = vmax.f32 %v3406_v10, 0.0  ;;  %v3421_v49 = vmax.f32 %v3409_v26, 0.0 }
 0x30b   : > { %3597 = vst [vmem:[#allocation2 + $0x18] sm:$0xf] %v3596_v30  ;;  %v6061_v50 = vpack.c.bf16 %v3417_v11, %v3417_v11  ;;  %v6059_v16 = vpack.c.bf16 %v3415_v8, %v3415_v8  ;;  %v3419_v53 = vmax.f32 %v3407_v25, 0.0  ;;  %v3518_v41 = vrot.slane %v3514_v21, 4  ;;  %v3613_v6 = vld [vmem:[#allocation2 + $0x38] sm:$0x1] }
 0x30c   : > { %v6064_v18 = vpack.c.bf16 %v3420_v61, %v3420_v61  ;;  %v6062_v17 = vpack.c.bf16 %v3418_v15, %v3418_v15  ;;  %v3501_v24 = vrot.slane %v3497_v59, 4  ;;  %v6065_v37 = vpack.c.bf16 %v3421_v49, %v3421_v49 }
 0x30d   : > { %v3520_v27 = vshrl.u32 %v6061_v50, 16  ;;  %v3503_v29 = vshrl.u32 %v6059_v16, 16  ;;  %v3523_v7 = vshll.u32 %v6061_v50, 16  ;;  %v3506_v47 = vshll.u32 %v6059_v16, 16 }
 0x30e   : > { %v3546_v22 = vshrl.u32 %v6064_v18, 16  ;;  %v3529_v31 = vshrl.u32 %v6062_v17, 16  ;;  %v3549_v33 = vshll.u32 %v6064_v18, 16  ;;  %v3532_v23 = vshll.u32 %v6062_v17, 16 }
 0x30f   : > { %v3522_v32 = vrot.slane %v3520_v27, 7  ;;  %v3505_v46 = vrot.slane %v3503_v29, 7  ;;  %v6063_v42 = vpack.c.bf16 %v3419_v53, %v3419_v53  ;;  %v3554_v13 = vshrl.u32 %v6065_v37, 16 }
 0x310   : > { %v3548_v55 = vrot.slane %v3546_v22, 7  ;;  %v3531_v36 = vrot.slane %v3529_v31, 7  ;;  %v3557_v56 = vshll.u32 %v6065_v37, 16  ;;  %v7506_v30 = vmov (!%p5739_p13), 0  }
 0x311   : > { %v3525_v44 = vor.u32 %v3523_v7, %v3522_v32  ;;  %v3527_v12 = vrot.slane %v3522_v32, 4  ;;  %v3508_v40 = vor.u32 %v3506_v47, %v3505_v46  ;;  %v3510_v28 = vrot.slane %v3505_v46, 4  ;;  %3626 = vst [vmem:[#allocation2] sm:$0xf] (!%p5739_p13), %v7506_v30  ;;  %3627 = vst [vmem:[#allocation2 + $0x4] sm:$0xf] (!%p5739_p13), %v7506_v30 }
 0x312   : > { %v3551_v39 = vor.u32 %v3549_v33, %v3548_v55  ;;  %v3534_v54 = vor.u32 %v3532_v23, %v3531_v36  ;;  %v3537_v63 = vshrl.u32 %v6063_v42, 16  ;;  %v3556_v59 = vrot.slane %v3554_v13, 7  ;;  %3628 = vst [vmem:[#allocation2 + $0x8] sm:$0x1] (!%p5739_p13), %v7506_v30 }
 0x313   : > { %v3526_v19 = vsel %vm8452_vm13, %v3518_v41, %v3525_v44  ;;  %v3607_v52 = vsel %vm7801_vm3, %v3527_v12, %v3606_v60  ;;  %v3509_v21 = vsel %vm8452_vm13, %v3501_v24, %v3508_v40  ;;  %v3600_v48 = vsel %vm7801_vm3, %v3510_v28, %v3599_v35  ;;  %3625 = sbr.rel (%p5739_p13) target bundleno = 794 (0x31a), region = 76 }
 0x314   : > { %3605 = vst [vmem:[#allocation2 + $0x28] sm:$0xf] %v3526_v19  ;;  %3608 = vst [vmem:[#allocation2 + $0x2c] sm:$0x1] %v3607_v52  ;;  %v3617_v57 = vsel %vm8445_vm12, %v3551_v39, %v3616_v45  ;;  %v3610_v34 = vsel %vm8445_vm12, %v3534_v54, %v3609_v51  ;;  %v3539_v62 = vrot.slane %v3537_v63, 7  ;;  %v3540_v3 = vshll.u32 %v6063_v42, 16 }
 0x315   : > { %3598 = vst [vmem:[#allocation2 + $0x1c] sm:$0xf] %v3509_v21  ;;  %3601 = vst [vmem:[#allocation2 + $0x20] sm:$0x1] %v3600_v48  ;;  %v3552_v4 = vrot.slane %v3548_v55, 4  ;;  %v3559_v0 = vor.u32 %v3557_v56, %v3556_v59  ;;  %v3561_v5 = vrot.slane %v3556_v59, 4 }
 0x316   : > { %3618 = vst [vmem:[#allocation2 + $0x3c] sm:$0xf] %v3617_v57  ;;  %3611 = vst [vmem:[#allocation2 + $0x30] sm:$0xf] %v3610_v34  ;;  %v3535_v9 = vrot.slane %v3531_v36, 4  ;;  %v3542_v10 = vor.u32 %v3540_v3, %v3539_v62  ;;  %v3544_v14 = vrot.slane %v3539_v62, 4 }
 0x317   : > { %v3560_v38 = vsel %vm8452_vm13, %v3552_v4, %v3559_v0  ;;  %v3621_v11 = vsel %vm7801_vm3, %v3561_v5, %v3620_v43 }
 0x318   : > { %3619 = vst [vmem:[#allocation2 + $0x40] sm:$0xf] %v3560_v38  ;;  %3622 = vst [vmem:[#allocation2 + $0x44] sm:$0x1] %v3621_v11  ;;  %v3543_v8 = vsel %vm8452_vm13, %v3535_v9, %v3542_v10  ;;  %v3614_v26 = vsel %vm7801_vm3, %v3544_v14, %v3613_v6 }
 0x319   : > { %3612 = vst [vmem:[#allocation2 + $0x34] sm:$0xf] %v3543_v8  ;;  %3615 = vst [vmem:[#allocation2 + $0x38] sm:$0x1] %v3614_v26 }
 0x31a PF: > { %3631 = sbr.rel (%p5740_p9) target bundleno = 801 (0x321), region = 80  ;;  %v7507_v61 = vmov (!%p5740_p9), 0  }
 0x31b   : > { %3633 = vst [vmem:[#allocation2 + $0x3c] sm:$0xf] (!%p5740_p9), %v7507_v61  ;;  %3634 = vst [vmem:[#allocation2 + $0x40] sm:$0xf] (!%p5740_p9), %v7507_v61 }
 0x31c   : > { %3635 = vst [vmem:[#allocation2 + $0x44] sm:$0x1] (!%p5740_p9), %v7507_v61 }
 0x321 PF: > { %v7202_v1 = vld [vmem:[#allocation8 + $0x40] sm:$0xff]   ;;  %v7203_v20 = vld [vmem:[#allocation8 + $0x48] sm:$0xff]   ;;  %v7204_v15 = vld [vmem:[#allocation8 + $0x50] sm:$0xff]   ;;  %s6067_s1 = sshll.u32 %s7482_s30, 5  ;;  %s8908_s14 = sld [smem:[#allocation21_spill]] }
 0x322   : > { %6605 = vmatprep.subr.bf16.mxu1 %v7202_v1  ;;  %v7205_v25 = vld [vmem:[#allocation8 + $0x58] sm:$0xff]   ;;  %v8508_v50 = vld [vmem:[#allocation2] sm:$0xf]  ;;  %v8510_v16 = vld [vmem:[#allocation2 + $0x4] sm:$0xf]  ;;  %s5491_s17 = scalar_lea.vmem %s7778_s23, %s6067_s1 [#allocation3]  ;;  %s8909_s23 = sld [smem:[#allocation14_spill]] }
 0x323   : > { %6606 = vmatpush3.bf16.msra.mxu1 %v7202_v1  ;;  %v8512_v18 = vld [vmem:[#allocation2 + $0x8] sm:$0x1]  ;;  %v3665_v17 = vshrl.u32 %v8508_v50, 16  ;;  %v3668_v49 = vshll.u32 %v8508_v50, 16  ;;  %v3674_v53 = vshll.u32 %v8510_v16, 16  ;;  %v3678_v41 = vshrl.u32 %v8510_v16, 16 }
 0x324   : > { %6607 = vmatprep.subr.bf16.mxu1 %v7203_v20  ;;  %v7206_v24 = vld [vmem:[#allocation8 + $0x60] sm:$0xff]   ;;  %v3684_v27 = vshll.u32 %v8512_v18, 16  ;;  %v8519_v31 = vld [vmem:[#allocation2 + $0xc] sm:$0xf]  ;;  %v8521_v46 = vld [vmem:[#allocation2 + $0x10] sm:$0xf] }
 0x325   : > { %v3667_v29 = vrot.slane %v3665_v17, 4  ;;  %v3670_v7 = vrot.slane %v3668_v49, 5  ;;  %v3676_v47 = vrot.slane %v3674_v53, 5  ;;  %v3680_v22 = vrot.slane %v3678_v41, 4  ;;  %v3661_v33 = vld [vmem:[#allocation2 + $0x14] sm:$0x1] }
 0x326   : > { %v3686_v32 = vrot.slane %v3684_v27, 5  ;;  %v3689_v23 = vshrl.u32 %v8519_v31, 16  ;;  %v3692_v55 = vshll.u32 %v8519_v31, 16  ;;  %v3698_v36 = vshll.u32 %v8521_v46, 16  ;;  %v7207_v51 = vld [vmem:[#allocation8 + $0x68] sm:$0xff]   ;;  %v7208_v63 = vld [vmem:[#allocation8 + $0x70] sm:$0xff]  }
 0x327   : > { %6608 = vmatpush3.bf16.msra.mxu1 %v7203_v20  ;;  %v3671_v60 = vor.u32 %v3670_v7, %v3667_v29  ;;  %v3681_v35 = vor.u32 %v3680_v22, %v3676_v47  ;;  %v3702_v42 = vshrl.u32 %v8521_v46, 16  ;;  %v4063_v44 = vrot.slane %v8521_v46, 5  ;;  %v8541_v56 = vld [vmem:[#allocation2 + $0x18] sm:$0xf]  ;;  %v8543_v62 = vld [vmem:[#allocation2 + $0x1c] sm:$0xf] }
 0x328   : > { %6609 = vmatprep.subr.bf16.mxu1 %v7204_v15  ;;  %v3691_v37 = vrot.slane %v3689_v23, 4  ;;  %v3694_v28 = vrot.slane %v3692_v55, 5  ;;  %v8528_v45 = vrot.slane %v3698_v36, 5  ;;  %v3708_v54 = vshll.u32 %v3661_v33, 16  ;;  %v3662_v3 = vld [vmem:[#allocation2 + $0x20] sm:$0x1] }
 0x329   : > { %v3672_v12 = vrot.slane %v3671_v60, 4  ;;  %v3682_v40 = vrot.slane %v3681_v35, 4  ;;  %v3704_v39 = vrot.slane %v3702_v42, 4  ;;  %v4065_v19 = vrot.slane %v4063_v44, 4  ;;  %v8549_v38 = vld [vmem:[#allocation2 + $0x24] sm:$0xf] }
 0x32a   : > { %v4066_v52 = vrot.slane %v3661_v33, 5  ;;  %v3695_v57 = vor.u32 %v3694_v28, %v3691_v37  ;;  %v3713_v4 = vshrl.u32 %v8541_v56, 16  ;;  %v3710_v0 = vrot.slane %v3708_v54, 5  ;;  %v8551_v61 = vld [vmem:[#allocation2 + $0x28] sm:$0xf]  ;;  %v7209_v1 = vld [vmem:[#allocation8 + $0x78] sm:$0xff]  }
 0x32b   : > { %6610 = vmatpush3.bf16.msra.mxu1 %v7204_v15  ;;  %v3677_v21 = vsel %vm8073_vm6, %v3672_v12, %v3676_v47  ;;  %v3687_v48 = vsel %vm8073_vm6, %v3682_v40, %v3686_v32  ;;  %v3705_v59 = vor.u32 %v3704_v39, %v8528_v45  ;;  %v3716_v5 = vshll.u32 %v8541_v56, 16  ;;  %v3663_v15 = vld [vmem:[#allocation2 + $0x2c] sm:$0x1]  ;;  %v7210_v35 = vld [vmem:[#allocation8] sm:$0xff]   ;;  %s6076_s15 = sshll.u32 %s7482_s30, 3  ;;  %s6048_s13 = sshll.u32 %s8909_s23, 5 }
 0x32c   : > { %6611 = vmatprep.subr.bf16.mxu1 %v7205_v25  ;;  %v5913_v34 = vcombine.low %v3677_v21, %v3687_v48  ;;  %v8538_v13 = vsel %vm8158_vm9, %v4065_v19, %v4066_v52  ;;  %v3696_v43 = vrot.slane %v3695_v57, 4  ;;  %v3722_v6 = vshll.u32 %v8543_v62, 16  ;;  %v7211_v54 = vld [vmem:[#allocation8 + $0x8] sm:$0xff]   ;;  %s5608_s27 = sadd.s32 %s6076_s15, %s6048_s13  ;;  %s8910_s30 = sld [smem:[#allocation16_spill]] }
 0x32d   : > { %v3726_v9 = vshrl.u32 %v8543_v62, 16  ;;  %v3715_v10 = vrot.slane %v3713_v4, 4  ;;  %v3732_v14 = vshll.u32 %v3662_v3, 16  ;;  %v3706_v11 = vrot.slane %v3705_v59, 4  ;;  %v4043_v59 = vld [vmem:[#allocation2 + $0xc] sm:$0xe] }
 0x32e   : > { %6621 = vmatprep.mubr.bf16.mxu1 %v5913_v34  ;;  %v3718_v8 = vrot.slane %v3716_v5, 5  ;;  %v3724_v26 = vrot.slane %v3722_v6, 5  ;;  %v3701_v20 = vsel %vm8073_vm6, %v3696_v43, %v8528_v45  ;;  %v3740_v17 = vshll.u32 %v8549_v38, 16  ;;  %v7283_v2 = vld [vmem:[#allocation8 + $0x228] sm:$0xff]   ;;  %s6049_s21 = sshll.u32 %s5608_s27, 6  ;;  %s5611_s6 = sshll.u32 %s7843_s16, 4  ;;  %s8768_s6 = int_to_ptr.vmem [resolvable:$true] %s5611_s6 }
 0x32f   : > { %6612 = vmatpush3.bf16.msra.mxu1 %v7205_v25  ;;  %v3728_v30 = vrot.slane %v3726_v9, 4  ;;  %v3737_v25 = vshrl.u32 %v8549_v38, 16  ;;  %v3746_v49 = vshll.u32 %v8551_v61, 16  ;;  %v3750_v27 = vshrl.u32 %v8551_v61, 16  ;;  %v7213_v9 = vld [vmem:[#allocation8 + $0x18] sm:$0xff]   ;;  %s8911_s1 = sld [smem:[#allocation22_spill]] }
 0x330   : > { %6613 = vmatprep.subr.bf16.mxu1 %v7206_v24  ;;  %v3719_v53 = vor.u32 %v3718_v8, %v3715_v10  ;;  %v3742_v7 = vrot.slane %v3740_v17, 5  ;;  %v3756_v22 = vshll.u32 %v3663_v15, 16  ;;  %v3711_v32 = vsel %vm8073_vm6, %v3706_v11, %v3710_v0  ;;  %v7216_v17 = vld [vmem:[#allocation8 + $0x30] sm:$0xff]   ;;  %s8774_s24 = scalar_lea.sflag [#allocation5], %s337_s9  ;;  %s7372_s20 = scalar_lea.vmem %s8768_s6, 512 }
 0x331   : > { %v3729_v41 = vor.u32 %v3728_v30, %v3724_v26  ;;  %v3739_v29 = vrot.slane %v3737_v25, 4  ;;  %v3748_v47 = vrot.slane %v3746_v49, 5  ;;  %v3752_v60 = vrot.slane %v3750_v27, 4  ;;  %v7215_v25 = vld [vmem:[#allocation8 + $0x28] sm:$0xff]   ;;  %v7217_v49 = vld [vmem:[#allocation8 + $0x38] sm:$0xff]   ;;  %p7373_p11 = scmp.ne.s32.totalorder %s8768_s6, %s7372_s20  ;;  %s7508_s19 = smov [#allocation9]  }
 0x332   : > { %v3720_v33 = vrot.slane %v3719_v53, 4  ;;  %v4070_v12 = vrot.slane %v8543_v62, 5  ;;  %v5914_v40 = vcombine.low %v3701_v20, %v3711_v32  ;;  %v3758_v28 = vrot.slane %v3756_v22, 5  ;;  %v7219_v53 = vld [vmem:[#allocation8 + $0x80] sm:$0xff]   ;;  %p8912_p0 = scmp.ne.s32.totalorder %s8910_s30, 0  ;;  %s7376_s18 = sshll.u32 %s7508_s19, 4  ;;  %s7377_s18 = int_to_ptr.vmem [resolvable:$false] %s7376_s18 }
 0x333   : > { %6614 = vmatpush3.bf16.msra.mxu1 %v7206_v24  ;;  %v3734_v24 = vrot.slane %v3732_v14, 5  ;;  %v3730_v23 = vrot.slane %v3729_v41, 4  ;;  %v3743_v55 = vor.u32 %v3742_v7, %v3739_v29  ;;  %v3753_v42 = vor.u32 %v3752_v60, %v3748_v47  ;;  %v4044_v14 = vld [vmem:[#allocation2 + $0x18] sm:$0xe]  ;;  %v7227_v60 = vld [vmem:[#allocation8 + $0xb0] sm:$0xff]   ;;  %p7379_p12 = scmp.lt.s32.totalorder %s8768_s6, %s7377_s18 }
 0x334   : > { %6615 = vmatprep.subr.bf16.mxu1 %v7207_v51  ;;  %v3725_v36 = vsel %vm8073_vm6, %v3720_v33, %v3724_v26  ;;  %v4072_v19 = vrot.slane %v4070_v12, 4  ;;  %v4073_v52 = vrot.slane %v3662_v3, 5  ;;  %v4077_v21 = vrot.slane %v8551_v61, 5  ;;  %v7214_v26 = vld [vmem:[#allocation8 + $0x20] sm:$0xff]   ;;  %v7222_v33 = vld [vmem:[#allocation8 + $0x90] sm:$0xff]   ;;  %p7374_p5 = pnand %p7373_p11, %p8912_p0 }
 0x335   : > { %v3735_v37 = vsel %vm8073_vm6, %v3730_v23, %v3734_v24  ;;  %v3754_v39 = vrot.slane %v3753_v42, 4  ;;  %v5938_v43 = vrot.slane %v4043_v59, 9  ;;  %v5925_v0 = vcombine.low %v8508_v50, %v8510_v16  ;;  %v4045_v50 = vld [vmem:[#allocation2 + $0x24] sm:$0xe]  ;;  %v4042_v24 = vld [vmem:[#allocation2] sm:$0xe] }
 0x336   : > { %v5915_v45 = vcombine.low %v3725_v36, %v3735_v37  ;;  %v8574_v34 = vsel %vm8158_vm9, %v4072_v19, %v4073_v52  ;;  %v4079_v4 = vrot.slane %v4077_v21, 4  ;;  %v4080_v6 = vrot.slane %v3663_v15, 5  ;;  %v7225_v23 = vld [vmem:[#allocation8 + $0xa8] sm:$0xff]   ;;  %v7233_v37 = vld [vmem:[#allocation8 + $0xd8] sm:$0xff]   ;;  %v7234_v42 = vld [vmem:[#allocation8 + $0xe0] sm:$0xff]   ;;  %p7375_p8 = pneg %p7374_p5 }
 0x337   : > { %6616 = vmatpush3.bf16.msra.mxu1 %v7207_v51  ;;  %v3744_v51 = vrot.slane %v3743_v55, 4  ;;  %v3759_v57 = vsel %vm8073_vm6, %v3754_v39, %v3758_v28  ;;  %v8582_v5 = vsel %vm8158_vm9, %v5938_v43, %v4063_v44  ;;  %v5939_v8 = vrot.slane %v4044_v14, 9  ;;  %v7232_v55 = vld [vmem:[#allocation8 + $0xd0] sm:$0xff]   ;;  %v7237_v19 = vld [vmem:[#allocation8 + $0xf8] sm:$0xff]  }
 0x338   : > { %6617 = vmatprep.subr.bf16.mxu1 %v7208_v63  ;;  %v5942_v10 = vcombine.low %v8582_v5, %v8538_v13  ;;  %v8588_v11 = vsel %vm8158_vm9, %v4079_v4, %v4080_v6  ;;  %v5940_v30 = vrot.slane %v4045_v50, 9  ;;  %v4056_v41 = vrot.slane %v8510_v16, 5  ;;  %v7238_v36 = vld [vmem:[#allocation2 + $0xc] sm:$0xff]   ;;  %v7240_v4 = vld [vmem:[#allocation2 + $0x18] sm:$0xff]  }
 0x339   : > { %v3749_v48 = vsel %vm8073_vm6, %v3744_v51, %v3748_v47  ;;  %v4071_v44 = vsel %vm8158_vm9, %v5939_v8, %v4070_v12  ;;  %v5926_v27 = vcombine.low %v8519_v31, %v8521_v46  ;;  %v5927_v29 = vcombine.low %v8541_v56, %v8543_v62  ;;  %v7221_v47 = vld [vmem:[#allocation8 + $0x88] sm:$0xff]   ;;  %v7223_v56 = vld [vmem:[#allocation8 + $0x98] sm:$0xff]   ;;  %v7224_v62 = vld [vmem:[#allocation8 + $0xa0] sm:$0xff]  }
 0x33a   : > { %v5916_v3 = vcombine.low %v3749_v48, %v3759_v57  ;;  %v8595_v20 = vsel %vm8158_vm9, %v5940_v30, %v4077_v21  ;;  %v4059_v7 = vrot.slane %v8512_v18, 5  ;;  %v5937_v22 = vrot.slane %v4042_v24, 9  ;;  %v7235_v12 = vld [vmem:[#allocation8 + $0xe8] sm:$0xff]   ;;  %v8614_v28 = vld [vmem:[#allocation2 + $0x10] sm:$0xf] }
 0x33b   : > { %6618 = vmatpush3.bf16.msra.mxu1 %v7208_v63  ;;  %v7212_v63 = vld [vmem:[#allocation8 + $0x10] sm:$0xff]   ;;  %v5944_v15 = vcombine.low %v8595_v20, %v8588_v11  ;;  %v4058_v32 = vrot.slane %v4056_v41, 4  ;;  %v5928_v46 = vcombine.low %v8549_v38, %v8551_v61  ;;  %v7230_v38 = vld [vmem:[#allocation8 + $0xc0] sm:$0xff]   ;;  %v7231_v61 = vld [vmem:[#allocation8 + $0xc8] sm:$0xff]   ;;  %v4426_v39 = vshll.u32 %v8614_v28, 16 }
 0x33c   : > { %6619 = vmatprep.subr.bf16.mxu1 %v7209_v1  ;;  %v4057_v16 = vsel %vm8158_vm9, %v5937_v22, %v4056_v41  ;;  %v7236_v13 = vld [vmem:[#allocation8 + $0xf0] sm:$0xff]   ;;  %v7241_v5 = vld [vmem:[#allocation8 + $0x108] sm:$0xff]   ;;  %v8625_v30 = vld [vmem:[#allocation2 + $0x1c] sm:$0xf] }
 0x33d   : > { %v4060_v31 = vsel %vm8158_vm9, %v4058_v32, %v4059_v7  ;;  %v4428_v48 = vrot.slane %v4426_v39, 5  ;;  %v7242_v14 = vld [vmem:[#allocation8 + $0x110] sm:$0xff]   ;;  %v4410_v20 = vld [vmem:[#allocation2 + $0x24] sm:$0xf] }
 0x33e   : > { %v5941_v18 = vcombine.low %v4057_v16, %v4060_v31  ;;  %v7248_v50 = vld [vmem:[#allocation2 + $0x30] sm:$0xff]   ;;  %v4465_v41 = vshrl.u32 %v4410_v20, 16  ;;  %v4468_v24 = vshll.u32 %v4410_v20, 16  ;;  %v7245_v16 = vld [vmem:[#allocation8 + $0x128] sm:$0xff]   ;;  %v8633_v31 = vld [vmem:[#allocation2 + $0x20] sm:$0x1] }
 0x33f   : > { %6620 = vmatpush3.bf16.msra.mxu1 %v7209_v1  ;;  %v5943_v1 = vcombine.low %v4071_v44, %v8574_v34  ;;  %v8618_v34 = vld [vmem:[#allocation2 + $0x14] sm:$0x1]  ;;  %v4407_v44 = vld [vmem:[#allocation2 + $0x18] sm:$0xf] }
 0x340   : > { %6629 = vmatprep.subr.bf16.mxu1 %v7210_v35 }
 0x342   : > { %6622 = vmatmul.mubr.bf16.vlgmr.msra.gmra.mrb[0].mxu1 %v5914_v40  ;;  %v4404_v40 = vld [vmem:[#allocation2 + $0xc] sm:$0xf] }
 0x343   : > { %6630 = vmatpush3.bf16.msra.mxu1 %v7210_v35  ;;  %6625 = vmatprep.mubr.bf16.mxu1 %v5915_v45  ;;  %v7229_v35 = vld [vmem:[#allocation8 + $0xb8] sm:$0xff]   ;;  %v4417_v45 = vshrl.u32 %v4404_v40, 16  ;;  %v4420_v51 = vshll.u32 %v4404_v40, 16  ;;  %v7247_v40 = vld [vmem:[#allocation8 + $0x130] sm:$0xff]  }
 0x344   : > { %6631 = vmatprep.subr.bf16.mxu1 %v7211_v54 }
 0x345   : > { %v4419_v52 = vrot.slane %v4417_v45, 4  ;;  %v4422_v21 = vrot.slane %v4420_v51, 5 }
 0x347   : > { %6632 = vmatpush3.bf16.msra.mxu1 %v7211_v54  ;;  %v4430_v54 = vshrl.u32 %v8614_v28, 16  ;;  %v4423_v59 = vor.u32 %v4422_v21, %v4419_v52 }
 0x348   : > { %6633 = vmatprep.subr.bf16.mxu1 %v7212_v63 }
 0x349   : > { %v4432_v57 = vrot.slane %v4430_v54, 4  ;;  %v4424_v6 = vrot.slane %v4423_v59, 4 }
 0x34a   : > { %6626 = vmatmul.mubr.bf16.gmra.mrb[4].mxu1 %v5916_v3  ;;  %v4436_v3 = vshll.u32 %v8618_v34, 16 }
 0x34b   : > { %6634 = vmatpush3.bf16.msra.mxu1 %v7212_v63  ;;  %6645 = vmatprep.mubr.bf16.mxu1 %v5925_v0  ;;  %v7239_v63 = vld [vmem:[#allocation8 + $0x100] sm:$0xff]   ;;  %v4433_v43 = vor.u32 %v4432_v57, %v4428_v48  ;;  %v4429_v11 = vsel %vm8073_vm6, %v4424_v6, %v4428_v48 }
 0x34c   : > { %6635 = vmatprep.subr.bf16.mxu1 %v7213_v9  ;;  %v7246_v0 = vld [vmem:[#allocation2 + $0x24] sm:$0xff]  }
 0x34f   : > { %6636 = vmatpush3.bf16.msra.mxu1 %v7213_v9  ;;  %v4434_v9 = vrot.slane %v4433_v43, 4 }
 0x350   : > { %6637 = vmatprep.subr.bf16.mxu1 %v7214_v26 }
 0x353   : > { %6638 = vmatpush3.bf16.msra.mxu1 %v7214_v26 }
 0x354   : > { %6639 = vmatprep.subr.bf16.mxu1 %v7215_v25 }
 0x357   : > { %6640 = vmatpush3.bf16.msra.mxu1 %v7215_v25  ;;  %v4441_v25 = vshrl.u32 %v4407_v44, 16 }
 0x358   : > { %6641 = vmatprep.subr.bf16.mxu1 %v7216_v17 }
 0x35b   : > { %6642 = vmatpush3.bf16.msra.mxu1 %v7216_v17  ;;  %v4444_v17 = vshll.u32 %v4407_v44, 16 }
 0x35c   : > { %6643 = vmatprep.subr.bf16.mxu1 %v7217_v49 }
 0x35d   : > { %v4446_v22 = vrot.slane %v4444_v17, 5 }
 0x35f   : > { %6644 = vmatpush3.bf16.msra.mxu1 %v7217_v49  ;;  %v4450_v49 = vshll.u32 %v8625_v30, 16 }
 0x360   : > { %6653 = vmatprep.subr.bf16.mxu1 %v7219_v53 }
 0x361   : > { %v4452_v32 = vrot.slane %v4450_v49, 5  ;;  %v7251_v49 = vld [vmem:[#allocation8 + $0x148] sm:$0xff]  }
 0x362   : > { %6646 = vmatmul.mubr.bf16.vlgmr.msra.gmra.mrb[0].mxu1 %v5926_v27  ;;  %v7244_v27 = vld [vmem:[#allocation8 + $0x120] sm:$0xff]  }
 0x363   : > { %6654 = vmatpush3.bf16.msra.mxu1 %v7219_v53  ;;  %6649 = vmatprep.mubr.bf16.mxu1 %v5927_v29  ;;  %v4454_v53 = vshrl.u32 %v8625_v30, 16 }
 0x364   : > { %6655 = vmatprep.subr.bf16.mxu1 %v7221_v47 }
 0x367   : > { %6656 = vmatpush3.bf16.msra.mxu1 %v7221_v47  ;;  %v4443_v47 = vrot.slane %v4441_v25, 4 }
 0x368   : > { %6657 = vmatprep.subr.bf16.mxu1 %v7222_v33 }
 0x36a   : > { %6650 = vmatmul.mubr.bf16.gmra.mrb[4].mxu1 %v5928_v46  ;;  %v4467_v46 = vrot.slane %v4465_v41, 4 }
 0x36b   : > { %6658 = vmatpush3.bf16.msra.mxu1 %v7222_v33  ;;  %6669 = vmatprep.mubr.bf16.mxu1 %v5941_v18  ;;  %v4456_v33 = vrot.slane %v4454_v53, 4  ;;  %v4470_v18 = vrot.slane %v4468_v24, 5  ;;  %v4686_v24 = vrot.slane %v8618_v34, 5 }
 0x36c   : > { %6659 = vmatprep.subr.bf16.mxu1 %v7223_v56 }
 0x36f   : > { %6660 = vmatpush3.bf16.msra.mxu1 %v7223_v56 }
 0x370   : > { %6661 = vmatprep.subr.bf16.mxu1 %v7224_v62 }
 0x373   : > { %6662 = vmatpush3.bf16.msra.mxu1 %v7224_v62 }
 0x374   : > { %6663 = vmatprep.subr.bf16.mxu1 %v7225_v23 }
 0x377   : > { %6664 = vmatpush3.bf16.msra.mxu1 %v7225_v23  ;;  %v4413_v23 = vld [vmem:[#allocation2 + $0x30] sm:$0xf] }
 0x378   : > { %6665 = vmatprep.subr.bf16.mxu1 %v7227_v60 }
 0x37b   : > { %6666 = vmatpush3.bf16.msra.mxu1 %v7227_v60  ;;  %v8635_v60 = vld [vmem:[#allocation2 + $0x34] sm:$0xf] }
 0x37c   : > { %6667 = vmatprep.subr.bf16.mxu1 %v7229_v35 }
 0x37f   : > { %6668 = vmatpush3.bf16.msra.mxu1 %v7229_v35  ;;  %v8637_v35 = vld [vmem:[#allocation2 + $0x2c] sm:$0x1] }
 0x380   : > { %6677 = vmatprep.subr.bf16.mxu1 %v7230_v38  ;;  %v4484_v51 = vshll.u32 %v8637_v35, 16 }
 0x382   : > { %6670 = vmatmul.mubr.bf16.vlgmr.msra.gmra.mrb[0].mxu1 %v5942_v10  ;;  %v4438_v10 = vrot.slane %v4436_v3, 5  ;;  %v4486_v3 = vrot.slane %v4484_v51, 5  ;;  %v4668_v51 = vld [vmem:[#allocation2 + $0x30] sm:$0xe] }
 0x383   : > { %6678 = vmatpush3.bf16.msra.mxu1 %v7230_v38  ;;  %6673 = vmatprep.mubr.bf16.mxu1 %v5943_v1  ;;  %v7243_v1 = vld [vmem:[#allocation8 + $0x118] sm:$0xff]   ;;  %v4447_v38 = vor.u32 %v4446_v22, %v4443_v47 }
 0x384   : > { %6679 = vmatprep.subr.bf16.mxu1 %v7231_v61  ;;  %v4439_v8 = vsel %vm8073_vm6, %v4434_v9, %v4438_v10 }
 0x385   : > { %v5965_v26 = vcombine.low %v4429_v11, %v4439_v8  ;;  %v4448_v39 = vrot.slane %v4447_v38, 4 }
 0x387   : > { %6680 = vmatpush3.bf16.msra.mxu1 %v7231_v61  ;;  %v4457_v61 = vor.u32 %v4456_v33, %v4452_v32  ;;  %v7254_v33 = vld [vmem:[#allocation8 + $0x160] sm:$0xff]  }
 0x388   : > { %6681 = vmatprep.subr.bf16.mxu1 %v7232_v55 }
 0x389   : > { %v4458_v54 = vrot.slane %v4457_v61, 4 }
 0x38a   : > { %6674 = vmatmul.mubr.bf16.gmra.mrb[4].mxu1 %v5944_v15  ;;  %v8627_v15 = vld [vmem:[#allocation2 + $0x28] sm:$0xf] }
 0x38b   : > { %6682 = vmatpush3.bf16.msra.mxu1 %v7232_v55  ;;  %6693 = vmatprep.mubr.bf16.mxu1 %v7238_v36  ;;  %v4474_v29 = vshll.u32 %v8627_v15, 16  ;;  %v4478_v7 = vshrl.u32 %v8627_v15, 16  ;;  %v4460_v55 = vshll.u32 %v8633_v31, 16  ;;  %v4489_v36 = vshrl.u32 %v4413_v23, 16 }
 0x38c   : > { %6683 = vmatprep.subr.bf16.mxu1 %v7233_v37 }
 0x38d   : > { %v4476_v56 = vrot.slane %v4474_v29, 5  ;;  %v4480_v62 = vrot.slane %v4478_v7, 4  ;;  %v4491_v52 = vrot.slane %v4489_v36, 4  ;;  %v7252_v29 = vld [vmem:[#allocation8 + $0x150] sm:$0xff]   ;;  %v7257_v36 = vld [vmem:[#allocation8 + $0x178] sm:$0xff]  }
 0x38f   : > { %6684 = vmatpush3.bf16.msra.mxu1 %v7233_v37  ;;  %v4492_v37 = vshll.u32 %v4413_v23, 16  ;;  %v4481_v45 = vor.u32 %v4480_v62, %v4476_v56  ;;  %v4697_v62 = vrot.slane %v8627_v15, 5  ;;  %v4667_v23 = vld [vmem:[#allocation2 + $0x24] sm:$0xe]  ;;  %v4704_v15 = vrot.slane %v8635_v60, 5 }
 0x390   : > { %6685 = vmatprep.subr.bf16.mxu1 %v7234_v42 }
 0x391   : > { %v4494_v21 = vrot.slane %v4492_v37, 5  ;;  %v4482_v43 = vrot.slane %v4481_v45, 4  ;;  %v5979_v37 = vrot.slane %v4667_v23, 9 }
 0x393   : > { %6686 = vmatpush3.bf16.msra.mxu1 %v7234_v42  ;;  %v4498_v42 = vshll.u32 %v8635_v60, 16  ;;  %v4495_v6 = vor.u32 %v4494_v21, %v4491_v52  ;;  %v4487_v8 = vsel %vm8073_vm6, %v4482_v43, %v4486_v3  ;;  %v7259_v21 = vld [vmem:[#allocation8 + $0x188] sm:$0xff]   ;;  %v7261_v43 = vld [vmem:[#allocation8 + $0x198] sm:$0xff]   ;;  %v7262_v3 = vld [vmem:[#allocation8 + $0x1a0] sm:$0xff]  }
 0x394   : > { %6687 = vmatprep.subr.bf16.mxu1 %v7235_v12 }
 0x395   : > { %v4500_v48 = vrot.slane %v4498_v42, 5  ;;  %v4496_v20 = vrot.slane %v4495_v6, 4  ;;  %v4699_v42 = vrot.slane %v4697_v62, 4  ;;  %v7264_v6 = vld [vmem:[#allocation8 + $0x1b0] sm:$0xff]  }
 0x397   : > { %6688 = vmatpush3.bf16.msra.mxu1 %v7235_v12  ;;  %v4502_v12 = vshrl.u32 %v8635_v60, 16 }
 0x398   : > { %6689 = vmatprep.subr.bf16.mxu1 %v7236_v13 }
 0x399   : > { %v4504_v57 = vrot.slane %v4502_v12, 4  ;;  %v4700_v12 = vrot.slane %v8637_v35, 5 }
 0x39b   : > { %6690 = vmatpush3.bf16.msra.mxu1 %v7236_v13  ;;  %v4471_v13 = vor.u32 %v4470_v18, %v4467_v46  ;;  %v4505_v9 = vor.u32 %v4504_v57, %v4500_v48  ;;  %v4690_v46 = vrot.slane %v8625_v30, 5  ;;  %v7256_v18 = vld [vmem:[#allocation8 + $0x170] sm:$0xff]   ;;  %v4701_v45 = vsel %vm8158_vm9, %v4699_v42, %v4700_v12 }
 0x39c   : > { %6691 = vmatprep.subr.bf16.mxu1 %v7237_v19  ;;  %v7260_v57 = vld [vmem:[#allocation8 + $0x190] sm:$0xff]  }
 0x39d   : > { %v4472_v59 = vrot.slane %v4471_v13, 4  ;;  %v4506_v25 = vrot.slane %v4505_v9, 4  ;;  %v4692_v61 = vrot.slane %v4690_v46, 4  ;;  %v7258_v13 = vld [vmem:[#allocation8 + $0x180] sm:$0xff]  }
 0x39f   : > { %6692 = vmatpush3.bf16.msra.mxu1 %v7237_v19  ;;  %v4462_v19 = vrot.slane %v4460_v55, 5  ;;  %v4477_v11 = vsel %vm8073_vm6, %v4472_v59, %v4476_v56  ;;  %v4666_v56 = vld [vmem:[#allocation2 + $0x18] sm:$0xe]  ;;  %v4693_v55 = vrot.slane %v8633_v31, 5  ;;  %v4698_v31 = vsel %vm8158_vm9, %v5979_v37, %v4697_v62  ;;  %v8695_v62 = vld [vmem:[#allocation2 + $0x34] sm:$0xf] }
 0x3a0   : > { %6701 = vmatprep.subr.bf16.mxu1 %v7239_v63  ;;  %v5978_v38 = vrot.slane %v4666_v56, 9  ;;  %v5983_v35 = vcombine.low %v4698_v31, %v4701_v45  ;;  %v7266_v59 = vld [vmem:[#allocation2 + $0x18] sm:$0xff]   ;;  %v5037_v56 = vld [vmem:[#allocation2 + $0x30] sm:$0xf]  ;;  %v5101_v12 = vshll.u32 %v8695_v62, 16  ;;  %v7273_v45 = vld [vmem:[#allocation8 + $0x1e8] sm:$0xff]  }
 0x3a1   : > { %v5092_v37 = vshrl.u32 %v5037_v56, 16  ;;  %v5095_v42 = vshll.u32 %v5037_v56, 16 }
 0x3a2   : > { %6694 = vmatmul.mubr.bf16.vlgmr.msra.gmra.mrb[0].mxu1 %v7240_v4  ;;  %v8643_v4 = vld [vmem:[#allocation2 + $0x38] sm:$0x1]  ;;  %v4691_v30 = vsel %vm8158_vm9, %v5978_v38, %v4690_v46  ;;  %v8693_v46 = vld [vmem:[#allocation2 + $0x28] sm:$0xf] }
 0x3a3   : > { %6702 = vmatpush3.bf16.msra.mxu1 %v7239_v63  ;;  %6697 = vmatprep.mubr.bf16.mxu1 %v7246_v0  ;;  %v7249_v63 = vld [vmem:[#allocation8 + $0x138] sm:$0xff]   ;;  %v4453_v0 = vsel %vm8073_vm6, %v4448_v39, %v4452_v32  ;;  %v4508_v10 = vshll.u32 %v8643_v4, 16  ;;  %v4707_v52 = vrot.slane %v8643_v4, 5  ;;  %v7263_v4 = vld [vmem:[#allocation8 + $0x1a8] sm:$0xff]  }
 0x3a4   : > { %6703 = vmatprep.subr.bf16.mxu1 %v7241_v5  ;;  %v7253_v32 = vld [vmem:[#allocation8 + $0x158] sm:$0xff]  }
 0x3a5   : > { %v4510_v17 = vrot.slane %v4508_v10, 5 }
 0x3a7   : > { %6704 = vmatpush3.bf16.msra.mxu1 %v7241_v5  ;;  %v4463_v5 = vsel %vm8073_vm6, %v4458_v54, %v4462_v19  ;;  %v5980_v54 = vrot.slane %v4668_v51, 9  ;;  %v4706_v19 = vrot.slane %v4704_v15, 4  ;;  %v8701_v51 = vld [vmem:[#allocation2 + $0x2c] sm:$0x1] }
 0x3a8   : > { %6705 = vmatprep.subr.bf16.mxu1 %v7242_v14  ;;  %v5966_v44 = vcombine.low %v4453_v0, %v4463_v5  ;;  %v5031_v0 = vld [vmem:[#allocation2 + $0x18] sm:$0xf]  ;;  %v8682_v5 = vld [vmem:[#allocation2 + $0x1c] sm:$0xf] }
 0x3a9   : > { %v4705_v60 = vsel %vm8158_vm9, %v5980_v54, %v4704_v15  ;;  %v5044_v9 = vshrl.u32 %v5031_v0, 16  ;;  %v5047_v10 = vshll.u32 %v5031_v0, 16  ;;  %v5097_v54 = vrot.slane %v5095_v42, 5  ;;  %v7275_v0 = vld [vmem:[#allocation8 + $0x1f0] sm:$0xff]  }
 0x3aa   : > { %6698 = vmatmul.mubr.bf16.gmra.mrb[4].mxu1 %v7248_v50  ;;  %v4683_v50 = vrot.slane %v8614_v28, 5  ;;  %v4511_v28 = vsel %vm8073_vm6, %v4506_v25, %v4510_v17  ;;  %v7267_v25 = vld [vmem:[#allocation8 + $0x1c0] sm:$0xff]  }
 0x3ab   : > { %6706 = vmatpush3.bf16.msra.mxu1 %v7242_v14  ;;  %6717 = vmatprep.mubr.bf16.mxu1 %v5965_v26  ;;  %v7250_v14 = vld [vmem:[#allocation8 + $0x140] sm:$0xff]   ;;  %v4665_v26 = vld [vmem:[#allocation2 + $0xc] sm:$0xe] }
 0x3ac   : > { %6707 = vmatprep.subr.bf16.mxu1 %v7243_v1  ;;  %v5977_v53 = vrot.slane %v4665_v26, 9  ;;  %v4685_v41 = vrot.slane %v4683_v50, 4  ;;  %v5049_v26 = vrot.slane %v5047_v10, 5 }
 0x3ae   : > { %v4684_v7 = vsel %vm8158_vm9, %v5977_v53, %v4683_v50  ;;  %v4687_v47 = vsel %vm8158_vm9, %v4685_v41, %v4686_v24  ;;  %v5046_v50 = vrot.slane %v5044_v9, 4  ;;  %v7268_v41 = vld [vmem:[#allocation2 + $0x24] sm:$0xff]   ;;  %v7274_v24 = vld [vmem:[#allocation2 + $0x30] sm:$0xff]  }
 0x3af   : > { %6708 = vmatpush3.bf16.msra.mxu1 %v7243_v1  ;;  %v5967_v1 = vcombine.low %v4477_v11, %v4487_v8  ;;  %v5981_v34 = vcombine.low %v4684_v7, %v4687_v47  ;;  %v5057_v11 = vshrl.u32 %v8682_v5, 16  ;;  %v7265_v8 = vld [vmem:[#allocation8 + $0x1b8] sm:$0xff]   ;;  %v7270_v47 = vld [vmem:[#allocation8 + $0x1d0] sm:$0xff]  }
 0x3b0   : > { %6709 = vmatprep.subr.bf16.mxu1 %v7244_v27  ;;  %v5050_v17 = vor.u32 %v5049_v26, %v5046_v50 }
 0x3b3   : > { %6710 = vmatpush3.bf16.msra.mxu1 %v7244_v27  ;;  %v4501_v27 = vsel %vm8073_vm6, %v4496_v20, %v4500_v48  ;;  %v4708_v48 = vsel %vm8158_vm9, %v4706_v19, %v4707_v52  ;;  %v8686_v20 = vld [vmem:[#allocation2 + $0x20] sm:$0x1]  ;;  %v5103_v19 = vrot.slane %v5101_v12, 5  ;;  %v7280_v12 = vld [vmem:[#allocation8 + $0x210] sm:$0xff]  }
 0x3b4   : > { %6711 = vmatprep.subr.bf16.mxu1 %v7245_v16  ;;  %v5968_v22 = vcombine.low %v4501_v27, %v4511_v28  ;;  %v5063_v53 = vshll.u32 %v8686_v20, 16  ;;  %v7269_v27 = vld [vmem:[#allocation8 + $0x1c8] sm:$0xff]   ;;  %v5051_v28 = vrot.slane %v5050_v17, 4 }
 0x3b6   : > { %v5065_v7 = vrot.slane %v5063_v53, 5 }
 0x3b7   : > { %6712 = vmatpush3.bf16.msra.mxu1 %v7245_v16  ;;  %v7255_v16 = vld [vmem:[#allocation8 + $0x168] sm:$0xff]  }
 0x3b8   : > { %6713 = vmatprep.subr.bf16.mxu1 %v7247_v40 }
 0x3bb   : > { %6714 = vmatpush3.bf16.msra.mxu1 %v7247_v40  ;;  %v4694_v40 = vsel %vm8158_vm9, %v4692_v61, %v4693_v55  ;;  %v5077_v61 = vshll.u32 %v8693_v46, 16  ;;  %v5081_v55 = vshrl.u32 %v8693_v46, 16 }
 0x3bc   : > { %6715 = vmatprep.subr.bf16.mxu1 %v7249_v63  ;;  %v5982_v39 = vcombine.low %v4691_v30, %v4694_v40  ;;  %v5105_v30 = vshrl.u32 %v8695_v62, 16 }
 0x3bd   : > { %v5083_v31 = vrot.slane %v5081_v55, 4 }
 0x3be   : > { %v5107_v52 = vrot.slane %v5105_v30, 4 }
 0x3bf   : > { %6716 = vmatpush3.bf16.msra.mxu1 %v7249_v63  ;;  %v5984_v63 = vcombine.low %v4705_v60, %v4708_v48  ;;  %v8705_v60 = vld [vmem:[#allocation2 + $0x38] sm:$0x1] }
 0x3c0   : > { %6725 = vmatprep.subr.bf16.mxu1 %v7250_v14  ;;  %v5108_v9 = vor.u32 %v5107_v52, %v5103_v19  ;;  %v5111_v10 = vshll.u32 %v8705_v60, 16 }
 0x3c2   : > { %6718 = vmatmul.mubr.bf16.vlgmr.msra.gmra.mrb[0].mxu1 %v5966_v44  ;;  %v5113_v53 = vrot.slane %v5111_v10, 5 }
 0x3c3   : > { %6726 = vmatpush3.bf16.msra.mxu1 %v7250_v14  ;;  %6721 = vmatprep.mubr.bf16.mxu1 %v5967_v1  ;;  %v5053_v14 = vshll.u32 %v8682_v5, 16  ;;  %v5059_v1 = vrot.slane %v5057_v11, 4 }
 0x3c4   : > { %6727 = vmatprep.subr.bf16.mxu1 %v7251_v49 }
 0x3c5   : > { %v5055_v44 = vrot.slane %v5053_v14, 5 }
 0x3c7   : > { %6728 = vmatpush3.bf16.msra.mxu1 %v7251_v49  ;;  %v5060_v49 = vor.u32 %v5059_v1, %v5055_v44 }
 0x3c8   : > { %6729 = vmatprep.subr.bf16.mxu1 %v7252_v29 }
 0x3ca   : > { %6722 = vmatmul.mubr.bf16.gmra.mrb[4].mxu1 %v5968_v22  ;;  %v5056_v22 = vsel %vm8073_vm6, %v5051_v28, %v5055_v44 }
 0x3cb   : > { %6730 = vmatpush3.bf16.msra.mxu1 %v7252_v29  ;;  %6741 = vmatprep.mubr.bf16.mxu1 %v5981_v34  ;;  %v5061_v29 = vrot.slane %v5060_v49, 4  ;;  %v5109_v49 = vrot.slane %v5108_v9, 4 }
 0x3cc   : > { %6731 = vmatprep.subr.bf16.mxu1 %v7253_v32 }
 0x3cd   : > { %v5066_v34 = vsel %vm8073_vm6, %v5061_v29, %v5065_v7 }
 0x3cf   : > { %6732 = vmatpush3.bf16.msra.mxu1 %v7253_v32  ;;  %v7276_v32 = vld [vmem:[#allocation2 + $0x3c] sm:$0xff]  }
 0x3d0   : > { %6733 = vmatprep.subr.bf16.mxu1 %v7254_v33 }
 0x3d3   : > { %6734 = vmatpush3.bf16.msra.mxu1 %v7254_v33  ;;  %v6005_v33 = vcombine.low %v5056_v22, %v5066_v34  ;;  %v5114_v34 = vsel %vm8073_vm6, %v5109_v49, %v5113_v53 }
 0x3d4   : > { %6735 = vmatprep.subr.bf16.mxu1 %v7255_v16 }
 0x3d7   : > { %6736 = vmatpush3.bf16.msra.mxu1 %v7255_v16  ;;  %v5034_v16 = vld [vmem:[#allocation2 + $0x24] sm:$0xf] }
 0x3d8   : > { %6737 = vmatprep.subr.bf16.mxu1 %v7256_v18  ;;  %v5068_v23 = vshrl.u32 %v5034_v16, 16  ;;  %v5071_v38 = vshll.u32 %v5034_v16, 16 }
 0x3da   : > { %v5070_v40 = vrot.slane %v5068_v23, 4  ;;  %v5073_v15 = vrot.slane %v5071_v38, 5 }
 0x3db   : > { %6738 = vmatpush3.bf16.msra.mxu1 %v7256_v18  ;;  %v7271_v18 = vld [vmem:[#allocation8 + $0x1d8] sm:$0xff]  }
 0x3dc   : > { %6739 = vmatprep.subr.bf16.mxu1 %v7257_v36  ;;  %v5074_v48 = vor.u32 %v5073_v15, %v5070_v40 }
 0x3de   : > { %v5075_v14 = vrot.slane %v5074_v48, 4 }
 0x3df   : > { %6740 = vmatpush3.bf16.msra.mxu1 %v7257_v36  ;;  %v7272_v36 = vld [vmem:[#allocation8 + $0x1e0] sm:$0xff]  }
 0x3e0   : > { %6749 = vmatprep.subr.bf16.mxu1 %v7258_v13 }
 0x3e2   : > { %6742 = vmatmul.mubr.bf16.vlgmr.msra.gmra.mrb[0].mxu1 %v5982_v39  ;;  %v5040_v39 = vld [vmem:[#allocation2 + $0x3c] sm:$0xf] }
 0x3e3   : > { %6750 = vmatpush3.bf16.msra.mxu1 %v7258_v13  ;;  %6745 = vmatprep.mubr.bf16.mxu1 %v5983_v35  ;;  %v5079_v13 = vrot.slane %v5077_v61, 5  ;;  %v5094_v35 = vrot.slane %v5092_v37, 4  ;;  %v7279_v61 = vld [vmem:[#allocation8 + $0x208] sm:$0xff]   ;;  %v5313_v37 = vrot.slane %v8686_v20, 5 }
 0x3e4   : > { %6751 = vmatprep.subr.bf16.mxu1 %v7259_v21 }
 0x3e7   : > { %6752 = vmatpush3.bf16.msra.mxu1 %v7259_v21  ;;  %v8703_v21 = vld [vmem:[#allocation2 + $0x40] sm:$0xf] }
 0x3e8   : > { %6753 = vmatprep.subr.bf16.mxu1 %v7260_v57 }
 0x3ea   : > { %6746 = vmatmul.mubr.bf16.gmra.mrb[4].mxu1 %v5984_v63  ;;  %v5087_v63 = vshll.u32 %v8701_v51, 16 }
 0x3eb   : > { %6754 = vmatpush3.bf16.msra.mxu1 %v7260_v57  ;;  %6765 = vmatprep.mubr.bf16.mxu1 %v7266_v59  ;;  %v5084_v57 = vor.u32 %v5083_v31, %v5079_v13  ;;  %v5116_v59 = vshrl.u32 %v5040_v39, 16  ;;  %v7282_v31 = vld [vmem:[#allocation8 + $0x220] sm:$0xff]  }
 0x3ec   : > { %6755 = vmatprep.subr.bf16.mxu1 %v7261_v43 }
 0x3ed   : > { %v5085_v11 = vrot.slane %v5084_v57, 4  ;;  %v5118_v50 = vrot.slane %v5116_v59, 4  ;;  %v5320_v57 = vrot.slane %v8701_v51, 5 }
 0x3ef   : > { %6756 = vmatpush3.bf16.msra.mxu1 %v7261_v43  ;;  %v5119_v43 = vshll.u32 %v5040_v39, 16  ;;  %v7284_v39 = vld [vmem:[#allocation8 + $0x230] sm:$0xff]  }
 0x3f0   : > { %6757 = vmatprep.subr.bf16.mxu1 %v7262_v3 }
 0x3f1   : > { %v5121_v26 = vrot.slane %v5119_v43, 5 }
 0x3f3   : > { %6758 = vmatpush3.bf16.msra.mxu1 %v7262_v3  ;;  %v5125_v3 = vshll.u32 %v8703_v21, 16  ;;  %v5122_v28 = vor.u32 %v5121_v26, %v5118_v50  ;;  %v6113_v26 = vld [vmem:[%s5491_s17 + $0x8] sm:$0xff]  }
 0x3f4   : > { %6759 = vmatprep.subr.bf16.mxu1 %v7263_v4  ;;  %v6083_v49 = vunpack.c.l.bf16 %v6113_v26 }
 0x3f5   : > { %v5127_v44 = vrot.slane %v5125_v3, 5  ;;  %v5123_v56 = vrot.slane %v5122_v28, 4  ;;  %v5327_v3 = vrot.slane %v8705_v60, 5 }
 0x3f7   : > { %6760 = vmatpush3.bf16.msra.mxu1 %v7263_v4  ;;  %v5129_v4 = vshrl.u32 %v8703_v21, 16  ;;  %v5128_v42 = vsel %vm8073_vm6, %v5123_v56, %v5127_v44 }
 0x3f8   : > { %6761 = vmatprep.subr.bf16.mxu1 %v7264_v6 }
 0x3f9   : > { %v5131_v1 = vrot.slane %v5129_v4, 4 }
 0x3fb   : > { %6762 = vmatpush3.bf16.msra.mxu1 %v7264_v6  ;;  %v5098_v6 = vor.u32 %v5097_v54, %v5094_v35  ;;  %v5132_v29 = vor.u32 %v5131_v1, %v5127_v44  ;;  %v5293_v35 = vld [vmem:[#allocation2 + $0x24] sm:$0xe]  ;;  %v5324_v54 = vrot.slane %v8695_v62, 5  ;;  %v5331_v62 = vrot.slane %v8703_v21, 5  ;;  %v6035_v44 = vld [vmem:[%s8840_s5] ss:$0 sm:$0xff] }
 0x3fc   : > { %6763 = vmatprep.subr.bf16.mxu1 %v7265_v8  ;;  %v6018_v52 = vrot.slane %v5293_v35, 9  ;;  %v6078_v1 = vld [vmem:[%s5491_s17] sm:$0xff]  }
 0x3fd   : > { %v5099_v17 = vrot.slane %v5098_v6, 4  ;;  %v5133_v23 = vrot.slane %v5132_v29, 4  ;;  %v5326_v43 = vrot.slane %v5324_v54, 4  ;;  %v5295_v6 = vld [vmem:[#allocation2 + $0x3c] sm:$0xe]  ;;  %v6079_v58 = vunpack.c.l.bf16 %v6078_v1 }
 0x3fe   : > { %v6020_v10 = vrot.slane %v5295_v6, 9  ;;  %v6084_v29 = vunpack.c.h.bf16 %v6113_v26 }
 0x3ff   : > { %6764 = vmatpush3.bf16.msra.mxu1 %v7265_v8  ;;  %v5089_v8 = vrot.slane %v5087_v63, 5  ;;  %v5104_v22 = vsel %vm8073_vm6, %v5099_v17, %v5103_v19  ;;  %v5294_v19 = vld [vmem:[#allocation2 + $0x30] sm:$0xe]  ;;  %v7285_v63 = vld [vmem:[#allocation8 + $0x238] sm:$0xff]   ;;  %v6036_v17 = vld [vmem:[%s8908_s14] ss:$0 sm:$0xff] }
 0x400   : > { %6773 = vmatprep.subr.bf16.mxu1 %v7267_v25  ;;  %v6019_v59 = vrot.slane %v5294_v19, 9  ;;  %v5332_v21 = vsel %vm8158_vm9, %v6020_v10, %v5331_v62  ;;  %s7378_s14 = scalar_lea.vmem %s7377_s18, 1024 }
 0x401   : > { %p7380_p2 = scmp.lt.s32.totalorder %s7378_s14, %s7372_s20 }
 0x402   : > { %6766 = vmatmul.mubr.bf16.vlgmr.msra.gmra.mrb[0].mxu1 %v7268_v41  ;;  %v8711_v41 = vld [vmem:[#allocation2 + $0x44] sm:$0x1]  ;;  %v5325_v51 = vsel %vm8158_vm9, %v6019_v59, %v5324_v54 }
 0x403   : > { %6774 = vmatpush3.bf16.msra.mxu1 %v7267_v25  ;;  %6769 = vmatprep.mubr.bf16.mxu1 %v7274_v24  ;;  %v7277_v25 = vld [vmem:[#allocation8 + $0x1f8] sm:$0xff]   ;;  %v5080_v24 = vsel %vm8073_vm6, %v5075_v14, %v5079_v13  ;;  %v5135_v7 = vshll.u32 %v8711_v41, 16  ;;  %v5333_v14 = vrot.slane %v5331_v62, 4  ;;  %p7381_p6 = por %p7380_p2, %p7379_p12 }
 0x404   : > { %6775 = vmatprep.subr.bf16.mxu1 %v7269_v27  ;;  %v7281_v13 = vld [vmem:[#allocation8 + $0x218] sm:$0xff]  }
 0x405   : > { %v5137_v38 = vrot.slane %v5135_v7, 5  ;;  %p7382_p10 = pnand %p7381_p6, %p7375_p8 }
 0x407   : > { %6776 = vmatpush3.bf16.msra.mxu1 %v7269_v27  ;;  %v5090_v27 = vsel %vm8073_vm6, %v5085_v11, %v5089_v8  ;;  %v5334_v11 = vrot.slane %v8711_v41, 5 }
 0x408   : > { %6777 = vmatprep.subr.bf16.mxu1 %v7270_v47  ;;  %v6006_v16 = vcombine.low %v5080_v24, %v5090_v27 }
 0x409   : > { %v5335_v8 = vsel %vm8158_vm9, %v5333_v14, %v5334_v11 }
 0x40a   : > { %6770 = vmatmul.mubr.bf16.gmra.mrb[4].mxu1 %v7276_v32  ;;  %v5310_v32 = vrot.slane %v8682_v5, 5  ;;  %v5138_v5 = vsel %vm8073_vm6, %v5133_v23, %v5137_v38  ;;  %v6024_v50 = vcombine.low %v5332_v21, %v5335_v8  ;;  %v6115_v23 = vld [vmem:[%s5491_s17 + $0x18] sm:$0xff]  }
 0x40b   : > { %6778 = vmatpush3.bf16.msra.mxu1 %v7270_v47  ;;  %6789 = vmatprep.mubr.bf16.mxu1 %v6005_v33  ;;  %v7278_v47 = vld [vmem:[#allocation8 + $0x200] sm:$0xff]   ;;  %v5292_v33 = vld [vmem:[#allocation2 + $0x18] sm:$0xe]  ;;  %v6008_v15 = vcombine.low %v5128_v42, %v5138_v5  ;;  %v6091_v5 = vunpack.c.l.bf16 %v6115_v23 }
 0x40c   : > { %6779 = vmatprep.subr.bf16.mxu1 %v7271_v18  ;;  %v6017_v55 = vrot.slane %v5292_v33, 9 }
 0x40e   : > { %v5311_v30 = vsel %vm8158_vm9, %v6017_v55, %v5310_v32 }
 0x40f   : > { %6780 = vmatpush3.bf16.msra.mxu1 %v7271_v18  ;;  %v6007_v18 = vcombine.low %v5104_v22, %v5114_v34  ;;  %v6080_v34 = vunpack.c.h.bf16 %v6078_v1 }
 0x410   : > { %6781 = vmatprep.subr.bf16.mxu1 %v7272_v36 }
 0x413   : > { %6782 = vmatpush3.bf16.msra.mxu1 %v7272_v36  ;;  %v5312_v36 = vrot.slane %v5310_v32, 4 }
 0x414   : > { %6783 = vmatprep.subr.bf16.mxu1 %v7273_v45 }
 0x415   : > { %v5314_v40 = vsel %vm8158_vm9, %v5312_v36, %v5313_v37 }
 0x416   : > { %v6021_v20 = vcombine.low %v5311_v30, %v5314_v40 }
 0x417   : > { %6784 = vmatpush3.bf16.msra.mxu1 %v7273_v45  ;;  %v5317_v45 = vrot.slane %v8693_v46, 5 }
 0x418   : > { %6785 = vmatprep.subr.bf16.mxu1 %v7275_v0 }
 0x419   : > { %v5319_v48 = vrot.slane %v5317_v45, 4  ;;  %v5318_v46 = vsel %vm8158_vm9, %v6018_v52, %v5317_v45 }
 0x41b   : > { %6786 = vmatpush3.bf16.msra.mxu1 %v7275_v0  ;;  %v5321_v4 = vsel %vm8158_vm9, %v5319_v48, %v5320_v57  ;;  %v5328_v0 = vsel %vm8158_vm9, %v5326_v43, %v5327_v3 }
 0x41c   : > { %6787 = vmatprep.subr.bf16.mxu1 %v7277_v25  ;;  %v6022_v60 = vcombine.low %v5318_v46, %v5321_v4  ;;  %v6023_v9 = vcombine.low %v5325_v51, %v5328_v0 }
 0x41f   : > { %6788 = vmatpush3.bf16.msra.mxu1 %v7277_v25 }
 0x420   : > { %6797 = vmatprep.subr.bf16.mxu1 %v7278_v47 }
 0x422   : > { %6790 = vmatmul.mubr.bf16.vlgmr.msra.gmra.mrb[0].mxu1 %v6006_v16 }
 0x423   : > { %6798 = vmatpush3.bf16.msra.mxu1 %v7278_v47  ;;  %6793 = vmatprep.mubr.bf16.mxu1 %v6007_v18 }
 0x424   : > { %6799 = vmatprep.subr.bf16.mxu1 %v7279_v61 }
 0x427   : > { %6800 = vmatpush3.bf16.msra.mxu1 %v7279_v61  ;;  %v6114_v61 = vld [vmem:[%s5491_s17 + $0x10] sm:$0xff]   ;;  %s8766_s17 = scalar_lea.hbm %s8911_s1, %s6049_s21 }
 0x428   : > { %6801 = vmatprep.subr.bf16.mxu1 %v7280_v12  ;;  %v6088_v48 = vunpack.c.h.bf16 %v6114_v61 }
 0x42a   : > { %6794 = vmatmul.mubr.bf16.gmra.mrb[4].mxu1 %v6008_v15 }
 0x42b   : > { %6802 = vmatpush3.bf16.msra.mxu1 %v7280_v12  ;;  %6813 = vmatprep.mubr.bf16.mxu1 %v6021_v20  ;;  %v6087_v20 = vunpack.c.l.bf16 %v6114_v61 }
 0x42c   : > { %6803 = vmatprep.subr.bf16.mxu1 %v7281_v13 }
 0x42f   : > { %6804 = vmatpush3.bf16.msra.mxu1 %v7281_v13 }
 0x430   : > { %6805 = vmatprep.subr.bf16.mxu1 %v7282_v31 }
 0x433   : > { %6806 = vmatpush3.bf16.msra.mxu1 %v7282_v31 }
 0x434   : > { %6807 = vmatprep.subr.bf16.mxu1 %v7283_v2 }
 0x437   : > { %6808 = vmatpush3.bf16.msra.mxu1 %v7283_v2 }
 0x438   : > { %6809 = vmatprep.subr.bf16.mxu1 %v7284_v39 }
 0x43b   : > { %6810 = vmatpush3.bf16.msra.mxu1 %v7284_v39  ;;  %v6092_v39 = vunpack.c.h.bf16 %v6115_v23 }
 0x43c   : > { %6811 = vmatprep.subr.bf16.mxu1 %v7285_v63 }
 0x43f   : > { %6812 = vmatpush3.bf16.msra.mxu1 %v7285_v63 }
 0x442   : > { %6814 = vmatmul.mubr.bf16.vlgmr.msra.gmra.mrb[0].mxu1 %v6022_v60 }
 0x443   : > { %6817 = vmatprep.mubr.bf16.mxu1 %v6023_v9 }
 0x44a   : > { %6818 = vmatmul.mubr.bf16.gmra.mrb[4].mxu1 %v6024_v50 }
 0x515   : > { %v6815_v25 = vpop.f32.mrb[0].mxu1 }
 0x516   : > { %v5517_v53 = vmul.f32 %v6815_v25, %v6035_v44  ;;  %v5450_v41 = vpop.f32.mrb[1].mxu1 }
 0x517   : > { %v5515_v24 = vmul.f32 %v6035_v44, %v5450_v41  ;;  %v6816_v27 = vpop.f32.mrb[2].mxu1 }
 0x518   : > { %v5532_v28 = vadd.f32 %v6036_v17, %v5517_v53  ;;  %v5518_v7 = vmul.f32 %v6816_v27, %v6035_v44  ;;  %v5453_v47 = vpop.f32.mrb[3].mxu1 }
 0x519   : > { %v5530_v22 = vadd.f32 %v6036_v17, %v5515_v24  ;;  %v5516_v32 = vmul.f32 %v6035_v44, %v5453_v47 }
 0x51a   : > { %v5540_v33 = vadd.f32 %v6083_v49, %v5532_v28  ;;  %v5533_v16 = vadd.f32 %v6036_v17, %v5518_v7 }
 0x51b   : > { %v5538_v18 = vadd.f32 %v6079_v58, %v5530_v22  ;;  %v5531_v56 = vadd.f32 %v6036_v17, %v5516_v32 }
 0x51c   : > { %v5541_v38 = vadd.f32 %v6084_v29, %v5533_v16  ;;  %v5548_v37 = vmax.f32 %v5540_v33, 0.0 }
 0x51d   : > { %v5539_v55 = vadd.f32 %v6080_v34, %v5531_v56  ;;  %v6819_v36 = vpop.f32.mrb[4].mxu1  ;;  %v5546_v40 = vmax.f32 %v5538_v18, 0.0 }
 0x51e   : > { %v5549_v42 = vmax.f32 %v5541_v38, 0.0  ;;  %v5521_v12 = vmul.f32 %v6819_v36, %v6035_v44  ;;  %v5466_v30 = vpop.f32.mrb[5].mxu1 }
 0x51f   : > { %v5547_v15 = vmax.f32 %v5539_v55, 0.0  ;;  %v5519_v13 = vmul.f32 %v6035_v44, %v5466_v30  ;;  %v6820_v31 = vpop.f32.mrb[6].mxu1 }
 0x520   : > { %v6101_v2 = vpack.c.bf16 %v5549_v42, %v5548_v37  ;;  %v5536_v45 = vadd.f32 %v6036_v17, %v5521_v12  ;;  %v5522_v35 = vmul.f32 %v6820_v31, %v6035_v44  ;;  %v5469_v54 = vpop.f32.mrb[7].mxu1 }
 0x521   : > { %v6096_v19 = vpack.c.bf16 %v5547_v15, %v5546_v40  ;;  %v5534_v52 = vadd.f32 %v6036_v17, %v5519_v13  ;;  %v5520_v57 = vmul.f32 %v6035_v44, %v5469_v54 }
 0x522   : > { %6116 = vst [vmem:[%s7843_s16 + $0x8] sm:$0xff] %v6101_v2   ;;  %v5544_v63 = vadd.f32 %v6091_v5, %v5536_v45  ;;  %v5537_v59 = vadd.f32 %v6036_v17, %v5522_v35 }
 0x523   : > { %6097 = vst [vmem:[%s7843_s16] sm:$0xff] %v6096_v19   ;;  %v5542_v43 = vadd.f32 %v6087_v20, %v5534_v52  ;;  %v5535_v3 = vadd.f32 %v6036_v17, %v5520_v57 }
 0x524   : > { %v5545_v46 = vadd.f32 %v6092_v39, %v5537_v59  ;;  %v5552_v62 = vmax.f32 %v5544_v63, 0.0 }
 0x525   : > { %v5543_v4 = vadd.f32 %v6088_v48, %v5535_v3  ;;  %v5550_v0 = vmax.f32 %v5542_v43, 0.0 }
 0x526   : > { %v5553_v51 = vmax.f32 %v5545_v46, 0.0 }
 0x527   : > { %v5551_v6 = vmax.f32 %v5543_v4, 0.0 }
 0x528   : > { %v6111_v60 = vpack.c.bf16 %v5553_v51, %v5552_v62 }
 0x529   : > { %v6106_v9 = vpack.c.bf16 %v5551_v6, %v5550_v0 }
 0x52a   : > { %6118 = vst [vmem:[%s7843_s16 + $0x18] sm:$0xff] %v6111_v60  }
 0x52b   : > { %6117 = vst [vmem:[%s7843_s16 + $0x10] sm:$0xff] %v6106_v9  }
 0x52c   : > { %7385 = shalt.err (!%p7382_p10)
}
 0x52d   : > { %s7386_s9 = scalar_lea.hbm %s8766_s17, 512  ;;  %s7390_s15 = scalar_lea.hbm %s8911_s1, 4096 }
 0x52e   : > { %p7387_p1 = scmp.ne.s32.totalorder %s8766_s17, %s7386_s9  ;;  %p7391_p7 = scmp.lt.u32.totalorder %s8766_s17, %s8911_s1 }
 0x52f   : > { %p7392_p13 = scmp.lt.u32.totalorder %s7390_s15, %s7386_s9  ;;  %p7394_p11 = scmp.lt.u32.totalorder %s7386_s9, %s8766_s17 }
 0x530   : > { %p7388_p4 = pnand %p7387_p1, %p8912_p0 }
 0x531   : > { %p7393_p9 = por %p7392_p13, %p7391_p7 }
 0x532   : > { %p7389_p3 = pneg %p7388_p4 }
 0x533   : > { %p7395_p5 = por %p7394_p11, %p7393_p9 }
 0x535   : > { %p7396_p8 = pnand %p7395_p5, %p7389_p3 }
 0x537   : > { %7399 = shalt.err (!%p7396_p8)
}
 0x538   : > { %s7509_s21 = smov 64   ;;  %s7510_s8 = smov 4  }
 0x539   : > { %6991 = dma.vmem_to_hbm [thread:$0]  (%p8912_p0), %s8768_s6, 512, %s8766_s17, %s8774_s24, %s7509_s21, %s7509_s21, %s7510_s8  }
 0x53a PF: > { %s8913_s7 = sld [smem:[#allocation13_spill]]  ;;  %s8914_s20 = sld [smem:[#allocation17_spill]] }
 0x53b   : > { %p7013_p12 = scmp.ge.s32.totalorder %s7498_s11, 2 }
 0x540   : > { %s5626_s19 = sand.u32 1, %s8913_s7   ;;  %p8915_p2 = scmp.ne.s32.totalorder %s8914_s20, 0 }
 0x541   : > { %s5627_s18 = scalar_lea.sflag [#allocation5], %s5626_s19 }
 0x542   : > { %p7005_p6 = pnand %p7013_p12, %p8915_p2 }
 0x544   : > { %7453 = dma.done.wait (!%p7005_p6), %s5627_s18, 512  }
 0x545   : > { %7455 = vsyncadd (!%p7005_p6), %s5627_s18, 4294966784  ;;  %s24_s11 = sadd.s32 1, %s7498_s11   ;;  %s8916_s30 = sld [smem:[#allocation15_spill]] }
 0x546   : > { %p21_p10 = scmp.ge.s32.totalorder %s24_s11, 10   ;;  %s8917_s9 = sld [smem:[#allocation18_spill]] }
 0x547   : > { %s8918_s24 = smov %s7462_s25  ;;  %s8919_s25 = smov %s7466_s26 }
 0x548   : > { %s8920_s26 = smov %s7732_s4  ;;  %s8921_s27 = smov %s7474_s28 }
 0x549   : > { %s8922_s28 = smov %s7478_s29  ;;  %s8923_s29 = smov %s7727_s12 }
 0x54a   : > { %s8924_s8 = smov %s7494_s10  ;;  %s8925_s10 = smov %s8931_s22 }
 0x54b   :  { %23 = sbr.rel (!%p21_p10) target bundleno = 15 (0xf), region = 129 }
 0x552   :  { %5632 = vsyncpa [#allocation4], 1 }
 0x553   :  { %5634 = vsyncpa [#allocation4 + $0x1], 1 }
 0x554   :  { %5635 = vsyncpa [#allocation7], 1 }
 0x555   :  { %5636 = vsyncpa [#allocation5], 1 }
 0x556   :  { %5638 = vsyncpa [#allocation5 + $0x1], 1 }

</bundles_post_ra>
